<compile_context>
chip_gen: v7x
topology: tpu7x:2x2x1
jax: 0.10.0
libtpu: 0.0.40
codegen_flags: <defaults>
</compile_context>

<pallas_src>
import jax
import jax.numpy as jnp
from jax.experimental import pallas as pl
from jax.experimental.pallas import tpu as pltpu

BN_EPS = 1e-5
LRELU_SLOPE = 0.1
LANE = 128   # all channel dims are zero-padded to this lane width
X_OFF = 8    # sublane-aligned offset of the activation inside the padded
             # W axis of the 3x3 scratch (left zero border lives at col 7)


def _make_fused_kernel(N, H, W):
    """Build the fused 5-layer (conv + train-mode BN + LeakyReLU) kernel."""
    P = N * H * W
    inv_P = 1.0 / P
    WPAD = W + 2 * X_OFF

    def bn_lrelu(acc, gamma, beta):
        # BatchNorm2d training-mode: batch stats over (N,H,W), biased variance.
        # Single pass: var = E[x^2] - E[x]^2, folded into one FMA per element.
        s = jnp.sum(acc, axis=0, keepdims=True)
        ss = jnp.sum(acc * acc, axis=0, keepdims=True)
        mean = s * inv_P
        var = ss * inv_P - mean * mean
        scale = gamma * jax.lax.rsqrt(var + BN_EPS)   # rsqrt -> EUP (free slot)
        bias = beta - mean * scale
        y = acc * scale + bias
        # LeakyReLU(0.1): slope in (0,1) => leaky = max(y, 0.1*y).
        return jnp.maximum(y, LRELU_SLOPE * y)

    def kernel(x_ref, w1_ref, w2_ref, w3_ref, w4_ref, w5_ref, gb_ref,
               o_ref, pad_ref):
        # gamma/beta for all 5 layers, packed lane-dense: rows 2i / 2i+1.
        gb = gb_ref[...]

        def conv1x1(act, w_ref, layer):
            acc = jnp.dot(act, w_ref[...], preferred_element_type=jnp.float32)
            return bn_lrelu(acc,
                            gb[2 * layer:2 * layer + 1, :],
                            gb[2 * layer + 1:2 * layer + 2, :])

        def conv3x3(act, w_ref, layer):
            # In-kernel spatial padding: write the activation at a
            # sublane-aligned offset; the zeroed border supplies the pad.
            pad_ref[:, 1:H + 1, X_OFF:X_OFF + W, :] = act.reshape(N, H, W, LANE)
            # im2col via static ref-slices, then ONE lane-dense matmul with
            # K = 9*LANE (single MXU push/pop stream instead of 9 small dots).
            cols = []
            for dy in range(3):
                for dx in range(3):
                    w0 = X_OFF - 1 + dx
                    win = pad_ref[:, dy:dy + H, w0:w0 + W, :]
                    cols.append(win.reshape(P, LANE))
            patches = jnp.concatenate(cols, axis=-1)          # (P, 9*LANE)
            acc = jnp.dot(patches, w_ref[...],
                          preferred_element_type=jnp.float32)
            return bn_lrelu(acc,
                            gb[2 * layer:2 * layer + 1, :],
                            gb[2 * layer + 1:2 * layer + 2, :])

        # Zero the padded scratch once; the border stays zero for both 3x3
        # layers (their interiors are fully overwritten each time).
        pad_ref[...] = jnp.zeros_like(pad_ref)

        a = x_ref[...]                  # (P, LANE) f32, lane-dense
        a = conv1x1(a, w1_ref, 0)       # Cin   -> Cout   (1x1)
        a = conv3x3(a, w2_ref, 1)       # Cout  -> 2Cout  (3x3, pad 1)
        a = conv1x1(a, w3_ref, 2)       # 2Cout -> Cout   (1x1)
        a = conv3x3(a, w4_ref, 3)       # Cout  -> 2Cout  (3x3, pad 1)
        a = conv1x1(a, w5_ref, 4)       # 2Cout -> Cout   (1x1)
        o_ref[...] = a                  # lane-dense unmasked store

    return kernel, WPAD


def _pack_layer(w_hwio, gamma, beta):
    """Zero-pad a layer's params to LANE channels and flatten the weight."""
    kh, kw, ci, co = w_hwio.shape
    assert ci <= LANE and co <= LANE, "channel tiling beyond 128 not implemented"
    w_p = jnp.pad(w_hwio, ((0, 0), (0, 0), (0, LANE - ci), (0, LANE - co)))
    w2d = w_p.reshape(kh * kw * LANE, LANE)            # (KH*KW*LANE, LANE)
    g = jnp.pad(gamma, (0, LANE - co)).reshape(1, LANE)
    b = jnp.pad(beta, (0, LANE - co)).reshape(1, LANE)
    return w2d, g, b


@jax.jit
def darkconvset_forward_nchw(x_nchw, params_list):
    """Full DarkConvSet forward. Input/output in NCHW (PyTorch convention)."""
    N, cin, H, W = x_nchw.shape
    cout = params_list[-1]["w"].shape[-1]

    # NCHW -> NHWC -> (N*H*W, LANE) lane-dense slab.
    x = jnp.transpose(x_nchw, (0, 2, 3, 1)).reshape(N * H * W, cin)
    x = jnp.pad(x, ((0, 0), (0, LANE - cin))).astype(jnp.float32)

    ws, gbs = [], []
    for p in params_list:
        w2d, g, b = _pack_layer(p["w"], p["gamma"], p["beta"])
        ws.append(w2d)
        gbs.extend([g, b])
    gb = jnp.concatenate(gbs, axis=0)                   # (10, LANE)

    kernel, wpad = _make_fused_kernel(N, H, W)
    vmem = pl.BlockSpec(memory_space=pltpu.MemorySpace.VMEM)
    out2d = pl.pallas_call(
        kernel,
        out_shape=jax.ShapeDtypeStruct((N * H * W, LANE), jnp.float32),
        in_specs=[vmem] * 7,
        out_specs=vmem,
        scratch_shapes=[pltpu.VMEM((N, H + 2, wpad, LANE), jnp.float32)],
        compiler_params=pltpu.CompilerParams(
            vmem_limit_bytes=32 * 1024 * 1024),
    )(x, ws[0], ws[1], ws[2], ws[3], ws[4], gb)

    out = out2d[:, :cout].reshape(N, H, W, cout)
    return jnp.transpose(out, (0, 3, 1, 2))             # NHWC -> NCHW


def init_darkconvset_params(key, inchannel, outchannel):
    """Deterministic init mirroring the PyTorch module:
       conv weight ~ N(0, 0.02), BN gamma ~ N(1, 0.02), BN beta = 0."""
    layer_specs = [
        (inchannel, outchannel, 1),
        (outchannel, 2 * outchannel, 3),
        (2 * outchannel, outchannel, 1),
        (outchannel, 2 * outchannel, 3),
        (2 * outchannel, outchannel, 1),
    ]
    params = []
    for (ci, co, k) in layer_specs:
        key, k_w, k_g = jax.random.split(key, 3)
        w = 0.02 * jax.random.normal(k_w, (k, k, ci, co), jnp.float32)  # HWIO
        gamma = 1.0 + 0.02 * jax.random.normal(k_g, (co,), jnp.float32)
        beta = jnp.zeros((co,), jnp.float32)
        params.append(dict(w=w, gamma=gamma, beta=beta))
    return params


# ---------------- pure-JAX reference (for self-check) ----------------
def _ref_darkconv(x_nhwc, w_hwio, gamma, beta):
    k = w_hwio.shape[0]
    pad = (k - 1) // 2
    y = jax.lax.conv_general_dilated(
        x_nhwc, w_hwio, window_strides=(1, 1),
        padding=[(pad, pad), (pad, pad)],
        dimension_numbers=("NHWC", "HWIO", "NHWC"))
    mean = y.mean(axis=(0, 1, 2))
    var = ((y - mean) ** 2).mean(axis=(0, 1, 2))
    y = gamma * (y - mean) / jnp.sqrt(var + BN_EPS) + beta
    return jnp.where(y > 0, y, LRELU_SLOPE * y)


def _ref_forward_nchw(x_nchw, params_list):
    x = jnp.transpose(x_nchw, (0, 2, 3, 1))
    for p in params_list:
        x = _ref_darkconv(x, p["w"], p["gamma"], p["beta"])
    return jnp.transpose(x, (0, 3, 1, 2))


if __name__ == "__main__":
    key = jax.random.PRNGKey(0)
    k_x, k_p = jax.random.split(key)

    # Small shapes: batch=2, inchannel=4, spatial=16x16, outchannel=8.
    N, C_IN, H, W = 2, 4, 16, 16
    C_OUT = 8

    x = jax.random.normal(k_x, (N, C_IN, H, W), jnp.float32)  # NCHW like PyTorch
    params = init_darkconvset_params(k_p, C_IN, C_OUT)

    out = darkconvset_forward_nchw(x, params)
    out = jax.block_until_ready(out)

    assert out.shape == (N, C_OUT, H, W), out.shape

    ref = jax.block_until_ready(_ref_forward_nchw(x, params))
    assert jnp.allclose(out, ref, rtol=1e-3, atol=1e-3), (
        float(jnp.max(jnp.abs(out - ref))))

    print("KERNEL_OK")
</pallas_src>

<mosaic_0001>
module attributes {stable_mosaic.version = 11 : i64} {
  func.func @kernel(%arg0: memref<512x128xf32, #tpu.memory_space<vmem>>, %arg1: memref<128x128xf32, #tpu.memory_space<vmem>>, %arg2: memref<1152x128xf32, #tpu.memory_space<vmem>>, %arg3: memref<128x128xf32, #tpu.memory_space<vmem>>, %arg4: memref<1152x128xf32, #tpu.memory_space<vmem>>, %arg5: memref<128x128xf32, #tpu.memory_space<vmem>>, %arg6: memref<10x128xf32, #tpu.memory_space<vmem>>, %arg7: memref<512x128xf32, #tpu.memory_space<vmem>>, %arg8: memref<2x18x32x128xf32, #tpu.memory_space<vmem>>) attributes {dimension_semantics = [], scalar_prefetch = 0 : i64, scratch_operands = 1 : i64, tpu.core_type = #tpu.core_type<tc>} {
    %c0 = arith.constant 0 : index
    %c0_0 = arith.constant 0 : index
    %0 = vector.load %arg6[%c0, %c0_0] : memref<10x128xf32, #tpu.memory_space<vmem>>, vector<10x128xf32>
    %cst = arith.constant 0.000000e+00 : f32
    %1 = vector.broadcast %cst : f32 to vector<2x18x32x128xf32>
    %c0_1 = arith.constant 0 : index
    %c0_2 = arith.constant 0 : index
    %c0_3 = arith.constant 0 : index
    %c0_4 = arith.constant 0 : index
    %2 = vector.load %arg8[%c0_1, %c0_2, %c0_3, %c0_4] : memref<2x18x32x128xf32, #tpu.memory_space<vmem>>, vector<2x18x32x128xf32>
    tpu.vector_store %arg8[%c0_1, %c0_2, %c0_3, %c0_4], %1 {strides = array<i32>} : memref<2x18x32x128xf32, #tpu.memory_space<vmem>>, vector<2x18x32x128xf32>,
    %c0_5 = arith.constant 0 : index
    %c0_6 = arith.constant 0 : index
    %3 = vector.load %arg0[%c0_5, %c0_6] : memref<512x128xf32, #tpu.memory_space<vmem>>, vector<512x128xf32>
    %c0_7 = arith.constant 0 : index
    %c0_8 = arith.constant 0 : index
    %4 = vector.load %arg1[%c0_7, %c0_8] : memref<128x128xf32, #tpu.memory_space<vmem>>, vector<128x128xf32>
    %cst_9 = arith.constant dense<0.000000e+00> : vector<512x128xf32>
    %5 = tpu.matmul %3, %4, %cst_9 {dimension_numbers = #tpu.dot_dimension_numbers<[1], [0], [0], [1], [0, 0, 1, 1], [], []>} : vector<512x128xf32>, vector<128x128xf32>, vector<512x128xf32> -> vector<512x128xf32>
    %6 = vector.extract_strided_slice %0 {offsets = [0, 0], sizes = [1, 128], strides = [1, 1]} : vector<10x128xf32> to vector<1x128xf32>
    %7 = vector.extract_strided_slice %0 {offsets = [1, 0], sizes = [1, 128], strides = [1, 1]} : vector<10x128xf32> to vector<1x128xf32>
    %cst_10 = arith.constant dense<0.000000e+00> : vector<128xf32>
    %8 = vector.multi_reduction <add>, %5, %cst_10 [0] : vector<512x128xf32> to vector<128xf32>
    %9 = vector.shape_cast %8 : vector<128xf32> to vector<1x128xf32>
    %10 = arith.mulf %5, %5 : vector<512x128xf32>
    %cst_11 = arith.constant dense<0.000000e+00> : vector<128xf32>
    %11 = vector.multi_reduction <add>, %10, %cst_11 [0] : vector<512x128xf32> to vector<128xf32>
    %12 = vector.shape_cast %11 : vector<128xf32> to vector<1x128xf32>
    %cst_12 = arith.constant 0.001953125 : f32
    %13 = vector.broadcast %cst_12 : f32 to vector<1x128xf32>
    %14 = arith.mulf %9, %13 : vector<1x128xf32>
    %cst_13 = arith.constant 0.001953125 : f32
    %15 = vector.broadcast %cst_13 : f32 to vector<1x128xf32>
    %16 = arith.mulf %12, %15 : vector<1x128xf32>
    %17 = arith.mulf %14, %14 : vector<1x128xf32>
    %18 = arith.subf %16, %17 : vector<1x128xf32>
    %cst_14 = arith.constant 9.99999974E-6 : f32
    %19 = vector.broadcast %cst_14 : f32 to vector<1x128xf32>
    %20 = arith.addf %18, %19 : vector<1x128xf32>
    %21 = math.rsqrt %20 : vector<1x128xf32>
    %22 = arith.mulf %6, %21 : vector<1x128xf32>
    %23 = arith.mulf %14, %22 : vector<1x128xf32>
    %24 = arith.subf %7, %23 : vector<1x128xf32>
    %25 = vector.broadcast %22 : vector<1x128xf32> to vector<512x128xf32>
    %26 = arith.mulf %5, %25 : vector<512x128xf32>
    %27 = vector.broadcast %24 : vector<1x128xf32> to vector<512x128xf32>
    %28 = arith.addf %26, %27 : vector<512x128xf32>
    %cst_15 = arith.constant 1.000000e-01 : f32
    %29 = vector.broadcast %cst_15 : f32 to vector<512x128xf32>
    %30 = arith.mulf %29, %28 : vector<512x128xf32>
    %31 = arith.maximumf %28, %30 : vector<512x128xf32>
    %32 = vector.shape_cast %31 : vector<512x128xf32> to vector<2x16x16x128xf32>
    %c0_16 = arith.constant 0 : index
    %c1 = arith.constant 1 : index
    %c8 = arith.constant 8 : index
    %c0_17 = arith.constant 0 : index
    %33 = vector.load %arg8[%c0_16, %c1, %c8, %c0_17] : memref<2x18x32x128xf32, #tpu.memory_space<vmem>>, vector<2x16x16x128xf32>
    tpu.vector_store %arg8[%c0_16, %c1, %c8, %c0_17], %32 {strides = array<i32>} : memref<2x18x32x128xf32, #tpu.memory_space<vmem>>, vector<2x16x16x128xf32>,
    %c0_18 = arith.constant 0 : index
    %c0_19 = arith.constant 0 : index
    %c7 = arith.constant 7 : index
    %c0_20 = arith.constant 0 : index
    %34 = vector.load %arg8[%c0_18, %c0_19, %c7, %c0_20] : memref<2x18x32x128xf32, #tpu.memory_space<vmem>>, vector<2x16x16x128xf32>
    %35 = vector.shape_cast %34 : vector<2x16x16x128xf32> to vector<512x128xf32>
    %c0_21 = arith.constant 0 : index
    %c0_22 = arith.constant 0 : index
    %c8_23 = arith.constant 8 : index
    %c0_24 = arith.constant 0 : index
    %36 = vector.load %arg8[%c0_21, %c0_22, %c8_23, %c0_24] : memref<2x18x32x128xf32, #tpu.memory_space<vmem>>, vector<2x16x16x128xf32>
    %37 = vector.shape_cast %36 : vector<2x16x16x128xf32> to vector<512x128xf32>
    %c0_25 = arith.constant 0 : index
    %c0_26 = arith.constant 0 : index
    %c9 = arith.constant 9 : index
    %c0_27 = arith.constant 0 : index
    %38 = vector.load %arg8[%c0_25, %c0_26, %c9, %c0_27] : memref<2x18x32x128xf32, #tpu.memory_space<vmem>>, vector<2x16x16x128xf32>
    %39 = vector.shape_cast %38 : vector<2x16x16x128xf32> to vector<512x128xf32>
    %c0_28 = arith.constant 0 : index
    %c1_29 = arith.constant 1 : index
    %c7_30 = arith.constant 7 : index
    %c0_31 = arith.constant 0 : index
    %40 = vector.load %arg8[%c0_28, %c1_29, %c7_30, %c0_31] : memref<2x18x32x128xf32, #tpu.memory_space<vmem>>, vector<2x16x16x128xf32>
    %41 = vector.shape_cast %40 : vector<2x16x16x128xf32> to vector<512x128xf32>
    %c0_32 = arith.constant 0 : index
    %c1_33 = arith.constant 1 : index
    %c8_34 = arith.constant 8 : index
    %c0_35 = arith.constant 0 : index
    %42 = vector.load %arg8[%c0_32, %c1_33, %c8_34, %c0_35] : memref<2x18x32x128xf32, #tpu.memory_space<vmem>>, vector<2x16x16x128xf32>
    %43 = vector.shape_cast %42 : vector<2x16x16x128xf32> to vector<512x128xf32>
    %c0_36 = arith.constant 0 : index
    %c1_37 = arith.constant 1 : index
    %c9_38 = arith.constant 9 : index
    %c0_39 = arith.constant 0 : index
    %44 = vector.load %arg8[%c0_36, %c1_37, %c9_38, %c0_39] : memref<2x18x32x128xf32, #tpu.memory_space<vmem>>, vector<2x16x16x128xf32>
    %45 = vector.shape_cast %44 : vector<2x16x16x128xf32> to vector<512x128xf32>
    %c0_40 = arith.constant 0 : index
    %c2 = arith.constant 2 : index
    %c7_41 = arith.constant 7 : index
    %c0_42 = arith.constant 0 : index
    %46 = vector.load %arg8[%c0_40, %c2, %c7_41, %c0_42] : memref<2x18x32x128xf32, #tpu.memory_space<vmem>>, vector<2x16x16x128xf32>
    %47 = vector.shape_cast %46 : vector<2x16x16x128xf32> to vector<512x128xf32>
    %c0_43 = arith.constant 0 : index
    %c2_44 = arith.constant 2 : index
    %c8_45 = arith.constant 8 : index
    %c0_46 = arith.constant 0 : index
    %48 = vector.load %arg8[%c0_43, %c2_44, %c8_45, %c0_46] : memref<2x18x32x128xf32, #tpu.memory_space<vmem>>, vector<2x16x16x128xf32>
    %49 = vector.shape_cast %48 : vector<2x16x16x128xf32> to vector<512x128xf32>
    %c0_47 = arith.constant 0 : index
    %c2_48 = arith.constant 2 : index
    %c9_49 = arith.constant 9 : index
    %c0_50 = arith.constant 0 : index
    %50 = vector.load %arg8[%c0_47, %c2_48, %c9_49, %c0_50] : memref<2x18x32x128xf32, #tpu.memory_space<vmem>>, vector<2x16x16x128xf32>
    %51 = vector.shape_cast %50 : vector<2x16x16x128xf32> to vector<512x128xf32>
    %52 = tpu.concatenate %35, %37, %39, %41, %43, %45, %47, %49, %51 in 1 : vector<512x128xf32>, vector<512x128xf32>, vector<512x128xf32>, vector<512x128xf32>, vector<512x128xf32>, vector<512x128xf32>, vector<512x128xf32>, vector<512x128xf32>, vector<512x128xf32> -> vector<512x1152xf32>
    %c0_51 = arith.constant 0 : index
    %c0_52 = arith.constant 0 : index
    %53 = vector.load %arg2[%c0_51, %c0_52] : memref<1152x128xf32, #tpu.memory_space<vmem>>, vector<1152x128xf32>
    %cst_53 = arith.constant dense<0.000000e+00> : vector<512x128xf32>
    %54 = tpu.matmul %52, %53, %cst_53 {dimension_numbers = #tpu.dot_dimension_numbers<[1], [0], [0], [1], [0, 0, 1, 1], [], []>} : vector<512x1152xf32>, vector<1152x128xf32>, vector<512x128xf32> -> vector<512x128xf32>
    %55 = vector.extract_strided_slice %0 {offsets = [2, 0], sizes = [1, 128], strides = [1, 1]} : vector<10x128xf32> to vector<1x128xf32>
    %56 = vector.extract_strided_slice %0 {offsets = [3, 0], sizes = [1, 128], strides = [1, 1]} : vector<10x128xf32> to vector<1x128xf32>
    %cst_54 = arith.constant dense<0.000000e+00> : vector<128xf32>
    %57 = vector.multi_reduction <add>, %54, %cst_54 [0] : vector<512x128xf32> to vector<128xf32>
    %58 = vector.shape_cast %57 : vector<128xf32> to vector<1x128xf32>
    %59 = arith.mulf %54, %54 : vector<512x128xf32>
    %cst_55 = arith.constant dense<0.000000e+00> : vector<128xf32>
    %60 = vector.multi_reduction <add>, %59, %cst_55 [0] : vector<512x128xf32> to vector<128xf32>
    %61 = vector.shape_cast %60 : vector<128xf32> to vector<1x128xf32>
    %cst_56 = arith.constant 0.001953125 : f32
    %62 = vector.broadcast %cst_56 : f32 to vector<1x128xf32>
    %63 = arith.mulf %58, %62 : vector<1x128xf32>
    %cst_57 = arith.constant 0.001953125 : f32
    %64 = vector.broadcast %cst_57 : f32 to vector<1x128xf32>
    %65 = arith.mulf %61, %64 : vector<1x128xf32>
    %66 = arith.mulf %63, %63 : vector<1x128xf32>
    %67 = arith.subf %65, %66 : vector<1x128xf32>
    %cst_58 = arith.constant 9.99999974E-6 : f32
    %68 = vector.broadcast %cst_58 : f32 to vector<1x128xf32>
    %69 = arith.addf %67, %68 : vector<1x128xf32>
    %70 = math.rsqrt %69 : vector<1x128xf32>
    %71 = arith.mulf %55, %70 : vector<1x128xf32>
    %72 = arith.mulf %63, %71 : vector<1x128xf32>
    %73 = arith.subf %56, %72 : vector<1x128xf32>
    %74 = vector.broadcast %71 : vector<1x128xf32> to vector<512x128xf32>
    %75 = arith.mulf %54, %74 : vector<512x128xf32>
    %76 = vector.broadcast %73 : vector<1x128xf32> to vector<512x128xf32>
    %77 = arith.addf %75, %76 : vector<512x128xf32>
    %cst_59 = arith.constant 1.000000e-01 : f32
    %78 = vector.broadcast %cst_59 : f32 to vector<512x128xf32>
    %79 = arith.mulf %78, %77 : vector<512x128xf32>
    %80 = arith.maximumf %77, %79 : vector<512x128xf32>
    %c0_60 = arith.constant 0 : index
    %c0_61 = arith.constant 0 : index
    %81 = vector.load %arg3[%c0_60, %c0_61] : memref<128x128xf32, #tpu.memory_space<vmem>>, vector<128x128xf32>
    %cst_62 = arith.constant dense<0.000000e+00> : vector<512x128xf32>
    %82 = tpu.matmul %80, %81, %cst_62 {dimension_numbers = #tpu.dot_dimension_numbers<[1], [0], [0], [1], [0, 0, 1, 1], [], []>} : vector<512x128xf32>, vector<128x128xf32>, vector<512x128xf32> -> vector<512x128xf32>
    %83 = vector.extract_strided_slice %0 {offsets = [4, 0], sizes = [1, 128], strides = [1, 1]} : vector<10x128xf32> to vector<1x128xf32>
    %84 = vector.extract_strided_slice %0 {offsets = [5, 0], sizes = [1, 128], strides = [1, 1]} : vector<10x128xf32> to vector<1x128xf32>
    %cst_63 = arith.constant dense<0.000000e+00> : vector<128xf32>
    %85 = vector.multi_reduction <add>, %82, %cst_63 [0] : vector<512x128xf32> to vector<128xf32>
    %86 = vector.shape_cast %85 : vector<128xf32> to vector<1x128xf32>
    %87 = arith.mulf %82, %82 : vector<512x128xf32>
    %cst_64 = arith.constant dense<0.000000e+00> : vector<128xf32>
    %88 = vector.multi_reduction <add>, %87, %cst_64 [0] : vector<512x128xf32> to vector<128xf32>
    %89 = vector.shape_cast %88 : vector<128xf32> to vector<1x128xf32>
    %cst_65 = arith.constant 0.001953125 : f32
    %90 = vector.broadcast %cst_65 : f32 to vector<1x128xf32>
    %91 = arith.mulf %86, %90 : vector<1x128xf32>
    %cst_66 = arith.constant 0.001953125 : f32
    %92 = vector.broadcast %cst_66 : f32 to vector<1x128xf32>
    %93 = arith.mulf %89, %92 : vector<1x128xf32>
    %94 = arith.mulf %91, %91 : vector<1x128xf32>
    %95 = arith.subf %93, %94 : vector<1x128xf32>
    %cst_67 = arith.constant 9.99999974E-6 : f32
    %96 = vector.broadcast %cst_67 : f32 to vector<1x128xf32>
    %97 = arith.addf %95, %96 : vector<1x128xf32>
    %98 = math.rsqrt %97 : vector<1x128xf32>
    %99 = arith.mulf %83, %98 : vector<1x128xf32>
    %100 = arith.mulf %91, %99 : vector<1x128xf32>
    %101 = arith.subf %84, %100 : vector<1x128xf32>
    %102 = vector.broadcast %99 : vector<1x128xf32> to vector<512x128xf32>
    %103 = arith.mulf %82, %102 : vector<512x128xf32>
    %104 = vector.broadcast %101 : vector<1x128xf32> to vector<512x128xf32>
    %105 = arith.addf %103, %104 : vector<512x128xf32>
    %cst_68 = arith.constant 1.000000e-01 : f32
    %106 = vector.broadcast %cst_68 : f32 to vector<512x128xf32>
    %107 = arith.mulf %106, %105 : vector<512x128xf32>
    %108 = arith.maximumf %105, %107 : vector<512x128xf32>
    %109 = vector.shape_cast %108 : vector<512x128xf32> to vector<2x16x16x128xf32>
    %c0_69 = arith.constant 0 : index
    %c1_70 = arith.constant 1 : index
    %c8_71 = arith.constant 8 : index
    %c0_72 = arith.constant 0 : index
    %110 = vector.load %arg8[%c0_69, %c1_70, %c8_71, %c0_72] : memref<2x18x32x128xf32, #tpu.memory_space<vmem>>, vector<2x16x16x128xf32>
    tpu.vector_store %arg8[%c0_69, %c1_70, %c8_71, %c0_72], %109 {strides = array<i32>} : memref<2x18x32x128xf32, #tpu.memory_space<vmem>>, vector<2x16x16x128xf32>,
    %c0_73 = arith.constant 0 : index
    %c0_74 = arith.constant 0 : index
    %c7_75 = arith.constant 7 : index
    %c0_76 = arith.constant 0 : index
    %111 = vector.load %arg8[%c0_73, %c0_74, %c7_75, %c0_76] : memref<2x18x32x128xf32, #tpu.memory_space<vmem>>, vector<2x16x16x128xf32>
    %112 = vector.shape_cast %111 : vector<2x16x16x128xf32> to vector<512x128xf32>
    %c0_77 = arith.constant 0 : index
    %c0_78 = arith.constant 0 : index
    %c8_79 = arith.constant 8 : index
    %c0_80 = arith.constant 0 : index
    %113 = vector.load %arg8[%c0_77, %c0_78, %c8_79, %c0_80] : memref<2x18x32x128xf32, #tpu.memory_space<vmem>>, vector<2x16x16x128xf32>
    %114 = vector.shape_cast %113 : vector<2x16x16x128xf32> to vector<512x128xf32>
    %c0_81 = arith.constant 0 : index
    %c0_82 = arith.constant 0 : index
    %c9_83 = arith.constant 9 : index
    %c0_84 = arith.constant 0 : index
    %115 = vector.load %arg8[%c0_81, %c0_82, %c9_83, %c0_84] : memref<2x18x32x128xf32, #tpu.memory_space<vmem>>, vector<2x16x16x128xf32>
    %116 = vector.shape_cast %115 : vector<2x16x16x128xf32> to vector<512x128xf32>
    %c0_85 = arith.constant 0 : index
    %c1_86 = arith.constant 1 : index
    %c7_87 = arith.constant 7 : index
    %c0_88 = arith.constant 0 : index
    %117 = vector.load %arg8[%c0_85, %c1_86, %c7_87, %c0_88] : memref<2x18x32x128xf32, #tpu.memory_space<vmem>>, vector<2x16x16x128xf32>
    %118 = vector.shape_cast %117 : vector<2x16x16x128xf32> to vector<512x128xf32>
    %c0_89 = arith.constant 0 : index
    %c1_90 = arith.constant 1 : index
    %c8_91 = arith.constant 8 : index
    %c0_92 = arith.constant 0 : index
    %119 = vector.load %arg8[%c0_89, %c1_90, %c8_91, %c0_92] : memref<2x18x32x128xf32, #tpu.memory_space<vmem>>, vector<2x16x16x128xf32>
    %120 = vector.shape_cast %119 : vector<2x16x16x128xf32> to vector<512x128xf32>
    %c0_93 = arith.constant 0 : index
    %c1_94 = arith.constant 1 : index
    %c9_95 = arith.constant 9 : index
    %c0_96 = arith.constant 0 : index
    %121 = vector.load %arg8[%c0_93, %c1_94, %c9_95, %c0_96] : memref<2x18x32x128xf32, #tpu.memory_space<vmem>>, vector<2x16x16x128xf32>
    %122 = vector.shape_cast %121 : vector<2x16x16x128xf32> to vector<512x128xf32>
    %c0_97 = arith.constant 0 : index
    %c2_98 = arith.constant 2 : index
    %c7_99 = arith.constant 7 : index
    %c0_100 = arith.constant 0 : index
    %123 = vector.load %arg8[%c0_97, %c2_98, %c7_99, %c0_100] : memref<2x18x32x128xf32, #tpu.memory_space<vmem>>, vector<2x16x16x128xf32>
    %124 = vector.shape_cast %123 : vector<2x16x16x128xf32> to vector<512x128xf32>
    %c0_101 = arith.constant 0 : index
    %c2_102 = arith.constant 2 : index
    %c8_103 = arith.constant 8 : index
    %c0_104 = arith.constant 0 : index
    %125 = vector.load %arg8[%c0_101, %c2_102, %c8_103, %c0_104] : memref<2x18x32x128xf32, #tpu.memory_space<vmem>>, vector<2x16x16x128xf32>
    %126 = vector.shape_cast %125 : vector<2x16x16x128xf32> to vector<512x128xf32>
    %c0_105 = arith.constant 0 : index
    %c2_106 = arith.constant 2 : index
    %c9_107 = arith.constant 9 : index
    %c0_108 = arith.constant 0 : index
    %127 = vector.load %arg8[%c0_105, %c2_106, %c9_107, %c0_108] : memref<2x18x32x128xf32, #tpu.memory_space<vmem>>, vector<2x16x16x128xf32>
    %128 = vector.shape_cast %127 : vector<2x16x16x128xf32> to vector<512x128xf32>
    %129 = tpu.concatenate %112, %114, %116, %118, %120, %122, %124, %126, %128 in 1 : vector<512x128xf32>, vector<512x128xf32>, vector<512x128xf32>, vector<512x128xf32>, vector<512x128xf32>, vector<512x128xf32>, vector<512x128xf32>, vector<512x128xf32>, vector<512x128xf32> -> vector<512x1152xf32>
    %c0_109 = arith.constant 0 : index
    %c0_110 = arith.constant 0 : index
    %130 = vector.load %arg4[%c0_109, %c0_110] : memref<1152x128xf32, #tpu.memory_space<vmem>>, vector<1152x128xf32>
    %cst_111 = arith.constant dense<0.000000e+00> : vector<512x128xf32>
    %131 = tpu.matmul %129, %130, %cst_111 {dimension_numbers = #tpu.dot_dimension_numbers<[1], [0], [0], [1], [0, 0, 1, 1], [], []>} : vector<512x1152xf32>, vector<1152x128xf32>, vector<512x128xf32> -> vector<512x128xf32>
    %132 = vector.extract_strided_slice %0 {offsets = [6, 0], sizes = [1, 128], strides = [1, 1]} : vector<10x128xf32> to vector<1x128xf32>
    %133 = vector.extract_strided_slice %0 {offsets = [7, 0], sizes = [1, 128], strides = [1, 1]} : vector<10x128xf32> to vector<1x128xf32>
    %cst_112 = arith.constant dense<0.000000e+00> : vector<128xf32>
    %134 = vector.multi_reduction <add>, %131, %cst_112 [0] : vector<512x128xf32> to vector<128xf32>
    %135 = vector.shape_cast %134 : vector<128xf32> to vector<1x128xf32>
    %136 = arith.mulf %131, %131 : vector<512x128xf32>
    %cst_113 = arith.constant dense<0.000000e+00> : vector<128xf32>
    %137 = vector.multi_reduction <add>, %136, %cst_113 [0] : vector<512x128xf32> to vector<128xf32>
    %138 = vector.shape_cast %137 : vector<128xf32> to vector<1x128xf32>
    %cst_114 = arith.constant 0.001953125 : f32
    %139 = vector.broadcast %cst_114 : f32 to vector<1x128xf32>
    %140 = arith.mulf %135, %139 : vector<1x128xf32>
    %cst_115 = arith.constant 0.001953125 : f32
    %141 = vector.broadcast %cst_115 : f32 to vector<1x128xf32>
    %142 = arith.mulf %138, %141 : vector<1x128xf32>
    %143 = arith.mulf %140, %140 : vector<1x128xf32>
    %144 = arith.subf %142, %143 : vector<1x128xf32>
    %cst_116 = arith.constant 9.99999974E-6 : f32
    %145 = vector.broadcast %cst_116 : f32 to vector<1x128xf32>
    %146 = arith.addf %144, %145 : vector<1x128xf32>
    %147 = math.rsqrt %146 : vector<1x128xf32>
    %148 = arith.mulf %132, %147 : vector<1x128xf32>
    %149 = arith.mulf %140, %148 : vector<1x128xf32>
    %150 = arith.subf %133, %149 : vector<1x128xf32>
    %151 = vector.broadcast %148 : vector<1x128xf32> to vector<512x128xf32>
    %152 = arith.mulf %131, %151 : vector<512x128xf32>
    %153 = vector.broadcast %150 : vector<1x128xf32> to vector<512x128xf32>
    %154 = arith.addf %152, %153 : vector<512x128xf32>
    %cst_117 = arith.constant 1.000000e-01 : f32
    %155 = vector.broadcast %cst_117 : f32 to vector<512x128xf32>
    %156 = arith.mulf %155, %154 : vector<512x128xf32>
    %157 = arith.maximumf %154, %156 : vector<512x128xf32>
    %c0_118 = arith.constant 0 : index
    %c0_119 = arith.constant 0 : index
    %158 = vector.load %arg5[%c0_118, %c0_119] : memref<128x128xf32, #tpu.memory_space<vmem>>, vector<128x128xf32>
    %cst_120 = arith.constant dense<0.000000e+00> : vector<512x128xf32>
    %159 = tpu.matmul %157, %158, %cst_120 {dimension_numbers = #tpu.dot_dimension_numbers<[1], [0], [0], [1], [0, 0, 1, 1], [], []>} : vector<512x128xf32>, vector<128x128xf32>, vector<512x128xf32> -> vector<512x128xf32>
    %160 = vector.extract_strided_slice %0 {offsets = [8, 0], sizes = [1, 128], strides = [1, 1]} : vector<10x128xf32> to vector<1x128xf32>
    %161 = vector.extract_strided_slice %0 {offsets = [9, 0], sizes = [1, 128], strides = [1, 1]} : vector<10x128xf32> to vector<1x128xf32>
    %cst_121 = arith.constant dense<0.000000e+00> : vector<128xf32>
    %162 = vector.multi_reduction <add>, %159, %cst_121 [0] : vector<512x128xf32> to vector<128xf32>
    %163 = vector.shape_cast %162 : vector<128xf32> to vector<1x128xf32>
    %164 = arith.mulf %159, %159 : vector<512x128xf32>
    %cst_122 = arith.constant dense<0.000000e+00> : vector<128xf32>
    %165 = vector.multi_reduction <add>, %164, %cst_122 [0] : vector<512x128xf32> to vector<128xf32>
    %166 = vector.shape_cast %165 : vector<128xf32> to vector<1x128xf32>
    %cst_123 = arith.constant 0.001953125 : f32
    %167 = vector.broadcast %cst_123 : f32 to vector<1x128xf32>
    %168 = arith.mulf %163, %167 : vector<1x128xf32>
    %cst_124 = arith.constant 0.001953125 : f32
    %169 = vector.broadcast %cst_124 : f32 to vector<1x128xf32>
    %170 = arith.mulf %166, %169 : vector<1x128xf32>
    %171 = arith.mulf %168, %168 : vector<1x128xf32>
    %172 = arith.subf %170, %171 : vector<1x128xf32>
    %cst_125 = arith.constant 9.99999974E-6 : f32
    %173 = vector.broadcast %cst_125 : f32 to vector<1x128xf32>
    %174 = arith.addf %172, %173 : vector<1x128xf32>
    %175 = math.rsqrt %174 : vector<1x128xf32>
    %176 = arith.mulf %160, %175 : vector<1x128xf32>
    %177 = arith.mulf %168, %176 : vector<1x128xf32>
    %178 = arith.subf %161, %177 : vector<1x128xf32>
    %179 = vector.broadcast %176 : vector<1x128xf32> to vector<512x128xf32>
    %180 = arith.mulf %159, %179 : vector<512x128xf32>
    %181 = vector.broadcast %178 : vector<1x128xf32> to vector<512x128xf32>
    %182 = arith.addf %180, %181 : vector<512x128xf32>
    %cst_126 = arith.constant 1.000000e-01 : f32
    %183 = vector.broadcast %cst_126 : f32 to vector<512x128xf32>
    %184 = arith.mulf %183, %182 : vector<512x128xf32>
    %185 = arith.maximumf %182, %184 : vector<512x128xf32>
    %c0_127 = arith.constant 0 : index
    %c0_128 = arith.constant 0 : index
    %186 = vector.load %arg7[%c0_127, %c0_128] : memref<512x128xf32, #tpu.memory_space<vmem>>, vector<512x128xf32>
    tpu.vector_store %arg7[%c0_127, %c0_128], %185 {strides = array<i32>} : memref<512x128xf32, #tpu.memory_space<vmem>>, vector<512x128xf32>,
    return
  }
}

</mosaic_0001>

<bundles_post_ra>
// kernel: darkconvset_forward_nchw.1
= control target key start
LH: loop header
LB: loop body
LE: loop exit
PB: predicated region body
PF: predicated region fallthrough
CT: control target
= control target key end

     0   :  { %v11710_v3 = vmov 0.0   ;;  %s20413_s1 = inlined_call_operand.vmem [shape: f32[128,128], index: 1, kind: input, shape index: {}]   ;;  %s20414_s0 = inlined_call_operand.vmem [shape: f32[512,128], index: 0, kind: input, shape index: {}]   ;;  %s20415_s2 = inlined_call_operand.vmem [shape: f32[1152,128], index: 2, kind: input, shape index: {}]   ;;  %s20416_s6 = inlined_call_operand.vmem [shape: f32[10,128], index: 6, kind: input, shape index: {}]   ;;  %s20417_s3 = inlined_call_operand.vmem [shape: f32[128,128], index: 3, kind: input, shape index: {}]   ;;  %s20418_s4 = inlined_call_operand.vmem [shape: f32[1152,128], index: 4, kind: input, shape index: {}]   ;;  %s20419_s5 = inlined_call_operand.vmem [shape: f32[128,128], index: 5, kind: input, shape index: {}]   ;;  %s20420_s7 = inlined_call_operand.vmem [shape: f32[512,128], index: 7, kind: output, shape index: {}]  }
   0x1   :  { %v11755_v0 = vld [vmem:[%s20413_s1] sm:$0xff]  ;;  %v11760_v1 = vld [vmem:[%s20413_s1 + $0x8] sm:$0xff]  ;;  %v11765_v2 = vld [vmem:[%s20413_s1 + $0x10] sm:$0xff]  ;;  %28 = vst [vmem:[#allocation2] sm:$0xff] %v11710_v3 }
   0x2   :  { %29 = vst [vmem:[#allocation2 + $0x8] sm:$0xff] %v11710_v3  ;;  %30 = vst [vmem:[#allocation2 + $0x10] sm:$0xff] %v11710_v3  ;;  %v10357_v4 = vpack.c.bf16 %v11760_v1, %v11755_v0  ;;  %v239_v5 = vld [vmem:[%s20413_s1 + $0x18] sm:$0xff]  ;;  %v240_v7 = vld [vmem:[%s20413_s1 + $0x20] sm:$0xff] }
   0x3   :  { %31 = vst [vmem:[#allocation2 + $0x18] sm:$0xff] %v11710_v3  ;;  %32 = vst [vmem:[#allocation2 + $0x20] sm:$0xff] %v11710_v3  ;;  %v10361_v6 = vpack.c.bf16 %v239_v5, %v11765_v2  ;;  %v241_v8 = vld [vmem:[%s20413_s1 + $0x28] sm:$0xff]  ;;  %v172_v10 = vld [vmem:[%s20414_s0] sm:$0xff] }
   0x4   :  { %35 = vst [vmem:[#allocation2 + $0x38] sm:$0xff] %v11710_v3  ;;  %36 = vst [vmem:[#allocation2 + $0x40] sm:$0xff] %v11710_v3  ;;  %10358 = vmatprep.subr.bf16.mxu0 %v10357_v4  ;;  %10901 = vmatprep.subr.bf16.mxu1 %v10357_v4  ;;  %v10365_v9 = vpack.c.bf16 %v241_v8, %v240_v7  ;;  %v242_v11 = vld [vmem:[%s20413_s1 + $0x30] sm:$0xff]  ;;  %v243_v12 = vld [vmem:[%s20413_s1 + $0x38] sm:$0xff] }
   0x5   :  { %39 = vst [vmem:[#allocation2 + $0x58] sm:$0xff] %v11710_v3  ;;  %40 = vst [vmem:[#allocation2 + $0x60] sm:$0xff] %v11710_v3  ;;  %10360 = vmatpush3.bf16.msra.mxu0 %v10357_v4  ;;  %10909 = vmatpush3.bf16.msra.mxu1 %v10357_v4  ;;  %v10369_v13 = vpack.c.bf16 %v243_v12, %v242_v11  ;;  %v244_v14 = vld [vmem:[%s20413_s1 + $0x40] sm:$0xff]  ;;  %v245_v15 = vld [vmem:[%s20413_s1 + $0x48] sm:$0xff] }
   0x6   :  { %43 = vst [vmem:[#allocation2 + $0x78] sm:$0xff] %v11710_v3  ;;  %44 = vst [vmem:[#allocation2 + $0x80] sm:$0xff] %v11710_v3  ;;  %10362 = vmatprep.subr.bf16.mxu0 %v10361_v6  ;;  %10902 = vmatprep.subr.bf16.mxu1 %v10361_v6  ;;  %v10373_v16 = vpack.c.bf16 %v245_v15, %v244_v14  ;;  %v246_v17 = vld [vmem:[%s20413_s1 + $0x50] sm:$0xff]  ;;  %v247_v18 = vld [vmem:[%s20413_s1 + $0x58] sm:$0xff] }
   0x7   :  { %47 = vst [vmem:[#allocation2 + $0x98] sm:$0xff] %v11710_v3  ;;  %48 = vst [vmem:[#allocation2 + $0xa0] sm:$0xff] %v11710_v3  ;;  %9749 = vmatprep.mubr.f32.mxu0 %v172_v10  ;;  %v204_v19 = vld [vmem:[%s20414_s0 + $0x100] sm:$0xff]  ;;  %v10377_v20 = vpack.c.bf16 %v247_v18, %v246_v17  ;;  %v249_v22 = vld [vmem:[%s20413_s1 + $0x68] sm:$0xff] }
   0x8   :  { %51 = vst [vmem:[#allocation2 + $0xb8] sm:$0xff] %v11710_v3  ;;  %52 = vst [vmem:[#allocation2 + $0xc0] sm:$0xff] %v11710_v3  ;;  %v248_v21 = vld [vmem:[%s20413_s1 + $0x60] sm:$0xff]  ;;  %9797 = vmatprep.mubr.f32.mxu1 %v204_v19  ;;  %v250_v24 = vld [vmem:[%s20413_s1 + $0x70] sm:$0xff] }
   0x9   :  { %55 = vst [vmem:[#allocation2 + $0xd8] sm:$0xff] %v11710_v3  ;;  %56 = vst [vmem:[#allocation2 + $0xe0] sm:$0xff] %v11710_v3  ;;  %10364 = vmatpush3.bf16.msra.mxu0 %v10361_v6  ;;  %10910 = vmatpush3.bf16.msra.mxu1 %v10361_v6  ;;  %v10381_v23 = vpack.c.bf16 %v249_v22, %v248_v21  ;;  %v251_v25 = vld [vmem:[%s20413_s1 + $0x78] sm:$0xff]  ;;  %v173_v27 = vld [vmem:[%s20414_s0 + $0x8] sm:$0xff] }
   0xa   :  { %59 = vst [vmem:[#allocation2 + $0xf8] sm:$0xff] %v11710_v3  ;;  %60 = vst [vmem:[#allocation2 + $0x100] sm:$0xff] %v11710_v3  ;;  %10366 = vmatprep.subr.bf16.mxu0 %v10365_v9  ;;  %10903 = vmatprep.subr.bf16.mxu1 %v10365_v9  ;;  %v10385_v26 = vpack.c.bf16 %v251_v25, %v250_v24  ;;  %v205_v28 = vld [vmem:[%s20414_s0 + $0x108] sm:$0xff]  ;;  %v174_v29 = vld [vmem:[%s20414_s0 + $0x10] sm:$0xff] }
   0xb   :  { %63 = vst [vmem:[#allocation2 + $0x118] sm:$0xff] %v11710_v3  ;;  %64 = vst [vmem:[#allocation2 + $0x120] sm:$0xff] %v11710_v3  ;;  %v206_v30 = vld [vmem:[%s20414_s0 + $0x110] sm:$0xff]  ;;  %v175_v31 = vld [vmem:[%s20414_s0 + $0x18] sm:$0xff] }
   0xc   :  { %67 = vst [vmem:[#allocation2 + $0x138] sm:$0xff] %v11710_v3  ;;  %68 = vst [vmem:[#allocation2 + $0x140] sm:$0xff] %v11710_v3  ;;  %v207_v32 = vld [vmem:[%s20414_s0 + $0x118] sm:$0xff]  ;;  %v176_v33 = vld [vmem:[%s20414_s0 + $0x20] sm:$0xff] }
   0xd   :  { %71 = vst [vmem:[#allocation2 + $0x158] sm:$0xff] %v11710_v3  ;;  %72 = vst [vmem:[#allocation2 + $0x160] sm:$0xff] %v11710_v3  ;;  %10368 = vmatpush3.bf16.msra.mxu0 %v10365_v9  ;;  %10911 = vmatpush3.bf16.msra.mxu1 %v10365_v9  ;;  %v208_v34 = vld [vmem:[%s20414_s0 + $0x120] sm:$0xff]  ;;  %v177_v35 = vld [vmem:[%s20414_s0 + $0x28] sm:$0xff] }
   0xe   :  { %75 = vst [vmem:[#allocation2 + $0x178] sm:$0xff] %v11710_v3  ;;  %76 = vst [vmem:[#allocation2 + $0x180] sm:$0xff] %v11710_v3  ;;  %10370 = vmatprep.subr.bf16.mxu0 %v10369_v13  ;;  %10904 = vmatprep.subr.bf16.mxu1 %v10369_v13  ;;  %v209_v36 = vld [vmem:[%s20414_s0 + $0x128] sm:$0xff]  ;;  %v178_v37 = vld [vmem:[%s20414_s0 + $0x30] sm:$0xff] }
   0xf   :  { %79 = vst [vmem:[#allocation2 + $0x198] sm:$0xff] %v11710_v3  ;;  %80 = vst [vmem:[#allocation2 + $0x1a0] sm:$0xff] %v11710_v3  ;;  %v210_v38 = vld [vmem:[%s20414_s0 + $0x130] sm:$0xff]  ;;  %v179_v39 = vld [vmem:[%s20414_s0 + $0x38] sm:$0xff] }
  0x10   :  { %83 = vst [vmem:[#allocation2 + $0x1b8] sm:$0xff] %v11710_v3  ;;  %84 = vst [vmem:[#allocation2 + $0x1c0] sm:$0xff] %v11710_v3  ;;  %v211_v40 = vld [vmem:[%s20414_s0 + $0x138] sm:$0xff]  ;;  %v180_v41 = vld [vmem:[%s20414_s0 + $0x40] sm:$0xff] }
  0x11   :  { %87 = vst [vmem:[#allocation2 + $0x1d8] sm:$0xff] %v11710_v3  ;;  %88 = vst [vmem:[#allocation2 + $0x1e0] sm:$0xff] %v11710_v3  ;;  %10372 = vmatpush3.bf16.msra.mxu0 %v10369_v13  ;;  %10912 = vmatpush3.bf16.msra.mxu1 %v10369_v13  ;;  %v212_v42 = vld [vmem:[%s20414_s0 + $0x140] sm:$0xff]  ;;  %v181_v43 = vld [vmem:[%s20414_s0 + $0x48] sm:$0xff] }
  0x12   :  { %91 = vst [vmem:[#allocation2 + $0x1f8] sm:$0xff] %v11710_v3  ;;  %92 = vst [vmem:[#allocation2 + $0x200] sm:$0xff] %v11710_v3  ;;  %10374 = vmatprep.subr.bf16.mxu0 %v10373_v16  ;;  %10905 = vmatprep.subr.bf16.mxu1 %v10373_v16  ;;  %v213_v44 = vld [vmem:[%s20414_s0 + $0x148] sm:$0xff]  ;;  %v182_v45 = vld [vmem:[%s20414_s0 + $0x50] sm:$0xff] }
  0x13   :  { %95 = vst [vmem:[#allocation2 + $0x218] sm:$0xff] %v11710_v3  ;;  %96 = vst [vmem:[#allocation2 + $0x220] sm:$0xff] %v11710_v3  ;;  %v214_v46 = vld [vmem:[%s20414_s0 + $0x150] sm:$0xff]  ;;  %v183_v47 = vld [vmem:[%s20414_s0 + $0x58] sm:$0xff] }
  0x14   :  { %97 = vst [vmem:[#allocation2 + $0x228] sm:$0xff] %v11710_v3  ;;  %98 = vst [vmem:[#allocation2 + $0x230] sm:$0xff] %v11710_v3  ;;  %v215_v48 = vld [vmem:[%s20414_s0 + $0x158] sm:$0xff]  ;;  %v184_v49 = vld [vmem:[%s20414_s0 + $0x60] sm:$0xff] }
  0x15   :  { %99 = vst [vmem:[#allocation2 + $0x238] sm:$0xff] %v11710_v3  ;;  %100 = vst [vmem:[#allocation2 + $0x240] sm:$0xff] %v11710_v3  ;;  %10376 = vmatpush3.bf16.msra.mxu0 %v10373_v16  ;;  %10913 = vmatpush3.bf16.msra.mxu1 %v10373_v16  ;;  %v216_v50 = vld [vmem:[%s20414_s0 + $0x160] sm:$0xff]  ;;  %v185_v51 = vld [vmem:[%s20414_s0 + $0x68] sm:$0xff] }
  0x16   :  { %101 = vst [vmem:[#allocation2 + $0x248] sm:$0xff] %v11710_v3  ;;  %102 = vst [vmem:[#allocation2 + $0x250] sm:$0xff] %v11710_v3  ;;  %10378 = vmatprep.subr.bf16.mxu0 %v10377_v20  ;;  %10906 = vmatprep.subr.bf16.mxu1 %v10377_v20  ;;  %v217_v52 = vld [vmem:[%s20414_s0 + $0x168] sm:$0xff]  ;;  %v186_v53 = vld [vmem:[%s20414_s0 + $0x70] sm:$0xff] }
  0x17   :  { %103 = vst [vmem:[#allocation2 + $0x258] sm:$0xff] %v11710_v3  ;;  %104 = vst [vmem:[#allocation2 + $0x260] sm:$0xff] %v11710_v3  ;;  %v218_v54 = vld [vmem:[%s20414_s0 + $0x170] sm:$0xff]  ;;  %v187_v55 = vld [vmem:[%s20414_s0 + $0x78] sm:$0xff] }
  0x18   :  { %107 = vst [vmem:[#allocation2 + $0x278] sm:$0xff] %v11710_v3  ;;  %108 = vst [vmem:[#allocation2 + $0x280] sm:$0xff] %v11710_v3  ;;  %v219_v56 = vld [vmem:[%s20414_s0 + $0x178] sm:$0xff]  ;;  %v188_v57 = vld [vmem:[%s20414_s0 + $0x80] sm:$0xff] }
  0x19   :  { %111 = vst [vmem:[#allocation2 + $0x298] sm:$0xff] %v11710_v3  ;;  %112 = vst [vmem:[#allocation2 + $0x2a0] sm:$0xff] %v11710_v3  ;;  %10380 = vmatpush3.bf16.msra.mxu0 %v10377_v20  ;;  %10914 = vmatpush3.bf16.msra.mxu1 %v10377_v20  ;;  %v220_v58 = vld [vmem:[%s20414_s0 + $0x180] sm:$0xff]  ;;  %v189_v59 = vld [vmem:[%s20414_s0 + $0x88] sm:$0xff] }
  0x1a   :  { %115 = vst [vmem:[#allocation2 + $0x2b8] sm:$0xff] %v11710_v3  ;;  %116 = vst [vmem:[#allocation2 + $0x2c0] sm:$0xff] %v11710_v3  ;;  %10382 = vmatprep.subr.bf16.mxu0 %v10381_v23  ;;  %10907 = vmatprep.subr.bf16.mxu1 %v10381_v23  ;;  %v221_v60 = vld [vmem:[%s20414_s0 + $0x188] sm:$0xff]  ;;  %v190_v61 = vld [vmem:[%s20414_s0 + $0x90] sm:$0xff] }
  0x1b   :  { %119 = vst [vmem:[#allocation2 + $0x2d8] sm:$0xff] %v11710_v3  ;;  %120 = vst [vmem:[#allocation2 + $0x2e0] sm:$0xff] %v11710_v3  ;;  %v222_v62 = vld [vmem:[%s20414_s0 + $0x190] sm:$0xff]  ;;  %v191_v63 = vld [vmem:[%s20414_s0 + $0x98] sm:$0xff] }
  0x1c   :  { %123 = vst [vmem:[#allocation2 + $0x2f8] sm:$0xff] %v11710_v3  ;;  %124 = vst [vmem:[#allocation2 + $0x300] sm:$0xff] %v11710_v3  ;;  %v223_v0 = vld [vmem:[%s20414_s0 + $0x198] sm:$0xff]  ;;  %v192_v1 = vld [vmem:[%s20414_s0 + $0xa0] sm:$0xff] }
  0x1d   :  { %127 = vst [vmem:[#allocation2 + $0x318] sm:$0xff] %v11710_v3  ;;  %128 = vst [vmem:[#allocation2 + $0x320] sm:$0xff] %v11710_v3  ;;  %10384 = vmatpush3.bf16.msra.mxu0 %v10381_v23  ;;  %10915 = vmatpush3.bf16.msra.mxu1 %v10381_v23  ;;  %v224_v2 = vld [vmem:[%s20414_s0 + $0x1a0] sm:$0xff]  ;;  %v193_v4 = vld [vmem:[%s20414_s0 + $0xa8] sm:$0xff] }
  0x1e   :  { %131 = vst [vmem:[#allocation2 + $0x338] sm:$0xff] %v11710_v3  ;;  %132 = vst [vmem:[#allocation2 + $0x340] sm:$0xff] %v11710_v3  ;;  %10386 = vmatprep.subr.bf16.mxu0 %v10385_v26  ;;  %10908 = vmatprep.subr.bf16.mxu1 %v10385_v26  ;;  %v225_v5 = vld [vmem:[%s20414_s0 + $0x1a8] sm:$0xff]  ;;  %v194_v6 = vld [vmem:[%s20414_s0 + $0xb0] sm:$0xff] }
  0x1f   :  { %135 = vst [vmem:[#allocation2 + $0x358] sm:$0xff] %v11710_v3  ;;  %136 = vst [vmem:[#allocation2 + $0x360] sm:$0xff] %v11710_v3  ;;  %v226_v7 = vld [vmem:[%s20414_s0 + $0x1b0] sm:$0xff]  ;;  %v195_v8 = vld [vmem:[%s20414_s0 + $0xb8] sm:$0xff] }
  0x20   :  { %139 = vst [vmem:[#allocation2 + $0x378] sm:$0xff] %v11710_v3  ;;  %140 = vst [vmem:[#allocation2 + $0x380] sm:$0xff] %v11710_v3  ;;  %v227_v9 = vld [vmem:[%s20414_s0 + $0x1b8] sm:$0xff]  ;;  %v196_v10 = vld [vmem:[%s20414_s0 + $0xc0] sm:$0xff] }
  0x21   :  { %143 = vst [vmem:[#allocation2 + $0x398] sm:$0xff] %v11710_v3  ;;  %144 = vst [vmem:[#allocation2 + $0x3a0] sm:$0xff] %v11710_v3  ;;  %10388 = vmatpush3.bf16.msra.mxu0 %v10385_v26  ;;  %10916 = vmatpush3.bf16.msra.mxu1 %v10385_v26  ;;  %v228_v11 = vld [vmem:[%s20414_s0 + $0x1c0] sm:$0xff]  ;;  %v197_v12 = vld [vmem:[%s20414_s0 + $0xc8] sm:$0xff] }
  0x22   :  { %147 = vst [vmem:[#allocation2 + $0x3b8] sm:$0xff] %v11710_v3  ;;  %148 = vst [vmem:[#allocation2 + $0x3c0] sm:$0xff] %v11710_v3  ;;  %v229_v13 = vld [vmem:[%s20414_s0 + $0x1c8] sm:$0xff]  ;;  %v198_v14 = vld [vmem:[%s20414_s0 + $0xd0] sm:$0xff] }
  0x23   :  { %151 = vst [vmem:[#allocation2 + $0x3d8] sm:$0xff] %v11710_v3  ;;  %152 = vst [vmem:[#allocation2 + $0x3e0] sm:$0xff] %v11710_v3  ;;  %v230_v15 = vld [vmem:[%s20414_s0 + $0x1d0] sm:$0xff]  ;;  %v199_v16 = vld [vmem:[%s20414_s0 + $0xd8] sm:$0xff] }
  0x24   :  { %155 = vst [vmem:[#allocation2 + $0x3f8] sm:$0xff] %v11710_v3  ;;  %156 = vst [vmem:[#allocation2 + $0x400] sm:$0xff] %v11710_v3  ;;  %9750 = vmatmul.mubr.f32.vlgmr.msra.gmra.mrb[0].mxu0 %v173_v27  ;;  %9798 = vmatmul.mubr.f32.vlgmr.msra.gmra.mrb[0].mxu1 %v205_v28  ;;  %v231_v17 = vld [vmem:[%s20414_s0 + $0x1d8] sm:$0xff]  ;;  %v200_v18 = vld [vmem:[%s20414_s0 + $0xe0] sm:$0xff] }
  0x25   :  { %159 = vst [vmem:[#allocation2 + $0x418] sm:$0xff] %v11710_v3  ;;  %160 = vst [vmem:[#allocation2 + $0x420] sm:$0xff] %v11710_v3  ;;  %9752 = vmatprep.mubr.f32.mxu0 %v174_v29  ;;  %9800 = vmatprep.mubr.f32.mxu1 %v206_v30  ;;  %v232_v19 = vld [vmem:[%s20414_s0 + $0x1e0] sm:$0xff]  ;;  %v201_v20 = vld [vmem:[%s20414_s0 + $0xe8] sm:$0xff]  ;;  %v20421_v29 = vmov 0.0|0.0  }
  0x26   :  { %163 = vst [vmem:[#allocation2 + $0x438] sm:$0xff] %v11710_v3  ;;  %164 = vst [vmem:[#allocation2 + $0x440] sm:$0xff] %v11710_v3  ;;  %v233_v21 = vld [vmem:[%s20414_s0 + $0x1e8] sm:$0xff]  ;;  %v202_v22 = vld [vmem:[%s20414_s0 + $0xf0] sm:$0xff]  ;;  %10389 = vmatprep.subr.bf16.mxu1 %v20421_v29 }
  0x27   :  { %167 = vst [vmem:[#allocation2 + $0x458] sm:$0xff] %v11710_v3  ;;  %168 = vst [vmem:[#allocation2 + $0x460] sm:$0xff] %v11710_v3  ;;  %v234_v23 = vld [vmem:[%s20414_s0 + $0x1f0] sm:$0xff]  ;;  %v203_v24 = vld [vmem:[%s20414_s0 + $0xf8] sm:$0xff] }
  0x28   :  { %169 = vst [vmem:[#allocation2 + $0x468] sm:$0xff] %v11710_v3  ;;  %170 = vst [vmem:[#allocation2 + $0x470] sm:$0xff] %v11710_v3  ;;  %9753 = vmatmul.mubr.f32.gmra.mrb[2].mxu0 %v175_v31  ;;  %9801 = vmatmul.mubr.f32.gmra.mrb[2].mxu1 %v207_v32  ;;  %v235_v25 = vld [vmem:[%s20414_s0 + $0x1f8] sm:$0xff]  ;;  %v1757_v26 = vld [vmem:[%s20415_s2] sm:$0xff] }
  0x29   :  { %171 = vst [vmem:[#allocation2 + $0x478] sm:$0xff] %v11710_v3  ;;  %9755 = vmatprep.mubr.f32.mxu0 %v176_v33  ;;  %9803 = vmatprep.mubr.f32.mxu1 %v208_v34  ;;  %v1758_v27 = vld [vmem:[%s20415_s2 + $0x8] sm:$0xff]  ;;  %v1759_v30 = vld [vmem:[%s20415_s2 + $0x10] sm:$0xff]  ;;  %v1761_v32 = vld [vmem:[%s20415_s2 + $0x20] sm:$0xff] }
  0x2a   :  { %v10390_v28 = vpack.c.bf16 %v1758_v27, %v1757_v26  ;;  %v1762_v33 = vld [vmem:[%s20415_s2 + $0x28] sm:$0xff] }
  0x2b   :  { %v10396_v34 = vpack.c.bf16 %v1762_v33, %v1761_v32 }
  0x2c   :  { %9756 = vmatmul.mubr.f32.gmra.mrb[4].mxu0 %v177_v35  ;;  %9804 = vmatmul.mubr.f32.gmra.mrb[4].mxu1 %v209_v36 }
  0x2d   :  { %9758 = vmatprep.mubr.f32.mxu0 %v178_v37  ;;  %9806 = vmatprep.mubr.f32.mxu1 %v210_v38 }
  0x2e   :  { %10391 = vmatpush1.bf16.msra.mxu1 %v10390_v28 }
  0x2f   :  { %10392 = vmatprep.subr.bf16.mxu1 %v20421_v29 }
  0x30   :  { %9759 = vmatmul.mubr.f32.gmra.mrb[6].mxu0 %v179_v39  ;;  %9807 = vmatmul.mubr.f32.gmra.mrb[6].mxu1 %v211_v40 }
  0x31   :  { %9761 = vmatprep.mubr.f32.mxu0 %v180_v41  ;;  %9809 = vmatprep.mubr.f32.mxu1 %v212_v42 }
  0x34   :  { %9762 = vmatmul.mubr.f32.gmra.mrb[8].mxu0 %v181_v43  ;;  %9810 = vmatmul.mubr.f32.gmra.mrb[8].mxu1 %v213_v44 }
  0x35   :  { %9764 = vmatprep.mubr.f32.mxu0 %v182_v45  ;;  %9812 = vmatprep.mubr.f32.mxu1 %v214_v46 }
  0x38   :  { %9765 = vmatmul.mubr.f32.gmra.mrb[10].mxu0 %v183_v47  ;;  %9813 = vmatmul.mubr.f32.gmra.mrb[10].mxu1 %v215_v48 }
  0x39   :  { %9767 = vmatprep.mubr.f32.mxu0 %v184_v49  ;;  %9815 = vmatprep.mubr.f32.mxu1 %v216_v50 }
  0x3c   :  { %9768 = vmatmul.mubr.f32.gmra.mrb[12].mxu0 %v185_v51  ;;  %9816 = vmatmul.mubr.f32.gmra.mrb[12].mxu1 %v217_v52 }
  0x3d   :  { %9770 = vmatprep.mubr.f32.mxu0 %v186_v53  ;;  %9818 = vmatprep.mubr.f32.mxu1 %v218_v54 }
  0x40   :  { %9771 = vmatmul.mubr.f32.gmra.mrb[14].mxu0 %v187_v55  ;;  %9819 = vmatmul.mubr.f32.gmra.mrb[14].mxu1 %v219_v56 }
  0x41   :  { %9773 = vmatprep.mubr.f32.mxu0 %v188_v57  ;;  %9821 = vmatprep.mubr.f32.mxu1 %v220_v58 }
  0x44   :  { %9774 = vmatmul.mubr.f32.gmra.mrb[16].mxu0 %v189_v59  ;;  %9822 = vmatmul.mubr.f32.gmra.mrb[16].mxu1 %v221_v60 }
  0x45   :  { %9776 = vmatprep.mubr.f32.mxu0 %v190_v61  ;;  %9824 = vmatprep.mubr.f32.mxu1 %v222_v62 }
  0x48   :  { %9777 = vmatmul.mubr.f32.gmra.mrb[18].mxu0 %v191_v63  ;;  %9825 = vmatmul.mubr.f32.gmra.mrb[18].mxu1 %v223_v0 }
  0x49   :  { %9779 = vmatprep.mubr.f32.mxu0 %v192_v1  ;;  %9827 = vmatprep.mubr.f32.mxu1 %v224_v2 }
  0x4c   :  { %9780 = vmatmul.mubr.f32.gmra.mrb[20].mxu0 %v193_v4  ;;  %9828 = vmatmul.mubr.f32.gmra.mrb[20].mxu1 %v225_v5 }
  0x4d   :  { %9782 = vmatprep.mubr.f32.mxu0 %v194_v6  ;;  %9830 = vmatprep.mubr.f32.mxu1 %v226_v7 }
  0x50   :  { %9783 = vmatmul.mubr.f32.gmra.mrb[22].mxu0 %v195_v8  ;;  %9831 = vmatmul.mubr.f32.gmra.mrb[22].mxu1 %v227_v9 }
  0x51   :  { %9785 = vmatprep.mubr.f32.mxu0 %v196_v10  ;;  %9833 = vmatprep.mubr.f32.mxu1 %v228_v11 }
  0x54   :  { %9786 = vmatmul.mubr.f32.gmra.mrb[24].mxu0 %v197_v12  ;;  %9834 = vmatmul.mubr.f32.gmra.mrb[24].mxu1 %v229_v13 }
  0x55   :  { %9788 = vmatprep.mubr.f32.mxu0 %v198_v14  ;;  %9836 = vmatprep.mubr.f32.mxu1 %v230_v15 }
  0x58   :  { %9789 = vmatmul.mubr.f32.gmra.mrb[26].mxu0 %v199_v16  ;;  %9837 = vmatmul.mubr.f32.gmra.mrb[26].mxu1 %v231_v17 }
  0x59   :  { %9791 = vmatprep.mubr.f32.mxu0 %v200_v18  ;;  %9839 = vmatprep.mubr.f32.mxu1 %v232_v19 }
  0x5c   :  { %9792 = vmatmul.mubr.f32.gmra.mrb[28].mxu0 %v201_v20  ;;  %9840 = vmatmul.mubr.f32.gmra.mrb[28].mxu1 %v233_v21 }
  0x5d   :  { %9794 = vmatprep.mubr.f32.mxu0 %v202_v22  ;;  %9842 = vmatprep.mubr.f32.mxu1 %v234_v23 }
  0x60   :  { %9795 = vmatmul.mubr.f32.gmra.mrb[30].mxu0 %v203_v24  ;;  %9843 = vmatmul.mubr.f32.gmra.mrb[30].mxu1 %v235_v25 }
  0x61   :  { %1965 = vmatprep.mubr.f32.mxu1 %v11710_v3  ;;  %v1760_v3 = vld [vmem:[%s20415_s2 + $0x18] sm:$0xff] }
  0x62   :  { %v10393_v31 = vpack.c.bf16 %v1760_v3, %v1759_v30 }
  0x64   :  { %10394 = vmatpush1.bf16.msra.mxu1 %v10393_v31 }
  0x65   :  { %10395 = vmatprep.subr.bf16.mxu1 %v20421_v29 }
  0x68   :  { %10397 = vmatpush1.bf16.msra.mxu1 %v10396_v34 }
  0x69   :  { %10398 = vmatprep.subr.bf16.mxu1 %v20421_v29 }
  0xf7   :  { %v12104_v35 = vpop.f32.mrb[0].mxu0  ;;  %v12106_v36 = vpop.f32.mrb[0].mxu1 }
  0xf8   :  { %v707_v37 = vmul.f32 %v12104_v35, %v12104_v35  ;;  %v12110_v38 = vpop.f32.mrb[1].mxu0  ;;  %v12112_v39 = vpop.f32.mrb[1].mxu1 }
  0xf9   :  { %v637_v40 = vadd.f32 %v12104_v35, %v12110_v38  ;;  %v706_v41 = vmul.f32 %v12110_v38, %v12110_v38 }
  0xfb   :  { %v770_v42 = vadd.f32 %v707_v37, %v706_v41  ;;  %v12118_v43 = vpop.f32.mrb[2].mxu0  ;;  %v12120_v44 = vpop.f32.mrb[2].mxu1 }
  0xfc   :  { %v12122_v45 = vpop.f32.mrb[3].mxu0  ;;  %v12124_v46 = vpop.f32.mrb[3].mxu1  ;;  %v709_v49 = vmul.f32 %v12118_v43, %v12118_v43 }
  0xfd   :  { %v638_v47 = vadd.f32 %v637_v40, %v12122_v45  ;;  %v708_v48 = vmul.f32 %v12122_v45, %v12122_v45 }
  0xff   :  { %v771_v50 = vadd.f32 %v770_v42, %v708_v48  ;;  %v12131_v51 = vpop.f32.mrb[4].mxu0  ;;  %v639_v52 = vadd.f32 %v12118_v43, %v638_v47  ;;  %v12134_v53 = vpop.f32.mrb[4].mxu1 }
 0x100   :  { %20699 = vst [vmem:[#allocation3_spill] sm:$0xff] %v12134_v53  ;;  %v12136_v54 = vpop.f32.mrb[5].mxu0  ;;  %v12138_v55 = vpop.f32.mrb[5].mxu1  ;;  %v711_v59 = vmul.f32 %v12131_v51, %v12131_v51 }
 0x101   :  { %20700 = vst [vmem:[#allocation4_spill] sm:$0xff] %v12138_v55  ;;  %v640_v56 = vadd.f32 %v639_v52, %v12136_v54  ;;  %v710_v57 = vmul.f32 %v12136_v54, %v12136_v54  ;;  %v772_v58 = vadd.f32 %v771_v50, %v709_v49 }
 0x103   :  { %v773_v60 = vadd.f32 %v772_v58, %v710_v57  ;;  %v12145_v61 = vpop.f32.mrb[6].mxu0  ;;  %v641_v62 = vadd.f32 %v12131_v51, %v640_v56  ;;  %v12148_v63 = vpop.f32.mrb[6].mxu1 }
 0x104   :  { %v12150_v0 = vpop.f32.mrb[7].mxu0  ;;  %v12152_v1 = vpop.f32.mrb[7].mxu1  ;;  %v713_v6 = vmul.f32 %v12145_v61, %v12145_v61 }
 0x105   :  { %v642_v2 = vadd.f32 %v641_v62, %v12150_v0  ;;  %v712_v4 = vmul.f32 %v12150_v0, %v12150_v0  ;;  %v774_v5 = vadd.f32 %v773_v60, %v711_v59 }
 0x107   :  { %v775_v7 = vadd.f32 %v774_v5, %v712_v4  ;;  %v12159_v8 = vpop.f32.mrb[8].mxu0  ;;  %v643_v9 = vadd.f32 %v12145_v61, %v642_v2  ;;  %v12162_v10 = vpop.f32.mrb[8].mxu1 }
 0x108   :  { %v12164_v11 = vpop.f32.mrb[9].mxu0  ;;  %v12166_v12 = vpop.f32.mrb[9].mxu1  ;;  %v715_v16 = vmul.f32 %v12159_v8, %v12159_v8 }
 0x109   :  { %v644_v13 = vadd.f32 %v643_v9, %v12164_v11  ;;  %v714_v14 = vmul.f32 %v12164_v11, %v12164_v11  ;;  %v776_v15 = vadd.f32 %v775_v7, %v713_v6 }
 0x10b   :  { %v777_v17 = vadd.f32 %v776_v15, %v714_v14  ;;  %v12173_v18 = vpop.f32.mrb[10].mxu0  ;;  %v645_v19 = vadd.f32 %v12159_v8, %v644_v13  ;;  %v12176_v20 = vpop.f32.mrb[10].mxu1 }
 0x10c   :  { %v12178_v21 = vpop.f32.mrb[11].mxu0  ;;  %v12180_v22 = vpop.f32.mrb[11].mxu1  ;;  %v717_v26 = vmul.f32 %v12173_v18, %v12173_v18 }
 0x10d   :  { %v646_v23 = vadd.f32 %v645_v19, %v12178_v21  ;;  %v716_v24 = vmul.f32 %v12178_v21, %v12178_v21  ;;  %v778_v25 = vadd.f32 %v777_v17, %v715_v16 }
 0x10f   :  { %v779_v27 = vadd.f32 %v778_v25, %v716_v24  ;;  %v12187_v28 = vpop.f32.mrb[12].mxu0  ;;  %v647_v30 = vadd.f32 %v12173_v18, %v646_v23  ;;  %v12190_v3 = vpop.f32.mrb[12].mxu1 }
 0x110   :  { %v12192_v31 = vpop.f32.mrb[13].mxu0  ;;  %v12194_v32 = vpop.f32.mrb[13].mxu1  ;;  %v719_v40 = vmul.f32 %v12187_v28, %v12187_v28 }
 0x111   :  { %v648_v33 = vadd.f32 %v647_v30, %v12192_v31  ;;  %v718_v34 = vmul.f32 %v12192_v31, %v12192_v31  ;;  %v780_v37 = vadd.f32 %v779_v27, %v717_v26 }
 0x113   :  { %v781_v41 = vadd.f32 %v780_v37, %v718_v34  ;;  %v12201_v42 = vpop.f32.mrb[14].mxu0  ;;  %v649_v47 = vadd.f32 %v12187_v28, %v648_v33  ;;  %v12204_v48 = vpop.f32.mrb[14].mxu1 }
 0x114   :  { %v12206_v49 = vpop.f32.mrb[15].mxu0  ;;  %v12208_v50 = vpop.f32.mrb[15].mxu1  ;;  %v721_v58 = vmul.f32 %v12201_v42, %v12201_v42 }
 0x115   :  { %v650_v52 = vadd.f32 %v649_v47, %v12206_v49  ;;  %v720_v56 = vmul.f32 %v12206_v49, %v12206_v49  ;;  %v782_v57 = vadd.f32 %v781_v41, %v719_v40 }
 0x117   :  { %v783_v59 = vadd.f32 %v782_v57, %v720_v56  ;;  %v12215_v60 = vpop.f32.mrb[16].mxu0  ;;  %v651_v62 = vadd.f32 %v12201_v42, %v650_v52  ;;  %v12218_v2 = vpop.f32.mrb[16].mxu1 }
 0x118   :  { %20701 = vst [vmem:[#allocation5_spill] sm:$0xff] %v12215_v60  ;;  %v12220_v4 = vpop.f32.mrb[17].mxu0  ;;  %v12222_v5 = vpop.f32.mrb[17].mxu1  ;;  %v723_v13 = vmul.f32 %v12215_v60, %v12215_v60 }
 0x119   :  { %20702 = vst [vmem:[#allocation6_spill] sm:$0xff] %v12220_v4  ;;  %v652_v6 = vadd.f32 %v651_v62, %v12220_v4  ;;  %v722_v7 = vmul.f32 %v12220_v4, %v12220_v4  ;;  %v784_v9 = vadd.f32 %v783_v59, %v721_v58 }
 0x11b   :  { %v785_v14 = vadd.f32 %v784_v9, %v722_v7  ;;  %v12229_v15 = vpop.f32.mrb[18].mxu0  ;;  %v653_v16 = vadd.f32 %v12215_v60, %v652_v6  ;;  %v12232_v17 = vpop.f32.mrb[18].mxu1  ;;  %v1763_v7 = vld [vmem:[%s20415_s2 + $0x30] sm:$0xff]  ;;  %v1764_v9 = vld [vmem:[%s20415_s2 + $0x38] sm:$0xff] }
 0x11c   :  { %20703 = vst [vmem:[#allocation7_spill] sm:$0xff] %v12229_v15  ;;  %20704 = vst [vmem:[#allocation8_spill] sm:$0xff] %v12232_v17  ;;  %v12234_v19 = vpop.f32.mrb[19].mxu0  ;;  %v12236_v23 = vpop.f32.mrb[19].mxu1  ;;  %v725_v27 = vmul.f32 %v12229_v15, %v12229_v15 }
 0x11d   :  { %20705 = vst [vmem:[#allocation9_spill] sm:$0xff] %v12234_v19  ;;  %20706 = vst [vmem:[#allocation10_spill] sm:$0xff] %v12236_v23  ;;  %v654_v24 = vadd.f32 %v653_v16, %v12234_v19  ;;  %v724_v25 = vmul.f32 %v12234_v19, %v12234_v19  ;;  %v786_v26 = vadd.f32 %v785_v14, %v723_v13 }
 0x11e   :  { %v10399_v16 = vpack.c.bf16 %v1764_v9, %v1763_v7 }
 0x11f   :  { %v787_v30 = vadd.f32 %v786_v26, %v724_v25  ;;  %v12243_v33 = vpop.f32.mrb[20].mxu0  ;;  %v655_v34 = vadd.f32 %v12229_v15, %v654_v24  ;;  %v12246_v37 = vpop.f32.mrb[20].mxu1 }
 0x120   :  { %20707 = vst [vmem:[#allocation11_spill] sm:$0xff] %v12243_v33  ;;  %v12248_v40 = vpop.f32.mrb[21].mxu0  ;;  %v12250_v41 = vpop.f32.mrb[21].mxu1  ;;  %v727_v57 = vmul.f32 %v12243_v33, %v12243_v33  ;;  %10400 = vmatpush1.bf16.msra.mxu1 %v10399_v16 }
 0x121   :  { %20708 = vst [vmem:[#allocation12_spill] sm:$0xff] %v12248_v40  ;;  %v656_v47 = vadd.f32 %v655_v34, %v12248_v40  ;;  %v726_v52 = vmul.f32 %v12248_v40, %v12248_v40  ;;  %v788_v56 = vadd.f32 %v787_v30, %v725_v27  ;;  %10401 = vmatprep.subr.bf16.mxu1 %v20421_v29 }
 0x123   :  { %v789_v58 = vadd.f32 %v788_v56, %v726_v52  ;;  %v12257_v59 = vpop.f32.mrb[22].mxu0  ;;  %v657_v62 = vadd.f32 %v12243_v33, %v656_v47  ;;  %v12260_v6 = vpop.f32.mrb[22].mxu1  ;;  %v1765_v56 = vld [vmem:[%s20415_s2 + $0x40] sm:$0xff]  ;;  %v20714_v33 = vmov 0.0|0.0  }
 0x124   :  { %20709 = vst [vmem:[#allocation13_spill] sm:$0xff] %v12257_v59  ;;  %v12268_v13 = vpop.f32.mrb[23].mxu0  ;;  %v12270_v14 = vpop.f32.mrb[23].mxu1  ;;  %v729_v27 = vmul.f32 %v12257_v59, %v12257_v59 }
 0x125   :  { %20710 = vst [vmem:[#allocation14_spill] sm:$0xff] %v12268_v13  ;;  %v658_v24 = vadd.f32 %v657_v62, %v12268_v13  ;;  %v728_v25 = vmul.f32 %v12268_v13, %v12268_v13  ;;  %v790_v26 = vadd.f32 %v789_v58, %v727_v57  ;;  %v1766_v57 = vld [vmem:[%s20415_s2 + $0x48] sm:$0xff] }
 0x126   :  { %v10402_v7 = vpack.c.bf16 %v1766_v57, %v1765_v56 }
 0x127   :  { %v791_v30 = vadd.f32 %v790_v26, %v728_v25  ;;  %v12277_v34 = vpop.f32.mrb[24].mxu0  ;;  %v659_v47 = vadd.f32 %v12257_v59, %v658_v24  ;;  %v12280_v52 = vpop.f32.mrb[24].mxu1 }
 0x128   :  { %20711 = vst [vmem:[#allocation15_spill] sm:$0xff] %v12277_v34  ;;  %v12289_v58 = vpop.f32.mrb[25].mxu0  ;;  %v12291_v62 = vpop.f32.mrb[25].mxu1  ;;  %10403 = vmatpush1.bf16.msra.mxu1 %v10402_v7  ;;  %v731_v25 = vmul.f32 %v12277_v34, %v12277_v34 }
 0x129   :  { %20712 = vst [vmem:[#allocation16_spill] sm:$0xff] %v12289_v58  ;;  %v660_v9 = vadd.f32 %v659_v47, %v12289_v58  ;;  %v730_v16 = vmul.f32 %v12289_v58, %v12289_v58  ;;  %v792_v24 = vadd.f32 %v791_v30, %v729_v27  ;;  %10404 = vmatprep.subr.bf16.mxu1 %v20714_v33  ;;  %v1767_v47 = vld [vmem:[%s20415_s2 + $0x50] sm:$0xff]  ;;  %v1768_v27 = vld [vmem:[%s20415_s2 + $0x58] sm:$0xff] }
 0x12a   :  { %v10405_v57 = vpack.c.bf16 %v1768_v27, %v1767_v47 }
 0x12b   :  { %v793_v26 = vadd.f32 %v792_v24, %v730_v16  ;;  %v12298_v29 = vpop.f32.mrb[26].mxu0  ;;  %v661_v59 = vadd.f32 %v12277_v34, %v660_v9  ;;  %v12301_v13 = vpop.f32.mrb[26].mxu1 }
 0x12c   :  { %20713 = vst [vmem:[#allocation17_spill] sm:$0xff] %v12298_v29  ;;  %v12310_v30 = vpop.f32.mrb[27].mxu0  ;;  %v12312_v56 = vpop.f32.mrb[27].mxu1  ;;  %10406 = vmatpush1.bf16.msra.mxu1 %v10405_v57  ;;  %v733_v24 = vmul.f32 %v12298_v29, %v12298_v29 }
 0x12d   :  { %20715 = vst [vmem:[#allocation18_spill] sm:$0xff] %v12310_v30  ;;  %v662_v7 = vadd.f32 %v661_v59, %v12310_v30  ;;  %v732_v9 = vmul.f32 %v12310_v30, %v12310_v30  ;;  %v794_v16 = vadd.f32 %v793_v26, %v731_v25  ;;  %10407 = vmatprep.subr.bf16.mxu1 %v20714_v33  ;;  %v1769_v59 = vld [vmem:[%s20415_s2 + $0x60] sm:$0xff]  ;;  %v1770_v25 = vld [vmem:[%s20415_s2 + $0x68] sm:$0xff] }
 0x12e   :  { %v10408_v27 = vpack.c.bf16 %v1770_v25, %v1769_v59  ;;  %v1771_v59 = vld [vmem:[%s20415_s2 + $0x70] sm:$0xff] }
 0x12f   :  { %v795_v34 = vadd.f32 %v794_v16, %v732_v9  ;;  %v12319_v58 = vpop.f32.mrb[28].mxu0  ;;  %v663_v40 = vadd.f32 %v12298_v29, %v662_v7  ;;  %v12322_v15 = vpop.f32.mrb[28].mxu1 }
 0x130   :  { %20716 = vst [vmem:[#allocation19_spill] sm:$0xff] %v12319_v58  ;;  %20717 = vst [vmem:[#allocation20_spill] sm:$0xff] %v12322_v15  ;;  %v12331_v26 = vpop.f32.mrb[29].mxu0  ;;  %v12333_v47 = vpop.f32.mrb[29].mxu1  ;;  %10409 = vmatpush1.bf16.msra.mxu1 %v10408_v27  ;;  %v735_v30 = vmul.f32 %v12319_v58, %v12319_v58 }
 0x131   :  { %20718 = vst [vmem:[#allocation21_spill] sm:$0xff] %v12331_v26  ;;  %v734_v57 = vmul.f32 %v12331_v26, %v12331_v26  ;;  %v664_v7 = vadd.f32 %v663_v40, %v12331_v26  ;;  %v796_v9 = vadd.f32 %v795_v34, %v733_v24  ;;  %10410 = vmatprep.subr.bf16.mxu1 %v20714_v33  ;;  %v1772_v40 = vld [vmem:[%s20415_s2 + $0x78] sm:$0xff] }
 0x132   :  { %v10411_v25 = vpack.c.bf16 %v1772_v40, %v1771_v59  ;;  %v738_v26 = vmul.f32 %v12112_v39, %v12112_v39 }
 0x133   :  { %v12338_v16 = vpop.f32.mrb[30].mxu0  ;;  %v665_v29 = vadd.f32 %v12319_v58, %v664_v7  ;;  %v797_v19 = vadd.f32 %v796_v9, %v734_v57  ;;  %v12343_v60 = vpop.f32.mrb[30].mxu1 }
 0x134   :  { %20719 = vst [vmem:[#allocation22_spill] sm:$0xff] %v12338_v16  ;;  %20720 = vst [vmem:[#allocation23_spill] sm:$0xff] %v12343_v60  ;;  %v12352_v34 = vpop.f32.mrb[31].mxu0  ;;  %v12354_v24 = vpop.f32.mrb[31].mxu1  ;;  %10412 = vmatpush1.bf16.msra.mxu1 %v10411_v25  ;;  %v737_v58 = vmul.f32 %v12338_v16, %v12338_v16  ;;  %v739_v25 = vmul.f32 %v12106_v36, %v12106_v36 }
 0x135   :  { %v666_v27 = vadd.f32 %v665_v29, %v12352_v34  ;;  %v736_v57 = vmul.f32 %v12352_v34, %v12352_v34  ;;  %v798_v7 = vadd.f32 %v797_v19, %v735_v30  ;;  %10413 = vmatprep.subr.bf16.mxu1 %v20714_v33  ;;  %v1773_v29 = vld [vmem:[%s20415_s2 + $0x80] sm:$0xff]  ;;  %v1774_v19 = vld [vmem:[%s20415_s2 + $0x88] sm:$0xff] }
 0x136   :  { %v10414_v30 = vpack.c.bf16 %v1774_v19, %v1773_v29 }
 0x137   :  { %v667_v9 = vadd.f32 %v12338_v16, %v666_v27  ;;  %v799_v4 = vadd.f32 %v798_v7, %v736_v57  ;;  %v740_v7 = vmul.f32 %v12124_v46, %v12124_v46  ;;  %v1775_v16 = vld [vmem:[%s20415_s2 + $0x90] sm:$0xff] }
 0x138   :  { %10415 = vmatpush1.bf16.msra.mxu1 %v10414_v30 }
 0x139   :  { %v668_v59 = vadd.f32 %v667_v9, %v12112_v39  ;;  %v800_v40 = vadd.f32 %v799_v4, %v737_v58  ;;  %10416 = vmatprep.subr.bf16.mxu1 %v20714_v33  ;;  %v1776_v4 = vld [vmem:[%s20415_s2 + $0x98] sm:$0xff] }
 0x13a   :  { %v10417_v58 = vpack.c.bf16 %v1776_v4, %v1775_v16  ;;  %v1778_v16 = vld [vmem:[%s20415_s2 + $0xa8] sm:$0xff] }
 0x13b   :  { %v801_v27 = vadd.f32 %v800_v40, %v738_v26  ;;  %v669_v57 = vadd.f32 %v12106_v36, %v668_v59  ;;  %v741_v26 = vmul.f32 %v12120_v44, %v12120_v44  ;;  %v742_v59 = vmul.f32 %v12138_v55, %v12138_v55  ;;  %v1777_v40 = vld [vmem:[%s20415_s2 + $0xa0] sm:$0xff] }
 0x13c   :  { %10418 = vmatpush1.bf16.msra.mxu1 %v10417_v58 }
 0x13d   :  { %v670_v9 = vadd.f32 %v669_v57, %v12124_v46  ;;  %v802_v29 = vadd.f32 %v801_v27, %v739_v25  ;;  %10419 = vmatprep.subr.bf16.mxu1 %v20714_v33  ;;  %v10420_v25 = vpack.c.bf16 %v1778_v16, %v1777_v40 }
 0x13f   :  { %v803_v19 = vadd.f32 %v802_v29, %v740_v7  ;;  %v671_v30 = vadd.f32 %v12120_v44, %v670_v9  ;;  %v743_v7 = vmul.f32 %v12134_v53, %v12134_v53  ;;  %v744_v9 = vmul.f32 %v12152_v1, %v12152_v1  ;;  %v1779_v29 = vld [vmem:[%s20415_s2 + $0xb0] sm:$0xff] }
 0x140   :  { %10421 = vmatpush1.bf16.msra.mxu1 %v10420_v25 }
 0x141   :  { %v672_v27 = vadd.f32 %v671_v30, %v12138_v55  ;;  %v804_v57 = vadd.f32 %v803_v19, %v741_v26  ;;  %10422 = vmatprep.subr.bf16.mxu1 %v20714_v33  ;;  %v1780_v26 = vld [vmem:[%s20415_s2 + $0xb8] sm:$0xff]  ;;  %v1885_v19 = vld [vmem:[%s20415_s2 + $0x400] sm:$0xff]  ;;  %v1886_v30 = vld [vmem:[%s20415_s2 + $0x408] sm:$0xff]  ;;  %v746_v55 = vmul.f32 %v12166_v12, %v12166_v12 }
 0x142   :  { %v10581_v25 = vpack.c.bf16 %v1886_v30, %v1885_v19 }
 0x143   :  { %v805_v4 = vadd.f32 %v804_v57, %v742_v59  ;;  %v673_v58 = vadd.f32 %v12134_v53, %v672_v27  ;;  %v10423_v59 = vpack.c.bf16 %v1780_v26, %v1779_v29  ;;  %v745_v27 = vmul.f32 %v12148_v63, %v12148_v63  ;;  %v1781_v29 = vld [vmem:[%s20415_s2 + $0xc0] sm:$0xff] }
 0x144   :  { %10582 = vmatprep.subr.bf16.mxu0 %v10581_v25 }
 0x145   :  { %v674_v40 = vadd.f32 %v673_v58, %v12152_v1  ;;  %v806_v16 = vadd.f32 %v805_v4, %v743_v7  ;;  %10424 = vmatpush1.bf16.msra.mxu1 %v10423_v59  ;;  %v1782_v7 = vld [vmem:[%s20415_s2 + $0xc8] sm:$0xff]  ;;  %10584 = vmatpush3.bf16.msra.mxu0 %v10581_v25  ;;  %v1887_v4 = vld [vmem:[%s20415_s2 + $0x410] sm:$0xff]  ;;  %v1888_v58 = vld [vmem:[%s20415_s2 + $0x418] sm:$0xff]  ;;  %v747_v59 = vmul.f32 %v12162_v10, %v12162_v10 }
 0x146   :  { %10425 = vmatprep.subr.bf16.mxu1 %v20714_v33  ;;  %v10585_v30 = vpack.c.bf16 %v1888_v58, %v1887_v4  ;;  %v748_v25 = vmul.f32 %v12180_v22, %v12180_v22 }
 0x147   :  { %v807_v57 = vadd.f32 %v806_v16, %v744_v9  ;;  %v675_v53 = vadd.f32 %v12148_v63, %v674_v40  ;;  %v10426_v9 = vpack.c.bf16 %v1782_v7, %v1781_v29  ;;  %v1783_v29 = vld [vmem:[%s20415_s2 + $0xd0] sm:$0xff] }
 0x148   :  { %10586 = vmatprep.subr.bf16.mxu0 %v10585_v30 }
 0x149   :  { %v676_v26 = vadd.f32 %v675_v53, %v12166_v12  ;;  %v808_v19 = vadd.f32 %v807_v57, %v745_v27  ;;  %10427 = vmatpush1.bf16.msra.mxu1 %v10426_v9  ;;  %v1784_v53 = vld [vmem:[%s20415_s2 + $0xd8] sm:$0xff]  ;;  %10588 = vmatpush3.bf16.msra.mxu0 %v10585_v30  ;;  %v1890_v27 = vld [vmem:[%s20415_s2 + $0x428] sm:$0xff]  ;;  %v749_v9 = vmul.f32 %v12176_v20, %v12176_v20 }
 0x14a   :  { %10428 = vmatprep.subr.bf16.mxu1 %v20714_v33  ;;  %v10429_v57 = vpack.c.bf16 %v1784_v53, %v1783_v29  ;;  %v750_v30 = vmul.f32 %v12194_v32, %v12194_v32  ;;  %v1785_v29 = vld [vmem:[%s20415_s2 + $0xe0] sm:$0xff] }
 0x14b   :  { %v809_v40 = vadd.f32 %v808_v19, %v746_v55  ;;  %v677_v16 = vadd.f32 %v12162_v10, %v676_v26  ;;  %v1889_v55 = vld [vmem:[%s20415_s2 + $0x420] sm:$0xff] }
 0x14c   :  { %v10589_v58 = vpack.c.bf16 %v1890_v27, %v1889_v55 }
 0x14d   :  { %v678_v7 = vadd.f32 %v677_v16, %v12180_v22  ;;  %v810_v4 = vadd.f32 %v809_v40, %v747_v59  ;;  %10430 = vmatpush1.bf16.msra.mxu1 %v10429_v57  ;;  %v1786_v59 = vld [vmem:[%s20415_s2 + $0xe8] sm:$0xff]  ;;  %v1891_v40 = vld [vmem:[%s20415_s2 + $0x430] sm:$0xff]  ;;  %v1892_v16 = vld [vmem:[%s20415_s2 + $0x438] sm:$0xff]  ;;  %v751_v57 = vmul.f32 %v12190_v3, %v12190_v3 }
 0x14e   :  { %10590 = vmatprep.subr.bf16.mxu0 %v10589_v58  ;;  %10431 = vmatprep.subr.bf16.mxu1 %v20714_v33  ;;  %v10593_v27 = vpack.c.bf16 %v1892_v16, %v1891_v40 }
 0x14f   :  { %v811_v26 = vadd.f32 %v810_v4, %v748_v25  ;;  %v679_v19 = vadd.f32 %v12176_v20, %v678_v7  ;;  %10592 = vmatpush3.bf16.msra.mxu0 %v10589_v58  ;;  %v10432_v25 = vpack.c.bf16 %v1786_v59, %v1785_v29  ;;  %v752_v58 = vmul.f32 %v12208_v50, %v12208_v50  ;;  %v1787_v29 = vld [vmem:[%s20415_s2 + $0xf0] sm:$0xff] }
 0x150   :  { %10594 = vmatprep.subr.bf16.mxu0 %v10593_v27 }
 0x151   :  { %v680_v53 = vadd.f32 %v679_v19, %v12194_v32  ;;  %v812_v55 = vadd.f32 %v811_v26, %v749_v9  ;;  %10433 = vmatpush1.bf16.msra.mxu1 %v10432_v25  ;;  %v1788_v9 = vld [vmem:[%s20415_s2 + $0xf8] sm:$0xff]  ;;  %v1893_v26 = vld [vmem:[%s20415_s2 + $0x440] sm:$0xff]  ;;  %v1894_v19 = vld [vmem:[%s20415_s2 + $0x448] sm:$0xff]  ;;  %v753_v25 = vmul.f32 %v12204_v48, %v12204_v48 }
 0x152   :  { %10434 = vmatprep.subr.bf16.mxu1 %v20714_v33  ;;  %v10597_v16 = vpack.c.bf16 %v1894_v19, %v1893_v26  ;;  %v11697_v26 = vld [vmem:[#allocation2] sm:$0xff]  ;;  %v755_v19 = vmul.f32 %v12218_v2, %v12218_v2 }
 0x153   :  { %v813_v7 = vadd.f32 %v812_v55, %v750_v30  ;;  %v681_v4 = vadd.f32 %v12190_v3, %v680_v53  ;;  %10596 = vmatpush3.bf16.msra.mxu0 %v10593_v27  ;;  %v10435_v30 = vpack.c.bf16 %v1788_v9, %v1787_v29  ;;  %v754_v27 = vmul.f32 %v12222_v5, %v12222_v5 }
 0x154   :  { %10598 = vmatprep.subr.bf16.mxu0 %v10597_v16 }
 0x155   :  { %v682_v59 = vadd.f32 %v681_v4, %v12208_v50  ;;  %v814_v40 = vadd.f32 %v813_v7, %v751_v57  ;;  %10436 = vmatpush1.bf16.msra.mxu1 %v10435_v30  ;;  %v1895_v4 = vld [vmem:[%s20415_s2 + $0x450] sm:$0xff]  ;;  %v1896_v57 = vld [vmem:[%s20415_s2 + $0x458] sm:$0xff]  ;;  %v1180_v7 = vld [vmem:[#allocation2 + $0x7] sm:$0xff] }
 0x156   :  { %10437 = vmatprep.subr.bf16.mxu1 %v20714_v33  ;;  %v10601_v9 = vpack.c.bf16 %v1896_v57, %v1895_v4  ;;  %v757_v57 = vmul.f32 %v12232_v17, %v12232_v17 }
 0x157   :  { %v815_v53 = vadd.f32 %v814_v40, %v752_v58  ;;  %v683_v55 = vadd.f32 %v12204_v48, %v682_v59  ;;  %10600 = vmatpush3.bf16.msra.mxu0 %v10597_v16  ;;  %v756_v40 = vmul.f32 %v12236_v23, %v12236_v23  ;;  %v1897_v16 = vld [vmem:[%s20415_s2 + $0x460] sm:$0xff] }
 0x158   :  { %1966 = vmatmul.mubr.f32.vlgmr.msra.gmra.mrb[32].mxu1 %v1180_v7  ;;  %10602 = vmatprep.subr.bf16.mxu0 %v10601_v9  ;;  %v1789_v7 = vld [vmem:[%s20415_s2 + $0x100] sm:$0xff] }
 0x159   :  { %v684_v58 = vadd.f32 %v683_v55, %v12222_v5  ;;  %v816_v29 = vadd.f32 %v815_v53, %v753_v25  ;;  %1970 = vmatprep.mubr.f32.mxu1 %v11697_v26  ;;  %v1898_v25 = vld [vmem:[%s20415_s2 + $0x468] sm:$0xff] }
 0x15a   :  { %v1181_v53 = vld [vmem:[#allocation2 + $0xf] sm:$0xff] }
 0x15b   :  { %v817_v30 = vadd.f32 %v816_v29, %v754_v27  ;;  %v685_v59 = vadd.f32 %v12218_v2, %v684_v58  ;;  %10604 = vmatpush3.bf16.msra.mxu0 %v10601_v9  ;;  %v10605_v27 = vpack.c.bf16 %v1898_v25, %v1897_v16  ;;  %v1790_v58 = vld [vmem:[%s20415_s2 + $0x108] sm:$0xff]  ;;  %v1899_v29 = vld [vmem:[%s20415_s2 + $0x470] sm:$0xff]  ;;  %v1792_v25 = vld [vmem:[%s20415_s2 + $0x118] sm:$0xff] }
 0x15c   :  { %1971 = vmatmul.mubr.f32.gmra.mrb[34].mxu1 %v1181_v53  ;;  %v1791_v16 = vld [vmem:[%s20415_s2 + $0x110] sm:$0xff] }
 0x15d   :  { %v686_v55 = vadd.f32 %v685_v59, %v12236_v23  ;;  %v818_v4 = vadd.f32 %v817_v30, %v755_v19  ;;  %v758_v19 = vmul.f32 %v12250_v41, %v12250_v41  ;;  %v10438_v30 = vpack.c.bf16 %v1790_v58, %v1789_v7  ;;  %10606 = vmatprep.subr.bf16.mxu0 %v10605_v27  ;;  %v1900_v59 = vld [vmem:[%s20415_s2 + $0x478] sm:$0xff] }
 0x15e   :  { %v759_v7 = vmul.f32 %v12246_v37, %v12246_v37  ;;  %v760_v23 = vmul.f32 %v12270_v14, %v12270_v14 }
 0x15f   :  { %v819_v9 = vadd.f32 %v818_v4, %v756_v40  ;;  %v687_v26 = vadd.f32 %v12232_v17, %v686_v55  ;;  %10608 = vmatpush3.bf16.msra.mxu0 %v10605_v27  ;;  %v10609_v40 = vpack.c.bf16 %v1900_v59, %v1899_v29  ;;  %10439 = vmatpush1.bf16.msra.mxu1 %v10438_v30 }
 0x160   :  { %v10441_v4 = vpack.c.bf16 %v1792_v25, %v1791_v16  ;;  %10440 = vmatprep.subr.bf16.mxu1 %v20714_v33  ;;  %v763_v16 = vmul.f32 %v12280_v52, %v12280_v52 }
 0x161   :  { %v688_v53 = vadd.f32 %v687_v26, %v12250_v41  ;;  %v820_v55 = vadd.f32 %v819_v9, %v757_v57  ;;  %10610 = vmatprep.subr.bf16.mxu0 %v10609_v40  ;;  %v761_v57 = vmul.f32 %v12260_v6, %v12260_v6 }
 0x163   :  { %v821_v58 = vadd.f32 %v820_v55, %v758_v19  ;;  %v689_v17 = vadd.f32 %v12246_v37, %v688_v53  ;;  %10612 = vmatpush3.bf16.msra.mxu0 %v10609_v40  ;;  %10442 = vmatpush1.bf16.msra.mxu1 %v10441_v4  ;;  %v762_v19 = vmul.f32 %v12291_v62, %v12291_v62  ;;  %v1794_v53 = vld [vmem:[%s20415_s2 + $0x128] sm:$0xff] }
 0x164   :  { %10443 = vmatprep.subr.bf16.mxu1 %v20714_v33  ;;  %v764_v40 = vmul.f32 %v12312_v56, %v12312_v56 }
 0x165   :  { %v690_v27 = vadd.f32 %v689_v17, %v12270_v14  ;;  %v822_v29 = vadd.f32 %v821_v58, %v759_v7  ;;  %v765_v58 = vmul.f32 %v12301_v13, %v12301_v13 }
 0x167   :  { %v823_v9 = vadd.f32 %v822_v29, %v760_v23  ;;  %v691_v26 = vadd.f32 %v12260_v6, %v690_v27  ;;  %v1793_v23 = vld [vmem:[%s20415_s2 + $0x120] sm:$0xff] }
 0x168   :  { %v10444_v7 = vpack.c.bf16 %v1794_v53, %v1793_v23 }
 0x169   :  { %v692_v30 = vadd.f32 %v691_v26, %v12291_v62  ;;  %v824_v59 = vadd.f32 %v823_v9, %v761_v57  ;;  %v766_v57 = vmul.f32 %v12333_v47, %v12333_v47 }
 0x16a   :  { %10445 = vmatpush1.bf16.msra.mxu1 %v10444_v7 }
 0x16b   :  { %v825_v17 = vadd.f32 %v824_v59, %v762_v19  ;;  %v693_v25 = vadd.f32 %v12280_v52, %v692_v30  ;;  %10446 = vmatprep.subr.bf16.mxu1 %v20714_v33  ;;  %v767_v19 = vmul.f32 %v12322_v15, %v12322_v15 }
 0x16d   :  { %v694_v55 = vadd.f32 %v693_v25, %v12312_v56  ;;  %v826_v4 = vadd.f32 %v825_v17, %v763_v16  ;;  %v768_v16 = vmul.f32 %v12354_v24, %v12354_v24 }
 0x16f   :  { %v827_v27 = vadd.f32 %v826_v4, %v764_v40  ;;  %v695_v29 = vadd.f32 %v12301_v13, %v694_v55  ;;  %v769_v40 = vmul.f32 %v12343_v60, %v12343_v60 }
 0x171   :  { %v696_v9 = vadd.f32 %v695_v29, %v12333_v47  ;;  %v828_v26 = vadd.f32 %v827_v27, %v765_v58  ;;  %v1795_v27 = vld [vmem:[%s20415_s2 + $0x130] sm:$0xff]  ;;  %v1796_v29 = vld [vmem:[%s20415_s2 + $0x138] sm:$0xff] }
 0x173   :  { %v829_v30 = vadd.f32 %v828_v26, %v766_v57  ;;  %v697_v59 = vadd.f32 %v12322_v15, %v696_v9  ;;  %v10447_v26 = vpack.c.bf16 %v1796_v29, %v1795_v27  ;;  %v851_v27 = vlaneseq }
 0x175   :  { %v698_v17 = vadd.f32 %v697_v59, %v12354_v24  ;;  %v830_v25 = vadd.f32 %v829_v30, %v767_v19  ;;  %10448 = vmatpush1.bf16.msra.mxu1 %v10447_v26  ;;  %v12598_v29 = vshrl.u32 %v851_v27, 7  ;;  %v20725_v27 = vld [vmem:[#allocation7_spill] sm:$0xff] }
 0x176   :  { %10449 = vmatprep.subr.bf16.mxu1 %v20714_v33 }
 0x177   :  { %v699_v23 = vadd.f32 %v12343_v60, %v698_v17  ;;  %v831_v53 = vadd.f32 %v830_v25, %v768_v16  ;;  %20721 = vst [vmem:[#allocation24_spill] sm:$0xff] %v12598_v29 }
 0x179   :  { %v700_v55 = vrot.slane %v699_v23, 4  ;;  %v832_v4 = vadd.f32 %v831_v53, %v769_v40 }
 0x17b   :  { %v701_v7 = vadd.f32 %v700_v55, %v699_v23  ;;  %v833_v58 = vrot.slane %v832_v4, 4 }
 0x17d   :  { %v702_v57 = vrot.slane %v701_v7, 2  ;;  %v834_v9 = vadd.f32 %v833_v58, %v832_v4  ;;  %v1797_v4 = vld [vmem:[%s20415_s2 + $0x140] sm:$0xff] }
 0x17f   :  { %v703_v19 = vadd.f32 %v702_v57, %v701_v7  ;;  %v835_v30 = vrot.slane %v834_v9, 2  ;;  %v1798_v7 = vld [vmem:[%s20415_s2 + $0x148] sm:$0xff]  ;;  %v20445_v57 = vsub.s32 0, %v12598_v29 }
 0x180   :  { %v10450_v58 = vpack.c.bf16 %v1798_v7, %v1797_v4  ;;  %v20723_v4 = vld [vmem:[#allocation5_spill] sm:$0xff] }
 0x181   :  { %v704_v59 = vrot.slane %v703_v19, 1  ;;  %v836_v16 = vadd.f32 %v835_v30, %v834_v9 }
 0x182   :  { %10451 = vmatpush1.bf16.msra.mxu1 %v10450_v58  ;;  %v20724_v58 = vld [vmem:[#allocation9_spill] sm:$0xff] }
 0x183   :  { %v705_v17 = vadd.f32 %v704_v59, %v703_v19  ;;  %v837_v25 = vrot.slane %v836_v16, 1  ;;  %10452 = vmatprep.subr.bf16.mxu1 %v20714_v33  ;;  %v20736_v33 = vld [vmem:[#allocation21_spill] sm:$0xff] }
 0x185   :  { %v838_v40 = vadd.f32 %v837_v25, %v836_v16  ;;  %v839_v23 = vmul.f32 0.001953125, %v705_v17 }
 0x187   :  { %v840_v53 = vmul.f32 0.001953125, %v838_v40  ;;  %v841_v55 = vmul.f32 %v839_v23, %v839_v23 }
 0x189   :  { %v842_v60 = vsub.f32 %v840_v53, %v841_v55  ;;  %v20722_v55 = vld [vmem:[#allocation6_spill] sm:$0xff] }
 0x18b   :  { %v843_v15 = vadd.f32 1e-05, %v842_v60  ;;  %v26_v60 = vld [vmem:[%s20416_s6] sm:$0xff] }
 0x18d   :  { %11687 = vrsqrt.f32 %v843_v15  ;;  %v20444_v15 = vsub.s32 1, %v12598_v29 }
 0x197   :  { %v11688_v9 = vpop.eup %11687 }
 0x198   :  { %v845_v26 = vmul.f32 %v11688_v9, %v26_v60 }
 0x19a   :  { %v846_v19 = vmul.f32 %v845_v26, %v839_v23  ;;  %v12606_v30 = vrot.slane %v845_v26, %v20445_v57  ;;  %v20727_v26 = vld [vmem:[#allocation11_spill] sm:$0xff] }
 0x19c   :  { %v848_v59 = vrot.slane %v846_v19, 7  ;;  %v917_v16 = vmul.f32 %v12606_v30, %v12354_v24  ;;  %v12613_v17 = vmul.f32 %v12606_v30, %v12110_v38  ;;  %v12617_v25 = vmul.f32 %v12104_v35, %v12606_v30 }
 0x19d   :  { %v12621_v40 = vmul.f32 %v12606_v30, %v12122_v45  ;;  %v12625_v23 = vmul.f32 %v12118_v43, %v12606_v30  ;;  %v12629_v53 = vmul.f32 %v12606_v30, %v12136_v54  ;;  %v12633_v38 = vmul.f32 %v12131_v51, %v12606_v30 }
 0x19e   :  { %v850_v24 = vsub.f32 %v26_v60, %v848_v59  ;;  %v12637_v35 = vmul.f32 %v12606_v30, %v12150_v0  ;;  %v12641_v45 = vmul.f32 %v12145_v61, %v12606_v30  ;;  %v12645_v43 = vmul.f32 %v12606_v30, %v12164_v11  ;;  %v20728_v59 = vld [vmem:[#allocation14_spill] sm:$0xff] }
 0x19f   :  { %v12649_v54 = vmul.f32 %v12159_v8, %v12606_v30  ;;  %v12653_v51 = vmul.f32 %v12606_v30, %v12178_v21  ;;  %v12657_v0 = vmul.f32 %v12173_v18, %v12606_v30  ;;  %v12661_v61 = vmul.f32 %v12606_v30, %v12192_v31 }
 0x1a0   :  { %v12665_v11 = vrot.slane %v850_v24, %v20444_v15  ;;  %v12669_v8 = vmul.f32 %v12187_v28, %v12606_v30  ;;  %v12673_v21 = vmul.f32 %v12606_v30, %v12206_v49  ;;  %v12677_v18 = vmul.f32 %v12201_v42, %v12606_v30  ;;  %v20726_v42 = vld [vmem:[#allocation12_spill] sm:$0xff]  ;;  %v20733_v15 = vld [vmem:[#allocation18_spill] sm:$0xff] }
 0x1a1   :  { %v12681_v31 = vmul.f32 %v12606_v30, %v20722_v55  ;;  %v12685_v7 = vmul.f32 %v20723_v4, %v12606_v30  ;;  %v12689_v28 = vmul.f32 %v12606_v30, %v20724_v58  ;;  %v12693_v49 = vmul.f32 %v20725_v27, %v12606_v30  ;;  %v20729_v55 = vld [vmem:[#allocation13_spill] sm:$0xff]  ;;  %v20730_v58 = vld [vmem:[#allocation16_spill] sm:$0xff] }
 0x1a2   :  { %v985_v60 = vadd.f32 %v12665_v11, %v917_v16  ;;  %v12698_v9 = vmul.f32 %v12606_v30, %v20726_v42  ;;  %v12702_v19 = vmul.f32 %v20727_v26, %v12606_v30  ;;  %v12706_v24 = vmul.f32 %v12606_v30, %v20728_v59  ;;  %v20732_v16 = vld [vmem:[#allocation15_spill] sm:$0xff]  ;;  %v20735_v59 = vld [vmem:[#allocation17_spill] sm:$0xff] }
 0x1a3   :  { %v12710_v4 = vmul.f32 %v20729_v55, %v12606_v30  ;;  %v12714_v27 = vmul.f32 %v12606_v30, %v20730_v58  ;;  %v12718_v42 = vmul.f32 %v20732_v16, %v12606_v30  ;;  %v12722_v26 = vmul.f32 %v12606_v30, %v20733_v15  ;;  %v20738_v58 = vld [vmem:[#allocation19_spill] sm:$0xff]  ;;  %v20740_v15 = vld [vmem:[#allocation22_spill] sm:$0xff] }
 0x1a4   :  { %v1049_v57 = vmul.f32 0.1, %v985_v60  ;;  %v12726_v29 = vmul.f32 %v20735_v59, %v12606_v30  ;;  %v12730_v55 = vmul.f32 %v12606_v30, %v20736_v33  ;;  %v12738_v16 = vmul.f32 %v12606_v30, %v12352_v34 }
 0x1a5   :  { %20731 = vst [vmem:[#allocation6_spill] sm:$0xff] %v12714_v27  ;;  %20734 = vst [vmem:[#allocation5_spill] sm:$0xff] %v12722_v26  ;;  %v12734_v27 = vmul.f32 %v20738_v58, %v12606_v30  ;;  %v12742_v26 = vmul.f32 %v20740_v15, %v12606_v30  ;;  %v12746_v59 = vmul.f32 %v12606_v30, %v12112_v39  ;;  %v20743_v39 = vld [vmem:[#allocation3_spill] sm:$0xff] }
 0x1a6   :  { %20737 = vst [vmem:[#allocation9_spill] sm:$0xff] %v12730_v55  ;;  %20739 = vst [vmem:[#allocation7_spill] sm:$0xff] %v12738_v16  ;;  %v12750_v33 = vmul.f32 %v12106_v36, %v12606_v30  ;;  %v1113_v55 = vmax.f32 %v985_v60, %v1049_v57  ;;  %v12754_v58 = vmul.f32 %v12606_v30, %v12124_v46  ;;  %v20742_v16 = vld [vmem:[#allocation4_spill] sm:$0xff] }
 0x1a7   :  { %20741 = vst [vmem:[#allocation12_spill] sm:$0xff] %v12746_v59  ;;  %v12758_v34 = vmul.f32 %v12120_v44, %v12606_v30  ;;  %v12762_v15 = vmul.f32 %v12606_v30, %v20742_v16  ;;  %v12766_v59 = vmul.f32 %v20743_v39, %v12606_v30  ;;  %v12770_v36 = vmul.f32 %v12606_v30, %v12152_v1  ;;  %v20745_v16 = vld [vmem:[#allocation8_spill] sm:$0xff] }
 0x1a8   :  { %v12774_v46 = vmul.f32 %v12148_v63, %v12606_v30  ;;  %v12778_v44 = vmul.f32 %v12606_v30, %v12166_v12  ;;  %1178 = vst [vmem:[#allocation2 + $0x448] sm:$0xff] %v1113_v55  ;;  %v12782_v57 = vmul.f32 %v12162_v10, %v12606_v30  ;;  %v12786_v60 = vmul.f32 %v12606_v30, %v12180_v22  ;;  %v20744_v55 = vld [vmem:[#allocation10_spill] sm:$0xff] }
 0x1a9   :  { %v12790_v1 = vmul.f32 %v12176_v20, %v12606_v30  ;;  %v12794_v63 = vmul.f32 %v12606_v30, %v12194_v32  ;;  %v12798_v12 = vmul.f32 %v12190_v3, %v12606_v30  ;;  %v12802_v10 = vmul.f32 %v12606_v30, %v12208_v50 }
 0x1aa   :  { %v12806_v22 = vmul.f32 %v12204_v48, %v12606_v30  ;;  %v12810_v20 = vmul.f32 %v12606_v30, %v12222_v5  ;;  %v12814_v32 = vmul.f32 %v12218_v2, %v12606_v30  ;;  %v12818_v3 = vmul.f32 %v12606_v30, %v20744_v55 }
 0x1ab   :  { %v12822_v50 = vmul.f32 %v20745_v16, %v12606_v30  ;;  %v12826_v48 = vmul.f32 %v12606_v30, %v12250_v41  ;;  %v12830_v5 = vmul.f32 %v12246_v37, %v12606_v30  ;;  %v12834_v2 = vmul.f32 %v12606_v30, %v12270_v14  ;;  %v20747_v16 = vld [vmem:[#allocation20_spill] sm:$0xff] }
 0x1ac   :  { %v12838_v39 = vmul.f32 %v12260_v6, %v12606_v30  ;;  %v12842_v55 = vmul.f32 %v12606_v30, %v12291_v62  ;;  %v12846_v41 = vmul.f32 %v12280_v52, %v12606_v30  ;;  %v12850_v37 = vmul.f32 %v12606_v30, %v12312_v56 }
 0x1ad   :  { %v12854_v14 = vmul.f32 %v12301_v13, %v12606_v30  ;;  %v12858_v6 = vmul.f32 %v12606_v30, %v12333_v47  ;;  %v12862_v62 = vmul.f32 %v20747_v16, %v12606_v30  ;;  %v12870_v56 = vadd.f32 %v12665_v11, %v12613_v17 }
 0x1ae   :  { %20746 = vst [vmem:[#allocation11_spill] sm:$0xff] %v12842_v55  ;;  %v20748_v55 = vld [vmem:[#allocation23_spill] sm:$0xff]  ;;  %v12874_v13 = vadd.f32 %v12665_v11, %v12617_v25  ;;  %v12878_v47 = vadd.f32 %v12665_v11, %v12621_v40  ;;  %v12882_v16 = vadd.f32 %v12665_v11, %v12625_v23  ;;  %v12890_v17 = vadd.f32 %v12665_v11, %v12633_v38 }
 0x1af   :  { %v12866_v52 = vmul.f32 %v20748_v55, %v12606_v30  ;;  %v12886_v30 = vadd.f32 %v12665_v11, %v12629_v53  ;;  %v12894_v25 = vadd.f32 %v12665_v11, %v12637_v35  ;;  %v12898_v40 = vadd.f32 %v12665_v11, %v12641_v45  ;;  %v20755_v55 = vld [vmem:[#allocation6_spill] sm:$0xff] }
 0x1b0   :  { %v12902_v23 = vadd.f32 %v12665_v11, %v12645_v43  ;;  %v12906_v53 = vadd.f32 %v12665_v11, %v12649_v54  ;;  %v12910_v38 = vadd.f32 %v12665_v11, %v12653_v51  ;;  %v12914_v35 = vadd.f32 %v12665_v11, %v12657_v0 }
 0x1b1   :  { %v12918_v45 = vadd.f32 %v12665_v11, %v12661_v61  ;;  %v12922_v43 = vadd.f32 %v12665_v11, %v12669_v8  ;;  %v12926_v54 = vadd.f32 %v12665_v11, %v12673_v21  ;;  %v12930_v51 = vadd.f32 %v12665_v11, %v12677_v18 }
 0x1b2   :  { %v12934_v0 = vadd.f32 %v12665_v11, %v12681_v31  ;;  %v12938_v61 = vadd.f32 %v12665_v11, %v12685_v7  ;;  %v12942_v8 = vadd.f32 %v12665_v11, %v12689_v28  ;;  %v12946_v21 = vadd.f32 %v12665_v11, %v12693_v49 }
 0x1b3   :  { %v12950_v18 = vadd.f32 %v12665_v11, %v12698_v9  ;;  %v12954_v31 = vadd.f32 %v12665_v11, %v12702_v19  ;;  %v12958_v7 = vadd.f32 %v12665_v11, %v12706_v24  ;;  %v12962_v28 = vadd.f32 %v12665_v11, %v12710_v4 }
 0x1b4   :  { %20749 = vst [vmem:[#allocation14_spill] sm:$0xff] %v12934_v0  ;;  %20750 = vst [vmem:[#allocation13_spill] sm:$0xff] %v12938_v61  ;;  %v12966_v49 = vadd.f32 %v12665_v11, %v20755_v55  ;;  %v12970_v9 = vadd.f32 %v12665_v11, %v12718_v42  ;;  %v12978_v24 = vadd.f32 %v12665_v11, %v12726_v29 }
 0x1b5   :  { %20751 = vst [vmem:[#allocation16_spill] sm:$0xff] %v12946_v21  ;;  %20752 = vst [vmem:[#allocation15_spill] sm:$0xff] %v12950_v18  ;;  %v20757_v18 = vld [vmem:[#allocation5_spill] sm:$0xff]  ;;  %v12986_v55 = vadd.f32 %v12665_v11, %v12734_v27  ;;  %v13006_v27 = vadd.f32 %v12665_v11, %v12754_v58  ;;  %v13026_v58 = vadd.f32 %v12665_v11, %v12774_v46 }
 0x1b6   :  { %20753 = vst [vmem:[#allocation18_spill] sm:$0xff] %v12958_v7  ;;  %20754 = vst [vmem:[#allocation17_spill] sm:$0xff] %v12962_v28  ;;  %v12974_v19 = vadd.f32 %v12665_v11, %v20757_v18  ;;  %v20759_v7 = vld [vmem:[#allocation9_spill] sm:$0xff]  ;;  %v12994_v18 = vadd.f32 %v12665_v11, %v12742_v26  ;;  %v13014_v26 = vadd.f32 %v12665_v11, %v12762_v15 }
 0x1b7   :  { %20756 = vst [vmem:[#allocation21_spill] sm:$0xff] %v12966_v49  ;;  %v12982_v4 = vadd.f32 %v12665_v11, %v20759_v7  ;;  %20760 = vst [vmem:[#allocation22_spill] sm:$0xff] %v12986_v55  ;;  %v20761_v49 = vld [vmem:[#allocation7_spill] sm:$0xff]  ;;  %v13002_v7 = vadd.f32 %v12665_v11, %v12750_v33  ;;  %v13022_v33 = vadd.f32 %v12665_v11, %v12770_v36 }
 0x1b8   :  { %20758 = vst [vmem:[#allocation19_spill] sm:$0xff] %v12974_v19  ;;  %v12990_v42 = vadd.f32 %v12665_v11, %v20761_v49  ;;  %v20762_v19 = vld [vmem:[#allocation12_spill] sm:$0xff]  ;;  %v13010_v49 = vadd.f32 %v12665_v11, %v12758_v34  ;;  %v13030_v34 = vadd.f32 %v12665_v11, %v12778_v44  ;;  %v13034_v15 = vadd.f32 %v12665_v11, %v12782_v57 }
 0x1b9   :  { %v12998_v29 = vadd.f32 %v12665_v11, %v20762_v19  ;;  %v13018_v19 = vadd.f32 %v12665_v11, %v12766_v59  ;;  %20765 = vst [vmem:[#allocation10_spill] sm:$0xff] %v13022_v33  ;;  %v13038_v59 = vadd.f32 %v12665_v11, %v12786_v60  ;;  %v13042_v36 = vadd.f32 %v12665_v11, %v12790_v1 }
 0x1ba   :  { %20764 = vst [vmem:[#allocation3_spill] sm:$0xff] %v13010_v49  ;;  %20766 = vst [vmem:[#allocation8_spill] sm:$0xff] %v13034_v15  ;;  %v13046_v46 = vadd.f32 %v12665_v11, %v12794_v63  ;;  %v13050_v44 = vadd.f32 %v12665_v11, %v12798_v12  ;;  %v13054_v57 = vadd.f32 %v12665_v11, %v12802_v10 }
 0x1bb   :  { %20763 = vst [vmem:[#allocation4_spill] sm:$0xff] %v12998_v29  ;;  %v13058_v60 = vadd.f32 %v12665_v11, %v12806_v22  ;;  %v13062_v1 = vadd.f32 %v12665_v11, %v12810_v20  ;;  %v13066_v63 = vadd.f32 %v12665_v11, %v12814_v32  ;;  %v13070_v12 = vadd.f32 %v12665_v11, %v12818_v3 }
 0x1bc   :  { %20767 = vst [vmem:[#allocation20_spill] sm:$0xff] %v13046_v46  ;;  %20768 = vst [vmem:[#allocation23_spill] sm:$0xff] %v13050_v44  ;;  %v13074_v10 = vadd.f32 %v12665_v11, %v12822_v50  ;;  %v13078_v22 = vadd.f32 %v12665_v11, %v12826_v48  ;;  %v13082_v20 = vadd.f32 %v12665_v11, %v12830_v5  ;;  %v1799_v5 = vld [vmem:[%s20415_s2 + $0x150] sm:$0xff] }
 0x1bd   :  { %20769 = vst [vmem:[#allocation6_spill] sm:$0xff] %v13054_v57  ;;  %20770 = vst [vmem:[#allocation5_spill] sm:$0xff] %v13058_v60  ;;  %v13086_v32 = vadd.f32 %v12665_v11, %v12834_v2  ;;  %v13090_v3 = vadd.f32 %v12665_v11, %v12838_v39  ;;  %v13098_v48 = vadd.f32 %v12665_v11, %v12846_v41  ;;  %v1800_v2 = vld [vmem:[%s20415_s2 + $0x158] sm:$0xff] }
 0x1be   :  { %20771 = vst [vmem:[#allocation9_spill] sm:$0xff] %v13062_v1  ;;  %20772 = vst [vmem:[#allocation7_spill] sm:$0xff] %v13066_v63  ;;  %v13108_v39 = vadd.f32 %v12665_v11, %v12850_v37  ;;  %v13116_v41 = vadd.f32 %v12665_v11, %v12858_v6  ;;  %v988_v37 = vmul.f32 0.1, %v12874_v13  ;;  %v992_v6 = vmul.f32 0.1, %v12890_v17 }
 0x1bf   :  { %20773 = vst [vmem:[#allocation12_spill] sm:$0xff] %v13070_v12  ;;  %20774 = vst [vmem:[#allocation25_spill] sm:$0xff] %v13074_v10  ;;  %v20779_v12 = vld [vmem:[#allocation11_spill] sm:$0xff]  ;;  %v13145_v10 = vmul.f32 0.1, %v12926_v54 }
 0x1c0   :  { %20775 = vst [vmem:[#allocation26_spill] sm:$0xff] %v13078_v22  ;;  %20776 = vst [vmem:[#allocation27_spill] sm:$0xff] %v13082_v20  ;;  %v13094_v50 = vadd.f32 %v12665_v11, %v20779_v12  ;;  %v13112_v12 = vadd.f32 %v12665_v11, %v12854_v14  ;;  %v990_v14 = vmul.f32 0.1, %v12882_v16  ;;  %v998_v20 = vmul.f32 0.1, %v12914_v35 }
 0x1c1   :  { %20777 = vst [vmem:[#allocation28_spill] sm:$0xff] %v13086_v32  ;;  %20778 = vst [vmem:[#allocation29_spill] sm:$0xff] %v13090_v3  ;;  %v987_v3 = vmul.f32 0.1, %v12870_v56  ;;  %v997_v32 = vmul.f32 0.1, %v12910_v38  ;;  %v13140_v22 = vmax.f32 %v12874_v13, %v988_v37 }
 0x1c2   :  { %20780 = vst [vmem:[#allocation11_spill] sm:$0xff] %v13094_v50  ;;  %20781 = vst [vmem:[#allocation30_spill] sm:$0xff] %v13098_v48  ;;  %v13120_v48 = vadd.f32 %v12665_v11, %v12862_v62  ;;  %v13124_v50 = vadd.f32 %v12665_v11, %v12866_v52  ;;  %v993_v62 = vmul.f32 0.1, %v12894_v25  ;;  %v995_v11 = vmul.f32 0.1, %v12902_v23 }
 0x1c3   :  { %20782 = vst [vmem:[#allocation31_spill] sm:$0xff] %v13108_v39  ;;  %20783 = vst [vmem:[#allocation32_spill] sm:$0xff] %v13112_v12  ;;  %v989_v39 = vmul.f32 0.1, %v12878_v47  ;;  %v991_v12 = vmul.f32 0.1, %v12886_v30  ;;  %v1051_v52 = vmax.f32 %v12870_v56, %v987_v3  ;;  %v13161_v37 = vmax.f32 %v12882_v16, %v990_v14 }
 0x1c4   :  { %20784 = vst [vmem:[#allocation33_spill] sm:$0xff] %v13116_v41  ;;  %20785 = vst [vmem:[#allocation34_spill] sm:$0xff] %v13120_v48  ;;  %v10453_v41 = vpack.c.bf16 %v1800_v2, %v1799_v5  ;;  %v994_v48 = vmul.f32 0.1, %v12898_v40  ;;  %v999_v5 = vmul.f32 0.1, %v12918_v45 }
 0x1c5   :  { %20786 = vst [vmem:[#allocation35_spill] sm:$0xff] %v13124_v50  ;;  %v996_v50 = vmul.f32 0.1, %v12906_v53  ;;  %20787 = vst [vmem:[#allocation36_spill] sm:$0xff] %v13140_v22  ;;  %v1000_v2 = vmul.f32 0.1, %v12922_v43  ;;  %v13148_v63 = vmax.f32 %v12878_v47, %v989_v39  ;;  %1975 = vmatprep.mubr.f32.mxu1 %v1051_v52 }
 0x1c6   :  { %10454 = vmatpush1.bf16.msra.mxu1 %v10453_v41  ;;  %1116 = vst [vmem:[#allocation2 + $0x28] sm:$0xff] %v1051_v52  ;;  %v20789_v56 = vmov 0.0|0.0   ;;  %v13152_v3 = vmul.f32 0.1, %v12930_v51  ;;  %v13155_v13 = vmul.f32 0.1, %v12934_v0  ;;  %v13174_v0 = vmax.f32 %v12886_v30, %v991_v12 }
 0x1c7   :  { %20788 = vst [vmem:[#allocation37_spill] sm:$0xff] %v13148_v63  ;;  %10455 = vmatprep.subr.bf16.mxu1 %v20789_v56  ;;  %v13158_v41 = vmul.f32 0.1, %v12938_v61  ;;  %20790 = vst [vmem:[#allocation38_spill] sm:$0xff] %v13161_v37  ;;  %v13165_v47 = vmul.f32 0.1, %v12942_v8 }
 0x1c8   :  { %1117 = vst [vmem:[#allocation2 + $0x30] sm:$0xff] %v13140_v22  ;;  %v13168_v39 = vmul.f32 0.1, %v12946_v21  ;;  %v20791_v52 = vld [vmem:[#allocation15_spill] sm:$0xff]  ;;  %20793 = vst [vmem:[#allocation40_spill] sm:$0xff] %v13174_v0  ;;  %v20794_v16 = vld [vmem:[#allocation18_spill] sm:$0xff]  ;;  %v13187_v21 = vmax.f32 %v12890_v17, %v992_v6 }
 0x1c9   :  { %v13171_v56 = vmul.f32 0.1, %v20791_v52  ;;  %1118 = vst [vmem:[#allocation2 + $0x48] sm:$0xff] %v13148_v63  ;;  %v13178_v61 = vmul.f32 0.1, %v12954_v31  ;;  %1119 = vst [vmem:[#allocation2 + $0x50] sm:$0xff] %v13161_v37  ;;  %v13213_v37 = vmax.f32 %v12898_v40, %v994_v48 }
 0x1ca   :  { %v13181_v14 = vmul.f32 0.1, %v20794_v16  ;;  %v13184_v22 = vmul.f32 0.1, %v12962_v28  ;;  %20795 = vst [vmem:[#allocation41_spill] sm:$0xff] %v13187_v21  ;;  %v20796_v52 = vld [vmem:[#allocation21_spill] sm:$0xff]  ;;  %v13200_v16 = vmax.f32 %v12894_v25, %v993_v62 }
 0x1cb   :  { %20792 = vst [vmem:[#allocation39_spill] sm:$0xff] %v13171_v56  ;;  %v13191_v56 = vmul.f32 0.1, %v20796_v52  ;;  %v13194_v30 = vmul.f32 0.1, %v12970_v9  ;;  %v20797_v12 = vld [vmem:[#allocation19_spill] sm:$0xff] }
 0x1cc   :  { %v13197_v63 = vmul.f32 0.1, %v20797_v12  ;;  %20798 = vst [vmem:[#allocation21_spill] sm:$0xff] %v13200_v16  ;;  %1120 = vst [vmem:[#allocation2 + $0x68] sm:$0xff] %v13174_v0  ;;  %v13204_v28 = vmul.f32 0.1, %v12978_v24  ;;  %v13226_v0 = vmax.f32 %v12902_v23, %v995_v11 }
 0x1cd   :  { %v13207_v17 = vmul.f32 0.1, %v12982_v4  ;;  %v13210_v6 = vmul.f32 0.1, %v12986_v55  ;;  %20799 = vst [vmem:[#allocation42_spill] sm:$0xff] %v13213_v37  ;;  %1121 = vst [vmem:[#allocation2 + $0x70] sm:$0xff] %v13187_v21  ;;  %v13239_v21 = vmax.f32 %v12906_v53, %v996_v50 }
 0x1ce   :  { %v13217_v12 = vmul.f32 0.1, %v12990_v42  ;;  %v13220_v25 = vmul.f32 0.1, %v12994_v18  ;;  %v13223_v62 = vmul.f32 0.1, %v12998_v29 }
 0x1cf   :  { %20800 = vst [vmem:[#allocation43_spill] sm:$0xff] %v13226_v0  ;;  %1122 = vst [vmem:[#allocation2 + $0x88] sm:$0xff] %v13200_v16  ;;  %v13230_v55 = vmul.f32 0.1, %v13002_v7  ;;  %v13233_v40 = vmul.f32 0.1, %v13006_v27  ;;  %v13252_v16 = vmax.f32 %v12910_v38, %v997_v32 }
 0x1d0   :  { %v13236_v48 = vmul.f32 0.1, %v13010_v49  ;;  %20801 = vst [vmem:[#allocation44_spill] sm:$0xff] %v13239_v21  ;;  %1123 = vst [vmem:[#allocation2 + $0x90] sm:$0xff] %v13213_v37  ;;  %v13243_v29 = vmul.f32 0.1, %v13014_v26  ;;  %v13265_v37 = vmax.f32 %v12914_v35, %v998_v20 }
 0x1d1   :  { %v13246_v23 = vmul.f32 0.1, %v13018_v19  ;;  %v13249_v11 = vmul.f32 0.1, %v13022_v33  ;;  %20802 = vst [vmem:[#allocation45_spill] sm:$0xff] %v13252_v16  ;;  %1124 = vst [vmem:[#allocation2 + $0xa8] sm:$0xff] %v13226_v0  ;;  %v13278_v0 = vmax.f32 %v12918_v45, %v999_v5 }
 0x1d2   :  { %v13256_v49 = vmul.f32 0.1, %v13026_v58  ;;  %v13259_v53 = vmul.f32 0.1, %v13030_v34  ;;  %v13262_v50 = vmul.f32 0.1, %v13034_v15 }
 0x1d3   :  { %20803 = vst [vmem:[#allocation46_spill] sm:$0xff] %v13265_v37  ;;  %1125 = vst [vmem:[#allocation2 + $0xb0] sm:$0xff] %v13239_v21  ;;  %v13269_v33 = vmul.f32 0.1, %v13038_v59  ;;  %v13272_v38 = vmul.f32 0.1, %v13042_v36  ;;  %v13291_v21 = vmax.f32 %v12922_v43, %v1000_v2 }
 0x1d4   :  { %v13275_v32 = vmul.f32 0.1, %v13046_v46  ;;  %20804 = vst [vmem:[#allocation47_spill] sm:$0xff] %v13278_v0  ;;  %1126 = vst [vmem:[#allocation2 + $0xc8] sm:$0xff] %v13252_v16  ;;  %v13282_v15 = vmul.f32 0.1, %v13050_v44 }
 0x1d5   :  { %v13285_v35 = vmul.f32 0.1, %v13054_v57  ;;  %v13288_v20 = vmul.f32 0.1, %v13058_v60  ;;  %20805 = vst [vmem:[#allocation48_spill] sm:$0xff] %v13291_v21  ;;  %1127 = vst [vmem:[#allocation2 + $0xd0] sm:$0xff] %v13265_v37  ;;  %v13305_v57 = vmax.f32 %v12926_v54, %v13145_v10 }
 0x1d6   :  { %v13295_v46 = vmul.f32 0.1, %v13062_v1  ;;  %v20807_v45 = vld [vmem:[#allocation7_spill] sm:$0xff]  ;;  %v20808_v16 = vld [vmem:[#allocation12_spill] sm:$0xff]  ;;  %1128 = vst [vmem:[#allocation2 + $0xe8] sm:$0xff] %v13278_v0  ;;  %v20810_v60 = vld [vmem:[#allocation25_spill] sm:$0xff] }
 0x1d7   :  { %v13298_v5 = vmul.f32 0.1, %v20807_v45  ;;  %v13301_v44 = vmul.f32 0.1, %v20808_v16  ;;  %20809 = vst [vmem:[#allocation50_spill] sm:$0xff] %v13305_v57  ;;  %v20812_v2 = vld [vmem:[#allocation26_spill] sm:$0xff]  ;;  %v13319_v45 = vmax.f32 %v12930_v51, %v13152_v3 }
 0x1d8   :  { %20806 = vst [vmem:[#allocation49_spill] sm:$0xff] %v13295_v46  ;;  %v13309_v43 = vmul.f32 0.1, %v20810_v60  ;;  %v13312_v37 = vmul.f32 0.1, %v20812_v2  ;;  %v20814_v1 = vld [vmem:[#allocation27_spill] sm:$0xff] }
 0x1d9   :  { %v13315_v46 = vmul.f32 0.1, %v20814_v1  ;;  %20815 = vst [vmem:[#allocation53_spill] sm:$0xff] %v13319_v45  ;;  %1129 = vst [vmem:[#allocation2 + $0xf0] sm:$0xff] %v13291_v21  ;;  %v20816_v16 = vld [vmem:[#allocation28_spill] sm:$0xff]  ;;  %v20818_v10 = vld [vmem:[#allocation29_spill] sm:$0xff] }
 0x1da   :  { %20811 = vst [vmem:[#allocation51_spill] sm:$0xff] %v13309_v43  ;;  %20813 = vst [vmem:[#allocation52_spill] sm:$0xff] %v13312_v37  ;;  %v13323_v54 = vmul.f32 0.1, %v20816_v16  ;;  %v13326_v0 = vmul.f32 0.1, %v20818_v10 }
 0x1db   :  { %v20820_v60 = vld [vmem:[#allocation11_spill] sm:$0xff]  ;;  %v20821_v2 = vld [vmem:[#allocation14_spill] sm:$0xff]  ;;  %1130 = vst [vmem:[#allocation2 + $0x108] sm:$0xff] %v13305_v57  ;;  %v20826_v16 = vld [vmem:[#allocation32_spill] sm:$0xff] }
 0x1dc   :  { %20817 = vst [vmem:[#allocation54_spill] sm:$0xff] %v13323_v54  ;;  %20819 = vst [vmem:[#allocation55_spill] sm:$0xff] %v13326_v0  ;;  %v13329_v43 = vmul.f32 0.1, %v20820_v60  ;;  %v13333_v37 = vmax.f32 %v20821_v2, %v13155_v13  ;;  %v20823_v1 = vld [vmem:[#allocation30_spill] sm:$0xff]  ;;  %v20825_v3 = vld [vmem:[#allocation31_spill] sm:$0xff] }
 0x1dd   :  { %v13337_v51 = vmul.f32 0.1, %v20823_v1  ;;  %v13340_v21 = vmul.f32 0.1, %v20825_v3  ;;  %v13343_v54 = vmul.f32 0.1, %v20826_v16  ;;  %v13361_v3 = vmax.f32 %v12942_v8, %v13165_v47 }
 0x1de   :  { %20822 = vst [vmem:[#allocation14_spill] sm:$0xff] %v13333_v37  ;;  %v20827_v10 = vld [vmem:[#allocation13_spill] sm:$0xff]  ;;  %1131 = vst [vmem:[#allocation2 + $0x110] sm:$0xff] %v13319_v45  ;;  %v20829_v2 = vld [vmem:[#allocation34_spill] sm:$0xff] }
 0x1df   :  { %20824 = vst [vmem:[#allocation56_spill] sm:$0xff] %v13337_v51  ;;  %v13347_v0 = vmax.f32 %v20827_v10, %v13158_v41  ;;  %v20828_v60 = vld [vmem:[#allocation33_spill] sm:$0xff]  ;;  %v13354_v57 = vmul.f32 0.1, %v20829_v2  ;;  %v20830_v1 = vld [vmem:[#allocation35_spill] sm:$0xff]  ;;  %1132 = vst [vmem:[#allocation2 + $0x128] sm:$0xff] %v13333_v37  ;;  %v13374_v2 = vmax.f32 %v12954_v31, %v13178_v61  ;;  %v13393_v61 = vmax.f32 %v12970_v9, %v13194_v30 }
 0x1e0   :  { %v13351_v13 = vmul.f32 0.1, %v20828_v60  ;;  %v13357_v51 = vmul.f32 0.1, %v20830_v1  ;;  %v20832_v41 = vld [vmem:[#allocation16_spill] sm:$0xff]  ;;  %v20833_v45 = vld [vmem:[#allocation39_spill] sm:$0xff]  ;;  %v1081_v9 = vmax.f32 %v12990_v42, %v13217_v12  ;;  %v13427_v42 = vmax.f32 %v13002_v7, %v13230_v55 }
 0x1e1   :  { %v13366_v10 = vmax.f32 %v20832_v41, %v13168_v39  ;;  %v20834_v16 = vld [vmem:[#allocation15_spill] sm:$0xff]  ;;  %v20835_v1 = vld [vmem:[#allocation18_spill] sm:$0xff]  ;;  %1133 = vst [vmem:[#allocation2 + $0x130] sm:$0xff] %v13347_v0  ;;  %v1693_v8 = vld [vmem:[#allocation2 + $0x49] sm:$0xff]  ;;  %v13443_v55 = vmax.f32 %v13014_v26, %v13243_v29  ;;  %v13447_v7 = vmax.f32 %v13018_v19, %v13246_v23  ;;  %v13461_v29 = vmax.f32 %v13026_v58, %v13256_v49 }
 0x1e2   :  { %20831 = vst [vmem:[#allocation13_spill] sm:$0xff] %v13357_v51  ;;  %v13370_v60 = vmax.f32 %v20834_v16, %v20833_v45  ;;  %v13378_v51 = vmax.f32 %v20835_v1, %v13181_v14  ;;  %v13381_v47 = vld [vmem:[#allocation2 + $0x27] sm:$0xff]  ;;  %v1694_v37 = vld [vmem:[#allocation2 + $0x51] sm:$0xff]  ;;  %v13389_v16 = vmax.f32 %v20796_v52, %v13191_v56  ;;  %1134 = vst [vmem:[#allocation2 + $0x148] sm:$0xff] %v13361_v3  ;;  %9877 = vmatprep.mubr.f32.mxu0 %v1693_v8 }
 0x1e3   :  { %v20836_v39 = vld [vmem:[#allocation17_spill] sm:$0xff]  ;;  %v20837_v31 = vld [vmem:[#allocation19_spill] sm:$0xff]  ;;  %v13402_v14 = vmax.f32 %v12978_v24, %v13204_v28  ;;  %v20838_v56 = vld [vmem:[#allocation22_spill] sm:$0xff]  ;;  %1135 = vst [vmem:[#allocation2 + $0x150] sm:$0xff] %v13366_v10  ;;  %1976 = vmatmul.mubr.f32.gmra.mrb[36].mxu1 %v13381_v47  ;;  %v1082_v28 = vmax.f32 %v12994_v18, %v13220_v25  ;;  %9878 = vmatmul.mubr.f32.vlgmr.msra.gmra.mrb[32].mxu0 %v1694_v37 }
 0x1e4   :  { %v13385_v41 = vmax.f32 %v20836_v39, %v13184_v22  ;;  %v13397_v1 = vmax.f32 %v20837_v31, %v13197_v63  ;;  %v13406_v22 = vmax.f32 %v12982_v4, %v13207_v17  ;;  %v13410_v52 = vmax.f32 %v20838_v56, %v13210_v6  ;;  %1136 = vst [vmem:[#allocation2 + $0x168] sm:$0xff] %v13370_v60  ;;  %v20839_v24 = vld [vmem:[#allocation4_spill] sm:$0xff]  ;;  %v20840_v18 = vld [vmem:[#allocation3_spill] sm:$0xff]  ;;  %v20847_v23 = vld [vmem:[#allocation5_spill] sm:$0xff] }
 0x1e5   :  { %1137 = vst [vmem:[#allocation2 + $0x170] sm:$0xff] %v13374_v2  ;;  %1138 = vst [vmem:[#allocation2 + $0x188] sm:$0xff] %v13378_v51  ;;  %v13423_v4 = vmax.f32 %v20839_v24, %v13223_v62  ;;  %v13431_v63 = vmax.f32 %v13006_v27, %v13233_v40  ;;  %v13439_v30 = vmax.f32 %v20840_v18, %v13236_v48  ;;  %v20841_v27 = vld [vmem:[#allocation10_spill] sm:$0xff]  ;;  %v20842_v37 = vld [vmem:[#allocation36_spill] sm:$0xff] }
 0x1e6   :  { %1139 = vst [vmem:[#allocation2 + $0x190] sm:$0xff] %v13385_v41  ;;  %1140 = vst [vmem:[#allocation2 + $0x1a8] sm:$0xff] %v13389_v16  ;;  %v13451_v12 = vmax.f32 %v20841_v27, %v13249_v11  ;;  %1980 = vmatprep.mubr.f32.mxu1 %v20842_v37  ;;  %v13457_v17 = vld [vmem:[#allocation2 + $0x69] sm:$0xff]  ;;  %v13465_v26 = vmax.f32 %v13030_v34, %v13259_v53  ;;  %v13473_v25 = vmax.f32 %v13038_v59, %v13269_v33  ;;  %v20845_v33 = vld [vmem:[#allocation23_spill] sm:$0xff] }
 0x1e7   :  { %1141 = vst [vmem:[#allocation2 + $0x1b0] sm:$0xff] %v13393_v61  ;;  %1142 = vst [vmem:[#allocation2 + $0x1c8] sm:$0xff] %v13397_v1  ;;  %v20843_v19 = vld [vmem:[#allocation8_spill] sm:$0xff]  ;;  %9880 = vmatprep.mubr.f32.mxu0 %v13457_v17  ;;  %v13483_v58 = vmax.f32 %v13042_v36, %v13272_v38  ;;  %v13491_v59 = vmax.f32 %v20845_v33, %v13282_v15  ;;  %v20846_v40 = vld [vmem:[#allocation6_spill] sm:$0xff]  ;;  %v13506_v15 = vmax.f32 %v20847_v23, %v13288_v20 }
 0x1e8   :  { %1143 = vst [vmem:[#allocation2 + $0x1d0] sm:$0xff] %v13402_v14  ;;  %1144 = vst [vmem:[#allocation2 + $0x1e8] sm:$0xff] %v13406_v22  ;;  %v13469_v6 = vmax.f32 %v20843_v19, %v13262_v50  ;;  %v13479_v49 = vld [vmem:[#allocation2 + $0x2f] sm:$0xff]  ;;  %v13495_v48 = vmax.f32 %v20846_v40, %v13285_v35  ;;  %v20850_v38 = vld [vmem:[#allocation7_spill] sm:$0xff] }
 0x1e9   :  { %1145 = vst [vmem:[#allocation2 + $0x1f0] sm:$0xff] %v13410_v52  ;;  %1146 = vst [vmem:[#allocation2 + $0x208] sm:$0xff] %v1081_v9  ;;  %v20844_v34 = vld [vmem:[#allocation20_spill] sm:$0xff]  ;;  %1981 = vmatmul.mubr.f32.gmra.mrb[38].mxu1 %v13479_v49  ;;  %v13502_v36 = vld [vmem:[#allocation2 + $0x71] sm:$0xff] }
 0x1ea   :  { %1147 = vst [vmem:[#allocation2 + $0x210] sm:$0xff] %v1082_v28  ;;  %1148 = vst [vmem:[#allocation2 + $0x268] sm:$0xff] %v13423_v4  ;;  %v13487_v62 = vmax.f32 %v20844_v34, %v13275_v32  ;;  %v20848_v11 = vld [vmem:[#allocation49_spill] sm:$0xff]  ;;  %v13514_v32 = vmax.f32 %v20850_v38, %v13298_v5  ;;  %v20851_v35 = vld [vmem:[#allocation12_spill] sm:$0xff]  ;;  %9881 = vmatmul.mubr.f32.gmra.mrb[34].mxu0 %v13502_v36 }
 0x1eb   :  { %1149 = vst [vmem:[#allocation2 + $0x270] sm:$0xff] %v13427_v42  ;;  %1150 = vst [vmem:[#allocation2 + $0x288] sm:$0xff] %v13431_v63  ;;  %v20849_v53 = vld [vmem:[#allocation9_spill] sm:$0xff]  ;;  %v1101_v45 = vmax.f32 %v20851_v35, %v13301_v44  ;;  %v20852_v20 = vld [vmem:[#allocation51_spill] sm:$0xff] }
 0x1ec   :  { %1151 = vst [vmem:[#allocation2 + $0x290] sm:$0xff] %v13439_v30  ;;  %1152 = vst [vmem:[#allocation2 + $0x2a8] sm:$0xff] %v13443_v55  ;;  %v13510_v50 = vmax.f32 %v20849_v53, %v20848_v11  ;;  %v20853_v8 = vld [vmem:[#allocation25_spill] sm:$0xff]  ;;  %v20854_v31 = vld [vmem:[#allocation52_spill] sm:$0xff] }
 0x1ed   :  { %1153 = vst [vmem:[#allocation2 + $0x2b0] sm:$0xff] %v13447_v7  ;;  %1154 = vst [vmem:[#allocation2 + $0x2c8] sm:$0xff] %v13451_v12  ;;  %v1102_v39 = vmax.f32 %v20853_v8, %v20852_v20  ;;  %v20855_v56 = vld [vmem:[#allocation26_spill] sm:$0xff]  ;;  %v20856_v9 = vld [vmem:[#allocation27_spill] sm:$0xff] }
 0x1ee   :  { %1155 = vst [vmem:[#allocation2 + $0x2d0] sm:$0xff] %v13461_v29  ;;  %1156 = vst [vmem:[#allocation2 + $0x2e8] sm:$0xff] %v13465_v26  ;;  %v1103_v5 = vmax.f32 %v20855_v56, %v20854_v31  ;;  %v1104_v28 = vmax.f32 %v20856_v9, %v13315_v46  ;;  %v20857_v44 = vld [vmem:[#allocation54_spill] sm:$0xff]  ;;  %v20858_v24 = vld [vmem:[#allocation28_spill] sm:$0xff] }
 0x1ef   :  { %1157 = vst [vmem:[#allocation2 + $0x2f0] sm:$0xff] %v13469_v6  ;;  %1158 = vst [vmem:[#allocation2 + $0x308] sm:$0xff] %v13473_v25  ;;  %v1105_v18 = vmax.f32 %v20858_v24, %v20857_v44  ;;  %v20859_v27 = vld [vmem:[#allocation37_spill] sm:$0xff]  ;;  %v1801_v19 = vld [vmem:[%s20415_s2 + $0x160] sm:$0xff] }
 0x1f0   :  { %1159 = vst [vmem:[#allocation2 + $0x310] sm:$0xff] %v13483_v58  ;;  %1160 = vst [vmem:[#allocation2 + $0x328] sm:$0xff] %v13487_v62  ;;  %1985 = vmatprep.mubr.f32.mxu1 %v20859_v27  ;;  %v13536_v37 = vld [vmem:[#allocation2 + $0x89] sm:$0xff]  ;;  %v20860_v34 = vld [vmem:[#allocation55_spill] sm:$0xff] }
 0x1f1   :  { %1161 = vst [vmem:[#allocation2 + $0x330] sm:$0xff] %v13491_v59  ;;  %1162 = vst [vmem:[#allocation2 + $0x348] sm:$0xff] %v13495_v48  ;;  %v1802_v46 = vld [vmem:[%s20415_s2 + $0x168] sm:$0xff]  ;;  %v20861_v33 = vld [vmem:[#allocation29_spill] sm:$0xff]  ;;  %9883 = vmatprep.mubr.f32.mxu0 %v13536_v37 }
 0x1f2   :  { %v1106_v40 = vmax.f32 %v20861_v33, %v20860_v34  ;;  %v20862_v23 = vld [vmem:[#allocation11_spill] sm:$0xff]  ;;  %v20863_v53 = vld [vmem:[#allocation56_spill] sm:$0xff]  ;;  %v20864_v38 = vld [vmem:[#allocation30_spill] sm:$0xff]  ;;  %1163 = vst [vmem:[#allocation2 + $0x350] sm:$0xff] %v13506_v15 }
 0x1f3   :  { %v1107_v11 = vmax.f32 %v20862_v23, %v13329_v43  ;;  %v1108_v35 = vmax.f32 %v20864_v38, %v20863_v53  ;;  %v20865_v20 = vld [vmem:[#allocation31_spill] sm:$0xff]  ;;  %1164 = vst [vmem:[#allocation2 + $0x368] sm:$0xff] %v13510_v50  ;;  %1165 = vst [vmem:[#allocation2 + $0x370] sm:$0xff] %v13514_v32  ;;  %v20866_v56 = vld [vmem:[#allocation32_spill] sm:$0xff]  ;;  %v20872_v23 = vmov 0.0|0.0  }
 0x1f4   :  { %v1109_v8 = vmax.f32 %v20865_v20, %v13340_v21  ;;  %1166 = vst [vmem:[#allocation2 + $0x388] sm:$0xff] %v1101_v45  ;;  %v13556_v31 = vld [vmem:[#allocation2 + $0x47] sm:$0xff]  ;;  %v1110_v43 = vmax.f32 %v20866_v56, %v13343_v54  ;;  %v20867_v9 = vld [vmem:[#allocation33_spill] sm:$0xff]  ;;  %v20868_v24 = vld [vmem:[#allocation34_spill] sm:$0xff] }
 0x1f5   :  { %v1111_v44 = vmax.f32 %v20867_v9, %v13351_v13  ;;  %v1112_v21 = vmax.f32 %v20868_v24, %v13354_v57  ;;  %v20869_v27 = vld [vmem:[#allocation13_spill] sm:$0xff]  ;;  %v20870_v34 = vld [vmem:[#allocation35_spill] sm:$0xff]  ;;  %1167 = vst [vmem:[#allocation2 + $0x390] sm:$0xff] %v1102_v39  ;;  %1168 = vst [vmem:[#allocation2 + $0x3a8] sm:$0xff] %v1103_v5  ;;  %1986 = vmatmul.mubr.f32.gmra.mrb[40].mxu1 %v13556_v31  ;;  %v10456_v5 = vpack.c.bf16 %v1802_v46, %v1801_v19 }
 0x1f6   :  { %v1114_v33 = vmax.f32 %v20870_v34, %v20869_v27  ;;  %1169 = vst [vmem:[#allocation2 + $0x3b0] sm:$0xff] %v1104_v28  ;;  %1170 = vst [vmem:[#allocation2 + $0x3c8] sm:$0xff] %v1105_v18  ;;  %v13567_v45 = vld [vmem:[#allocation2 + $0x91] sm:$0xff]  ;;  %v13577_v39 = vld [vmem:[#allocation2 + $0xa9] sm:$0xff] }
 0x1f7   :  { %v1803_v54 = vld [vmem:[%s20415_s2 + $0x170] sm:$0xff]  ;;  %v1804_v13 = vld [vmem:[%s20415_s2 + $0x178] sm:$0xff]  ;;  %1171 = vst [vmem:[#allocation2 + $0x3d0] sm:$0xff] %v1106_v40  ;;  %1172 = vst [vmem:[#allocation2 + $0x3e8] sm:$0xff] %v1107_v11  ;;  %9884 = vmatmul.mubr.f32.gmra.mrb[36].mxu0 %v13567_v45  ;;  %10457 = vmatpush1.bf16.msra.mxu1 %v10456_v5 }
 0x1f8   :  { %1173 = vst [vmem:[#allocation2 + $0x3f0] sm:$0xff] %v1108_v35  ;;  %1174 = vst [vmem:[#allocation2 + $0x408] sm:$0xff] %v1109_v8  ;;  %v20871_v57 = vld [vmem:[#allocation38_spill] sm:$0xff]  ;;  %9886 = vmatprep.mubr.f32.mxu0 %v13577_v39  ;;  %v13580_v28 = vld [vmem:[#allocation2 + $0x4f] sm:$0xff]  ;;  %v10459_v18 = vpack.c.bf16 %v1804_v13, %v1803_v54  ;;  %10458 = vmatprep.subr.bf16.mxu1 %v20872_v23 }
 0x1f9   :  { %1990 = vmatprep.mubr.f32.mxu1 %v20871_v57  ;;  %1175 = vst [vmem:[#allocation2 + $0x410] sm:$0xff] %v1110_v43  ;;  %1176 = vst [vmem:[#allocation2 + $0x428] sm:$0xff] %v1111_v44  ;;  %v1700_v40 = vld [vmem:[#allocation2 + $0xb1] sm:$0xff]  ;;  %v20873_v11 = vld [vmem:[#allocation40_spill] sm:$0xff] }
 0x1fa   :  { %1177 = vst [vmem:[#allocation2 + $0x430] sm:$0xff] %v1112_v21  ;;  %1179 = vst [vmem:[#allocation2 + $0x450] sm:$0xff] %v1114_v33  ;;  %1991 = vmatmul.mubr.f32.gmra.mrb[42].mxu1 %v13580_v28  ;;  %v1701_v53 = vld [vmem:[#allocation2 + $0xc9] sm:$0xff]  ;;  %v1702_v46 = vld [vmem:[#allocation2 + $0xd1] sm:$0xff] }
 0x1fb   :  { %9887 = vmatmul.mubr.f32.gmra.mrb[38].mxu0 %v1700_v40  ;;  %1995 = vmatprep.mubr.f32.mxu1 %v20873_v11  ;;  %v13585_v19 = vld [vmem:[#allocation2 + $0x67] sm:$0xff]  ;;  %v20874_v38 = vld [vmem:[#allocation41_spill] sm:$0xff]  ;;  %v20876_v24 = vld [vmem:[#allocation42_spill] sm:$0xff] }
 0x1fc   :  { %9889 = vmatprep.mubr.f32.mxu0 %v1701_v53  ;;  %10460 = vmatpush1.bf16.msra.mxu1 %v10459_v18  ;;  %v1703_v35 = vld [vmem:[#allocation2 + $0xe9] sm:$0xff]  ;;  %v1704_v8 = vld [vmem:[#allocation2 + $0xf1] sm:$0xff]  ;;  %v1805_v33 = vld [vmem:[%s20415_s2 + $0x180] sm:$0xff] }
 0x1fd   :  { %10461 = vmatprep.subr.bf16.mxu1 %v20872_v23  ;;  %v13590_v20 = vld [vmem:[#allocation2 + $0x6f] sm:$0xff]  ;;  %v13594_v9 = vld [vmem:[#allocation2 + $0x87] sm:$0xff]  ;;  %v1808_v40 = vld [vmem:[%s20415_s2 + $0x198] sm:$0xff] }
 0x1fe   :  { %1996 = vmatmul.mubr.f32.gmra.mrb[44].mxu1 %v13585_v19  ;;  %v20875_v56 = vld [vmem:[#allocation21_spill] sm:$0xff]  ;;  %v1806_v54 = vld [vmem:[%s20415_s2 + $0x188] sm:$0xff]  ;;  %v20877_v13 = vld [vmem:[#allocation43_spill] sm:$0xff] }
 0x1ff   :  { %9890 = vmatmul.mubr.f32.gmra.mrb[40].mxu0 %v1702_v46  ;;  %2000 = vmatprep.mubr.f32.mxu1 %v20874_v38  ;;  %v1705_v43 = vld [vmem:[#allocation2 + $0x109] sm:$0xff]  ;;  %v1706_v44 = vld [vmem:[#allocation2 + $0x111] sm:$0xff]  ;;  %v10462_v5 = vpack.c.bf16 %v1806_v54, %v1805_v33  ;;  %v1809_v38 = vld [vmem:[%s20415_s2 + $0x1a0] sm:$0xff] }
 0x200   :  { %9892 = vmatprep.mubr.f32.mxu0 %v1703_v35  ;;  %v1707_v21 = vld [vmem:[#allocation2 + $0x129] sm:$0xff]  ;;  %v1708_v34 = vld [vmem:[#allocation2 + $0x131] sm:$0xff] }
 0x201   :  { %v13598_v27 = vld [vmem:[#allocation2 + $0x8f] sm:$0xff]  ;;  %v13614_v11 = vld [vmem:[#allocation2 + $0xa7] sm:$0xff]  ;;  %10463 = vmatpush1.bf16.msra.mxu1 %v10462_v5  ;;  %v20880_v5 = vld [vmem:[#allocation46_spill] sm:$0xff] }
 0x202   :  { %2001 = vmatmul.mubr.f32.gmra.mrb[46].mxu1 %v13590_v20  ;;  %v1709_v57 = vld [vmem:[#allocation2 + $0x149] sm:$0xff]  ;;  %v1710_v46 = vld [vmem:[#allocation2 + $0x151] sm:$0xff]  ;;  %10464 = vmatprep.subr.bf16.mxu1 %v20872_v23 }
 0x203   :  { %9893 = vmatmul.mubr.f32.gmra.mrb[42].mxu0 %v1704_v8  ;;  %2005 = vmatprep.mubr.f32.mxu1 %v20875_v56  ;;  %v1807_v18 = vld [vmem:[%s20415_s2 + $0x190] sm:$0xff]  ;;  %v1810_v35 = vld [vmem:[%s20415_s2 + $0x1a8] sm:$0xff] }
 0x204   :  { %9895 = vmatprep.mubr.f32.mxu0 %v1705_v43  ;;  %v10465_v53 = vpack.c.bf16 %v1808_v40, %v1807_v18  ;;  %v20878_v8 = vld [vmem:[#allocation44_spill] sm:$0xff]  ;;  %v1714_v54 = vld [vmem:[#allocation2 + $0x191] sm:$0xff] }
 0x205   :  { %v1711_v56 = vld [vmem:[#allocation2 + $0x169] sm:$0xff] }
 0x206   :  { %2006 = vmatmul.mubr.f32.gmra.mrb[48].mxu1 %v13594_v9  ;;  %v13625_v43 = vld [vmem:[#allocation2 + $0xaf] sm:$0xff]  ;;  %v13630_v33 = vld [vmem:[#allocation2 + $0xc7] sm:$0xff] }
 0x207   :  { %9896 = vmatmul.mubr.f32.gmra.mrb[44].mxu0 %v1706_v44  ;;  %2010 = vmatprep.mubr.f32.mxu1 %v20876_v24  ;;  %v10468_v44 = vpack.c.bf16 %v1810_v35, %v1809_v38  ;;  %v1712_v24 = vld [vmem:[#allocation2 + $0x171] sm:$0xff]  ;;  %v1715_v18 = vld [vmem:[#allocation2 + $0x1a9] sm:$0xff]  ;;  %v20881_v38 = vld [vmem:[#allocation47_spill] sm:$0xff] }
 0x208   :  { %9898 = vmatprep.mubr.f32.mxu0 %v1707_v21  ;;  %10466 = vmatpush1.bf16.msra.mxu1 %v10465_v53  ;;  %v20879_v21 = vld [vmem:[#allocation45_spill] sm:$0xff] }
 0x209   :  { %10467 = vmatprep.subr.bf16.mxu1 %v20872_v23  ;;  %v13641_v53 = vld [vmem:[#allocation2 + $0xcf] sm:$0xff] }
 0x20a   :  { %2011 = vmatmul.mubr.f32.gmra.mrb[50].mxu1 %v13598_v27  ;;  %v1717_v35 = vld [vmem:[#allocation2 + $0x1c9] sm:$0xff] }
 0x20b   :  { %9899 = vmatmul.mubr.f32.gmra.mrb[46].mxu0 %v1708_v34  ;;  %2015 = vmatprep.mubr.f32.mxu1 %v20877_v13  ;;  %v1713_v34 = vld [vmem:[#allocation2 + $0x189] sm:$0xff] }
 0x20c   :  { %9901 = vmatprep.mubr.f32.mxu0 %v1709_v57  ;;  %10469 = vmatpush1.bf16.msra.mxu1 %v10468_v44  ;;  %v1811_v13 = vld [vmem:[%s20415_s2 + $0x1b0] sm:$0xff]  ;;  %v1812_v57 = vld [vmem:[%s20415_s2 + $0x1b8] sm:$0xff]  ;;  %v20882_v44 = vld [vmem:[#allocation48_spill] sm:$0xff] }
 0x20d   :  { %10470 = vmatprep.subr.bf16.mxu1 %v20872_v23  ;;  %v10471_v40 = vpack.c.bf16 %v1812_v57, %v1811_v13  ;;  %v1721_v13 = vld [vmem:[#allocation2 + $0x209] sm:$0xff] }
 0x20e   :  { %2016 = vmatmul.mubr.f32.gmra.mrb[52].mxu1 %v13614_v11  ;;  %v13654_v57 = vld [vmem:[#allocation2 + $0x107] sm:$0xff] }
 0x20f   :  { %9902 = vmatmul.mubr.f32.gmra.mrb[48].mxu0 %v1710_v46  ;;  %2020 = vmatprep.mubr.f32.mxu1 %v20878_v8  ;;  %v1716_v46 = vld [vmem:[#allocation2 + $0x1b1] sm:$0xff]  ;;  %v13646_v8 = vld [vmem:[#allocation2 + $0xe7] sm:$0xff] }
 0x210   :  { %9904 = vmatprep.mubr.f32.mxu0 %v1711_v56  ;;  %10472 = vmatpush1.bf16.msra.mxu1 %v10471_v40  ;;  %v1718_v56 = vld [vmem:[#allocation2 + $0x1d1] sm:$0xff]  ;;  %v1813_v40 = vld [vmem:[%s20415_s2 + $0x1c0] sm:$0xff] }
 0x211   :  { %10473 = vmatprep.subr.bf16.mxu1 %v20872_v23 }
 0x212   :  { %2021 = vmatmul.mubr.f32.gmra.mrb[54].mxu1 %v13625_v43 }
 0x213   :  { %9905 = vmatmul.mubr.f32.gmra.mrb[50].mxu0 %v1712_v24  ;;  %2025 = vmatprep.mubr.f32.mxu1 %v20879_v21  ;;  %v1719_v24 = vld [vmem:[#allocation2 + $0x1e9] sm:$0xff] }
 0x214   :  { %9907 = vmatprep.mubr.f32.mxu0 %v1713_v34  ;;  %v13650_v21 = vld [vmem:[#allocation2 + $0xef] sm:$0xff] }
 0x215   :  { %v1720_v34 = vld [vmem:[#allocation2 + $0x1f1] sm:$0xff] }
 0x216   :  { %2026 = vmatmul.mubr.f32.gmra.mrb[56].mxu1 %v13630_v33 }
 0x217   :  { %9908 = vmatmul.mubr.f32.gmra.mrb[52].mxu0 %v1714_v54  ;;  %2030 = vmatprep.mubr.f32.mxu1 %v20880_v5  ;;  %v20883_v54 = vld [vmem:[#allocation50_spill] sm:$0xff]  ;;  %v1723_v5 = vld [vmem:[#allocation2 + $0x229] sm:$0xff] }
 0x218   :  { %9910 = vmatprep.mubr.f32.mxu0 %v1715_v18  ;;  %v1722_v18 = vld [vmem:[#allocation2 + $0x211] sm:$0xff] }
 0x21a   :  { %2031 = vmatmul.mubr.f32.gmra.mrb[58].mxu1 %v13641_v53 }
 0x21b   :  { %9911 = vmatmul.mubr.f32.gmra.mrb[54].mxu0 %v1716_v46  ;;  %2035 = vmatprep.mubr.f32.mxu1 %v20881_v38  ;;  %v1814_v46 = vld [vmem:[%s20415_s2 + $0x1c8] sm:$0xff]  ;;  %v20884_v38 = vld [vmem:[#allocation53_spill] sm:$0xff] }
 0x21c   :  { %9913 = vmatprep.mubr.f32.mxu0 %v1717_v35  ;;  %v10474_v35 = vpack.c.bf16 %v1814_v46, %v1813_v40  ;;  %v1728_v40 = vld [vmem:[#allocation2 + $0x2b1] sm:$0xff]  ;;  %v1729_v46 = vld [vmem:[#allocation2 + $0x2c9] sm:$0xff] }
 0x21e   :  { %2036 = vmatmul.mubr.f32.gmra.mrb[60].mxu1 %v13646_v8 }
 0x21f   :  { %9914 = vmatmul.mubr.f32.gmra.mrb[56].mxu0 %v1718_v56  ;;  %2040 = vmatprep.mubr.f32.mxu1 %v20882_v44  ;;  %v1724_v56 = vld [vmem:[#allocation2 + $0x231] sm:$0xff] }
 0x220   :  { %9916 = vmatprep.mubr.f32.mxu0 %v1719_v24  ;;  %v13664_v44 = vld [vmem:[#allocation2 + $0x10f] sm:$0xff]  ;;  %10475 = vmatpush1.bf16.msra.mxu1 %v10474_v35  ;;  %v20885_v24 = vld [vmem:[#allocation14_spill] sm:$0xff] }
 0x221   :  { %10476 = vmatprep.subr.bf16.mxu1 %v20872_v23  ;;  %v1730_v35 = vld [vmem:[#allocation2 + $0x2d1] sm:$0xff] }
 0x222   :  { %2041 = vmatmul.mubr.f32.gmra.mrb[62].mxu1 %v13650_v21 }
 0x223   :  { %9917 = vmatmul.mubr.f32.gmra.mrb[58].mxu0 %v1720_v34  ;;  %2045 = vmatprep.mubr.f32.mxu1 %v20883_v54  ;;  %v1725_v34 = vld [vmem:[#allocation2 + $0x289] sm:$0xff] }
 0x224   :  { %9919 = vmatprep.mubr.f32.mxu0 %v1721_v13  ;;  %v13669_v54 = vld [vmem:[#allocation2 + $0x127] sm:$0xff]  ;;  %v1726_v13 = vld [vmem:[#allocation2 + $0x291] sm:$0xff] }
 0x226   :  { %2046 = vmatmul.mubr.f32.gmra.mrb[64].mxu1 %v13654_v57 }
 0x227   :  { %9920 = vmatmul.mubr.f32.gmra.mrb[60].mxu0 %v1722_v18  ;;  %2050 = vmatprep.mubr.f32.mxu1 %v20884_v38  ;;  %v13673_v18 = vld [vmem:[#allocation2 + $0x12f] sm:$0xff]  ;;  %v13677_v38 = vld [vmem:[#allocation2 + $0x147] sm:$0xff] }
 0x228   :  { %9922 = vmatprep.mubr.f32.mxu0 %v1723_v5  ;;  %v1727_v5 = vld [vmem:[#allocation2 + $0x2a9] sm:$0xff] }
 0x22a   :  { %2051 = vmatmul.mubr.f32.gmra.mrb[66].mxu1 %v13664_v44 }
 0x22b   :  { %9923 = vmatmul.mubr.f32.gmra.mrb[62].mxu0 %v1724_v56  ;;  %2055 = vmatprep.mubr.f32.mxu1 %v20885_v24  ;;  %v1816_v56 = vld [vmem:[%s20415_s2 + $0x1d8] sm:$0xff]  ;;  %v1731_v24 = vld [vmem:[#allocation2 + $0x2e9] sm:$0xff] }
 0x22c   :  { %9925 = vmatprep.mubr.f32.mxu0 %v1725_v34  ;;  %v13687_v34 = vld [vmem:[#allocation2 + $0x14f] sm:$0xff] }
 0x22e   :  { %2056 = vmatmul.mubr.f32.gmra.mrb[68].mxu1 %v13669_v54 }
 0x22f   :  { %9926 = vmatmul.mubr.f32.gmra.mrb[64].mxu0 %v1726_v13  ;;  %2060 = vmatprep.mubr.f32.mxu1 %v13347_v0  ;;  %v1815_v0 = vld [vmem:[%s20415_s2 + $0x1d0] sm:$0xff] }
 0x230   :  { %9928 = vmatprep.mubr.f32.mxu0 %v1727_v5  ;;  %v1732_v13 = vld [vmem:[#allocation2 + $0x2f1] sm:$0xff]  ;;  %v1733_v5 = vld [vmem:[#allocation2 + $0x309] sm:$0xff] }
 0x232   :  { %2061 = vmatmul.mubr.f32.gmra.mrb[70].mxu1 %v13673_v18 }
 0x233   :  { %9929 = vmatmul.mubr.f32.gmra.mrb[66].mxu0 %v1728_v40  ;;  %2065 = vmatprep.mubr.f32.mxu1 %v13361_v3  ;;  %v10477_v3 = vpack.c.bf16 %v1816_v56, %v1815_v0  ;;  %v13692_v40 = vld [vmem:[#allocation2 + $0x167] sm:$0xff]  ;;  %v1736_v0 = vld [vmem:[#allocation2 + $0x331] sm:$0xff] }
 0x234   :  { %9931 = vmatprep.mubr.f32.mxu0 %v1729_v46  ;;  %v1735_v46 = vld [vmem:[#allocation2 + $0x329] sm:$0xff] }
 0x235   :  { %10478 = vmatpush1.bf16.msra.mxu1 %v10477_v3  ;;  %v13700_v56 = vld [vmem:[#allocation2 + $0x187] sm:$0xff] }
 0x236   :  { %2066 = vmatmul.mubr.f32.gmra.mrb[72].mxu1 %v13677_v38  ;;  %10479 = vmatprep.subr.bf16.mxu1 %v20872_v23  ;;  %v1818_v3 = vld [vmem:[%s20415_s2 + $0x1e8] sm:$0xff] }
 0x237   :  { %9932 = vmatmul.mubr.f32.gmra.mrb[68].mxu0 %v1730_v35  ;;  %2070 = vmatprep.mubr.f32.mxu1 %v13366_v10  ;;  %v1734_v10 = vld [vmem:[#allocation2 + $0x311] sm:$0xff] }
 0x238   :  { %9934 = vmatprep.mubr.f32.mxu0 %v1731_v24  ;;  %v13696_v35 = vld [vmem:[#allocation2 + $0x16f] sm:$0xff] }
 0x239   :  { %v1738_v24 = vld [vmem:[#allocation2 + $0x351] sm:$0xff] }
 0x23a   :  { %2071 = vmatmul.mubr.f32.gmra.mrb[74].mxu1 %v13687_v34 }
 0x23b   :  { %9935 = vmatmul.mubr.f32.gmra.mrb[70].mxu0 %v1732_v13  ;;  %2075 = vmatprep.mubr.f32.mxu1 %v13370_v60  ;;  %v1737_v60 = vld [vmem:[#allocation2 + $0x349] sm:$0xff] }
 0x23c   :  { %9937 = vmatprep.mubr.f32.mxu0 %v1733_v5  ;;  %v1739_v13 = vld [vmem:[#allocation2 + $0x369] sm:$0xff] }
 0x23d   :  { %v13710_v5 = vld [vmem:[#allocation2 + $0x18f] sm:$0xff] }
 0x23e   :  { %2076 = vmatmul.mubr.f32.gmra.mrb[76].mxu1 %v13692_v40 }
 0x23f   :  { %9938 = vmatmul.mubr.f32.gmra.mrb[72].mxu0 %v1734_v10  ;;  %2080 = vmatprep.mubr.f32.mxu1 %v13374_v2  ;;  %v1817_v2 = vld [vmem:[%s20415_s2 + $0x1e0] sm:$0xff]  ;;  %v1740_v10 = vld [vmem:[#allocation2 + $0x371] sm:$0xff] }
 0x240   :  { %9940 = vmatprep.mubr.f32.mxu0 %v1735_v46  ;;  %v1741_v46 = vld [vmem:[#allocation2 + $0x389] sm:$0xff] }
 0x242   :  { %2081 = vmatmul.mubr.f32.gmra.mrb[78].mxu1 %v13696_v35 }
 0x243   :  { %9941 = vmatmul.mubr.f32.gmra.mrb[74].mxu0 %v1736_v0  ;;  %2085 = vmatprep.mubr.f32.mxu1 %v13378_v51  ;;  %v10480_v51 = vpack.c.bf16 %v1818_v3, %v1817_v2  ;;  %v13715_v0 = vld [vmem:[#allocation2 + $0x1a7] sm:$0xff]  ;;  %v1744_v2 = vld [vmem:[#allocation2 + $0x3b1] sm:$0xff] }
 0x244   :  { %9943 = vmatprep.mubr.f32.mxu0 %v1737_v60  ;;  %v1743_v60 = vld [vmem:[#allocation2 + $0x3a9] sm:$0xff] }
 0x245   :  { %10481 = vmatpush1.bf16.msra.mxu1 %v10480_v51  ;;  %v13723_v3 = vld [vmem:[#allocation2 + $0x1c7] sm:$0xff]  ;;  %v1820_v51 = vld [vmem:[%s20415_s2 + $0x1f8] sm:$0xff] }
 0x246   :  { %2086 = vmatmul.mubr.f32.gmra.mrb[80].mxu1 %v13700_v56  ;;  %10482 = vmatprep.subr.bf16.mxu1 %v20872_v23 }
 0x247   :  { %9944 = vmatmul.mubr.f32.gmra.mrb[76].mxu0 %v1738_v24  ;;  %2090 = vmatprep.mubr.f32.mxu1 %v13385_v41  ;;  %v1742_v41 = vld [vmem:[#allocation2 + $0x391] sm:$0xff] }
 0x248   :  { %9946 = vmatprep.mubr.f32.mxu0 %v1739_v13  ;;  %v13719_v24 = vld [vmem:[#allocation2 + $0x1af] sm:$0xff] }
 0x249   :  { %v1746_v13 = vld [vmem:[#allocation2 + $0x3d1] sm:$0xff] }
 0x24a   :  { %2091 = vmatmul.mubr.f32.gmra.mrb[82].mxu1 %v13710_v5 }
 0x24b   :  { %9947 = vmatmul.mubr.f32.gmra.mrb[78].mxu0 %v1740_v10  ;;  %2095 = vmatprep.mubr.f32.mxu1 %v13389_v16  ;;  %v1745_v16 = vld [vmem:[#allocation2 + $0x3c9] sm:$0xff] }
 0x24c   :  { %9949 = vmatprep.mubr.f32.mxu0 %v1741_v46  ;;  %v1747_v10 = vld [vmem:[#allocation2 + $0x3e9] sm:$0xff] }
 0x24d   :  { %v13733_v46 = vld [vmem:[#allocation2 + $0x1cf] sm:$0xff] }
 0x24e   :  { %2096 = vmatmul.mubr.f32.gmra.mrb[84].mxu1 %v13715_v0 }
 0x24f   :  { %9950 = vmatmul.mubr.f32.gmra.mrb[80].mxu0 %v1742_v41  ;;  %2100 = vmatprep.mubr.f32.mxu1 %v13393_v61  ;;  %v1819_v61 = vld [vmem:[%s20415_s2 + $0x1f0] sm:$0xff] }
 0x250   :  { %9952 = vmatprep.mubr.f32.mxu0 %v1743_v60  ;;  %v1748_v41 = vld [vmem:[#allocation2 + $0x3f1] sm:$0xff]  ;;  %v1749_v60 = vld [vmem:[#allocation2 + $0x409] sm:$0xff] }
 0x252   :  { %2101 = vmatmul.mubr.f32.gmra.mrb[86].mxu1 %v13719_v24 }
 0x253   :  { %9953 = vmatmul.mubr.f32.gmra.mrb[82].mxu0 %v1744_v2  ;;  %2105 = vmatprep.mubr.f32.mxu1 %v13397_v1  ;;  %v10483_v1 = vpack.c.bf16 %v1820_v51, %v1819_v61  ;;  %v13738_v2 = vld [vmem:[#allocation2 + $0x1e7] sm:$0xff]  ;;  %v1752_v61 = vld [vmem:[#allocation2 + $0x431] sm:$0xff] }
 0x254   :  { %9955 = vmatprep.mubr.f32.mxu0 %v1745_v16  ;;  %v1751_v16 = vld [vmem:[#allocation2 + $0x429] sm:$0xff] }
 0x255   :  { %10484 = vmatpush1.bf16.msra.mxu1 %v10483_v1  ;;  %v1753_v51 = vld [vmem:[#allocation2 + $0x449] sm:$0xff]  ;;  %v1754_v1 = vld [vmem:[#allocation2 + $0x451] sm:$0xff] }
 0x256   :  { %2106 = vmatmul.mubr.f32.gmra.mrb[88].mxu1 %v13723_v3  ;;  %10485 = vmatprep.subr.bf16.mxu1 %v20872_v23 }
 0x257   :  { %9956 = vmatmul.mubr.f32.gmra.mrb[84].mxu0 %v1746_v13  ;;  %2110 = vmatprep.mubr.f32.mxu1 %v13402_v14  ;;  %v1750_v14 = vld [vmem:[#allocation2 + $0x411] sm:$0xff] }
 0x258   :  { %9958 = vmatprep.mubr.f32.mxu0 %v1747_v10  ;;  %v13742_v13 = vld [vmem:[#allocation2 + $0x1ef] sm:$0xff]  ;;  %v1212_v10 = vld [vmem:[#allocation2 + $0x247] sm:$0xff] }
 0x25a   :  { %2111 = vmatmul.mubr.f32.gmra.mrb[90].mxu1 %v13733_v46 }
 0x25b   :  { %9959 = vmatmul.mubr.f32.gmra.mrb[86].mxu0 %v1748_v41  ;;  %2115 = vmatprep.mubr.f32.mxu1 %v13406_v22  ;;  %v11698_v22 = vld [vmem:[#allocation2] sm:$0xff]  ;;  %v1213_v41 = vld [vmem:[#allocation2 + $0x24f] sm:$0xff] }
 0x25c   :  { %9961 = vmatprep.mubr.f32.mxu0 %v1749_v60  ;;  %v13750_v60 = vld [vmem:[#allocation2 + $0x26f] sm:$0xff] }
 0x25e   :  { %2116 = vmatmul.mubr.f32.gmra.mrb[92].mxu1 %v13738_v2 }
 0x25f   :  { %9962 = vmatmul.mubr.f32.gmra.mrb[88].mxu0 %v1750_v14  ;;  %2120 = vmatprep.mubr.f32.mxu1 %v13410_v52  ;;  %v13746_v52 = vld [vmem:[#allocation2 + $0x267] sm:$0xff] }
 0x260   :  { %9964 = vmatprep.mubr.f32.mxu0 %v1751_v16  ;;  %v13754_v14 = vld [vmem:[#allocation2 + $0x287] sm:$0xff]  ;;  %v13758_v16 = vld [vmem:[#allocation2 + $0x28f] sm:$0xff] }
 0x262   :  { %2121 = vmatmul.mubr.f32.gmra.mrb[94].mxu1 %v13742_v13 }
 0x263   :  { %9965 = vmatmul.mubr.f32.gmra.mrb[90].mxu0 %v1752_v61  ;;  %2125 = vmatprep.mubr.f32.mxu1 %v11698_v22  ;;  %v13817_v61 = vld [vmem:[#allocation2 + $0x387] sm:$0xff] }
 0x264   :  { %9967 = vmatprep.mubr.f32.mxu0 %v1753_v51  ;;  %20886 = vst [vmem:[#allocation16_spill] sm:$0xff] %v13817_v61  ;;  %v13820_v51 = vld [vmem:[#allocation2 + $0x38f] sm:$0xff] }
 0x265   :  { %20887 = vst [vmem:[#allocation39_spill] sm:$0xff] %v13820_v51 }
 0x266   :  { %2126 = vmatmul.mubr.f32.gmra.mrb[96].mxu1 %v1212_v10  ;;  %v13826_v10 = vld [vmem:[#allocation2 + $0x3af] sm:$0xff] }
 0x267   :  { %9968 = vmatmul.mubr.f32.gmra.mrb[92].mxu0 %v1754_v1  ;;  %2130 = vmatprep.mubr.f32.mxu1 %v11698_v22  ;;  %v13823_v22 = vld [vmem:[#allocation2 + $0x3a7] sm:$0xff]  ;;  %20889 = vst [vmem:[#allocation18_spill] sm:$0xff] %v13826_v10 }
 0x268   :  { %20888 = vst [vmem:[#allocation15_spill] sm:$0xff] %v13823_v22 }
 0x26a   :  { %2131 = vmatmul.mubr.f32.gmra.mrb[98].mxu1 %v1213_v41  ;;  %v1300_v41 = vld [vmem:[#allocation2 + $0x3c8] sm:$0xff] }
 0x26b   :  { %2135 = vmatprep.mubr.f32.mxu1 %v13423_v4  ;;  %v13762_v4 = vld [vmem:[#allocation2 + $0x2a7] sm:$0xff] }
 0x26e   :  { %2136 = vmatmul.mubr.f32.gmra.mrb[100].mxu1 %v13746_v52 }
 0x26f   :  { %2140 = vmatprep.mubr.f32.mxu1 %v13427_v42  ;;  %v13766_v42 = vld [vmem:[#allocation2 + $0x2af] sm:$0xff] }
 0x272   :  { %2141 = vmatmul.mubr.f32.gmra.mrb[102].mxu1 %v13750_v60 }
 0x273   :  { %2145 = vmatprep.mubr.f32.mxu1 %v13431_v63  ;;  %v13770_v63 = vld [vmem:[#allocation2 + $0x2c7] sm:$0xff] }
 0x276   :  { %2146 = vmatmul.mubr.f32.gmra.mrb[104].mxu1 %v13754_v14 }
 0x277   :  { %2150 = vmatprep.mubr.f32.mxu1 %v13439_v30  ;;  %v13774_v30 = vld [vmem:[#allocation2 + $0x2cf] sm:$0xff] }
 0x27a   :  { %2151 = vmatmul.mubr.f32.gmra.mrb[106].mxu1 %v13758_v16 }
 0x27b   :  { %2155 = vmatprep.mubr.f32.mxu1 %v13443_v55  ;;  %v13778_v55 = vld [vmem:[#allocation2 + $0x2e7] sm:$0xff] }
 0x27e   :  { %2156 = vmatmul.mubr.f32.gmra.mrb[108].mxu1 %v13762_v4 }
 0x27f   :  { %2160 = vmatprep.mubr.f32.mxu1 %v13447_v7  ;;  %v13782_v7 = vld [vmem:[#allocation2 + $0x2ef] sm:$0xff] }
 0x282   :  { %2161 = vmatmul.mubr.f32.gmra.mrb[110].mxu1 %v13766_v42 }
 0x283   :  { %2165 = vmatprep.mubr.f32.mxu1 %v13451_v12  ;;  %v13786_v12 = vld [vmem:[#allocation2 + $0x307] sm:$0xff] }
 0x286   :  { %2166 = vmatmul.mubr.f32.gmra.mrb[112].mxu1 %v13770_v63 }
 0x287   :  { %2170 = vmatprep.mubr.f32.mxu1 %v13461_v29  ;;  %v13790_v29 = vld [vmem:[#allocation2 + $0x30f] sm:$0xff] }
 0x28a   :  { %2171 = vmatmul.mubr.f32.gmra.mrb[114].mxu1 %v13774_v30 }
 0x28b   :  { %2175 = vmatprep.mubr.f32.mxu1 %v13465_v26  ;;  %v13794_v26 = vld [vmem:[#allocation2 + $0x327] sm:$0xff] }
 0x28e   :  { %2176 = vmatmul.mubr.f32.gmra.mrb[116].mxu1 %v13778_v55 }
 0x28f   :  { %2180 = vmatprep.mubr.f32.mxu1 %v13469_v6  ;;  %v13798_v6 = vld [vmem:[#allocation2 + $0x32f] sm:$0xff] }
 0x292   :  { %2181 = vmatmul.mubr.f32.gmra.mrb[118].mxu1 %v13782_v7 }
 0x293   :  { %2185 = vmatprep.mubr.f32.mxu1 %v13473_v25  ;;  %v13802_v25 = vld [vmem:[#allocation2 + $0x347] sm:$0xff] }
 0x296   :  { %2186 = vmatmul.mubr.f32.gmra.mrb[120].mxu1 %v13786_v12 }
 0x297   :  { %2190 = vmatprep.mubr.f32.mxu1 %v13483_v58  ;;  %v13806_v58 = vld [vmem:[#allocation2 + $0x34f] sm:$0xff] }
 0x29a   :  { %2191 = vmatmul.mubr.f32.gmra.mrb[122].mxu1 %v13790_v29 }
 0x29b   :  { %2195 = vmatprep.mubr.f32.mxu1 %v13487_v62  ;;  %v13810_v62 = vld [vmem:[#allocation2 + $0x367] sm:$0xff] }
 0x29e   :  { %2196 = vmatmul.mubr.f32.gmra.mrb[124].mxu1 %v13794_v26 }
 0x29f   :  { %2200 = vmatprep.mubr.f32.mxu1 %v13491_v59  ;;  %v13814_v59 = vld [vmem:[#allocation2 + $0x36f] sm:$0xff] }
 0x2a2   :  { %2201 = vmatmul.mubr.f32.gmra.mrb[126].mxu1 %v13798_v6 }
 0x2a3   :  { %2205 = vmatprep.mubr.f32.mxu1 %v13495_v48  ;;  %v1296_v48 = vld [vmem:[#allocation2 + $0x388] sm:$0xff] }
 0x2a6   :  { %2206 = vmatmul.mubr.f32.gmra.mrb[128].mxu1 %v13802_v25 }
 0x2a7   :  { %2210 = vmatprep.mubr.f32.mxu1 %v13506_v15  ;;  %v1297_v15 = vld [vmem:[#allocation2 + $0x390] sm:$0xff] }
 0x2aa   :  { %2211 = vmatmul.mubr.f32.gmra.mrb[130].mxu1 %v13806_v58 }
 0x2ab   :  { %2215 = vmatprep.mubr.f32.mxu1 %v13510_v50  ;;  %v1298_v50 = vld [vmem:[#allocation2 + $0x3a8] sm:$0xff] }
 0x2ae   :  { %2216 = vmatmul.mubr.f32.gmra.mrb[132].mxu1 %v13810_v62 }
 0x2af   :  { %2220 = vmatprep.mubr.f32.mxu1 %v13514_v32  ;;  %v1299_v32 = vld [vmem:[#allocation2 + $0x3b0] sm:$0xff] }
 0x2b2   :  { %2221 = vmatmul.mubr.f32.gmra.mrb[134].mxu1 %v13814_v59 }
 0x2b3   :  { %2225 = vmatprep.mubr.f32.mxu1 %v1296_v48 }
 0x2b6   :  { %2226 = vmatmul.mubr.f32.gmra.mrb[136].mxu1 %v13817_v61  ;;  %v13828_v1 = vpop.f32.mrb[32].mxu0 }
 0x2b7   :  { %2230 = vmatprep.mubr.f32.mxu1 %v1297_v15  ;;  %20890 = vst [vmem:[#allocation17_spill] sm:$0xff] %v13828_v1  ;;  %v13831_v48 = vpop.f32.mrb[33].mxu0  ;;  %v13833_v15 = vld [vmem:[#allocation2 + $0x3c7] sm:$0xff] }
 0x2b8   :  { %20891 = vst [vmem:[#allocation19_spill] sm:$0xff] %v13831_v48  ;;  %20892 = vst [vmem:[#allocation22_spill] sm:$0xff] %v13833_v15  ;;  %v1302_v1 = vld [vmem:[#allocation2 + $0x3e8] sm:$0xff] }
 0x2ba   :  { %2231 = vmatmul.mubr.f32.gmra.mrb[138].mxu1 %v13820_v51 }
 0x2bb   :  { %2235 = vmatprep.mubr.f32.mxu1 %v1298_v50  ;;  %v1301_v50 = vld [vmem:[#allocation2 + $0x3d0] sm:$0xff] }
 0x2bd   :  { %v13835_v51 = vpop.f32.mrb[34].mxu0 }
 0x2be   :  { %2236 = vmatmul.mubr.f32.gmra.mrb[140].mxu1 %v13823_v22  ;;  %20893 = vst [vmem:[#allocation4_spill] sm:$0xff] %v13835_v51  ;;  %v13838_v22 = vpop.f32.mrb[35].mxu0  ;;  %v1303_v51 = vld [vmem:[#allocation2 + $0x3f0] sm:$0xff] }
 0x2bf   :  { %2240 = vmatprep.mubr.f32.mxu1 %v1299_v32  ;;  %20894 = vst [vmem:[#allocation3_spill] sm:$0xff] %v13838_v22  ;;  %v13840_v32 = vld [vmem:[#allocation2 + $0x3cf] sm:$0xff] }
 0x2c0   :  { %20895 = vst [vmem:[#allocation10_spill] sm:$0xff] %v13840_v32 }
 0x2c2   :  { %2241 = vmatmul.mubr.f32.gmra.mrb[142].mxu1 %v13826_v10 }
 0x2c3   :  { %2245 = vmatprep.mubr.f32.mxu1 %v1300_v41  ;;  %v13847_v41 = vld [vmem:[#allocation2 + $0x3e7] sm:$0xff] }
 0x2c4   :  { %20898 = vst [vmem:[#allocation20_spill] sm:$0xff] %v13847_v41 }
 0x2c6   :  { %2246 = vmatmul.mubr.f32.gmra.mrb[144].mxu1 %v13833_v15 }
 0x2c7   :  { %2250 = vmatprep.mubr.f32.mxu1 %v1301_v50  ;;  %v13854_v50 = vld [vmem:[#allocation2 + $0x3ef] sm:$0xff] }
 0x2c8   :  { %20901 = vst [vmem:[#allocation5_spill] sm:$0xff] %v13854_v50 }
 0x2ca   :  { %v13842_v61 = vpop.f32.mrb[36].mxu0  ;;  %2251 = vmatmul.mubr.f32.gmra.mrb[146].mxu1 %v13840_v32 }
 0x2cb   :  { %20896 = vst [vmem:[#allocation36_spill] sm:$0xff] %v13842_v61  ;;  %v13845_v10 = vpop.f32.mrb[37].mxu0  ;;  %2255 = vmatprep.mubr.f32.mxu1 %v1302_v1  ;;  %v1304_v61 = vld [vmem:[#allocation2 + $0x408] sm:$0xff] }
 0x2cc   :  { %20897 = vst [vmem:[#allocation8_spill] sm:$0xff] %v13845_v10  ;;  %v13861_v1 = vld [vmem:[#allocation2 + $0x407] sm:$0xff] }
 0x2cd   :  { %20904 = vst [vmem:[#allocation7_spill] sm:$0xff] %v13861_v1 }
 0x2ce   :  { %v13849_v48 = vpop.f32.mrb[38].mxu0  ;;  %2256 = vmatmul.mubr.f32.gmra.mrb[148].mxu1 %v13847_v41 }
 0x2cf   :  { %20899 = vst [vmem:[#allocation23_spill] sm:$0xff] %v13849_v48  ;;  %v13852_v15 = vpop.f32.mrb[39].mxu0  ;;  %2260 = vmatprep.mubr.f32.mxu1 %v1303_v51  ;;  %v1305_v48 = vld [vmem:[#allocation2 + $0x410] sm:$0xff] }
 0x2d0   :  { %20900 = vst [vmem:[#allocation6_spill] sm:$0xff] %v13852_v15  ;;  %v13868_v51 = vld [vmem:[#allocation2 + $0x40f] sm:$0xff] }
 0x2d1   :  { %20907 = vst [vmem:[#allocation25_spill] sm:$0xff] %v13868_v51 }
 0x2d2   :  { %v13856_v22 = vpop.f32.mrb[40].mxu0  ;;  %2261 = vmatmul.mubr.f32.gmra.mrb[150].mxu1 %v13854_v50 }
 0x2d3   :  { %20902 = vst [vmem:[#allocation49_spill] sm:$0xff] %v13856_v22  ;;  %v13859_v32 = vpop.f32.mrb[41].mxu0  ;;  %2265 = vmatprep.mubr.f32.mxu1 %v1304_v61  ;;  %v1306_v22 = vld [vmem:[#allocation2 + $0x428] sm:$0xff] }
 0x2d4   :  { %20903 = vst [vmem:[#allocation9_spill] sm:$0xff] %v13859_v32  ;;  %v13875_v61 = vld [vmem:[#allocation2 + $0x427] sm:$0xff] }
 0x2d5   :  { %20910 = vst [vmem:[#allocation27_spill] sm:$0xff] %v13875_v61 }
 0x2d6   :  { %v13863_v10 = vpop.f32.mrb[42].mxu0  ;;  %2266 = vmatmul.mubr.f32.gmra.mrb[152].mxu1 %v13861_v1 }
 0x2d7   :  { %20905 = vst [vmem:[#allocation12_spill] sm:$0xff] %v13863_v10  ;;  %v13866_v41 = vpop.f32.mrb[43].mxu0  ;;  %2270 = vmatprep.mubr.f32.mxu1 %v1305_v48  ;;  %v1307_v10 = vld [vmem:[#allocation2 + $0x430] sm:$0xff]  ;;  %v1821_v48 = vld [vmem:[%s20415_s2 + $0x200] sm:$0xff] }
 0x2d8   :  { %20906 = vst [vmem:[#allocation51_spill] sm:$0xff] %v13866_v41  ;;  %v1823_v41 = vld [vmem:[%s20415_s2 + $0x210] sm:$0xff] }
 0x2da   :  { %v13870_v15 = vpop.f32.mrb[44].mxu0  ;;  %2271 = vmatmul.mubr.f32.gmra.mrb[154].mxu1 %v13868_v51 }
 0x2db   :  { %20908 = vst [vmem:[#allocation52_spill] sm:$0xff] %v13870_v15  ;;  %v13873_v50 = vpop.f32.mrb[45].mxu0  ;;  %2275 = vmatprep.mubr.f32.mxu1 %v1306_v22  ;;  %v1822_v15 = vld [vmem:[%s20415_s2 + $0x208] sm:$0xff] }
 0x2dc   :  { %20909 = vst [vmem:[#allocation26_spill] sm:$0xff] %v13873_v50  ;;  %v13888_v50 = vld [vmem:[#allocation2 + $0x42f] sm:$0xff] }
 0x2dd   :  { %20913 = vst [vmem:[#allocation37_spill] sm:$0xff] %v13888_v50 }
 0x2de   :  { %v13877_v32 = vpop.f32.mrb[46].mxu0  ;;  %2276 = vmatmul.mubr.f32.gmra.mrb[156].mxu1 %v13875_v61  ;;  %v1824_v61 = vld [vmem:[%s20415_s2 + $0x218] sm:$0xff] }
 0x2df   :  { %20911 = vst [vmem:[#allocation54_spill] sm:$0xff] %v13877_v32  ;;  %v13880_v1 = vpop.f32.mrb[47].mxu0  ;;  %2280 = vmatprep.mubr.f32.mxu1 %v1307_v10  ;;  %v10486_v10 = vpack.c.bf16 %v1822_v15, %v1821_v48  ;;  %v1825_v15 = vld [vmem:[%s20415_s2 + $0x220] sm:$0xff]  ;;  %v1826_v48 = vld [vmem:[%s20415_s2 + $0x228] sm:$0xff] }
 0x2e0   :  { %20912 = vst [vmem:[#allocation28_spill] sm:$0xff] %v13880_v1  ;;  %v1308_v1 = vld [vmem:[#allocation2 + $0x9] sm:$0xff] }
 0x2e2   :  { %v13890_v22 = vpop.f32.mrb[48].mxu0  ;;  %2281 = vmatmul.mubr.f32.gmra.mrb[158].mxu1 %v13888_v50 }
 0x2e3   :  { %20914 = vst [vmem:[#allocation55_spill] sm:$0xff] %v13890_v22  ;;  %v13893_v32 = vpop.f32.mrb[49].mxu0  ;;  %2350 = vmatprep.mubr.f32.mxu1 %v13381_v47  ;;  %v10489_v47 = vpack.c.bf16 %v1824_v61, %v1823_v41  ;;  %v1827_v41 = vld [vmem:[%s20415_s2 + $0x230] sm:$0xff]  ;;  %v1828_v61 = vld [vmem:[%s20415_s2 + $0x238] sm:$0xff] }
 0x2e4   :  { %20915 = vst [vmem:[#allocation29_spill] sm:$0xff] %v13893_v32  ;;  %v1309_v32 = vld [vmem:[#allocation2 + $0x11] sm:$0xff] }
 0x2e6   :  { %v13902_v51 = vpop.f32.mrb[50].mxu0  ;;  %2351 = vmatmul.mubr.f32.vlgmr.msra.gmra.mrb[32].mxu1 %v1308_v1 }
 0x2e7   :  { %20916 = vst [vmem:[#allocation11_spill] sm:$0xff] %v13902_v51  ;;  %10487 = vmatpush1.bf16.msra.mxu1 %v10486_v10  ;;  %v13904_v22 = vpop.f32.mrb[51].mxu0  ;;  %2355 = vmatprep.mubr.f32.mxu1 %v13479_v49  ;;  %v10492_v49 = vpack.c.bf16 %v1826_v48, %v1825_v15  ;;  %v13926_v10 = vld [vmem:[#allocation2 + $0x29] sm:$0xff]  ;;  %v13941_v48 = vld [vmem:[#allocation2 + $0x31] sm:$0xff] }
 0x2e8   :  { %20917 = vst [vmem:[#allocation56_spill] sm:$0xff] %v13904_v22  ;;  %10488 = vmatprep.subr.bf16.mxu1 %v20872_v23  ;;  %v1830_v15 = vld [vmem:[%s20415_s2 + $0x248] sm:$0xff]  ;;  %v1505_v51 = vld [vmem:[#allocation2 + $0x71] sm:$0xff] }
 0x2e9   :  { %v1506_v22 = vld [vmem:[#allocation2 + $0x89] sm:$0xff] }
 0x2ea   :  { %v13914_v50 = vpop.f32.mrb[52].mxu0  ;;  %2356 = vmatmul.mubr.f32.gmra.mrb[34].mxu1 %v1309_v32 }
 0x2eb   :  { %20918 = vst [vmem:[#allocation30_spill] sm:$0xff] %v13914_v50  ;;  %v13916_v1 = vpop.f32.mrb[53].mxu0  ;;  %2360 = vmatprep.mubr.f32.mxu1 %v13556_v31  ;;  %10490 = vmatpush1.bf16.msra.mxu1 %v10489_v47  ;;  %v10495_v31 = vpack.c.bf16 %v1828_v61, %v1827_v41  ;;  %v1829_v47 = vld [vmem:[%s20415_s2 + $0x240] sm:$0xff]  ;;  %v1832_v41 = vld [vmem:[%s20415_s2 + $0x258] sm:$0xff] }
 0x2ec   :  { %20919 = vst [vmem:[#allocation31_spill] sm:$0xff] %v13916_v1  ;;  %10491 = vmatprep.subr.bf16.mxu1 %v20872_v23 }
 0x2ee   :  { %v13928_v50 = vpop.f32.mrb[54].mxu0  ;;  %2361 = vmatmul.mubr.f32.gmra.mrb[36].mxu1 %v13926_v10 }
 0x2ef   :  { %20920 = vst [vmem:[#allocation32_spill] sm:$0xff] %v13928_v50  ;;  %v13931_v32 = vpop.f32.mrb[55].mxu0  ;;  %2365 = vmatprep.mubr.f32.mxu1 %v13580_v28  ;;  %10493 = vmatpush1.bf16.msra.mxu1 %v10492_v49  ;;  %v10498_v28 = vpack.c.bf16 %v1830_v15, %v1829_v47  ;;  %v1831_v49 = vld [vmem:[%s20415_s2 + $0x250] sm:$0xff]  ;;  %v1834_v47 = vld [vmem:[%s20415_s2 + $0x268] sm:$0xff] }
 0x2f0   :  { %20921 = vst [vmem:[#allocation33_spill] sm:$0xff] %v13931_v32  ;;  %10494 = vmatprep.subr.bf16.mxu1 %v20872_v23 }
 0x2f2   :  { %v13943_v50 = vpop.f32.mrb[56].mxu0  ;;  %2366 = vmatmul.mubr.f32.gmra.mrb[38].mxu1 %v13941_v48 }
 0x2f3   :  { %20922 = vst [vmem:[#allocation34_spill] sm:$0xff] %v13943_v50  ;;  %v13946_v32 = vpop.f32.mrb[57].mxu0  ;;  %2370 = vmatprep.mubr.f32.mxu1 %v13585_v19  ;;  %10496 = vmatpush1.bf16.msra.mxu1 %v10495_v31  ;;  %v11699_v50 = vld [vmem:[#allocation2 + $0x49] sm:$0xff]  ;;  %v10501_v19 = vpack.c.bf16 %v1832_v41, %v1831_v49  ;;  %v1833_v31 = vld [vmem:[%s20415_s2 + $0x260] sm:$0xff]  ;;  %v1836_v49 = vld [vmem:[%s20415_s2 + $0x278] sm:$0xff] }
 0x2f4   :  { %20923 = vst [vmem:[#allocation13_spill] sm:$0xff] %v13946_v32  ;;  %10497 = vmatprep.subr.bf16.mxu1 %v20872_v23  ;;  %v1502_v32 = vld [vmem:[#allocation2 + $0x49] sm:$0xff] }
 0x2f6   :  { %v13956_v61 = vpop.f32.mrb[58].mxu0  ;;  %2371 = vmatmul.mubr.f32.gmra.mrb[40].mxu1 %v11699_v50 }
 0x2f7   :  { %20924 = vst [vmem:[#allocation35_spill] sm:$0xff] %v13956_v61  ;;  %v13958_v1 = vpop.f32.mrb[59].mxu0  ;;  %2375 = vmatprep.mubr.f32.mxu1 %v13590_v20  ;;  %10499 = vmatpush1.bf16.msra.mxu1 %v10498_v28  ;;  %v11700_v61 = vld [vmem:[#allocation2 + $0x51] sm:$0xff]  ;;  %v10504_v20 = vpack.c.bf16 %v1834_v47, %v1833_v31  ;;  %v1838_v31 = vld [vmem:[%s20415_s2 + $0x288] sm:$0xff] }
 0x2f8   :  { %20925 = vst [vmem:[#allocation38_spill] sm:$0xff] %v13958_v1  ;;  %10500 = vmatprep.subr.bf16.mxu1 %v20872_v23  ;;  %v1835_v28 = vld [vmem:[%s20415_s2 + $0x270] sm:$0xff] }
 0x2fa   :  { %v13968_v15 = vpop.f32.mrb[60].mxu0  ;;  %2376 = vmatmul.mubr.f32.gmra.mrb[42].mxu1 %v11700_v61 }
 0x2fb   :  { %20926 = vst [vmem:[#allocation40_spill] sm:$0xff] %v13968_v15  ;;  %v13970_v50 = vpop.f32.mrb[61].mxu0  ;;  %2380 = vmatprep.mubr.f32.mxu1 %v13594_v9  ;;  %10502 = vmatpush1.bf16.msra.mxu1 %v10501_v19  ;;  %v10507_v9 = vpack.c.bf16 %v1836_v49, %v1835_v28  ;;  %v1837_v19 = vld [vmem:[%s20415_s2 + $0x280] sm:$0xff]  ;;  %v1840_v28 = vld [vmem:[%s20415_s2 + $0x298] sm:$0xff]  ;;  %v1855_v15 = vld [vmem:[%s20415_s2 + $0x310] sm:$0xff] }
 0x2fc   :  { %20927 = vst [vmem:[#allocation41_spill] sm:$0xff] %v13970_v50  ;;  %10503 = vmatprep.subr.bf16.mxu1 %v20872_v23  ;;  %v1436_v50 = vld [vmem:[#allocation2 + $0x28] sm:$0xff] }
 0x2fe   :  { %2381 = vmatmul.mubr.f32.gmra.mrb[44].mxu1 %v13457_v17  ;;  %v13981_v41 = vpop.f32.mrb[62].mxu0 }
 0x2ff   :  { %20928 = vst [vmem:[#allocation21_spill] sm:$0xff] %v13981_v41  ;;  %2385 = vmatprep.mubr.f32.mxu1 %v13598_v27  ;;  %v13984_v61 = vpop.f32.mrb[63].mxu0  ;;  %10505 = vmatpush1.bf16.msra.mxu1 %v10504_v20  ;;  %v10510_v27 = vpack.c.bf16 %v1838_v31, %v1837_v19  ;;  %v1839_v20 = vld [vmem:[%s20415_s2 + $0x290] sm:$0xff]  ;;  %v1842_v19 = vld [vmem:[%s20415_s2 + $0x2a8] sm:$0xff] }
 0x300   :  { %20929 = vst [vmem:[#allocation42_spill] sm:$0xff] %v13984_v61  ;;  %10506 = vmatprep.subr.bf16.mxu1 %v20872_v23  ;;  %v14307_v41 = vld [vmem:[#allocation2 + $0x429] sm:$0xff]  ;;  %v14316_v61 = vld [vmem:[#allocation2 + $0x431] sm:$0xff] }
 0x302   :  { %v13993_v47 = vpop.f32.mrb[64].mxu0  ;;  %2386 = vmatmul.mubr.f32.gmra.mrb[46].mxu1 %v13502_v36 }
 0x303   :  { %20930 = vst [vmem:[#allocation43_spill] sm:$0xff] %v13993_v47  ;;  %v13996_v17 = vpop.f32.mrb[65].mxu0  ;;  %2390 = vmatprep.mubr.f32.mxu1 %v13614_v11  ;;  %10508 = vmatpush1.bf16.msra.mxu1 %v10507_v9  ;;  %v10513_v11 = vpack.c.bf16 %v1840_v28, %v1839_v20  ;;  %v1841_v9 = vld [vmem:[%s20415_s2 + $0x2a0] sm:$0xff]  ;;  %v14300_v47 = vld [vmem:[#allocation2 + $0x409] sm:$0xff] }
 0x304   :  { %20931 = vst [vmem:[#allocation44_spill] sm:$0xff] %v13996_v17  ;;  %10509 = vmatprep.subr.bf16.mxu1 %v20872_v23  ;;  %v14304_v17 = vld [vmem:[#allocation2 + $0x411] sm:$0xff] }
 0x306   :  { %v14006_v49 = vpop.f32.mrb[66].mxu0  ;;  %2391 = vmatmul.mubr.f32.gmra.mrb[48].mxu1 %v13536_v37 }
 0x307   :  { %20932 = vst [vmem:[#allocation45_spill] sm:$0xff] %v14006_v49  ;;  %v14009_v36 = vpop.f32.mrb[67].mxu0  ;;  %2395 = vmatprep.mubr.f32.mxu1 %v13625_v43  ;;  %10511 = vmatpush1.bf16.msra.mxu1 %v10510_v27  ;;  %v10516_v43 = vpack.c.bf16 %v1842_v19, %v1841_v9  ;;  %v1844_v9 = vld [vmem:[%s20415_s2 + $0x2b8] sm:$0xff]  ;;  %v14292_v49 = vld [vmem:[#allocation2 + $0x3e9] sm:$0xff] }
 0x308   :  { %20933 = vst [vmem:[#allocation46_spill] sm:$0xff] %v14009_v36  ;;  %10512 = vmatprep.subr.bf16.mxu1 %v20872_v23  ;;  %v14296_v36 = vld [vmem:[#allocation2 + $0x3f1] sm:$0xff] }
 0x30a   :  { %v14019_v31 = vpop.f32.mrb[68].mxu0  ;;  %2396 = vmatmul.mubr.f32.gmra.mrb[50].mxu1 %v13567_v45  ;;  %v14033_v45 = vld [vmem:[#allocation2 + $0xb1] sm:$0xff] }
 0x30b   :  { %20934 = vst [vmem:[#allocation47_spill] sm:$0xff] %v14019_v31  ;;  %v14022_v37 = vpop.f32.mrb[69].mxu0  ;;  %2400 = vmatprep.mubr.f32.mxu1 %v13630_v33  ;;  %10514 = vmatpush1.bf16.msra.mxu1 %v10513_v11  ;;  %v14041_v11 = vld [vmem:[#allocation2 + $0xc9] sm:$0xff] }
 0x30c   :  { %20935 = vst [vmem:[#allocation48_spill] sm:$0xff] %v14022_v37  ;;  %10515 = vmatprep.subr.bf16.mxu1 %v20872_v23  ;;  %v14284_v31 = vld [vmem:[#allocation2 + $0x3c9] sm:$0xff]  ;;  %v14288_v37 = vld [vmem:[#allocation2 + $0x3d1] sm:$0xff] }
 0x30e   :  { %v14026_v27 = vpop.f32.mrb[70].mxu0  ;;  %2401 = vmatmul.mubr.f32.gmra.mrb[52].mxu1 %v13577_v39 }
 0x30f   :  { %20936 = vst [vmem:[#allocation50_spill] sm:$0xff] %v14026_v27  ;;  %v14029_v20 = vpop.f32.mrb[71].mxu0  ;;  %2405 = vmatprep.mubr.f32.mxu1 %v13641_v53  ;;  %10517 = vmatpush1.bf16.msra.mxu1 %v10516_v43  ;;  %v1843_v53 = vld [vmem:[%s20415_s2 + $0x2b0] sm:$0xff] }
 0x310   :  { %20937 = vst [vmem:[#allocation53_spill] sm:$0xff] %v14029_v20  ;;  %10518 = vmatprep.subr.bf16.mxu1 %v20872_v23  ;;  %v10519_v43 = vpack.c.bf16 %v1844_v9, %v1843_v53  ;;  %v14072_v53 = vld [vmem:[#allocation2 + $0xf1] sm:$0xff] }
 0x311   :  { %v14280_v20 = vld [vmem:[#allocation2 + $0x3b1] sm:$0xff] }
 0x312   :  { %v14035_v28 = vpop.f32.mrb[72].mxu0  ;;  %2406 = vmatmul.mubr.f32.gmra.mrb[54].mxu1 %v14033_v45 }
 0x313   :  { %20938 = vst [vmem:[#allocation14_spill] sm:$0xff] %v14035_v28  ;;  %v14038_v33 = vpop.f32.mrb[73].mxu0  ;;  %2410 = vmatprep.mubr.f32.mxu1 %v13646_v8  ;;  %v14055_v8 = vld [vmem:[#allocation2 + $0xd1] sm:$0xff]  ;;  %10520 = vmatpush1.bf16.msra.mxu1 %v10519_v43 }
 0x314   :  { %20939 = vst [vmem:[#allocation57_spill] sm:$0xff] %v14038_v33  ;;  %10521 = vmatprep.subr.bf16.mxu1 %v20872_v23  ;;  %v14064_v33 = vld [vmem:[#allocation2 + $0xe9] sm:$0xff] }
 0x316   :  { %v14043_v39 = vpop.f32.mrb[74].mxu0  ;;  %2411 = vmatmul.mubr.f32.gmra.mrb[56].mxu1 %v14041_v11 }
 0x317   :  { %20940 = vst [vmem:[#allocation58_spill] sm:$0xff] %v14043_v39  ;;  %v14052_v19 = vpop.f32.mrb[75].mxu0  ;;  %2415 = vmatprep.mubr.f32.mxu1 %v13650_v21 }
 0x318   :  { %20941 = vst [vmem:[#allocation59_spill] sm:$0xff] %v14052_v19 }
 0x31a   :  { %v14057_v28 = vpop.f32.mrb[76].mxu0  ;;  %2416 = vmatmul.mubr.f32.gmra.mrb[58].mxu1 %v14055_v8 }
 0x31b   :  { %20942 = vst [vmem:[#allocation60_spill] sm:$0xff] %v14057_v28  ;;  %v14061_v39 = vpop.f32.mrb[77].mxu0  ;;  %2420 = vmatprep.mubr.f32.mxu1 %v13654_v57  ;;  %v14080_v57 = vld [vmem:[#allocation2 + $0x109] sm:$0xff] }
 0x31c   :  { %20943 = vst [vmem:[#allocation61_spill] sm:$0xff] %v14061_v39  ;;  %v14103_v39 = vld [vmem:[#allocation2 + $0x129] sm:$0xff] }
 0x31e   :  { %v14066_v27 = vpop.f32.mrb[78].mxu0  ;;  %2421 = vmatmul.mubr.f32.gmra.mrb[60].mxu1 %v14064_v33 }
 0x31f   :  { %20944 = vst [vmem:[#allocation62_spill] sm:$0xff] %v14066_v27  ;;  %v14069_v21 = vpop.f32.mrb[79].mxu0  ;;  %2425 = vmatprep.mubr.f32.mxu1 %v13664_v44  ;;  %v1845_v44 = vld [vmem:[%s20415_s2 + $0x2c0] sm:$0xff] }
 0x320   :  { %20945 = vst [vmem:[#allocation63_spill] sm:$0xff] %v14069_v21 }
 0x322   :  { %v14074_v9 = vpop.f32.mrb[80].mxu0  ;;  %2426 = vmatmul.mubr.f32.gmra.mrb[62].mxu1 %v14072_v53 }
 0x323   :  { %20946 = vst [vmem:[#allocation64_spill] sm:$0xff] %v14074_v9  ;;  %v14077_v43 = vpop.f32.mrb[81].mxu0  ;;  %2430 = vmatprep.mubr.f32.mxu1 %v13669_v54  ;;  %v1846_v9 = vld [vmem:[%s20415_s2 + $0x2c8] sm:$0xff]  ;;  %v14094_v54 = vld [vmem:[#allocation2 + $0x111] sm:$0xff] }
 0x324   :  { %20947 = vst [vmem:[#allocation65_spill] sm:$0xff] %v14077_v43  ;;  %v10522_v43 = vpack.c.bf16 %v1846_v9, %v1845_v44  ;;  %v14111_v9 = vld [vmem:[#allocation2 + $0x131] sm:$0xff] }
 0x326   :  { %v14082_v28 = vpop.f32.mrb[82].mxu0  ;;  %2431 = vmatmul.mubr.f32.gmra.mrb[64].mxu1 %v14080_v57 }
 0x327   :  { %20948 = vst [vmem:[#allocation66_spill] sm:$0xff] %v14082_v28  ;;  %v14091_v27 = vpop.f32.mrb[83].mxu0  ;;  %2435 = vmatprep.mubr.f32.mxu1 %v13673_v18  ;;  %10523 = vmatpush1.bf16.msra.mxu1 %v10522_v43 }
 0x328   :  { %20949 = vst [vmem:[#allocation67_spill] sm:$0xff] %v14091_v27  ;;  %10524 = vmatprep.subr.bf16.mxu1 %v20872_v23  ;;  %v14276_v27 = vld [vmem:[#allocation2 + $0x3a9] sm:$0xff] }
 0x32a   :  { %v14096_v21 = vpop.f32.mrb[84].mxu0  ;;  %2436 = vmatmul.mubr.f32.gmra.mrb[66].mxu1 %v14094_v54 }
 0x32b   :  { %20950 = vst [vmem:[#allocation68_spill] sm:$0xff] %v14096_v21  ;;  %v14100_v28 = vpop.f32.mrb[85].mxu0  ;;  %2440 = vmatprep.mubr.f32.mxu1 %v13677_v38  ;;  %v14119_v38 = vld [vmem:[#allocation2 + $0x149] sm:$0xff] }
 0x32c   :  { %20951 = vst [vmem:[#allocation69_spill] sm:$0xff] %v14100_v28  ;;  %v14142_v28 = vld [vmem:[#allocation2 + $0x169] sm:$0xff] }
 0x32e   :  { %v14105_v19 = vpop.f32.mrb[86].mxu0  ;;  %2441 = vmatmul.mubr.f32.gmra.mrb[68].mxu1 %v14103_v39 }
 0x32f   :  { %20952 = vst [vmem:[#allocation70_spill] sm:$0xff] %v14105_v19  ;;  %v14108_v18 = vpop.f32.mrb[87].mxu0  ;;  %2445 = vmatprep.mubr.f32.mxu1 %v13687_v34  ;;  %v1847_v34 = vld [vmem:[%s20415_s2 + $0x2d0] sm:$0xff] }
 0x330   :  { %20953 = vst [vmem:[#allocation71_spill] sm:$0xff] %v14108_v18 }
 0x332   :  { %v14113_v43 = vpop.f32.mrb[88].mxu0  ;;  %2446 = vmatmul.mubr.f32.gmra.mrb[70].mxu1 %v14111_v9 }
 0x333   :  { %20954 = vst [vmem:[#allocation72_spill] sm:$0xff] %v14113_v43  ;;  %v14116_v44 = vpop.f32.mrb[89].mxu0  ;;  %2450 = vmatprep.mubr.f32.mxu1 %v13692_v40  ;;  %v1848_v43 = vld [vmem:[%s20415_s2 + $0x2d8] sm:$0xff] }
 0x334   :  { %20955 = vst [vmem:[#allocation73_spill] sm:$0xff] %v14116_v44  ;;  %v10525_v44 = vpack.c.bf16 %v1848_v43, %v1847_v34  ;;  %v14133_v40 = vld [vmem:[#allocation2 + $0x151] sm:$0xff]  ;;  %v14150_v43 = vld [vmem:[#allocation2 + $0x189] sm:$0xff] }
 0x335   :  { %v14160_v34 = vld [vmem:[#allocation2 + $0x191] sm:$0xff] }
 0x336   :  { %v14121_v21 = vpop.f32.mrb[90].mxu0  ;;  %2451 = vmatmul.mubr.f32.gmra.mrb[72].mxu1 %v14119_v38 }
 0x337   :  { %20956 = vst [vmem:[#allocation74_spill] sm:$0xff] %v14121_v21  ;;  %v14130_v19 = vpop.f32.mrb[91].mxu0  ;;  %2455 = vmatprep.mubr.f32.mxu1 %v13696_v35  ;;  %10526 = vmatpush1.bf16.msra.mxu1 %v10525_v44  ;;  %v14146_v35 = vld [vmem:[#allocation2 + $0x171] sm:$0xff]  ;;  %v1850_v44 = vld [vmem:[%s20415_s2 + $0x2e8] sm:$0xff] }
 0x338   :  { %20957 = vst [vmem:[#allocation75_spill] sm:$0xff] %v14130_v19  ;;  %10527 = vmatprep.subr.bf16.mxu1 %v20872_v23  ;;  %v14190_v19 = vld [vmem:[#allocation2 + $0x1f1] sm:$0xff] }
 0x33a   :  { %v14135_v18 = vpop.f32.mrb[92].mxu0  ;;  %2456 = vmatmul.mubr.f32.gmra.mrb[74].mxu1 %v14133_v40 }
 0x33b   :  { %20958 = vst [vmem:[#allocation76_spill] sm:$0xff] %v14135_v18  ;;  %v14139_v21 = vpop.f32.mrb[93].mxu0  ;;  %2460 = vmatprep.mubr.f32.mxu1 %v13700_v56  ;;  %v1849_v56 = vld [vmem:[%s20415_s2 + $0x2e0] sm:$0xff]  ;;  %v14169_v18 = vld [vmem:[#allocation2 + $0x1b1] sm:$0xff] }
 0x33c   :  { %20959 = vst [vmem:[#allocation77_spill] sm:$0xff] %v14139_v21  ;;  %v1403_v21 = vld [vmem:[#allocation2 + $0x20f] sm:$0xff] }
 0x33e   :  { %2461 = vmatmul.mubr.f32.gmra.mrb[76].mxu1 %v14142_v28 }
 0x33f   :  { %2465 = vmatprep.mubr.f32.mxu1 %v13710_v5  ;;  %v10528_v5 = vpack.c.bf16 %v1850_v44, %v1849_v56  ;;  %v1852_v56 = vld [vmem:[%s20415_s2 + $0x2f8] sm:$0xff] }
 0x340   :  { %v14183_v44 = vld [vmem:[#allocation2 + $0x1d1] sm:$0xff] }
 0x341   :  { %10529 = vmatpush1.bf16.msra.mxu1 %v10528_v5  ;;  %v14187_v5 = vld [vmem:[#allocation2 + $0x1e9] sm:$0xff] }
 0x342   :  { %2466 = vmatmul.mubr.f32.gmra.mrb[78].mxu1 %v14146_v35  ;;  %10530 = vmatprep.subr.bf16.mxu1 %v20872_v23 }
 0x343   :  { %2470 = vmatprep.mubr.f32.mxu1 %v13715_v0  ;;  %v14165_v0 = vld [vmem:[#allocation2 + $0x1a9] sm:$0xff] }
 0x346   :  { %2471 = vmatmul.mubr.f32.gmra.mrb[80].mxu1 %v14150_v43 }
 0x347   :  { %2475 = vmatprep.mubr.f32.mxu1 %v13719_v24  ;;  %v14173_v24 = vld [vmem:[#allocation2 + $0x1c9] sm:$0xff] }
 0x34a   :  { %2476 = vmatmul.mubr.f32.gmra.mrb[82].mxu1 %v14160_v34 }
 0x34b   :  { %2480 = vmatprep.mubr.f32.mxu1 %v13723_v3  ;;  %v1851_v3 = vld [vmem:[%s20415_s2 + $0x2f0] sm:$0xff] }
 0x34e   :  { %2481 = vmatmul.mubr.f32.gmra.mrb[84].mxu1 %v14165_v0 }
 0x34f   :  { %2485 = vmatprep.mubr.f32.mxu1 %v13733_v46  ;;  %v10531_v46 = vpack.c.bf16 %v1852_v56, %v1851_v3  ;;  %v1341_v3 = vld [vmem:[#allocation2 + $0x251] sm:$0xff]  ;;  %v14196_v56 = vld [vmem:[#allocation2 + $0x269] sm:$0xff] }
 0x351   :  { %10532 = vmatpush1.bf16.msra.mxu1 %v10531_v46  ;;  %v14260_v46 = vld [vmem:[#allocation2 + $0x369] sm:$0xff] }
 0x352   :  { %2486 = vmatmul.mubr.f32.gmra.mrb[86].mxu1 %v14169_v18  ;;  %10533 = vmatprep.subr.bf16.mxu1 %v20872_v23 }
 0x353   :  { %2490 = vmatprep.mubr.f32.mxu1 %v13738_v2  ;;  %v1402_v2 = vld [vmem:[#allocation2 + $0x207] sm:$0xff] }
 0x356   :  { %2491 = vmatmul.mubr.f32.gmra.mrb[88].mxu1 %v14173_v24 }
 0x357   :  { %2495 = vmatprep.mubr.f32.mxu1 %v13742_v13  ;;  %v1340_v13 = vld [vmem:[#allocation2 + $0x249] sm:$0xff] }
 0x35a   :  { %2496 = vmatmul.mubr.f32.gmra.mrb[90].mxu1 %v14183_v44 }
 0x35b   :  { %2500 = vmatprep.mubr.f32.mxu1 %v1402_v2  ;;  %v14264_v2 = vld [vmem:[#allocation2 + $0x371] sm:$0xff] }
 0x35e   :  { %2501 = vmatmul.mubr.f32.gmra.mrb[92].mxu1 %v14187_v5 }
 0x35f   :  { %2505 = vmatprep.mubr.f32.mxu1 %v1403_v21  ;;  %v14200_v21 = vld [vmem:[#allocation2 + $0x271] sm:$0xff] }
 0x362   :  { %2506 = vmatmul.mubr.f32.gmra.mrb[94].mxu1 %v14190_v19 }
 0x363   :  { %2510 = vmatprep.mubr.f32.mxu1 %v13746_v52  ;;  %v14204_v52 = vld [vmem:[#allocation2 + $0x289] sm:$0xff] }
 0x366   :  { %2511 = vmatmul.mubr.f32.gmra.mrb[96].mxu1 %v1340_v13  ;;  %v14268_v13 = vld [vmem:[#allocation2 + $0x389] sm:$0xff] }
 0x367   :  { %2515 = vmatprep.mubr.f32.mxu1 %v13750_v60  ;;  %v14208_v60 = vld [vmem:[#allocation2 + $0x291] sm:$0xff] }
 0x36a   :  { %2516 = vmatmul.mubr.f32.gmra.mrb[98].mxu1 %v1341_v3  ;;  %v14272_v3 = vld [vmem:[#allocation2 + $0x391] sm:$0xff] }
 0x36b   :  { %2520 = vmatprep.mubr.f32.mxu1 %v13754_v14  ;;  %v14212_v14 = vld [vmem:[#allocation2 + $0x2a9] sm:$0xff] }
 0x36e   :  { %2521 = vmatmul.mubr.f32.gmra.mrb[100].mxu1 %v14196_v56 }
 0x36f   :  { %2525 = vmatprep.mubr.f32.mxu1 %v13758_v16  ;;  %v14216_v16 = vld [vmem:[#allocation2 + $0x2b1] sm:$0xff] }
 0x372   :  { %2526 = vmatmul.mubr.f32.gmra.mrb[102].mxu1 %v14200_v21 }
 0x373   :  { %2530 = vmatprep.mubr.f32.mxu1 %v13762_v4  ;;  %v14220_v4 = vld [vmem:[#allocation2 + $0x2c9] sm:$0xff] }
 0x376   :  { %2531 = vmatmul.mubr.f32.gmra.mrb[104].mxu1 %v14204_v52 }
 0x377   :  { %2535 = vmatprep.mubr.f32.mxu1 %v13766_v42  ;;  %v14224_v42 = vld [vmem:[#allocation2 + $0x2d1] sm:$0xff] }
 0x37a   :  { %2536 = vmatmul.mubr.f32.gmra.mrb[106].mxu1 %v14208_v60 }
 0x37b   :  { %2540 = vmatprep.mubr.f32.mxu1 %v13770_v63  ;;  %v14228_v63 = vld [vmem:[#allocation2 + $0x2e9] sm:$0xff] }
 0x37e   :  { %2541 = vmatmul.mubr.f32.gmra.mrb[108].mxu1 %v14212_v14 }
 0x37f   :  { %2545 = vmatprep.mubr.f32.mxu1 %v13774_v30  ;;  %v14232_v30 = vld [vmem:[#allocation2 + $0x2f1] sm:$0xff] }
 0x382   :  { %2546 = vmatmul.mubr.f32.gmra.mrb[110].mxu1 %v14216_v16 }
 0x383   :  { %2550 = vmatprep.mubr.f32.mxu1 %v13778_v55  ;;  %v14236_v55 = vld [vmem:[#allocation2 + $0x309] sm:$0xff] }
 0x386   :  { %2551 = vmatmul.mubr.f32.gmra.mrb[112].mxu1 %v14220_v4 }
 0x387   :  { %2555 = vmatprep.mubr.f32.mxu1 %v13782_v7  ;;  %v14240_v7 = vld [vmem:[#allocation2 + $0x311] sm:$0xff] }
 0x38a   :  { %2556 = vmatmul.mubr.f32.gmra.mrb[114].mxu1 %v14224_v42 }
 0x38b   :  { %2560 = vmatprep.mubr.f32.mxu1 %v13786_v12  ;;  %v14244_v12 = vld [vmem:[#allocation2 + $0x329] sm:$0xff] }
 0x38e   :  { %2561 = vmatmul.mubr.f32.gmra.mrb[116].mxu1 %v14228_v63 }
 0x38f   :  { %2565 = vmatprep.mubr.f32.mxu1 %v13790_v29  ;;  %v14248_v29 = vld [vmem:[#allocation2 + $0x331] sm:$0xff] }
 0x392   :  { %2566 = vmatmul.mubr.f32.gmra.mrb[118].mxu1 %v14232_v30 }
 0x393   :  { %2570 = vmatprep.mubr.f32.mxu1 %v13794_v26  ;;  %v14252_v26 = vld [vmem:[#allocation2 + $0x349] sm:$0xff] }
 0x396   :  { %2571 = vmatmul.mubr.f32.gmra.mrb[120].mxu1 %v14236_v55 }
 0x397   :  { %2575 = vmatprep.mubr.f32.mxu1 %v13798_v6  ;;  %v14256_v6 = vld [vmem:[#allocation2 + $0x351] sm:$0xff] }
 0x39a   :  { %2576 = vmatmul.mubr.f32.gmra.mrb[122].mxu1 %v14240_v7 }
 0x39b   :  { %2580 = vmatprep.mubr.f32.mxu1 %v13802_v25  ;;  %v20960_v25 = vld [vmem:[#allocation16_spill] sm:$0xff] }
 0x39e   :  { %2581 = vmatmul.mubr.f32.gmra.mrb[124].mxu1 %v14244_v12 }
 0x39f   :  { %2585 = vmatprep.mubr.f32.mxu1 %v13806_v58  ;;  %v20961_v58 = vld [vmem:[#allocation39_spill] sm:$0xff] }
 0x3a2   :  { %2586 = vmatmul.mubr.f32.gmra.mrb[126].mxu1 %v14248_v29 }
 0x3a3   :  { %2590 = vmatprep.mubr.f32.mxu1 %v13810_v62  ;;  %v20962_v62 = vld [vmem:[#allocation15_spill] sm:$0xff] }
 0x3a6   :  { %2591 = vmatmul.mubr.f32.gmra.mrb[128].mxu1 %v14252_v26 }
 0x3a7   :  { %2595 = vmatprep.mubr.f32.mxu1 %v13814_v59  ;;  %v20963_v59 = vld [vmem:[#allocation18_spill] sm:$0xff] }
 0x3aa   :  { %2596 = vmatmul.mubr.f32.gmra.mrb[130].mxu1 %v14256_v6 }
 0x3ab   :  { %2600 = vmatprep.mubr.f32.mxu1 %v20960_v25  ;;  %v20964_v25 = vld [vmem:[#allocation22_spill] sm:$0xff] }
 0x3ae   :  { %2601 = vmatmul.mubr.f32.gmra.mrb[132].mxu1 %v14260_v46 }
 0x3af   :  { %2605 = vmatprep.mubr.f32.mxu1 %v20961_v58  ;;  %v20965_v58 = vld [vmem:[#allocation10_spill] sm:$0xff] }
 0x3b2   :  { %2606 = vmatmul.mubr.f32.gmra.mrb[134].mxu1 %v14264_v2 }
 0x3b3   :  { %2610 = vmatprep.mubr.f32.mxu1 %v20962_v62  ;;  %v20966_v62 = vld [vmem:[#allocation20_spill] sm:$0xff] }
 0x3b6   :  { %2611 = vmatmul.mubr.f32.gmra.mrb[136].mxu1 %v14268_v13 }
 0x3b7   :  { %2615 = vmatprep.mubr.f32.mxu1 %v20963_v59  ;;  %v20967_v59 = vld [vmem:[#allocation5_spill] sm:$0xff] }
 0x3ba   :  { %2616 = vmatmul.mubr.f32.gmra.mrb[138].mxu1 %v14272_v3 }
 0x3bb   :  { %2620 = vmatprep.mubr.f32.mxu1 %v20964_v25  ;;  %v20968_v25 = vld [vmem:[#allocation7_spill] sm:$0xff] }
 0x3be   :  { %2621 = vmatmul.mubr.f32.gmra.mrb[140].mxu1 %v14276_v27 }
 0x3bf   :  { %2625 = vmatprep.mubr.f32.mxu1 %v20965_v58  ;;  %v20969_v58 = vld [vmem:[#allocation25_spill] sm:$0xff] }
 0x3c2   :  { %2626 = vmatmul.mubr.f32.gmra.mrb[142].mxu1 %v14280_v20 }
 0x3c3   :  { %2630 = vmatprep.mubr.f32.mxu1 %v20966_v62  ;;  %v20970_v62 = vld [vmem:[#allocation27_spill] sm:$0xff] }
 0x3c6   :  { %2631 = vmatmul.mubr.f32.gmra.mrb[144].mxu1 %v14284_v31 }
 0x3c7   :  { %2635 = vmatprep.mubr.f32.mxu1 %v20967_v59  ;;  %v20971_v59 = vld [vmem:[#allocation37_spill] sm:$0xff] }
 0x3ca   :  { %2636 = vmatmul.mubr.f32.gmra.mrb[146].mxu1 %v14288_v37 }
 0x3cb   :  { %2640 = vmatprep.mubr.f32.mxu1 %v20968_v25  ;;  %v1434_v25 = vld [vmem:[#allocation2 + $0x447] sm:$0xff] }
 0x3ce   :  { %2641 = vmatmul.mubr.f32.gmra.mrb[148].mxu1 %v14292_v49 }
 0x3cf   :  { %2645 = vmatprep.mubr.f32.mxu1 %v20969_v58  ;;  %v1435_v58 = vld [vmem:[#allocation2 + $0x44f] sm:$0xff] }
 0x3d2   :  { %2646 = vmatmul.mubr.f32.gmra.mrb[150].mxu1 %v14296_v36 }
 0x3d3   :  { %2650 = vmatprep.mubr.f32.mxu1 %v20970_v62  ;;  %v1853_v62 = vld [vmem:[%s20415_s2 + $0x300] sm:$0xff] }
 0x3d6   :  { %2651 = vmatmul.mubr.f32.gmra.mrb[152].mxu1 %v14300_v47 }
 0x3d7   :  { %2655 = vmatprep.mubr.f32.mxu1 %v20971_v59  ;;  %v1854_v59 = vld [vmem:[%s20415_s2 + $0x308] sm:$0xff] }
 0x3da   :  { %2656 = vmatmul.mubr.f32.gmra.mrb[154].mxu1 %v14304_v17 }
 0x3db   :  { %2660 = vmatprep.mubr.f32.mxu1 %v1434_v25  ;;  %v10534_v25 = vpack.c.bf16 %v1854_v59, %v1853_v62  ;;  %v1858_v62 = vld [vmem:[%s20415_s2 + $0x328] sm:$0xff]  ;;  %v1437_v59 = vld [vmem:[#allocation2 + $0x30] sm:$0xff] }
 0x3de   :  { %2661 = vmatmul.mubr.f32.gmra.mrb[156].mxu1 %v14307_v41 }
 0x3df   :  { %2665 = vmatprep.mubr.f32.mxu1 %v1435_v58  ;;  %v1856_v58 = vld [vmem:[%s20415_s2 + $0x318] sm:$0xff] }
 0x3e0   :  { %v10537_v1 = vpack.c.bf16 %v1856_v58, %v1855_v15  ;;  %v1860_v15 = vld [vmem:[%s20415_s2 + $0x338] sm:$0xff] }
 0x3e1   :  { %v1503_v58 = vld [vmem:[#allocation2 + $0x51] sm:$0xff] }
 0x3e2   :  { %2666 = vmatmul.mubr.f32.gmra.mrb[158].mxu1 %v14316_v61 }
 0x3e3   :  { %2735 = vmatprep.mubr.f32.mxu1 %v13926_v10  ;;  %v1857_v10 = vld [vmem:[%s20415_s2 + $0x320] sm:$0xff] }
 0x3e6   :  { %2736 = vmatmul.mubr.f32.vlgmr.msra.gmra.mrb[32].mxu1 %v1436_v50  ;;  %v10540_v50 = vpack.c.bf16 %v1858_v62, %v1857_v10  ;;  %v1862_v10 = vld [vmem:[%s20415_s2 + $0x348] sm:$0xff]  ;;  %v14351_v62 = vld [vmem:[#allocation2 + $0x50] sm:$0xff] }
 0x3e7   :  { %10535 = vmatpush1.bf16.msra.mxu1 %v10534_v25  ;;  %2740 = vmatprep.mubr.f32.mxu1 %v13941_v48  ;;  %v1859_v48 = vld [vmem:[%s20415_s2 + $0x330] sm:$0xff]  ;;  %v14341_v25 = vld [vmem:[#allocation2 + $0x48] sm:$0xff] }
 0x3e8   :  { %10536 = vmatprep.subr.bf16.mxu1 %v20872_v23 }
 0x3ea   :  { %2741 = vmatmul.mubr.f32.gmra.mrb[34].mxu1 %v1437_v59  ;;  %v1504_v59 = vld [vmem:[#allocation2 + $0x69] sm:$0xff] }
 0x3eb   :  { %2745 = vmatprep.mubr.f32.mxu1 %v1502_v32  ;;  %10538 = vmatpush1.bf16.msra.mxu1 %v10537_v1  ;;  %v10543_v32 = vpack.c.bf16 %v1860_v15, %v1859_v48  ;;  %v1861_v1 = vld [vmem:[%s20415_s2 + $0x340] sm:$0xff]  ;;  %v1864_v48 = vld [vmem:[%s20415_s2 + $0x358] sm:$0xff]  ;;  %v14361_v15 = vld [vmem:[#allocation2 + $0x68] sm:$0xff] }
 0x3ec   :  { %10539 = vmatprep.subr.bf16.mxu1 %v20872_v23  ;;  %20972 = vst [vmem:[#allocation16_spill] sm:$0xff] %v14361_v15 }
 0x3ee   :  { %2746 = vmatmul.mubr.f32.gmra.mrb[36].mxu1 %v14341_v25 }
 0x3ef   :  { %2750 = vmatprep.mubr.f32.mxu1 %v1503_v58  ;;  %10541 = vmatpush1.bf16.msra.mxu1 %v10540_v50  ;;  %v10546_v58 = vpack.c.bf16 %v1862_v10, %v1861_v1  ;;  %v1863_v50 = vld [vmem:[%s20415_s2 + $0x350] sm:$0xff]  ;;  %v1866_v1 = vld [vmem:[%s20415_s2 + $0x368] sm:$0xff] }
 0x3f0   :  { %10542 = vmatprep.subr.bf16.mxu1 %v20872_v23  ;;  %v14371_v10 = vld [vmem:[#allocation2 + $0x70] sm:$0xff] }
 0x3f1   :  { %20973 = vst [vmem:[#allocation39_spill] sm:$0xff] %v14371_v10 }
 0x3f2   :  { %2751 = vmatmul.mubr.f32.gmra.mrb[38].mxu1 %v14351_v62 }
 0x3f3   :  { %2755 = vmatprep.mubr.f32.mxu1 %v1504_v59  ;;  %10544 = vmatpush1.bf16.msra.mxu1 %v10543_v32  ;;  %v10549_v59 = vpack.c.bf16 %v1864_v48, %v1863_v50  ;;  %v1865_v32 = vld [vmem:[%s20415_s2 + $0x360] sm:$0xff]  ;;  %v1868_v50 = vld [vmem:[%s20415_s2 + $0x378] sm:$0xff]  ;;  %v14381_v48 = vld [vmem:[#allocation2 + $0x88] sm:$0xff] }
 0x3f4   :  { %10545 = vmatprep.subr.bf16.mxu1 %v20872_v23 }
 0x3f6   :  { %2756 = vmatmul.mubr.f32.gmra.mrb[40].mxu1 %v14361_v15  ;;  %v1507_v15 = vld [vmem:[#allocation2 + $0x91] sm:$0xff] }
 0x3f7   :  { %2760 = vmatprep.mubr.f32.mxu1 %v1505_v51  ;;  %10547 = vmatpush1.bf16.msra.mxu1 %v10546_v58  ;;  %v10552_v51 = vpack.c.bf16 %v1866_v1, %v1865_v32  ;;  %v1867_v58 = vld [vmem:[%s20415_s2 + $0x370] sm:$0xff]  ;;  %v1870_v32 = vld [vmem:[%s20415_s2 + $0x388] sm:$0xff] }
 0x3f8   :  { %10548 = vmatprep.subr.bf16.mxu1 %v20872_v23  ;;  %v14391_v1 = vld [vmem:[#allocation2 + $0x90] sm:$0xff] }
 0x3fa   :  { %2761 = vmatmul.mubr.f32.gmra.mrb[42].mxu1 %v14371_v10  ;;  %v1508_v10 = vld [vmem:[#allocation2 + $0xa9] sm:$0xff] }
 0x3fb   :  { %2765 = vmatprep.mubr.f32.mxu1 %v1506_v22  ;;  %10550 = vmatpush1.bf16.msra.mxu1 %v10549_v59  ;;  %v10555_v22 = vpack.c.bf16 %v1868_v50, %v1867_v58  ;;  %v1869_v59 = vld [vmem:[%s20415_s2 + $0x380] sm:$0xff]  ;;  %v1872_v58 = vld [vmem:[%s20415_s2 + $0x398] sm:$0xff]  ;;  %v14401_v50 = vld [vmem:[#allocation2 + $0xa8] sm:$0xff] }
 0x3fc   :  { %10551 = vmatprep.subr.bf16.mxu1 %v20872_v23 }
 0x3fe   :  { %2766 = vmatmul.mubr.f32.gmra.mrb[44].mxu1 %v14381_v48 }
 0x3ff   :  { %2770 = vmatprep.mubr.f32.mxu1 %v1507_v15  ;;  %10553 = vmatpush1.bf16.msra.mxu1 %v10552_v51  ;;  %v10558_v15 = vpack.c.bf16 %v1870_v32, %v1869_v59  ;;  %v1871_v51 = vld [vmem:[%s20415_s2 + $0x390] sm:$0xff]  ;;  %v1874_v59 = vld [vmem:[%s20415_s2 + $0x3a8] sm:$0xff] }
 0x400   :  { %10554 = vmatprep.subr.bf16.mxu1 %v20872_v23  ;;  %v14412_v32 = vld [vmem:[#allocation2 + $0xb0] sm:$0xff] }
 0x402   :  { %2771 = vmatmul.mubr.f32.gmra.mrb[46].mxu1 %v14391_v1 }
 0x403   :  { %2775 = vmatprep.mubr.f32.mxu1 %v1508_v10  ;;  %10556 = vmatpush1.bf16.msra.mxu1 %v10555_v22  ;;  %v10561_v10 = vpack.c.bf16 %v1872_v58, %v1871_v51  ;;  %v1873_v22 = vld [vmem:[%s20415_s2 + $0x3a0] sm:$0xff]  ;;  %v14422_v51 = vld [vmem:[#allocation2 + $0xd0] sm:$0xff] }
 0x404   :  { %10557 = vmatprep.subr.bf16.mxu1 %v20872_v23  ;;  %v1875_v58 = vld [vmem:[%s20415_s2 + $0x3b0] sm:$0xff] }
 0x406   :  { %2776 = vmatmul.mubr.f32.gmra.mrb[48].mxu1 %v14401_v50 }
 0x407   :  { %2780 = vmatprep.mubr.f32.mxu1 %v14033_v45  ;;  %10559 = vmatpush1.bf16.msra.mxu1 %v10558_v15  ;;  %v10564_v45 = vpack.c.bf16 %v1874_v59, %v1873_v22  ;;  %v14417_v15 = vld [vmem:[#allocation2 + $0xc8] sm:$0xff]  ;;  %v14436_v22 = vld [vmem:[#allocation2 + $0xf0] sm:$0xff] }
 0x408   :  { %10560 = vmatprep.subr.bf16.mxu1 %v20872_v23  ;;  %v14445_v59 = vld [vmem:[#allocation2 + $0x110] sm:$0xff] }
 0x40a   :  { %2781 = vmatmul.mubr.f32.gmra.mrb[50].mxu1 %v14412_v32 }
 0x40b   :  { %2785 = vmatprep.mubr.f32.mxu1 %v14041_v11  ;;  %10562 = vmatpush1.bf16.msra.mxu1 %v10561_v10  ;;  %v14426_v11 = vld [vmem:[#allocation2 + $0xe8] sm:$0xff] }
 0x40c   :  { %10563 = vmatprep.subr.bf16.mxu1 %v20872_v23 }
 0x40e   :  { %2786 = vmatmul.mubr.f32.gmra.mrb[52].mxu1 %v14417_v15 }
 0x40f   :  { %2790 = vmatprep.mubr.f32.mxu1 %v14055_v8  ;;  %10565 = vmatpush1.bf16.msra.mxu1 %v10564_v45  ;;  %v1876_v8 = vld [vmem:[%s20415_s2 + $0x3b8] sm:$0xff]  ;;  %v1878_v45 = vld [vmem:[%s20415_s2 + $0x3c8] sm:$0xff] }
 0x410   :  { %10566 = vmatprep.subr.bf16.mxu1 %v20872_v23  ;;  %v10567_v10 = vpack.c.bf16 %v1876_v8, %v1875_v58  ;;  %v14459_v58 = vld [vmem:[#allocation2 + $0x130] sm:$0xff] }
 0x411   :  { %v14468_v8 = vld [vmem:[#allocation2 + $0x150] sm:$0xff] }
 0x412   :  { %2791 = vmatmul.mubr.f32.gmra.mrb[54].mxu1 %v14422_v51 }
 0x413   :  { %2795 = vmatprep.mubr.f32.mxu1 %v14064_v33  ;;  %10568 = vmatpush1.bf16.msra.mxu1 %v10567_v10  ;;  %v14441_v33 = vld [vmem:[#allocation2 + $0x108] sm:$0xff]  ;;  %v1880_v10 = vld [vmem:[%s20415_s2 + $0x3d8] sm:$0xff] }
 0x414   :  { %10569 = vmatprep.subr.bf16.mxu1 %v20872_v23 }
 0x416   :  { %2796 = vmatmul.mubr.f32.gmra.mrb[56].mxu1 %v14426_v11 }
 0x417   :  { %2800 = vmatprep.mubr.f32.mxu1 %v14072_v53  ;;  %v14449_v53 = vld [vmem:[#allocation2 + $0x128] sm:$0xff] }
 0x41a   :  { %2801 = vmatmul.mubr.f32.gmra.mrb[58].mxu1 %v14436_v22 }
 0x41b   :  { %2805 = vmatprep.mubr.f32.mxu1 %v14080_v57  ;;  %v1877_v57 = vld [vmem:[%s20415_s2 + $0x3c0] sm:$0xff] }
 0x41e   :  { %2806 = vmatmul.mubr.f32.gmra.mrb[60].mxu1 %v14441_v33 }
 0x41f   :  { %2810 = vmatprep.mubr.f32.mxu1 %v14094_v54  ;;  %v10570_v54 = vpack.c.bf16 %v1878_v45, %v1877_v57  ;;  %v14482_v57 = vld [vmem:[#allocation2 + $0x170] sm:$0xff] }
 0x420   :  { %v14491_v45 = vld [vmem:[#allocation2 + $0x190] sm:$0xff] }
 0x421   :  { %10571 = vmatpush1.bf16.msra.mxu1 %v10570_v54  ;;  %v1882_v54 = vld [vmem:[%s20415_s2 + $0x3e8] sm:$0xff] }
 0x422   :  { %2811 = vmatmul.mubr.f32.gmra.mrb[62].mxu1 %v14445_v59  ;;  %10572 = vmatprep.subr.bf16.mxu1 %v20872_v23 }
 0x423   :  { %2815 = vmatprep.mubr.f32.mxu1 %v14103_v39  ;;  %v14464_v39 = vld [vmem:[#allocation2 + $0x148] sm:$0xff] }
 0x426   :  { %2816 = vmatmul.mubr.f32.gmra.mrb[64].mxu1 %v14449_v53 }
 0x427   :  { %2820 = vmatprep.mubr.f32.mxu1 %v14111_v9  ;;  %v14472_v9 = vld [vmem:[#allocation2 + $0x168] sm:$0xff] }
 0x42a   :  { %2821 = vmatmul.mubr.f32.gmra.mrb[66].mxu1 %v14459_v58 }
 0x42b   :  { %2825 = vmatprep.mubr.f32.mxu1 %v14119_v38  ;;  %v1879_v38 = vld [vmem:[%s20415_s2 + $0x3d0] sm:$0xff] }
 0x42e   :  { %2826 = vmatmul.mubr.f32.gmra.mrb[68].mxu1 %v14464_v39 }
 0x42f   :  { %2830 = vmatprep.mubr.f32.mxu1 %v14133_v40  ;;  %v10573_v40 = vpack.c.bf16 %v1880_v10, %v1879_v38  ;;  %v14505_v38 = vld [vmem:[#allocation2 + $0x1b0] sm:$0xff] }
 0x430   :  { %v14514_v10 = vld [vmem:[#allocation2 + $0x1d0] sm:$0xff] }
 0x431   :  { %10574 = vmatpush1.bf16.msra.mxu1 %v10573_v40  ;;  %v1884_v40 = vld [vmem:[%s20415_s2 + $0x3f8] sm:$0xff] }
 0x432   :  { %2831 = vmatmul.mubr.f32.gmra.mrb[70].mxu1 %v14468_v8  ;;  %10575 = vmatprep.subr.bf16.mxu1 %v20872_v23 }
 0x433   :  { %2835 = vmatprep.mubr.f32.mxu1 %v14142_v28  ;;  %v14487_v28 = vld [vmem:[#allocation2 + $0x188] sm:$0xff] }
 0x436   :  { %2836 = vmatmul.mubr.f32.gmra.mrb[72].mxu1 %v14472_v9 }
 0x437   :  { %2840 = vmatprep.mubr.f32.mxu1 %v14146_v35  ;;  %v14495_v35 = vld [vmem:[#allocation2 + $0x1a8] sm:$0xff] }
 0x43a   :  { %2841 = vmatmul.mubr.f32.gmra.mrb[74].mxu1 %v14482_v57 }
 0x43b   :  { %2845 = vmatprep.mubr.f32.mxu1 %v14150_v43  ;;  %v1881_v43 = vld [vmem:[%s20415_s2 + $0x3e0] sm:$0xff] }
 0x43e   :  { %2846 = vmatmul.mubr.f32.gmra.mrb[76].mxu1 %v14487_v28 }
 0x43f   :  { %2850 = vmatprep.mubr.f32.mxu1 %v14160_v34  ;;  %v10576_v34 = vpack.c.bf16 %v1882_v54, %v1881_v43  ;;  %v14528_v43 = vld [vmem:[#allocation2 + $0x1f0] sm:$0xff]  ;;  %v14531_v54 = vld [vmem:[#allocation2 + $0x208] sm:$0xff] }
 0x441   :  { %10577 = vmatpush1.bf16.msra.mxu1 %v10576_v34  ;;  %v1531_v34 = vld [vmem:[#allocation2 + $0x211] sm:$0xff] }
 0x442   :  { %2851 = vmatmul.mubr.f32.gmra.mrb[78].mxu1 %v14491_v45  ;;  %10578 = vmatprep.subr.bf16.mxu1 %v20872_v23  ;;  %v14534_v23 = vld [vmem:[#allocation2 + $0x210] sm:$0xff] }
 0x443   :  { %2855 = vmatprep.mubr.f32.mxu1 %v14165_v0  ;;  %v14510_v0 = vld [vmem:[#allocation2 + $0x1c8] sm:$0xff] }
 0x446   :  { %2856 = vmatmul.mubr.f32.gmra.mrb[80].mxu1 %v14495_v35 }
 0x447   :  { %2860 = vmatprep.mubr.f32.mxu1 %v14169_v18  ;;  %v14518_v18 = vld [vmem:[#allocation2 + $0x1e8] sm:$0xff] }
 0x44a   :  { %2861 = vmatmul.mubr.f32.gmra.mrb[82].mxu1 %v14505_v38 }
 0x44b   :  { %2865 = vmatprep.mubr.f32.mxu1 %v14173_v24  ;;  %v1883_v24 = vld [vmem:[%s20415_s2 + $0x3f0] sm:$0xff] }
 0x44e   :  { %2866 = vmatmul.mubr.f32.gmra.mrb[84].mxu1 %v14510_v0 }
 0x44f   :  { %2870 = vmatprep.mubr.f32.mxu1 %v14183_v44  ;;  %v10579_v44 = vpack.c.bf16 %v1884_v40, %v1883_v24  ;;  %v1469_v24 = vld [vmem:[#allocation2 + $0x270] sm:$0xff]  ;;  %v14540_v40 = vld [vmem:[#allocation2 + $0x288] sm:$0xff] }
 0x451   :  { %10580 = vmatpush1.bf16.msra.mxu1 %v10579_v44  ;;  %v14544_v44 = vld [vmem:[#allocation2 + $0x290] sm:$0xff] }
 0x452   :  { %2871 = vmatmul.mubr.f32.gmra.mrb[86].mxu1 %v14514_v10 }
 0x453   :  { %2875 = vmatprep.mubr.f32.mxu1 %v14187_v5  ;;  %v1530_v5 = vld [vmem:[#allocation2 + $0x209] sm:$0xff] }
 0x456   :  { %2876 = vmatmul.mubr.f32.gmra.mrb[88].mxu1 %v14518_v18 }
 0x457   :  { %2880 = vmatprep.mubr.f32.mxu1 %v14190_v19  ;;  %v1468_v19 = vld [vmem:[#allocation2 + $0x268] sm:$0xff] }
 0x45a   :  { %2881 = vmatmul.mubr.f32.gmra.mrb[90].mxu1 %v14528_v43 }
 0x45b   :  { %2885 = vmatprep.mubr.f32.mxu1 %v1530_v5  ;;  %v14651_v5 = vld [vmem:[#allocation2 + $0x448] sm:$0xff] }
 0x45c   :  { %20974 = vst [vmem:[#allocation15_spill] sm:$0xff] %v14651_v5 }
 0x45e   :  { %2886 = vmatmul.mubr.f32.gmra.mrb[92].mxu1 %v14531_v54 }
 0x45f   :  { %2890 = vmatprep.mubr.f32.mxu1 %v1531_v34  ;;  %v14654_v34 = vld [vmem:[#allocation2 + $0x450] sm:$0xff] }
 0x462   :  { %2891 = vmatmul.mubr.f32.gmra.mrb[94].mxu1 %v14534_v23 }
 0x463   :  { %2895 = vmatprep.mubr.f32.mxu1 %v14196_v56  ;;  %v14548_v56 = vld [vmem:[#allocation2 + $0x2a8] sm:$0xff] }
 0x466   :  { %2896 = vmatmul.mubr.f32.gmra.mrb[96].mxu1 %v1468_v19  ;;  %v20975_v19 = vld [vmem:[#allocation16_spill] sm:$0xff] }
 0x467   :  { %2900 = vmatprep.mubr.f32.mxu1 %v14200_v21  ;;  %v14552_v21 = vld [vmem:[#allocation2 + $0x2b0] sm:$0xff] }
 0x46a   :  { %2901 = vmatmul.mubr.f32.gmra.mrb[98].mxu1 %v1469_v24  ;;  %v1567_v24 = vld [vmem:[#allocation2 + $0x67] sm:$0xff] }
 0x46b   :  { %2905 = vmatprep.mubr.f32.mxu1 %v14204_v52  ;;  %v14556_v52 = vld [vmem:[#allocation2 + $0x2c8] sm:$0xff] }
 0x46e   :  { %2906 = vmatmul.mubr.f32.gmra.mrb[100].mxu1 %v14540_v40 }
 0x46f   :  { %2910 = vmatprep.mubr.f32.mxu1 %v14208_v60  ;;  %v14560_v60 = vld [vmem:[#allocation2 + $0x2d0] sm:$0xff] }
 0x472   :  { %2911 = vmatmul.mubr.f32.gmra.mrb[102].mxu1 %v14544_v44 }
 0x473   :  { %2915 = vmatprep.mubr.f32.mxu1 %v14212_v14  ;;  %v14564_v14 = vld [vmem:[#allocation2 + $0x2e8] sm:$0xff] }
 0x476   :  { %2916 = vmatmul.mubr.f32.gmra.mrb[104].mxu1 %v14548_v56 }
 0x477   :  { %2920 = vmatprep.mubr.f32.mxu1 %v14216_v16  ;;  %v14568_v16 = vld [vmem:[#allocation2 + $0x2f0] sm:$0xff] }
 0x47a   :  { %2921 = vmatmul.mubr.f32.gmra.mrb[106].mxu1 %v14552_v21 }
 0x47b   :  { %2925 = vmatprep.mubr.f32.mxu1 %v14220_v4  ;;  %v14572_v4 = vld [vmem:[#allocation2 + $0x308] sm:$0xff] }
 0x47e   :  { %2926 = vmatmul.mubr.f32.gmra.mrb[108].mxu1 %v14556_v52 }
 0x47f   :  { %2930 = vmatprep.mubr.f32.mxu1 %v14224_v42  ;;  %v14576_v42 = vld [vmem:[#allocation2 + $0x310] sm:$0xff] }
 0x482   :  { %2931 = vmatmul.mubr.f32.gmra.mrb[110].mxu1 %v14560_v60 }
 0x483   :  { %2935 = vmatprep.mubr.f32.mxu1 %v14228_v63  ;;  %v14580_v63 = vld [vmem:[#allocation2 + $0x328] sm:$0xff] }
 0x486   :  { %2936 = vmatmul.mubr.f32.gmra.mrb[112].mxu1 %v14564_v14 }
 0x487   :  { %2940 = vmatprep.mubr.f32.mxu1 %v14232_v30  ;;  %v14584_v30 = vld [vmem:[#allocation2 + $0x330] sm:$0xff] }
 0x48a   :  { %2941 = vmatmul.mubr.f32.gmra.mrb[114].mxu1 %v14568_v16 }
 0x48b   :  { %2945 = vmatprep.mubr.f32.mxu1 %v14236_v55  ;;  %v14588_v55 = vld [vmem:[#allocation2 + $0x348] sm:$0xff] }
 0x48e   :  { %2946 = vmatmul.mubr.f32.gmra.mrb[116].mxu1 %v14572_v4 }
 0x48f   :  { %2950 = vmatprep.mubr.f32.mxu1 %v14240_v7  ;;  %v14592_v7 = vld [vmem:[#allocation2 + $0x350] sm:$0xff] }
 0x492   :  { %2951 = vmatmul.mubr.f32.gmra.mrb[118].mxu1 %v14576_v42 }
 0x493   :  { %2955 = vmatprep.mubr.f32.mxu1 %v14244_v12  ;;  %v14596_v12 = vld [vmem:[#allocation2 + $0x368] sm:$0xff] }
 0x496   :  { %2956 = vmatmul.mubr.f32.gmra.mrb[120].mxu1 %v14580_v63 }
 0x497   :  { %2960 = vmatprep.mubr.f32.mxu1 %v14248_v29  ;;  %v14600_v29 = vld [vmem:[#allocation2 + $0x370] sm:$0xff] }
 0x49a   :  { %2961 = vmatmul.mubr.f32.gmra.mrb[122].mxu1 %v14584_v30 }
 0x49b   :  { %2965 = vmatprep.mubr.f32.mxu1 %v14252_v26  ;;  %v14604_v26 = vld [vmem:[#allocation2 + $0x388] sm:$0xff] }
 0x49e   :  { %2966 = vmatmul.mubr.f32.gmra.mrb[124].mxu1 %v14588_v55 }
 0x49f   :  { %2970 = vmatprep.mubr.f32.mxu1 %v14256_v6  ;;  %v14608_v6 = vld [vmem:[#allocation2 + $0x390] sm:$0xff] }
 0x4a2   :  { %2971 = vmatmul.mubr.f32.gmra.mrb[126].mxu1 %v14592_v7 }
 0x4a3   :  { %2975 = vmatprep.mubr.f32.mxu1 %v14260_v46  ;;  %v14612_v46 = vld [vmem:[#allocation2 + $0x3a8] sm:$0xff] }
 0x4a6   :  { %2976 = vmatmul.mubr.f32.gmra.mrb[128].mxu1 %v14596_v12 }
 0x4a7   :  { %2980 = vmatprep.mubr.f32.mxu1 %v14264_v2  ;;  %v14616_v2 = vld [vmem:[#allocation2 + $0x3b0] sm:$0xff] }
 0x4aa   :  { %2981 = vmatmul.mubr.f32.gmra.mrb[130].mxu1 %v14600_v29 }
 0x4ab   :  { %2985 = vmatprep.mubr.f32.mxu1 %v14268_v13  ;;  %v14620_v13 = vld [vmem:[#allocation2 + $0x3c8] sm:$0xff] }
 0x4ae   :  { %2986 = vmatmul.mubr.f32.gmra.mrb[132].mxu1 %v14604_v26 }
 0x4af   :  { %2990 = vmatprep.mubr.f32.mxu1 %v14272_v3  ;;  %v14624_v3 = vld [vmem:[#allocation2 + $0x3d0] sm:$0xff] }
 0x4b2   :  { %2991 = vmatmul.mubr.f32.gmra.mrb[134].mxu1 %v14608_v6 }
 0x4b3   :  { %2995 = vmatprep.mubr.f32.mxu1 %v14276_v27  ;;  %v14628_v27 = vld [vmem:[#allocation2 + $0x3e8] sm:$0xff] }
 0x4b6   :  { %2996 = vmatmul.mubr.f32.gmra.mrb[136].mxu1 %v14612_v46 }
 0x4b7   :  { %3000 = vmatprep.mubr.f32.mxu1 %v14280_v20  ;;  %v14632_v20 = vld [vmem:[#allocation2 + $0x3f0] sm:$0xff] }
 0x4ba   :  { %3001 = vmatmul.mubr.f32.gmra.mrb[138].mxu1 %v14616_v2 }
 0x4bb   :  { %3005 = vmatprep.mubr.f32.mxu1 %v14284_v31  ;;  %v14636_v31 = vld [vmem:[#allocation2 + $0x408] sm:$0xff] }
 0x4be   :  { %3006 = vmatmul.mubr.f32.gmra.mrb[140].mxu1 %v14620_v13 }
 0x4bf   :  { %3010 = vmatprep.mubr.f32.mxu1 %v14288_v37  ;;  %v14640_v37 = vld [vmem:[#allocation2 + $0x410] sm:$0xff] }
 0x4c2   :  { %3011 = vmatmul.mubr.f32.gmra.mrb[142].mxu1 %v14624_v3 }
 0x4c3   :  { %3015 = vmatprep.mubr.f32.mxu1 %v14292_v49  ;;  %v14644_v49 = vld [vmem:[#allocation2 + $0x428] sm:$0xff] }
 0x4c6   :  { %3016 = vmatmul.mubr.f32.gmra.mrb[144].mxu1 %v14628_v27 }
 0x4c7   :  { %3020 = vmatprep.mubr.f32.mxu1 %v14296_v36  ;;  %v14648_v36 = vld [vmem:[#allocation2 + $0x430] sm:$0xff] }
 0x4ca   :  { %3021 = vmatmul.mubr.f32.gmra.mrb[146].mxu1 %v14632_v20 }
 0x4cb   :  { %3025 = vmatprep.mubr.f32.mxu1 %v14300_v47  ;;  %v1562_v47 = vld [vmem:[#allocation2 + $0x449] sm:$0xff] }
 0x4ce   :  { %3026 = vmatmul.mubr.f32.gmra.mrb[148].mxu1 %v14636_v31 }
 0x4cf   :  { %3030 = vmatprep.mubr.f32.mxu1 %v14304_v17  ;;  %v1563_v17 = vld [vmem:[#allocation2 + $0x451] sm:$0xff] }
 0x4d2   :  { %3031 = vmatmul.mubr.f32.gmra.mrb[150].mxu1 %v14640_v37 }
 0x4d3   :  { %3035 = vmatprep.mubr.f32.mxu1 %v14307_v41  ;;  %v1565_v41 = vld [vmem:[#allocation2 + $0x47] sm:$0xff] }
 0x4d6   :  { %3036 = vmatmul.mubr.f32.gmra.mrb[152].mxu1 %v14644_v49 }
 0x4d7   :  { %3040 = vmatprep.mubr.f32.mxu1 %v14316_v61  ;;  %v1566_v61 = vld [vmem:[#allocation2 + $0x4f] sm:$0xff] }
 0x4da   :  { %3041 = vmatmul.mubr.f32.gmra.mrb[154].mxu1 %v14648_v36 }
 0x4db   :  { %3045 = vmatprep.mubr.f32.mxu1 %v1562_v47  ;;  %v20976_v47 = vld [vmem:[#allocation39_spill] sm:$0xff] }
 0x4de   :  { %3046 = vmatmul.mubr.f32.gmra.mrb[156].mxu1 %v14651_v5  ;;  %v1568_v5 = vld [vmem:[#allocation2 + $0x6f] sm:$0xff] }
 0x4df   :  { %3050 = vmatprep.mubr.f32.mxu1 %v1563_v17  ;;  %v1569_v17 = vld [vmem:[#allocation2 + $0x87] sm:$0xff] }
 0x4e2   :  { %3051 = vmatmul.mubr.f32.gmra.mrb[158].mxu1 %v14654_v34 }
 0x4e3   :  { %3120 = vmatprep.mubr.f32.mxu1 %v14341_v25  ;;  %v1570_v25 = vld [vmem:[#allocation2 + $0x8f] sm:$0xff] }
 0x4e6   :  { %3121 = vmatmul.mubr.f32.vlgmr.msra.gmra.mrb[32].mxu1 %v1565_v41  ;;  %v1572_v41 = vld [vmem:[#allocation2 + $0xaf] sm:$0xff] }
 0x4e7   :  { %3125 = vmatprep.mubr.f32.mxu1 %v14351_v62  ;;  %v1571_v62 = vld [vmem:[#allocation2 + $0xa7] sm:$0xff] }
 0x4ea   :  { %3126 = vmatmul.mubr.f32.gmra.mrb[34].mxu1 %v1566_v61  ;;  %v1573_v61 = vld [vmem:[#allocation2 + $0xc7] sm:$0xff] }
 0x4eb   :  { %3130 = vmatprep.mubr.f32.mxu1 %v20975_v19  ;;  %v1756_v19 = vld [vmem:[#allocation2 + $0x471] sm:$0xff] }
 0x4ee   :  { %3131 = vmatmul.mubr.f32.gmra.mrb[36].mxu1 %v1567_v24  ;;  %v1599_v24 = vld [vmem:[#allocation2 + $0x2a7] sm:$0xff] }
 0x4ef   :  { %3135 = vmatprep.mubr.f32.mxu1 %v20976_v47  ;;  %v1600_v47 = vld [vmem:[#allocation2 + $0x2af] sm:$0xff] }
 0x4f2   :  { %3136 = vmatmul.mubr.f32.gmra.mrb[38].mxu1 %v1568_v5  ;;  %v14687_v5 = vld [vmem:[#allocation2] sm:$0xff] }
 0x4f3   :  { %3140 = vmatprep.mubr.f32.mxu1 %v14381_v48  ;;  %v1574_v48 = vld [vmem:[#allocation2 + $0xcf] sm:$0xff] }
 0x4f6   :  { %3141 = vmatmul.mubr.f32.gmra.mrb[40].mxu1 %v1569_v17  ;;  %v1601_v17 = vld [vmem:[#allocation2 + $0x2c7] sm:$0xff] }
 0x4f7   :  { %3145 = vmatprep.mubr.f32.mxu1 %v14391_v1  ;;  %v1575_v1 = vld [vmem:[#allocation2 + $0xe7] sm:$0xff] }
 0x4fa   :  { %3146 = vmatmul.mubr.f32.gmra.mrb[42].mxu1 %v1570_v25  ;;  %v1618_v25 = vld [vmem:[#allocation2 + $0x3cf] sm:$0xff] }
 0x4fb   :  { %3150 = vmatprep.mubr.f32.mxu1 %v14401_v50  ;;  %v1576_v50 = vld [vmem:[#allocation2 + $0xef] sm:$0xff] }
 0x4fe   :  { %3151 = vmatmul.mubr.f32.gmra.mrb[44].mxu1 %v1571_v62  ;;  %v20977_v62 = vld [vmem:[#allocation19_spill] sm:$0xff] }
 0x4ff   :  { %3155 = vmatprep.mubr.f32.mxu1 %v14412_v32  ;;  %v1577_v32 = vld [vmem:[#allocation2 + $0x107] sm:$0xff] }
 0x502   :  { %3156 = vmatmul.mubr.f32.gmra.mrb[46].mxu1 %v1572_v41 }
 0x503   :  { %3160 = vmatprep.mubr.f32.mxu1 %v14417_v15  ;;  %v1578_v15 = vld [vmem:[#allocation2 + $0x10f] sm:$0xff] }
 0x506   :  { %3161 = vmatmul.mubr.f32.gmra.mrb[48].mxu1 %v1573_v61  ;;  %v1619_v61 = vld [vmem:[#allocation2 + $0x3e7] sm:$0xff] }
 0x507   :  { %3165 = vmatprep.mubr.f32.mxu1 %v14422_v51  ;;  %v1579_v51 = vld [vmem:[#allocation2 + $0x127] sm:$0xff] }
 0x50a   :  { %3166 = vmatmul.mubr.f32.gmra.mrb[50].mxu1 %v1574_v48 }
 0x50b   :  { %3170 = vmatprep.mubr.f32.mxu1 %v14426_v11  ;;  %v1580_v11 = vld [vmem:[#allocation2 + $0x12f] sm:$0xff] }
 0x50e   :  { %3171 = vmatmul.mubr.f32.gmra.mrb[52].mxu1 %v1575_v1 }
 0x50f   :  { %3175 = vmatprep.mubr.f32.mxu1 %v14436_v22  ;;  %v1581_v22 = vld [vmem:[#allocation2 + $0x147] sm:$0xff] }
 0x512   :  { %3176 = vmatmul.mubr.f32.gmra.mrb[54].mxu1 %v1576_v50  ;;  %v20979_v50 = vld [vmem:[#allocation3_spill] sm:$0xff] }
 0x513   :  { %3180 = vmatprep.mubr.f32.mxu1 %v14441_v33  ;;  %v1582_v33 = vld [vmem:[#allocation2 + $0x14f] sm:$0xff] }
 0x516   :  { %3181 = vmatmul.mubr.f32.gmra.mrb[56].mxu1 %v1577_v32 }
 0x517   :  { %3185 = vmatprep.mubr.f32.mxu1 %v14445_v59  ;;  %v1583_v59 = vld [vmem:[#allocation2 + $0x167] sm:$0xff] }
 0x51a   :  { %3186 = vmatmul.mubr.f32.gmra.mrb[58].mxu1 %v1578_v15 }
 0x51b   :  { %3190 = vmatprep.mubr.f32.mxu1 %v14449_v53  ;;  %v1584_v53 = vld [vmem:[#allocation2 + $0x16f] sm:$0xff] }
 0x51e   :  { %3191 = vmatmul.mubr.f32.gmra.mrb[60].mxu1 %v1579_v51 }
 0x51f   :  { %3195 = vmatprep.mubr.f32.mxu1 %v14459_v58  ;;  %v1585_v58 = vld [vmem:[#allocation2 + $0x187] sm:$0xff] }
 0x522   :  { %3196 = vmatmul.mubr.f32.gmra.mrb[62].mxu1 %v1580_v11  ;;  %v20980_v11 = vld [vmem:[#allocation4_spill] sm:$0xff] }
 0x523   :  { %3200 = vmatprep.mubr.f32.mxu1 %v14464_v39  ;;  %v1586_v39 = vld [vmem:[#allocation2 + $0x18f] sm:$0xff] }
 0x526   :  { %3201 = vmatmul.mubr.f32.gmra.mrb[64].mxu1 %v1581_v22 }
 0x527   :  { %3205 = vmatprep.mubr.f32.mxu1 %v14468_v8  ;;  %v1587_v8 = vld [vmem:[#allocation2 + $0x1a7] sm:$0xff] }
 0x52a   :  { %3206 = vmatmul.mubr.f32.gmra.mrb[66].mxu1 %v1582_v33 }
 0x52b   :  { %3210 = vmatprep.mubr.f32.mxu1 %v14472_v9  ;;  %v1588_v9 = vld [vmem:[#allocation2 + $0x1af] sm:$0xff] }
 0x52e   :  { %3211 = vmatmul.mubr.f32.gmra.mrb[68].mxu1 %v1583_v59 }
 0x52f   :  { %3215 = vmatprep.mubr.f32.mxu1 %v14482_v57  ;;  %v1589_v57 = vld [vmem:[#allocation2 + $0x1c7] sm:$0xff] }
 0x532   :  { %3216 = vmatmul.mubr.f32.gmra.mrb[70].mxu1 %v1584_v53  ;;  %v20981_v53 = vld [vmem:[#allocation8_spill] sm:$0xff] }
 0x533   :  { %3220 = vmatprep.mubr.f32.mxu1 %v14487_v28  ;;  %v1590_v28 = vld [vmem:[#allocation2 + $0x1cf] sm:$0xff] }
 0x536   :  { %3221 = vmatmul.mubr.f32.gmra.mrb[72].mxu1 %v1585_v58 }
 0x537   :  { %3225 = vmatprep.mubr.f32.mxu1 %v14491_v45  ;;  %v1591_v45 = vld [vmem:[#allocation2 + $0x1e7] sm:$0xff] }
 0x53a   :  { %3226 = vmatmul.mubr.f32.gmra.mrb[74].mxu1 %v1586_v39 }
 0x53b   :  { %3230 = vmatprep.mubr.f32.mxu1 %v14495_v35  ;;  %v1592_v35 = vld [vmem:[#allocation2 + $0x1ef] sm:$0xff] }
 0x53e   :  { %3231 = vmatmul.mubr.f32.gmra.mrb[76].mxu1 %v1587_v8 }
 0x53f   :  { %3235 = vmatprep.mubr.f32.mxu1 %v14505_v38  ;;  %v1593_v38 = vld [vmem:[#allocation2 + $0x207] sm:$0xff] }
 0x542   :  { %3236 = vmatmul.mubr.f32.gmra.mrb[78].mxu1 %v1588_v9  ;;  %v20982_v9 = vld [vmem:[#allocation36_spill] sm:$0xff] }
 0x543   :  { %3240 = vmatprep.mubr.f32.mxu1 %v14510_v0  ;;  %v1594_v0 = vld [vmem:[#allocation2 + $0x20f] sm:$0xff] }
 0x546   :  { %3241 = vmatmul.mubr.f32.gmra.mrb[80].mxu1 %v1589_v57 }
 0x547   :  { %3245 = vmatprep.mubr.f32.mxu1 %v14514_v10  ;;  %v1595_v10 = vld [vmem:[#allocation2 + $0x227] sm:$0xff] }
 0x54a   :  { %3246 = vmatmul.mubr.f32.gmra.mrb[82].mxu1 %v1590_v28 }
 0x54b   :  { %3250 = vmatprep.mubr.f32.mxu1 %v14518_v18  ;;  %v1755_v18 = vld [vmem:[#allocation2 + $0x469] sm:$0xff] }
 0x54c   :  { %9970 = vmatprep.mubr.f32.mxu0 %v1755_v18 }
 0x54d   :  { %9971 = vmatmul.mubr.f32.gmra.mrb[94].mxu0 %v1756_v19 }
 0x54e   :  { %3251 = vmatmul.mubr.f32.gmra.mrb[84].mxu1 %v1591_v45 }
 0x54f   :  { %3255 = vmatprep.mubr.f32.mxu1 %v14528_v43  ;;  %v1596_v43 = vld [vmem:[#allocation2 + $0x22f] sm:$0xff] }
 0x552   :  { %3256 = vmatmul.mubr.f32.gmra.mrb[86].mxu1 %v1592_v35  ;;  %v20983_v35 = vld [vmem:[#allocation6_spill] sm:$0xff] }
 0x553   :  { %3260 = vmatprep.mubr.f32.mxu1 %v14531_v54  ;;  %v1597_v54 = vld [vmem:[#allocation2 + $0x287] sm:$0xff] }
 0x556   :  { %3261 = vmatmul.mubr.f32.gmra.mrb[88].mxu1 %v1593_v38 }
 0x557   :  { %3265 = vmatprep.mubr.f32.mxu1 %v14534_v23  ;;  %v1598_v23 = vld [vmem:[#allocation2 + $0x28f] sm:$0xff] }
 0x55a   :  { %3266 = vmatmul.mubr.f32.gmra.mrb[90].mxu1 %v1594_v0 }
 0x55b   :  { %3270 = vmatprep.mubr.f32.mxu1 %v14687_v5 }
 0x55e   :  { %3271 = vmatmul.mubr.f32.gmra.mrb[92].mxu1 %v1595_v10  ;;  %v20984_v10 = vld [vmem:[#allocation15_spill] sm:$0xff] }
 0x55f   :  { %3275 = vmatprep.mubr.f32.mxu1 %v14687_v5 }
 0x562   :  { %3276 = vmatmul.mubr.f32.gmra.mrb[94].mxu1 %v1596_v43  ;;  %v20985_v43 = vld [vmem:[#allocation23_spill] sm:$0xff] }
 0x563   :  { %3280 = vmatprep.mubr.f32.mxu1 %v14540_v40  ;;  %v1602_v40 = vld [vmem:[#allocation2 + $0x2cf] sm:$0xff] }
 0x566   :  { %3281 = vmatmul.mubr.f32.gmra.mrb[96].mxu1 %v1597_v54 }
 0x567   :  { %3285 = vmatprep.mubr.f32.mxu1 %v14544_v44  ;;  %v1603_v44 = vld [vmem:[#allocation2 + $0x2e7] sm:$0xff] }
 0x56a   :  { %3286 = vmatmul.mubr.f32.gmra.mrb[98].mxu1 %v1598_v23 }
 0x56b   :  { %3290 = vmatprep.mubr.f32.mxu1 %v14548_v56  ;;  %v1604_v56 = vld [vmem:[#allocation2 + $0x2ef] sm:$0xff] }
 0x56e   :  { %3291 = vmatmul.mubr.f32.gmra.mrb[100].mxu1 %v1599_v24  ;;  %v20986_v24 = vld [vmem:[#allocation9_spill] sm:$0xff] }
 0x56f   :  { %3295 = vmatprep.mubr.f32.mxu1 %v14552_v21  ;;  %v1605_v21 = vld [vmem:[#allocation2 + $0x307] sm:$0xff] }
 0x572   :  { %3296 = vmatmul.mubr.f32.gmra.mrb[102].mxu1 %v1600_v47 }
 0x573   :  { %3300 = vmatprep.mubr.f32.mxu1 %v14556_v52  ;;  %v1606_v52 = vld [vmem:[#allocation2 + $0x30f] sm:$0xff] }
 0x576   :  { %3301 = vmatmul.mubr.f32.gmra.mrb[104].mxu1 %v1601_v17 }
 0x577   :  { %3305 = vmatprep.mubr.f32.mxu1 %v14560_v60  ;;  %v1607_v60 = vld [vmem:[#allocation2 + $0x327] sm:$0xff] }
 0x57a   :  { %3306 = vmatmul.mubr.f32.gmra.mrb[106].mxu1 %v1602_v40  ;;  %v1627_v40 = vld [vmem:[#allocation2 + $0x467] sm:$0xff] }
 0x57b   :  { %3310 = vmatprep.mubr.f32.mxu1 %v14564_v14  ;;  %v1608_v14 = vld [vmem:[#allocation2 + $0x32f] sm:$0xff] }
 0x57e   :  { %3311 = vmatmul.mubr.f32.gmra.mrb[108].mxu1 %v1603_v44 }
 0x57f   :  { %3315 = vmatprep.mubr.f32.mxu1 %v14568_v16  ;;  %v1609_v16 = vld [vmem:[#allocation2 + $0x347] sm:$0xff] }
 0x582   :  { %3316 = vmatmul.mubr.f32.gmra.mrb[110].mxu1 %v1604_v56  ;;  %v20987_v56 = vld [vmem:[#allocation49_spill] sm:$0xff] }
 0x583   :  { %3320 = vmatprep.mubr.f32.mxu1 %v14572_v4  ;;  %v1610_v4 = vld [vmem:[#allocation2 + $0x34f] sm:$0xff] }
 0x586   :  { %3321 = vmatmul.mubr.f32.gmra.mrb[112].mxu1 %v1605_v21 }
 0x587   :  { %3325 = vmatprep.mubr.f32.mxu1 %v14576_v42  ;;  %v1611_v42 = vld [vmem:[#allocation2 + $0x367] sm:$0xff] }
 0x58a   :  { %3326 = vmatmul.mubr.f32.gmra.mrb[114].mxu1 %v1606_v52 }
 0x58b   :  { %3330 = vmatprep.mubr.f32.mxu1 %v14580_v63  ;;  %v1612_v63 = vld [vmem:[#allocation2 + $0x36f] sm:$0xff] }
 0x58e   :  { %3331 = vmatmul.mubr.f32.gmra.mrb[116].mxu1 %v1607_v60  ;;  %v1628_v60 = vld [vmem:[#allocation2 + $0x46f] sm:$0xff] }
 0x58f   :  { %3335 = vmatprep.mubr.f32.mxu1 %v14584_v30  ;;  %v1613_v30 = vld [vmem:[#allocation2 + $0x387] sm:$0xff] }
 0x592   :  { %3336 = vmatmul.mubr.f32.gmra.mrb[118].mxu1 %v1608_v14  ;;  %v20988_v14 = vld [vmem:[#allocation51_spill] sm:$0xff] }
 0x593   :  { %3340 = vmatprep.mubr.f32.mxu1 %v14588_v55  ;;  %v1614_v55 = vld [vmem:[#allocation2 + $0x38f] sm:$0xff] }
 0x596   :  { %3341 = vmatmul.mubr.f32.gmra.mrb[120].mxu1 %v1609_v16 }
 0x597   :  { %3345 = vmatprep.mubr.f32.mxu1 %v14592_v7  ;;  %v1615_v7 = vld [vmem:[#allocation2 + $0x3a7] sm:$0xff] }
 0x59a   :  { %3346 = vmatmul.mubr.f32.gmra.mrb[122].mxu1 %v1610_v4 }
 0x59b   :  { %3350 = vmatprep.mubr.f32.mxu1 %v14596_v12  ;;  %v1616_v12 = vld [vmem:[#allocation2 + $0x3af] sm:$0xff] }
 0x59e   :  { %3351 = vmatmul.mubr.f32.gmra.mrb[124].mxu1 %v1611_v42 }
 0x59f   :  { %3355 = vmatprep.mubr.f32.mxu1 %v14600_v29  ;;  %v1617_v29 = vld [vmem:[#allocation2 + $0x3c7] sm:$0xff] }
 0x5a2   :  { %3356 = vmatmul.mubr.f32.gmra.mrb[126].mxu1 %v1612_v63  ;;  %v20989_v63 = vld [vmem:[#allocation12_spill] sm:$0xff] }
 0x5a3   :  { %3360 = vmatprep.mubr.f32.mxu1 %v14604_v26 }
 0x5a6   :  { %3361 = vmatmul.mubr.f32.gmra.mrb[128].mxu1 %v1613_v30 }
 0x5a7   :  { %3365 = vmatprep.mubr.f32.mxu1 %v14608_v6 }
 0x5aa   :  { %3366 = vmatmul.mubr.f32.gmra.mrb[130].mxu1 %v1614_v55 }
 0x5ab   :  { %3370 = vmatprep.mubr.f32.mxu1 %v14612_v46 }
 0x5ae   :  { %3371 = vmatmul.mubr.f32.gmra.mrb[132].mxu1 %v1615_v7 }
 0x5af   :  { %3375 = vmatprep.mubr.f32.mxu1 %v14616_v2  ;;  %v20978_v2 = vld [vmem:[#allocation17_spill] sm:$0xff] }
 0x5b2   :  { %3376 = vmatmul.mubr.f32.gmra.mrb[134].mxu1 %v1616_v12  ;;  %v20990_v12 = vld [vmem:[#allocation26_spill] sm:$0xff] }
 0x5b3   :  { %3380 = vmatprep.mubr.f32.mxu1 %v14620_v13 }
 0x5b6   :  { %3381 = vmatmul.mubr.f32.gmra.mrb[136].mxu1 %v1617_v29 }
 0x5b7   :  { %3385 = vmatprep.mubr.f32.mxu1 %v14624_v3  ;;  %v1620_v3 = vld [vmem:[#allocation2 + $0x3ef] sm:$0xff] }
 0x5b9   :  { %v3122_v26 = vpop.f32.mrb[32].mxu1 }
 0x5ba   :  { %v14714_v6 = vadd.f32 %v20977_v62, %v3122_v26  ;;  %v3124_v41 = vpop.f32.mrb[33].mxu1  ;;  %3386 = vmatmul.mubr.f32.gmra.mrb[138].mxu1 %v1618_v25  ;;  %v20991_v62 = vld [vmem:[#allocation52_spill] sm:$0xff] }
 0x5bb   :  { %3390 = vmatprep.mubr.f32.mxu1 %v14628_v27  ;;  %v1621_v27 = vld [vmem:[#allocation2 + $0x407] sm:$0xff] }
 0x5bd   :  { %v3127_v46 = vpop.f32.mrb[34].mxu1 }
 0x5be   :  { %v14718_v48 = vadd.f32 %v20978_v2, %v3127_v46  ;;  %v3129_v1 = vpop.f32.mrb[35].mxu1  ;;  %3391 = vmatmul.mubr.f32.gmra.mrb[140].mxu1 %v1619_v61  ;;  %v4304_v46 = vld [vmem:[%s20417_s3] sm:$0xff]  ;;  %v4305_v61 = vld [vmem:[%s20417_s3 + $0x8] sm:$0xff] }
 0x5bf   :  { %3395 = vmatprep.mubr.f32.mxu1 %v14632_v20  ;;  %v1622_v20 = vld [vmem:[#allocation2 + $0x40f] sm:$0xff]  ;;  %v10613_v2 = vpack.c.bf16 %v4305_v61, %v4304_v46 }
 0x5c0   :  { %v21002_v46 = vld [vmem:[#allocation13_spill] sm:$0xff] }
 0x5c1   :  { %v3132_v13 = vpop.f32.mrb[36].mxu1  ;;  %10614 = vmatprep.subr.bf16.mxu0 %v10613_v2 }
 0x5c2   :  { %v14722_v32 = vadd.f32 %v20979_v50, %v3132_v13  ;;  %v3134_v15 = vpop.f32.mrb[37].mxu1  ;;  %3396 = vmatmul.mubr.f32.gmra.mrb[142].mxu1 %v1620_v3  ;;  %v20992_v13 = vld [vmem:[#allocation28_spill] sm:$0xff]  ;;  %10616 = vmatpush3.bf16.msra.mxu0 %v10613_v2 }
 0x5c3   :  { %3400 = vmatprep.mubr.f32.mxu1 %v14636_v31  ;;  %v1623_v31 = vld [vmem:[#allocation2 + $0x427] sm:$0xff] }
 0x5c5   :  { %v3137_v51 = vpop.f32.mrb[38].mxu1 }
 0x5c6   :  { %v14726_v22 = vadd.f32 %v20980_v11, %v3137_v51  ;;  %v3139_v33 = vpop.f32.mrb[39].mxu1  ;;  %3401 = vmatmul.mubr.f32.gmra.mrb[144].mxu1 %v1621_v27  ;;  %v20993_v51 = vld [vmem:[#allocation54_spill] sm:$0xff] }
 0x5c7   :  { %3405 = vmatprep.mubr.f32.mxu1 %v14640_v37  ;;  %v1624_v37 = vld [vmem:[#allocation2 + $0x42f] sm:$0xff] }
 0x5c9   :  { %v3142_v59 = vpop.f32.mrb[40].mxu1 }
 0x5ca   :  { %v14730_v58 = vadd.f32 %v20981_v53, %v3142_v59  ;;  %v3144_v39 = vpop.f32.mrb[41].mxu1  ;;  %3406 = vmatmul.mubr.f32.gmra.mrb[146].mxu1 %v1622_v20  ;;  %v20994_v59 = vld [vmem:[#allocation29_spill] sm:$0xff] }
 0x5cb   :  { %3410 = vmatprep.mubr.f32.mxu1 %v14644_v49  ;;  %v1625_v49 = vld [vmem:[#allocation2 + $0x447] sm:$0xff] }
 0x5cd   :  { %v3147_v8 = vpop.f32.mrb[42].mxu1 }
 0x5ce   :  { %v14734_v57 = vadd.f32 %v20982_v9, %v3147_v8  ;;  %v3149_v28 = vpop.f32.mrb[43].mxu1  ;;  %3411 = vmatmul.mubr.f32.gmra.mrb[148].mxu1 %v1623_v31  ;;  %v20995_v8 = vld [vmem:[#allocation55_spill] sm:$0xff] }
 0x5cf   :  { %3415 = vmatprep.mubr.f32.mxu1 %v14648_v36  ;;  %v1626_v36 = vld [vmem:[#allocation2 + $0x44f] sm:$0xff] }
 0x5d0   :  { %v4306_v28 = vld [vmem:[%s20417_s3 + $0x10] sm:$0xff] }
 0x5d1   :  { %v3152_v45 = vpop.f32.mrb[44].mxu1 }
 0x5d2   :  { %v14738_v38 = vadd.f32 %v20983_v35, %v3152_v45  ;;  %v3154_v0 = vpop.f32.mrb[45].mxu1  ;;  %3416 = vmatmul.mubr.f32.gmra.mrb[150].mxu1 %v1624_v37  ;;  %v4307_v45 = vld [vmem:[%s20417_s3 + $0x18] sm:$0xff] }
 0x5d3   :  { %3420 = vmatprep.mubr.f32.mxu1 %v20984_v10  ;;  %v10617_v37 = vpack.c.bf16 %v4307_v45, %v4306_v28  ;;  %v20996_v0 = vld [vmem:[#allocation56_spill] sm:$0xff]  ;;  %v21005_v28 = vld [vmem:[#allocation35_spill] sm:$0xff] }
 0x5d5   :  { %v3157_v18 = vpop.f32.mrb[46].mxu1  ;;  %10618 = vmatprep.subr.bf16.mxu0 %v10617_v37 }
 0x5d6   :  { %v14742_v19 = vadd.f32 %v20985_v43, %v3157_v18  ;;  %v3159_v54 = vpop.f32.mrb[47].mxu1  ;;  %3421 = vmatmul.mubr.f32.gmra.mrb[152].mxu1 %v1625_v49  ;;  %10620 = vmatpush3.bf16.msra.mxu0 %v10617_v37  ;;  %v20997_v43 = vld [vmem:[#allocation11_spill] sm:$0xff] }
 0x5d7   :  { %3425 = vmatprep.mubr.f32.mxu1 %v14654_v34 }
 0x5d9   :  { %v3162_v23 = vpop.f32.mrb[48].mxu1 }
 0x5da   :  { %v14746_v47 = vadd.f32 %v20986_v24, %v3162_v23  ;;  %v3164_v17 = vpop.f32.mrb[49].mxu1  ;;  %3426 = vmatmul.mubr.f32.gmra.mrb[154].mxu1 %v1626_v36  ;;  %v20998_v24 = vld [vmem:[#allocation31_spill] sm:$0xff] }
 0x5db   :  { %3430 = vmatprep.mubr.f32.mxu1 %v14687_v5 }
 0x5dd   :  { %v3167_v44 = vpop.f32.mrb[50].mxu1 }
 0x5de   :  { %v14750_v21 = vadd.f32 %v20987_v56, %v3167_v44  ;;  %v3169_v52 = vpop.f32.mrb[51].mxu1  ;;  %3431 = vmatmul.mubr.f32.gmra.mrb[156].mxu1 %v1627_v40  ;;  %v20999_v56 = vld [vmem:[#allocation30_spill] sm:$0xff] }
 0x5df   :  { %3435 = vmatprep.mubr.f32.mxu1 %v14687_v5 }
 0x5e1   :  { %v3172_v34 = vpop.f32.mrb[52].mxu1 }
 0x5e2   :  { %v14754_v16 = vadd.f32 %v20988_v14, %v3172_v34  ;;  %v3174_v4 = vpop.f32.mrb[53].mxu1  ;;  %3436 = vmatmul.mubr.f32.gmra.mrb[158].mxu1 %v1628_v60  ;;  %v4308_v34 = vld [vmem:[%s20417_s3 + $0x20] sm:$0xff]  ;;  %v4309_v14 = vld [vmem:[%s20417_s3 + $0x28] sm:$0xff] }
 0x5e3   :  { %v10621_v4 = vpack.c.bf16 %v4309_v14, %v4308_v34  ;;  %v21011_v34 = vld [vmem:[#allocation42_spill] sm:$0xff] }
 0x5e5   :  { %v3177_v42 = vpop.f32.mrb[54].mxu1  ;;  %10622 = vmatprep.subr.bf16.mxu0 %v10621_v4 }
 0x5e6   :  { %v14757_v30 = vadd.f32 %v20989_v63, %v3177_v42  ;;  %v3179_v55 = vpop.f32.mrb[55].mxu1  ;;  %v21000_v63 = vld [vmem:[#allocation33_spill] sm:$0xff]  ;;  %10624 = vmatpush3.bf16.msra.mxu0 %v10621_v4 }
 0x5e9   :  { %v3182_v7 = vpop.f32.mrb[56].mxu1 }
 0x5ea   :  { %v14760_v29 = vadd.f32 %v20990_v12, %v3182_v7  ;;  %v3184_v26 = vpop.f32.mrb[57].mxu1 }
 0x5eb   :  { %v21001_v26 = vld [vmem:[#allocation32_spill] sm:$0xff] }
 0x5ed   :  { %v3187_v25 = vpop.f32.mrb[58].mxu1 }
 0x5ee   :  { %v14763_v5 = vadd.f32 %v20991_v62, %v3187_v25  ;;  %v3189_v41 = vpop.f32.mrb[59].mxu1 }
 0x5f1   :  { %v3192_v1 = vpop.f32.mrb[60].mxu1 }
 0x5f2   :  { %v14772_v3 = vadd.f32 %v20992_v13, %v3192_v1  ;;  %v3194_v50 = vpop.f32.mrb[61].mxu1  ;;  %v21003_v13 = vld [vmem:[#allocation34_spill] sm:$0xff] }
 0x5f5   :  { %v3197_v15 = vpop.f32.mrb[62].mxu1 }
 0x5f6   :  { %v14775_v27 = vadd.f32 %v20993_v51, %v3197_v15  ;;  %v3199_v11 = vpop.f32.mrb[63].mxu1  ;;  %v4310_v51 = vld [vmem:[%s20417_s3 + $0x30] sm:$0xff] }
 0x5f7   :  { %v4311_v11 = vld [vmem:[%s20417_s3 + $0x38] sm:$0xff] }
 0x5f9   :  { %v3202_v33 = vpop.f32.mrb[64].mxu1 }
 0x5fa   :  { %v14778_v20 = vadd.f32 %v20994_v59, %v3202_v33  ;;  %v3204_v53 = vpop.f32.mrb[65].mxu1  ;;  %v10625_v33 = vpack.c.bf16 %v4311_v11, %v4310_v51 }
 0x5fb   :  { %v21004_v53 = vld [vmem:[#allocation38_spill] sm:$0xff] }
 0x5fc   :  { %10626 = vmatprep.subr.bf16.mxu0 %v10625_v33 }
 0x5fd   :  { %v3207_v39 = vpop.f32.mrb[66].mxu1  ;;  %10628 = vmatpush3.bf16.msra.mxu0 %v10625_v33 }
 0x5fe   :  { %v14781_v31 = vadd.f32 %v20995_v8, %v3207_v39  ;;  %v3209_v9 = vpop.f32.mrb[67].mxu1 }
 0x601   :  { %v3212_v35 = vpop.f32.mrb[68].mxu1 }
 0x602   :  { %v14790_v10 = vadd.f32 %v20996_v0, %v3212_v35  ;;  %v3214_v18 = vpop.f32.mrb[69].mxu1  ;;  %v21007_v0 = vld [vmem:[#allocation41_spill] sm:$0xff] }
 0x605   :  { %v3217_v49 = vpop.f32.mrb[70].mxu1 }
 0x606   :  { %v14793_v54 = vadd.f32 %v20997_v43, %v3217_v49  ;;  %v3219_v23 = vpop.f32.mrb[71].mxu1 }
 0x607   :  { %v21009_v23 = vld [vmem:[#allocation40_spill] sm:$0xff] }
 0x609   :  { %v3222_v36 = vpop.f32.mrb[72].mxu1 }
 0x60a   :  { %v14796_v17 = vadd.f32 %v20998_v24, %v3222_v36  ;;  %v3224_v40 = vpop.f32.mrb[73].mxu1 }
 0x60b   :  { %v4312_v40 = vld [vmem:[%s20417_s3 + $0x40] sm:$0xff] }
 0x60d   :  { %v3227_v44 = vpop.f32.mrb[74].mxu1 }
 0x60e   :  { %v14799_v52 = vadd.f32 %v20999_v56, %v3227_v44  ;;  %v3229_v60 = vpop.f32.mrb[75].mxu1  ;;  %v4313_v44 = vld [vmem:[%s20417_s3 + $0x48] sm:$0xff] }
 0x60f   :  { %v10629_v56 = vpack.c.bf16 %v4313_v44, %v4312_v40  ;;  %v3901_v44 = vmul.f32 %v14738_v38, %v14738_v38 }
 0x611   :  { %v3232_v42 = vpop.f32.mrb[76].mxu1  ;;  %10630 = vmatprep.subr.bf16.mxu0 %v10629_v56 }
 0x612   :  { %v14808_v55 = vadd.f32 %v21000_v63, %v3232_v42  ;;  %v3234_v7 = vpop.f32.mrb[77].mxu1  ;;  %10632 = vmatpush3.bf16.msra.mxu0 %v10629_v56  ;;  %v21013_v63 = vld [vmem:[#allocation21_spill] sm:$0xff] }
 0x615   :  { %v3237_v12 = vpop.f32.mrb[78].mxu1 }
 0x616   :  { %v14811_v25 = vadd.f32 %v21001_v26, %v3237_v12  ;;  %v3239_v62 = vpop.f32.mrb[79].mxu1 }
 0x617   :  { %v3896_v62 = vmul.f32 %v14718_v48, %v14718_v48 }
 0x619   :  { %v3242_v41 = vpop.f32.mrb[80].mxu1 }
 0x61a   :  { %v14814_v61 = vadd.f32 %v21002_v46, %v3242_v41  ;;  %v3244_v2 = vpop.f32.mrb[81].mxu1  ;;  %v3895_v46 = vmul.f32 %v14714_v6, %v14714_v6 }
 0x61b   :  { %v3897_v2 = vmul.f32 %v14722_v32, %v14722_v32 }
 0x61c   :  { %v3959_v33 = vadd.f32 %v3896_v62, %v3895_v46 }
 0x61d   :  { %v3247_v1 = vpop.f32.mrb[82].mxu1 }
 0x61e   :  { %v14817_v50 = vadd.f32 %v21003_v13, %v3247_v1  ;;  %v3249_v15 = vpop.f32.mrb[83].mxu1  ;;  %v3826_v13 = vadd.f32 %v14718_v48, %v14714_v6 }
 0x61f   :  { %v21015_v15 = vld [vmem:[#allocation44_spill] sm:$0xff] }
 0x620   :  { %v14849_v26 = vpop.f32.mrb[94].mxu0 }
 0x621   :  { %v3252_v59 = vpop.f32.mrb[84].mxu1  ;;  %v14853_v41 = vpop.f32.mrb[95].mxu0 }
 0x622   :  { %v14826_v39 = vadd.f32 %v21004_v53, %v3252_v59  ;;  %v3254_v8 = vpop.f32.mrb[85].mxu1  ;;  %v3898_v59 = vmul.f32 %v14726_v22, %v14726_v22  ;;  %v3827_v53 = vadd.f32 %v3826_v13, %v14722_v32 }
 0x623   :  { %v3960_v8 = vadd.f32 %v3959_v33, %v3897_v2  ;;  %v3903_v2 = vmul.f32 %v14746_v47, %v14746_v47 }
 0x625   :  { %v3257_v9 = vpop.f32.mrb[86].mxu1 }
 0x626   :  { %v14829_v45 = vadd.f32 %v21005_v28, %v3257_v9  ;;  %v3259_v37 = vpop.f32.mrb[87].mxu1  ;;  %v3899_v9 = vmul.f32 %v14730_v58, %v14730_v58 }
 0x627   :  { %v3828_v37 = vadd.f32 %v3827_v53, %v14726_v22  ;;  %v3904_v53 = vmul.f32 %v14750_v21, %v14750_v21 }
 0x628   :  { %21006 = vst [vmem:[#allocation18_spill] sm:$0xff] %v14829_v45 }
 0x629   :  { %v3262_v35 = vpop.f32.mrb[88].mxu1 }
 0x62a   :  { %v14832_v18 = vadd.f32 %v21007_v0, %v3262_v35  ;;  %v3264_v49 = vpop.f32.mrb[89].mxu1  ;;  %v21016_v35 = vld [vmem:[#allocation43_spill] sm:$0xff] }
 0x62c   :  { %21008 = vst [vmem:[#allocation22_spill] sm:$0xff] %v14832_v18 }
 0x62d   :  { %v3267_v43 = vpop.f32.mrb[90].mxu1 }
 0x62e   :  { %v14835_v36 = vadd.f32 %v21009_v23, %v3267_v43  ;;  %v3269_v24 = vpop.f32.mrb[91].mxu1  ;;  %v3961_v43 = vadd.f32 %v3960_v8, %v3898_v59  ;;  %v3900_v23 = vmul.f32 %v14734_v57, %v14734_v57 }
 0x62f   :  { %v3829_v24 = vadd.f32 %v3828_v37, %v14730_v58 }
 0x630   :  { %21010 = vst [vmem:[#allocation10_spill] sm:$0xff] %v14835_v36  ;;  %v3962_v40 = vadd.f32 %v3961_v43, %v3899_v9 }
 0x631   :  { %v3272_v60 = vpop.f32.mrb[92].mxu1 }
 0x632   :  { %v14844_v14 = vadd.f32 %v21011_v34, %v3272_v60  ;;  %v3274_v4 = vpop.f32.mrb[93].mxu1  ;;  %v3830_v60 = vadd.f32 %v3829_v24, %v14734_v57  ;;  %v21017_v34 = vld [vmem:[#allocation46_spill] sm:$0xff] }
 0x634   :  { %21012 = vst [vmem:[#allocation20_spill] sm:$0xff] %v14844_v14  ;;  %v3831_v62 = vadd.f32 %v3830_v60, %v14738_v38  ;;  %v3907_v60 = vmul.f32 %v14760_v29, %v14760_v29 }
 0x635   :  { %v3277_v42 = vpop.f32.mrb[94].mxu1 }
 0x636   :  { %v14847_v7 = vadd.f32 %v21013_v63, %v3277_v42  ;;  %v3279_v12 = vpop.f32.mrb[95].mxu1  ;;  %v3963_v63 = vadd.f32 %v3962_v40, %v3900_v23  ;;  %v3832_v13 = vadd.f32 %v3831_v62, %v14742_v19  ;;  %v3906_v40 = vmul.f32 %v14757_v30, %v14757_v30 }
 0x637   :  { %v3902_v12 = vmul.f32 %v14742_v19, %v14742_v19 }
 0x638   :  { %21014 = vst [vmem:[#allocation5_spill] sm:$0xff] %v14847_v7  ;;  %v3964_v46 = vadd.f32 %v3963_v63, %v3901_v44  ;;  %v3833_v8 = vadd.f32 %v3832_v13, %v14746_v47  ;;  %v21020_v63 = vld [vmem:[#allocation47_spill] sm:$0xff] }
 0x639   :  { %v3282_v1 = vpop.f32.mrb[96].mxu1 }
 0x63a   :  { %v14862_v51 = vadd.f32 %v21015_v15, %v3282_v1  ;;  %v3284_v11 = vpop.f32.mrb[97].mxu1  ;;  %v21018_v15 = vld [vmem:[#allocation45_spill] sm:$0xff]  ;;  %v3965_v59 = vadd.f32 %v3964_v46, %v3902_v12 }
 0x63c   :  { %v3966_v9 = vadd.f32 %v3965_v59, %v3903_v2  ;;  %v3908_v2 = vmul.f32 %v14763_v5, %v14763_v5 }
 0x63d   :  { %v3287_v28 = vpop.f32.mrb[98].mxu1 }
 0x63e   :  { %v14871_v0 = vadd.f32 %v21016_v35, %v3287_v28  ;;  %v3289_v49 = vpop.f32.mrb[99].mxu1  ;;  %v3905_v28 = vmul.f32 %v14754_v16, %v14754_v16  ;;  %v3834_v35 = vadd.f32 %v3833_v8, %v14750_v21  ;;  %v3967_v24 = vadd.f32 %v3966_v9, %v3904_v53  ;;  %v21022_v53 = vld [vmem:[#allocation53_spill] sm:$0xff] }
 0x63f   :  { %v21019_v49 = vld [vmem:[#allocation48_spill] sm:$0xff] }
 0x640   :  { %v3835_v44 = vadd.f32 %v3834_v35, %v14754_v16 }
 0x641   :  { %v3292_v56 = vpop.f32.mrb[100].mxu1 }
 0x642   :  { %v14880_v4 = vadd.f32 %v21017_v34, %v3292_v56  ;;  %v3294_v42 = vpop.f32.mrb[101].mxu1  ;;  %v3968_v56 = vadd.f32 %v3967_v24, %v3905_v28 }
 0x643   :  { %v3836_v42 = vadd.f32 %v3835_v44, %v14757_v30  ;;  %v21023_v44 = vld [vmem:[#allocation50_spill] sm:$0xff] }
 0x644   :  { %v3969_v46 = vadd.f32 %v3968_v56, %v3906_v40 }
 0x645   :  { %v3297_v1 = vpop.f32.mrb[102].mxu1 }
 0x646   :  { %v14889_v11 = vadd.f32 %v21018_v15, %v3297_v1  ;;  %v3299_v33 = vpop.f32.mrb[103].mxu1  ;;  %v3837_v1 = vadd.f32 %v3836_v42, %v14760_v29  ;;  %v3970_v13 = vadd.f32 %v3969_v46, %v3907_v60  ;;  %v3909_v15 = vmul.f32 %v14772_v3, %v14772_v3 }
 0x647   :  { %v3912_v42 = vmul.f32 %v14781_v31, %v14781_v31  ;;  %v3913_v46 = vmul.f32 %v14790_v10, %v14790_v10 }
 0x648   :  { %v3838_v59 = vadd.f32 %v3837_v1, %v14763_v5  ;;  %v3971_v28 = vadd.f32 %v3970_v13, %v3908_v2  ;;  %v21025_v13 = vld [vmem:[#allocation57_spill] sm:$0xff] }
 0x649   :  { %v3302_v37 = vpop.f32.mrb[104].mxu1 }
 0x64a   :  { %v14898_v43 = vadd.f32 %v21019_v49, %v3302_v37  ;;  %v3304_v23 = vpop.f32.mrb[105].mxu1  ;;  %v3910_v37 = vmul.f32 %v14775_v27, %v14775_v27  ;;  %v3839_v35 = vadd.f32 %v3838_v59, %v14772_v3  ;;  %v3972_v49 = vadd.f32 %v3971_v28, %v3909_v15 }
 0x64b   :  { %v3911_v23 = vmul.f32 %v14778_v20, %v14778_v20 }
 0x64c   :  { %v3840_v40 = vadd.f32 %v3839_v35, %v14775_v27 }
 0x64d   :  { %v3307_v34 = vpop.f32.mrb[106].mxu1 }
 0x64e   :  { %v14907_v12 = vadd.f32 %v21020_v63, %v3307_v34  ;;  %v3309_v62 = vpop.f32.mrb[107].mxu1  ;;  %v3973_v34 = vadd.f32 %v3972_v49, %v3910_v37  ;;  %v3841_v63 = vadd.f32 %v3840_v40, %v14778_v20  ;;  %v3915_v37 = vmul.f32 %v14796_v17, %v14796_v17 }
 0x650   :  { %21021 = vst [vmem:[#allocation7_spill] sm:$0xff] %v14907_v12  ;;  %v3974_v62 = vadd.f32 %v3973_v34, %v3911_v23  ;;  %v3842_v1 = vadd.f32 %v3841_v63, %v14781_v31  ;;  %v21026_v23 = vld [vmem:[#allocation14_spill] sm:$0xff]  ;;  %v3917_v63 = vmul.f32 %v14808_v55, %v14808_v55 }
 0x651   :  { %v3312_v33 = vpop.f32.mrb[108].mxu1 }
 0x652   :  { %v14916_v8 = vadd.f32 %v21022_v53, %v3312_v33  ;;  %v3314_v9 = vpop.f32.mrb[109].mxu1  ;;  %v3975_v59 = vadd.f32 %v3974_v62, %v3912_v42  ;;  %v3914_v53 = vmul.f32 %v14793_v54, %v14793_v54 }
 0x653   :  { %v3843_v9 = vadd.f32 %v3842_v1, %v14790_v10 }
 0x654   :  { %v3976_v28 = vadd.f32 %v3975_v59, %v3913_v46  ;;  %v3918_v59 = vmul.f32 %v14811_v25, %v14811_v25 }
 0x655   :  { %v3317_v24 = vpop.f32.mrb[110].mxu1  ;;  %v3844_v49 = vadd.f32 %v3843_v9, %v14793_v54 }
 0x656   :  { %v14925_v56 = vadd.f32 %v21023_v44, %v3317_v24  ;;  %v3319_v60 = vpop.f32.mrb[111].mxu1  ;;  %v3977_v44 = vadd.f32 %v3976_v28, %v3914_v53  ;;  %v3919_v28 = vmul.f32 %v14814_v61, %v14814_v61 }
 0x657   :  { %v3916_v60 = vmul.f32 %v14799_v52, %v14799_v52  ;;  %v3845_v34 = vadd.f32 %v3844_v49, %v14796_v17  ;;  %v21029_v49 = vld [vmem:[#allocation58_spill] sm:$0xff] }
 0x658   :  { %21024 = vst [vmem:[#allocation25_spill] sm:$0xff] %v14925_v56  ;;  %v3978_v42 = vadd.f32 %v3977_v44, %v3915_v37 }
 0x659   :  { %v3322_v2 = vpop.f32.mrb[112].mxu1  ;;  %v3846_v46 = vadd.f32 %v3845_v34, %v14799_v52 }
 0x65a   :  { %v14934_v15 = vadd.f32 %v21025_v13, %v3322_v2  ;;  %v3324_v33 = vpop.f32.mrb[113].mxu1  ;;  %v21028_v2 = vld [vmem:[#allocation59_spill] sm:$0xff] }
 0x65b   :  { %v3979_v33 = vadd.f32 %v3978_v42, %v3916_v60  ;;  %v3847_v53 = vadd.f32 %v3846_v46, %v14808_v55  ;;  %v3920_v60 = vmul.f32 %v14817_v50, %v14817_v50 }
 0x65d   :  { %v3327_v35 = vpop.f32.mrb[114].mxu1  ;;  %v3980_v9 = vadd.f32 %v3979_v33, %v3917_v63  ;;  %v3921_v63 = vmul.f32 %v14826_v39, %v14826_v39 }
 0x65e   :  { %v14943_v24 = vadd.f32 %v21026_v23, %v3327_v35  ;;  %v3329_v40 = vpop.f32.mrb[115].mxu1  ;;  %v3848_v35 = vadd.f32 %v3847_v53, %v14811_v25 }
 0x65f   :  { %v3981_v44 = vadd.f32 %v3980_v9, %v3918_v59  ;;  %v3922_v59 = vmul.f32 %v14829_v45, %v14829_v45 }
 0x660   :  { %21027 = vst [vmem:[#allocation27_spill] sm:$0xff] %v14943_v24  ;;  %v3849_v34 = vadd.f32 %v3848_v35, %v14814_v61 }
 0x661   :  { %v3332_v62 = vpop.f32.mrb[116].mxu1  ;;  %v3982_v42 = vadd.f32 %v3981_v44, %v3919_v28  ;;  %v3923_v28 = vmul.f32 %v14832_v18, %v14832_v18 }
 0x662   :  { %v14952_v1 = vadd.f32 %v21028_v2, %v3332_v62  ;;  %v3334_v13 = vpop.f32.mrb[117].mxu1  ;;  %v3850_v46 = vadd.f32 %v3849_v34, %v14817_v50  ;;  %v21031_v2 = vld [vmem:[#allocation61_spill] sm:$0xff] }
 0x663   :  { %v3983_v53 = vadd.f32 %v3982_v42, %v3920_v60  ;;  %v3924_v60 = vmul.f32 %v14835_v36, %v14835_v36 }
 0x664   :  { %v3851_v9 = vadd.f32 %v3850_v46, %v14826_v39 }
 0x665   :  { %v3337_v37 = vpop.f32.mrb[118].mxu1 }
 0x666   :  { %v14961_v23 = vadd.f32 %v21029_v49, %v3337_v37  ;;  %v3339_v40 = vpop.f32.mrb[119].mxu1  ;;  %v3984_v37 = vadd.f32 %v3983_v53, %v3921_v63  ;;  %v3852_v49 = vadd.f32 %v3851_v9, %v14829_v45  ;;  %v3925_v63 = vmul.f32 %v14844_v14, %v14844_v14  ;;  %v4315_v53 = vld [vmem:[%s20417_s3 + $0x58] sm:$0xff] }
 0x667   :  { %v21032_v40 = vld [vmem:[#allocation60_spill] sm:$0xff]  ;;  %v4319_v45 = vld [vmem:[%s20417_s3 + $0x78] sm:$0xff] }
 0x668   :  { %21030 = vst [vmem:[#allocation37_spill] sm:$0xff] %v14961_v23  ;;  %v3853_v42 = vadd.f32 %v3852_v49, %v14832_v18  ;;  %v4318_v18 = vld [vmem:[%s20417_s3 + $0x70] sm:$0xff] }
 0x669   :  { %v3342_v62 = vpop.f32.mrb[120].mxu1 }
 0x66a   :  { %v14970_v13 = vadd.f32 %v21031_v2, %v3342_v62  ;;  %v3344_v33 = vpop.f32.mrb[121].mxu1  ;;  %v3985_v62 = vadd.f32 %v3984_v37, %v3922_v59  ;;  %v4316_v59 = vld [vmem:[%s20417_s3 + $0x60] sm:$0xff]  ;;  %v3854_v9 = vadd.f32 %v3853_v42, %v14835_v36 }
 0x66b   :  { %v4314_v33 = vld [vmem:[%s20417_s3 + $0x50] sm:$0xff]  ;;  %v21034_v37 = vld [vmem:[#allocation63_spill] sm:$0xff] }
 0x66c   :  { %v3986_v2 = vadd.f32 %v3985_v62, %v3923_v28  ;;  %v10633_v49 = vpack.c.bf16 %v4315_v53, %v4314_v33  ;;  %v3855_v42 = vadd.f32 %v3854_v9, %v14844_v14  ;;  %v3928_v14 = vmul.f32 %v14871_v0, %v14871_v0 }
 0x66d   :  { %v3347_v35 = vpop.f32.mrb[122].mxu1 }
 0x66e   :  { %v14979_v44 = vadd.f32 %v21032_v40, %v3347_v35  ;;  %v3349_v34 = vpop.f32.mrb[123].mxu1  ;;  %v4317_v40 = vld [vmem:[%s20417_s3 + $0x68] sm:$0xff]  ;;  %10634 = vmatprep.subr.bf16.mxu0 %v10633_v49 }
 0x66f   :  { %v3987_v34 = vadd.f32 %v3986_v2, %v3924_v60  ;;  %v10637_v62 = vpack.c.bf16 %v4317_v40, %v4316_v59  ;;  %10636 = vmatpush3.bf16.msra.mxu0 %v10633_v49  ;;  %v3856_v60 = vadd.f32 %v3855_v42, %v14847_v7  ;;  %v3927_v2 = vmul.f32 %v14862_v51, %v14862_v51  ;;  %v21035_v59 = vld [vmem:[#allocation62_spill] sm:$0xff] }
 0x670   :  { %21033 = vst [vmem:[#allocation16_spill] sm:$0xff] %v14979_v44  ;;  %v10641_v40 = vpack.c.bf16 %v4319_v45, %v4318_v18  ;;  %v3929_v42 = vmul.f32 %v14880_v4, %v14880_v4 }
 0x671   :  { %v3352_v46 = vpop.f32.mrb[124].mxu1  ;;  %v3988_v33 = vadd.f32 %v3987_v34, %v3925_v63  ;;  %10638 = vmatprep.subr.bf16.mxu0 %v10637_v62  ;;  %v3857_v9 = vadd.f32 %v3856_v60, %v14862_v51  ;;  %v3931_v60 = vmul.f32 %v14898_v43, %v14898_v43 }
 0x672   :  { %v14997_v28 = vadd.f32 %v21034_v37, %v3352_v46  ;;  %v3354_v35 = vpop.f32.mrb[125].mxu1  ;;  %v3926_v46 = vmul.f32 %v14847_v7, %v14847_v7  ;;  %v21037_v7 = vld [vmem:[#allocation65_spill] sm:$0xff] }
 0x673   :  { %10640 = vmatpush3.bf16.msra.mxu0 %v10637_v62  ;;  %v3858_v34 = vadd.f32 %v3857_v9, %v14871_v0  ;;  %v21040_v9 = vmov 0.0|0.0  }
 0x674   :  { %v3989_v36 = vadd.f32 %v3988_v33, %v3926_v46  ;;  %10642 = vmatprep.subr.bf16.mxu0 %v10641_v40  ;;  %v3930_v46 = vmul.f32 %v14889_v11, %v14889_v11 }
 0x675   :  { %v3357_v53 = vpop.f32.mrb[126].mxu1  ;;  %v3859_v18 = vadd.f32 %v3858_v34, %v14880_v4 }
 0x676   :  { %v15015_v37 = vadd.f32 %v21035_v59, %v3357_v53  ;;  %v3359_v35 = vpop.f32.mrb[127].mxu1  ;;  %v3990_v49 = vadd.f32 %v3989_v36, %v3927_v2  ;;  %v21038_v2 = vld [vmem:[#allocation64_spill] sm:$0xff] }
 0x677   :  { %10644 = vmatpush3.bf16.msra.mxu0 %v10641_v40  ;;  %v3860_v36 = vadd.f32 %v3859_v18, %v14889_v11 }
 0x678   :  { %21036 = vst [vmem:[#allocation39_spill] sm:$0xff] %v15015_v37  ;;  %v3991_v45 = vadd.f32 %v3990_v49, %v3928_v14  ;;  %10645 = vmatprep.subr.bf16.mxu0 %v21040_v9  ;;  %v3932_v49 = vmul.f32 %v14907_v12, %v14907_v12 }
 0x679   :  { %v3362_v63 = vpop.f32.mrb[128].mxu1 }
 0x67a   :  { %v15024_v53 = vadd.f32 %v21037_v7, %v3362_v63  ;;  %v3364_v59 = vpop.f32.mrb[129].mxu1  ;;  %v3992_v62 = vadd.f32 %v3991_v45, %v3929_v42  ;;  %v3861_v63 = vadd.f32 %v3860_v36, %v14898_v43  ;;  %v21041_v45 = vld [vmem:[#allocation67_spill] sm:$0xff] }
 0x67b   :  { %v3933_v59 = vmul.f32 %v14916_v8, %v14916_v8 }
 0x67c   :  { %v3993_v14 = vadd.f32 %v3992_v62, %v3930_v46  ;;  %v3862_v42 = vadd.f32 %v3861_v63, %v14907_v12  ;;  %v3934_v46 = vmul.f32 %v14925_v56, %v14925_v56 }
 0x67d   :  { %v3367_v33 = vpop.f32.mrb[130].mxu1 }
 0x67e   :  { %v15033_v35 = vadd.f32 %v21038_v2, %v3367_v33  ;;  %v3369_v7 = vpop.f32.mrb[131].mxu1  ;;  %v3994_v40 = vadd.f32 %v3993_v14, %v3931_v60  ;;  %v3935_v60 = vmul.f32 %v14934_v15, %v14934_v15  ;;  %v21043_v14 = vld [vmem:[#allocation66_spill] sm:$0xff] }
 0x67f   :  { %v3863_v7 = vadd.f32 %v3862_v42, %v14916_v8 }
 0x680   :  { %21039 = vst [vmem:[#allocation19_spill] sm:$0xff] %v15033_v35  ;;  %v3995_v2 = vadd.f32 %v3994_v40, %v3932_v49  ;;  %v3936_v49 = vmul.f32 %v14943_v24, %v14943_v24 }
 0x681   :  { %v3372_v34 = vpop.f32.mrb[132].mxu1  ;;  %v3864_v9 = vadd.f32 %v3863_v7, %v14925_v56 }
 0x682   :  { %v15043_v18 = vadd.f32 %v21041_v45, %v3372_v34  ;;  %v3374_v33 = vpop.f32.mrb[133].mxu1  ;;  %v3996_v36 = vadd.f32 %v3995_v2, %v3933_v59  ;;  %v3937_v59 = vmul.f32 %v14952_v1, %v14952_v1  ;;  %v21045_v2 = vld [vmem:[#allocation69_spill] sm:$0xff] }
 0x683   :  { %v3865_v45 = vadd.f32 %v3864_v9, %v14934_v15  ;;  %v3938_v9 = vmul.f32 %v14961_v23, %v14961_v23 }
 0x684   :  { %21042 = vst [vmem:[#allocation17_spill] sm:$0xff] %v15043_v18  ;;  %v3997_v34 = vadd.f32 %v3996_v36, %v3934_v46 }
 0x685   :  { %v3377_v62 = vpop.f32.mrb[134].mxu1  ;;  %v3866_v33 = vadd.f32 %v3865_v45, %v14943_v24 }
 0x686   :  { %v15052_v63 = vadd.f32 %v21043_v14, %v3377_v62  ;;  %v3379_v12 = vpop.f32.mrb[135].mxu1  ;;  %v3998_v42 = vadd.f32 %v3997_v34, %v3935_v60  ;;  %v3939_v60 = vmul.f32 %v14970_v13, %v14970_v13  ;;  %v21047_v34 = vld [vmem:[#allocation68_spill] sm:$0xff] }
 0x687   :  { %v3867_v12 = vadd.f32 %v3866_v33, %v14952_v1 }
 0x688   :  { %21044 = vst [vmem:[#allocation3_spill] sm:$0xff] %v15052_v63  ;;  %v3999_v62 = vadd.f32 %v3998_v42, %v3936_v49  ;;  %v3940_v49 = vmul.f32 %v14979_v44, %v14979_v44 }
 0x689   :  { %v3382_v40 = vpop.f32.mrb[136].mxu1  ;;  %v3868_v14 = vadd.f32 %v3867_v12, %v14961_v23 }
 0x68a   :  { %v15061_v7 = vadd.f32 %v21045_v2, %v3382_v40  ;;  %v3384_v56 = vpop.f32.mrb[137].mxu1  ;;  %v4000_v36 = vadd.f32 %v3999_v62, %v3937_v59  ;;  %v3941_v59 = vmul.f32 %v14997_v28, %v14997_v28  ;;  %v21049_v62 = vld [vmem:[#allocation71_spill] sm:$0xff] }
 0x68b   :  { %v3869_v56 = vadd.f32 %v3868_v14, %v14970_v13 }
 0x68c   :  { %21046 = vst [vmem:[#allocation4_spill] sm:$0xff] %v15061_v7  ;;  %v4001_v40 = vadd.f32 %v4000_v36, %v3938_v9  ;;  %v3942_v9 = vmul.f32 %v15015_v37, %v15015_v37 }
 0x68d   :  { %v3387_v46 = vpop.f32.mrb[138].mxu1  ;;  %v3870_v2 = vadd.f32 %v3869_v56, %v14979_v44 }
 0x68e   :  { %v15070_v45 = vadd.f32 %v21047_v34, %v3387_v46  ;;  %v3389_v24 = vpop.f32.mrb[139].mxu1  ;;  %v4002_v33 = vadd.f32 %v4001_v40, %v3939_v60  ;;  %v3943_v60 = vmul.f32 %v15024_v53, %v15024_v53  ;;  %v21051_v40 = vld [vmem:[#allocation70_spill] sm:$0xff] }
 0x68f   :  { %v3871_v24 = vadd.f32 %v3870_v2, %v14997_v28 }
 0x690   :  { %21048 = vst [vmem:[#allocation8_spill] sm:$0xff] %v15070_v45  ;;  %v4003_v46 = vadd.f32 %v4002_v33, %v3940_v49  ;;  %v3944_v49 = vmul.f32 %v15033_v35, %v15033_v35 }
 0x691   :  { %v3392_v42 = vpop.f32.mrb[140].mxu1  ;;  %v3872_v34 = vadd.f32 %v3871_v24, %v15015_v37 }
 0x692   :  { %v15079_v12 = vadd.f32 %v21049_v62, %v3392_v42  ;;  %v3394_v23 = vpop.f32.mrb[141].mxu1  ;;  %v4004_v14 = vadd.f32 %v4003_v46, %v3941_v59  ;;  %v3945_v59 = vmul.f32 %v15043_v18, %v15043_v18  ;;  %v21053_v46 = vld [vmem:[#allocation73_spill] sm:$0xff] }
 0x693   :  { %v3873_v23 = vadd.f32 %v3872_v34, %v15024_v53 }
 0x694   :  { %21050 = vst [vmem:[#allocation36_spill] sm:$0xff] %v15079_v12  ;;  %v4005_v42 = vadd.f32 %v4004_v14, %v3942_v9  ;;  %v3946_v9 = vmul.f32 %v15052_v63, %v15052_v63 }
 0x695   :  { %v3397_v36 = vpop.f32.mrb[142].mxu1  ;;  %v3874_v62 = vadd.f32 %v3873_v23, %v15033_v35 }
 0x696   :  { %v15088_v56 = vadd.f32 %v21051_v40, %v3397_v36  ;;  %v3399_v44 = vpop.f32.mrb[143].mxu1  ;;  %v4006_v2 = vadd.f32 %v4005_v42, %v3943_v60  ;;  %v3947_v60 = vmul.f32 %v15061_v7, %v15061_v7  ;;  %v21055_v42 = vld [vmem:[#allocation72_spill] sm:$0xff] }
 0x697   :  { %v3875_v44 = vadd.f32 %v3874_v62, %v15043_v18 }
 0x698   :  { %21052 = vst [vmem:[#allocation6_spill] sm:$0xff] %v15088_v56  ;;  %v4007_v36 = vadd.f32 %v4006_v2, %v3944_v49  ;;  %v3948_v49 = vmul.f32 %v15070_v45, %v15070_v45 }
 0x699   :  { %v3402_v33 = vpop.f32.mrb[144].mxu1  ;;  %v3876_v40 = vadd.f32 %v3875_v44, %v15052_v63 }
 0x69a   :  { %v15097_v24 = vadd.f32 %v21053_v46, %v3402_v33  ;;  %v3404_v37 = vpop.f32.mrb[145].mxu1  ;;  %v4008_v34 = vadd.f32 %v4007_v36, %v3945_v59  ;;  %v3949_v59 = vmul.f32 %v15079_v12, %v15079_v12  ;;  %v21057_v36 = vld [vmem:[#allocation75_spill] sm:$0xff] }
 0x69b   :  { %v3877_v37 = vadd.f32 %v3876_v40, %v15061_v7 }
 0x69c   :  { %21054 = vst [vmem:[#allocation15_spill] sm:$0xff] %v15097_v24  ;;  %v4009_v33 = vadd.f32 %v4008_v34, %v3946_v9  ;;  %v3950_v9 = vmul.f32 %v15088_v56, %v15088_v56 }
 0x69d   :  { %v3407_v14 = vpop.f32.mrb[146].mxu1  ;;  %v3878_v46 = vadd.f32 %v3877_v37, %v15070_v45 }
 0x69e   :  { %v15106_v23 = vadd.f32 %v21055_v42, %v3407_v14  ;;  %v3409_v35 = vpop.f32.mrb[147].mxu1  ;;  %v4010_v62 = vadd.f32 %v4009_v33, %v3947_v60  ;;  %v3951_v60 = vmul.f32 %v15097_v24, %v15097_v24  ;;  %v21059_v33 = vld [vmem:[#allocation74_spill] sm:$0xff] }
 0x69f   :  { %v3879_v35 = vadd.f32 %v3878_v46, %v15079_v12 }
 0x6a0   :  { %21056 = vst [vmem:[#allocation23_spill] sm:$0xff] %v15106_v23  ;;  %v4011_v14 = vadd.f32 %v4010_v62, %v3948_v49  ;;  %v3952_v49 = vmul.f32 %v15106_v23, %v15106_v23 }
 0x6a1   :  { %v3412_v2 = vpop.f32.mrb[148].mxu1  ;;  %v3880_v42 = vadd.f32 %v3879_v35, %v15088_v56 }
 0x6a2   :  { %v15115_v44 = vadd.f32 %v21057_v36, %v3412_v2  ;;  %v3414_v63 = vpop.f32.mrb[149].mxu1  ;;  %v4012_v40 = vadd.f32 %v4011_v14, %v3949_v59  ;;  %v21061_v14 = vld [vmem:[#allocation77_spill] sm:$0xff] }
 0x6a3   :  { %v3881_v63 = vadd.f32 %v3880_v42, %v15097_v24 }
 0x6a4   :  { %21058 = vst [vmem:[#allocation9_spill] sm:$0xff] %v15115_v44  ;;  %v4013_v2 = vadd.f32 %v4012_v40, %v3950_v9  ;;  %v3953_v59 = vmul.f32 %v15115_v44, %v15115_v44 }
 0x6a5   :  { %v3417_v34 = vpop.f32.mrb[150].mxu1  ;;  %v3882_v36 = vadd.f32 %v3881_v63, %v15106_v23 }
 0x6a6   :  { %v15124_v37 = vadd.f32 %v21059_v33, %v3417_v34  ;;  %v3419_v45 = vpop.f32.mrb[151].mxu1  ;;  %v4014_v46 = vadd.f32 %v4013_v2, %v3951_v60  ;;  %v21063_v2 = vld [vmem:[#allocation76_spill] sm:$0xff] }
 0x6a7   :  { %v3883_v45 = vadd.f32 %v3882_v36, %v15115_v44 }
 0x6a8   :  { %21060 = vst [vmem:[#allocation49_spill] sm:$0xff] %v15124_v37  ;;  %v4015_v34 = vadd.f32 %v4014_v46, %v3952_v49  ;;  %v3954_v9 = vmul.f32 %v15124_v37, %v15124_v37 }
 0x6a9   :  { %v3422_v62 = vpop.f32.mrb[152].mxu1  ;;  %v3884_v33 = vadd.f32 %v3883_v45, %v15124_v37 }
 0x6aa   :  { %v15133_v35 = vadd.f32 %v21061_v14, %v3422_v62  ;;  %v3424_v56 = vpop.f32.mrb[153].mxu1  ;;  %v4016_v42 = vadd.f32 %v4015_v34, %v3953_v59 }
 0x6ac   :  { %21062 = vst [vmem:[#allocation51_spill] sm:$0xff] %v15133_v35  ;;  %v3955_v60 = vmul.f32 %v15133_v35, %v15133_v35  ;;  %v4017_v24 = vadd.f32 %v4016_v42, %v3954_v9  ;;  %v3885_v62 = vadd.f32 %v3884_v33, %v15133_v35 }
 0x6ad   :  { %v3427_v40 = vpop.f32.mrb[154].mxu1 }
 0x6ae   :  { %v3813_v63 = vadd.f32 %v21063_v2, %v3427_v40  ;;  %v3429_v23 = vpop.f32.mrb[155].mxu1  ;;  %v4018_v46 = vadd.f32 %v4017_v24, %v3955_v60 }
 0x6b0   :  { %v3956_v56 = vmul.f32 %v3813_v63, %v3813_v63  ;;  %v3886_v36 = vadd.f32 %v3885_v62, %v3813_v63 }
 0x6b1   :  { %v3432_v49 = vpop.f32.mrb[156].mxu1 }
 0x6b2   :  { %v3818_v14 = vadd.f32 %v14853_v41, %v3432_v49  ;;  %v3434_v44 = vpop.f32.mrb[157].mxu1  ;;  %v4019_v12 = vadd.f32 %v4018_v46, %v3956_v56 }
 0x6b4   :  { %v3887_v59 = vadd.f32 %v3886_v36, %v3818_v14  ;;  %v3957_v34 = vmul.f32 %v3818_v14, %v3818_v14 }
 0x6b5   :  { %v3437_v45 = vpop.f32.mrb[158].mxu1 }
 0x6b6   :  { %v4020_v37 = vadd.f32 %v4019_v12, %v3957_v34  ;;  %v3823_v7 = vadd.f32 %v14849_v26, %v3437_v45  ;;  %v3439_v18 = vpop.f32.mrb[159].mxu1 }
 0x6b8   :  { %v3888_v40 = vadd.f32 %v3887_v59, %v3823_v7  ;;  %v3958_v23 = vmul.f32 %v3823_v7, %v3823_v7  ;;  %v21064_v59 = vld [vmem:[#allocation24_spill] sm:$0xff] }
 0x6b9   :  { %v4042_v45 = vsub.s32 2, %v21064_v59 }
 0x6ba   :  { %v3889_v9 = vrot.slane %v3888_v40, 4  ;;  %v4021_v42 = vadd.f32 %v4020_v37, %v3958_v23 }
 0x6bc   :  { %v3890_v33 = vadd.f32 %v3889_v9, %v3888_v40  ;;  %v4022_v2 = vrot.slane %v4021_v42, 4  ;;  %v11702_v40 = vld [vmem:[%s20416_s6] sm:$0xff] }
 0x6be   :  { %v3891_v35 = vrot.slane %v3890_v33, 2  ;;  %v4023_v24 = vadd.f32 %v4022_v2, %v4021_v42 }
 0x6c0   :  { %v3892_v60 = vadd.f32 %v3891_v35, %v3890_v33  ;;  %v4024_v62 = vrot.slane %v4023_v24, 2 }
 0x6c2   :  { %v3893_v41 = vrot.slane %v3892_v60, 1  ;;  %v4025_v44 = vadd.f32 %v4024_v62, %v4023_v24  ;;  %v4110_v24 = vsub.s32 3, %v21064_v59 }
 0x6c4   :  { %v3894_v56 = vadd.f32 %v3893_v41, %v3892_v60  ;;  %v4026_v49 = vrot.slane %v4025_v44, 1 }
 0x6c6   :  { %v4027_v46 = vadd.f32 %v4026_v49, %v4025_v44  ;;  %v4028_v36 = vmul.f32 0.001953125, %v3894_v56 }
 0x6c8   :  { %v4029_v12 = vmul.f32 0.001953125, %v4027_v46  ;;  %v4030_v34 = vmul.f32 %v4028_v36, %v4028_v36 }
 0x6ca   :  { %v4031_v26 = vsub.f32 %v4029_v12, %v4030_v34 }
 0x6cc   :  { %v4032_v18 = vadd.f32 1e-05, %v4031_v26 }
 0x6ce   :  { %11689 = vrsqrt.f32 %v4032_v18 }
 0x6d8   :  { %v11690_v37 = vpop.eup %11689 }
 0x6d9   :  { %v4034_v35 = vmul.f32 %v11702_v40, %v11690_v37 }
 0x6db   :  { %v4035_v23 = vmul.f32 %v4034_v35, %v4028_v36  ;;  %v15149_v9 = vrot.slane %v4034_v35, %v4042_v45 }
 0x6dd   :  { %v15152_v42 = vmul.f32 %v15149_v9, %v3823_v7  ;;  %v4037_v33 = vrot.slane %v4035_v23, 7  ;;  %v4044_v62 = vmul.f32 %v15149_v9, %v14714_v6  ;;  %v4045_v41 = vmul.f32 %v15149_v9, %v14718_v48 }
 0x6de   :  { %v4046_v44 = vmul.f32 %v15149_v9, %v14722_v32  ;;  %v4047_v56 = vmul.f32 %v15149_v9, %v14726_v22  ;;  %v4048_v7 = vmul.f32 %v15149_v9, %v14730_v58  ;;  %v4049_v49 = vmul.f32 %v15149_v9, %v14734_v57 }
 0x6df   :  { %v4039_v2 = vsub.f32 %v11702_v40, %v4037_v33  ;;  %v4050_v46 = vmul.f32 %v15149_v9, %v14738_v38  ;;  %v4051_v6 = vmul.f32 %v15149_v9, %v14742_v19  ;;  %v4052_v48 = vmul.f32 %v15149_v9, %v14746_v47 }
 0x6e0   :  { %v15176_v32 = vmul.f32 %v15149_v9, %v3813_v63  ;;  %v15179_v22 = vmul.f32 %v15149_v9, %v3818_v14  ;;  %v4053_v45 = vmul.f32 %v15149_v9, %v14750_v21  ;;  %v4054_v37 = vmul.f32 %v15149_v9, %v14754_v16 }
 0x6e1   :  { %v15155_v60 = vrot.slane %v4039_v2, %v4110_v24  ;;  %v4055_v35 = vmul.f32 %v15149_v9, %v14757_v30  ;;  %v4056_v23 = vmul.f32 %v15149_v9, %v14760_v29  ;;  %v4057_v33 = vmul.f32 %v15149_v9, %v14763_v5 }
 0x6e2   :  { %v4058_v24 = vmul.f32 %v15149_v9, %v14772_v3  ;;  %v4059_v21 = vmul.f32 %v15149_v9, %v14775_v27  ;;  %v4060_v5 = vmul.f32 %v15149_v9, %v14778_v20  ;;  %v4062_v20 = vmul.f32 %v15149_v9, %v14790_v10 }
 0x6e3   :  { %v4113_v58 = vadd.f32 %v15155_v60, %v4045_v41  ;;  %v4112_v36 = vadd.f32 %v15155_v60, %v4044_v62  ;;  %v4114_v57 = vadd.f32 %v15155_v60, %v4046_v44  ;;  %v4115_v38 = vadd.f32 %v15155_v60, %v4047_v56 }
 0x6e4   :  { %v4116_v12 = vadd.f32 %v15155_v60, %v4048_v7  ;;  %v4117_v34 = vadd.f32 %v15155_v60, %v4049_v49  ;;  %v4118_v47 = vadd.f32 %v15155_v60, %v4050_v46  ;;  %v15189_v63 = vadd.f32 %v15155_v60, %v4051_v6 }
 0x6e5   :  { %v4177_v19 = vmul.f32 0.1, %v4113_v58  ;;  %v4176_v14 = vmul.f32 0.1, %v4112_v36  ;;  %v4178_v26 = vmul.f32 0.1, %v4114_v57  ;;  %v15192_v18 = vadd.f32 %v15155_v60, %v4052_v48 }
 0x6e6   :  { %v4179_v62 = vmul.f32 0.1, %v4115_v38  ;;  %v4180_v41 = vmul.f32 0.1, %v4116_v12  ;;  %v15209_v44 = vadd.f32 %v15155_v60, %v4053_v45  ;;  %v15212_v30 = vadd.f32 %v15155_v60, %v4054_v37 }
 0x6e7   :  { %v4241_v40 = vmax.f32 %v4113_v58, %v4177_v19  ;;  %v4240_v2 = vmax.f32 %v4112_v36, %v4176_v14  ;;  %v4242_v16 = vmax.f32 %v4114_v57, %v4178_v26  ;;  %v15215_v29 = vadd.f32 %v15155_v60, %v4055_v35 }
 0x6e8   :  { %v15220_v3 = vadd.f32 %v15155_v60, %v4056_v23  ;;  %v15223_v27 = vadd.f32 %v15155_v60, %v4057_v33  ;;  %v15226_v56 = vadd.f32 %v15155_v60, %v4058_v24  ;;  %v4061_v7 = vmul.f32 %v15149_v9, %v14781_v31  ;;  %v21065_v33 = vld [vmem:[#allocation18_spill] sm:$0xff] }
 0x6e9   :  { %10005 = vmatprep.mubr.f32.mxu0 %v4240_v2  ;;  %v4181_v49 = vmul.f32 0.1, %v4117_v34  ;;  %v15231_v46 = vadd.f32 %v15155_v60, %v4059_v21  ;;  %v4063_v6 = vmul.f32 %v15149_v9, %v14793_v54  ;;  %v4243_v48 = vmax.f32 %v4115_v38, %v4179_v62  ;;  %v21066_v24 = vld [vmem:[#allocation22_spill] sm:$0xff] }
 0x6ea   :  { %10006 = vmatmul.mubr.f32.vlgmr.msra.gmra.mrb[96].mxu0 %v4241_v40  ;;  %v15238_v58 = vadd.f32 %v15155_v60, %v4060_v5  ;;  %v4064_v36 = vmul.f32 %v15149_v9, %v14796_v17  ;;  %v4065_v31 = vmul.f32 %v15149_v9, %v14799_v52  ;;  %v4244_v57 = vmax.f32 %v4116_v12, %v4180_v41  ;;  %v21068_v41 = vld [vmem:[#allocation20_spill] sm:$0xff] }
 0x6eb   :  { %10008 = vmatprep.mubr.f32.mxu0 %v4242_v16  ;;  %v4182_v19 = vmul.f32 0.1, %v4118_v47  ;;  %v4066_v14 = vmul.f32 %v15149_v9, %v14808_v55  ;;  %v4067_v10 = vmul.f32 %v15149_v9, %v14811_v25  ;;  %v4068_v54 = vmul.f32 %v15149_v9, %v14814_v61 }
 0x6ec   :  { %v4183_v38 = vmul.f32 0.1, %v15189_v63  ;;  %v4245_v26 = vmax.f32 %v4117_v34, %v4181_v49  ;;  %v15252_v17 = vadd.f32 %v15155_v60, %v4061_v7  ;;  %v15255_v52 = vadd.f32 %v15155_v60, %v4062_v20 }
 0x6ed   :  { %v15258_v12 = vadd.f32 %v15155_v60, %v4063_v6  ;;  %v4184_v55 = vmul.f32 0.1, %v15192_v18  ;;  %v15262_v25 = vadd.f32 %v15155_v60, %v4064_v36  ;;  %v15265_v61 = vadd.f32 %v15155_v60, %v4065_v31 }
 0x6ee   :  { %10009 = vmatmul.mubr.f32.gmra.mrb[98].mxu0 %v4243_v48  ;;  %v15268_v45 = vadd.f32 %v15155_v60, %v4066_v14  ;;  %v4246_v34 = vmax.f32 %v4118_v47, %v4182_v19  ;;  %v15271_v37 = vadd.f32 %v15155_v60, %v4067_v10  ;;  %v4069_v40 = vmul.f32 %v15149_v9, %v14817_v50  ;;  %v21067_v47 = vld [vmem:[#allocation10_spill] sm:$0xff]  ;;  %v21069_v50 = vld [vmem:[#allocation5_spill] sm:$0xff] }
 0x6ef   :  { %10011 = vmatprep.mubr.f32.mxu0 %v4244_v57  ;;  %v4070_v35 = vmul.f32 %v15149_v9, %v14826_v39  ;;  %v15278_v23 = vadd.f32 %v15155_v60, %v4068_v54  ;;  %v4071_v2 = vmul.f32 %v15149_v9, %v21065_v33  ;;  %v4072_v21 = vmul.f32 %v15149_v9, %v21066_v24 }
 0x6f0   :  { %v4073_v62 = vmul.f32 %v15149_v9, %v21067_v47  ;;  %v4074_v16 = vmul.f32 %v15149_v9, %v21068_v41  ;;  %v4075_v39 = vmul.f32 %v15149_v9, %v21069_v50  ;;  %v4247_v5 = vmax.f32 %v15189_v63, %v4183_v38  ;;  %v21072_v50 = vld [vmem:[#allocation27_spill] sm:$0xff] }
 0x6f1   :  { %v4248_v7 = vmax.f32 %v15192_v18, %v4184_v55  ;;  %v4185_v49 = vmul.f32 0.1, %v15209_v44  ;;  %v4186_v20 = vmul.f32 0.1, %v15212_v30  ;;  %v15295_v6 = vadd.f32 %v15155_v60, %v4069_v40  ;;  %v21070_v55 = vld [vmem:[#allocation7_spill] sm:$0xff] }
 0x6f2   :  { %10012 = vmatmul.mubr.f32.gmra.mrb[100].mxu0 %v4245_v26  ;;  %v15298_v48 = vadd.f32 %v15155_v60, %v4070_v35  ;;  %v15301_v36 = vadd.f32 %v15155_v60, %v4071_v2  ;;  %v4076_v31 = vmul.f32 %v15149_v9, %v14862_v51  ;;  %v15306_v63 = vadd.f32 %v15155_v60, %v4072_v21  ;;  %v21071_v35 = vld [vmem:[#allocation25_spill] sm:$0xff] }
 0x6f3   :  { %10014 = vmatprep.mubr.f32.mxu0 %v4246_v34  ;;  %v15309_v18 = vadd.f32 %v15155_v60, %v4073_v62  ;;  %v15312_v57 = vadd.f32 %v15155_v60, %v4074_v16  ;;  %v4077_v19 = vmul.f32 %v15149_v9, %v14871_v0  ;;  %v4078_v14 = vmul.f32 %v15149_v9, %v14880_v4 }
 0x6f4   :  { %v15319_v10 = vadd.f32 %v15155_v60, %v4075_v39  ;;  %v4079_v51 = vmul.f32 %v15149_v9, %v14889_v11  ;;  %v4249_v54 = vmax.f32 %v15209_v44, %v4185_v49  ;;  %v4187_v38 = vmul.f32 0.1, %v15215_v29 }
 0x6f5   :  { %v15326_v26 = vadd.f32 %v15155_v60, %v4076_v31  ;;  %v4080_v0 = vmul.f32 %v15149_v9, %v14898_v43  ;;  %v4081_v4 = vmul.f32 %v15149_v9, %v21070_v55  ;;  %v4250_v34 = vmax.f32 %v15212_v30, %v4186_v20 }
 0x6f6   :  { %10015 = vmatmul.mubr.f32.gmra.mrb[102].mxu0 %v4247_v5  ;;  %v4188_v40 = vmul.f32 0.1, %v15220_v3  ;;  %v4082_v11 = vmul.f32 %v15149_v9, %v14916_v8  ;;  %v4083_v44 = vmul.f32 %v15149_v9, %v21071_v35  ;;  %v4084_v33 = vmul.f32 %v15149_v9, %v14934_v15 }
 0x6f7   :  { %10017 = vmatprep.mubr.f32.mxu0 %v4248_v7  ;;  %v4189_v2 = vmul.f32 0.1, %v15223_v27  ;;  %v4190_v43 = vmul.f32 0.1, %v15226_v56  ;;  %v15343_v24 = vadd.f32 %v15155_v60, %v4077_v19  ;;  %v15346_v30 = vadd.f32 %v15155_v60, %v4078_v14  ;;  %v21073_v7 = vld [vmem:[#allocation37_spill] sm:$0xff]  ;;  %v21075_v14 = vld [vmem:[#allocation39_spill] sm:$0xff] }
 0x6f8   :  { %v15349_v8 = vadd.f32 %v15155_v60, %v4079_v51  ;;  %v4251_v21 = vmax.f32 %v15215_v29, %v4187_v38  ;;  %v15353_v47 = vadd.f32 %v15155_v60, %v4080_v0  ;;  %v15356_v15 = vadd.f32 %v15155_v60, %v4081_v4 }
 0x6f9   :  { %v15359_v62 = vadd.f32 %v15155_v60, %v4082_v11  ;;  %v4252_v41 = vmax.f32 %v15220_v3, %v4188_v40  ;;  %v15363_v16 = vadd.f32 %v15155_v60, %v4083_v44  ;;  %v4085_v39 = vmul.f32 %v15149_v9, %v21072_v50  ;;  %v21074_v3 = vld [vmem:[#allocation16_spill] sm:$0xff]  ;;  %v21076_v40 = vld [vmem:[#allocation19_spill] sm:$0xff]  ;;  %v21077_v44 = vld [vmem:[#allocation17_spill] sm:$0xff] }
 0x6fa   :  { %10018 = vmatmul.mubr.f32.gmra.mrb[104].mxu0 %v4249_v54  ;;  %v4086_v29 = vmul.f32 %v15149_v9, %v14952_v1  ;;  %v15370_v5 = vadd.f32 %v15155_v60, %v4084_v33  ;;  %v4087_v49 = vmul.f32 %v15149_v9, %v21073_v7  ;;  %v4088_v20 = vmul.f32 %v15149_v9, %v14970_v13  ;;  %v21079_v50 = vld [vmem:[#allocation4_spill] sm:$0xff] }
 0x6fb   :  { %10020 = vmatprep.mubr.f32.mxu0 %v4250_v34  ;;  %v4089_v31 = vmul.f32 %v15149_v9, %v21074_v3  ;;  %v4090_v19 = vmul.f32 %v15149_v9, %v14997_v28  ;;  %v4091_v1 = vmul.f32 %v15149_v9, %v21075_v14  ;;  %v4253_v51 = vmax.f32 %v15223_v27, %v4189_v2  ;;  %v21081_v3 = vld [vmem:[#allocation36_spill] sm:$0xff]  ;;  %v21083_v14 = vld [vmem:[#allocation15_spill] sm:$0xff] }
 0x6fc   :  { %v4254_v54 = vmax.f32 %v15226_v56, %v4190_v43  ;;  %v4191_v38 = vmul.f32 0.1, %v15231_v46  ;;  %v4192_v0 = vmul.f32 0.1, %v15238_v58  ;;  %v15387_v13 = vadd.f32 %v15155_v60, %v4085_v39 }
 0x6fd   :  { %v15390_v55 = vadd.f32 %v15155_v60, %v4086_v29  ;;  %v15393_v28 = vadd.f32 %v15155_v60, %v4087_v49  ;;  %v4092_v4 = vmul.f32 %v15149_v9, %v15024_v53  ;;  %v15398_v27 = vadd.f32 %v15155_v60, %v4088_v20  ;;  %v21080_v49 = vld [vmem:[#allocation8_spill] sm:$0xff] }
 0x6fe   :  { %10021 = vmatmul.mubr.f32.gmra.mrb[106].mxu0 %v4251_v21  ;;  %v15401_v56 = vadd.f32 %v15155_v60, %v4089_v31  ;;  %v15404_v34 = vadd.f32 %v15155_v60, %v4090_v19  ;;  %v4093_v11 = vmul.f32 %v15149_v9, %v21076_v40  ;;  %v15409_v35 = vadd.f32 %v15155_v60, %v4091_v1  ;;  %v21078_v21 = vld [vmem:[#allocation3_spill] sm:$0xff]  ;;  %v21082_v31 = vld [vmem:[#allocation6_spill] sm:$0xff] }
 0x6ff   :  { %10023 = vmatprep.mubr.f32.mxu0 %v4252_v41  ;;  %v4094_v53 = vmul.f32 %v15149_v9, %v21077_v44  ;;  %v4255_v33 = vmax.f32 %v15231_v46, %v4191_v38  ;;  %v4193_v2 = vmul.f32 0.1, %v15252_v17  ;;  %v15416_v43 = vadd.f32 %v15155_v60, %v4092_v4 }
 0x700   :  { %v4095_v41 = vmul.f32 %v15149_v9, %v21078_v21  ;;  %v4096_v39 = vmul.f32 %v15149_v9, %v21079_v50  ;;  %v4256_v29 = vmax.f32 %v15238_v58, %v4192_v0  ;;  %v4194_v7 = vmul.f32 0.1, %v15255_v52 }
 0x701   :  { %v4097_v20 = vmul.f32 %v15149_v9, %v21080_v49  ;;  %v4098_v46 = vmul.f32 %v15149_v9, %v21081_v3  ;;  %v4099_v19 = vmul.f32 %v15149_v9, %v21082_v31  ;;  %v4100_v1 = vmul.f32 %v15149_v9, %v21083_v14 }
 0x702   :  { %10024 = vmatmul.mubr.f32.gmra.mrb[108].mxu0 %v4253_v51  ;;  %v4195_v51 = vmul.f32 0.1, %v15258_v12  ;;  %v15434_v58 = vadd.f32 %v15155_v60, %v4093_v11  ;;  %v15440_v38 = vadd.f32 %v15155_v60, %v4095_v41  ;;  %v4257_v0 = vmax.f32 %v15252_v17, %v4193_v2  ;;  %v21084_v17 = vld [vmem:[#allocation23_spill] sm:$0xff]  ;;  %v21085_v41 = vld [vmem:[#allocation9_spill] sm:$0xff] }
 0x703   :  { %10026 = vmatprep.mubr.f32.mxu0 %v4254_v54  ;;  %v15437_v54 = vadd.f32 %v15155_v60, %v4094_v53  ;;  %v15444_v4 = vadd.f32 %v15155_v60, %v4096_v39  ;;  %v15447_v40 = vadd.f32 %v15155_v60, %v4097_v20  ;;  %v15450_v44 = vadd.f32 %v15155_v60, %v4098_v46  ;;  %v21086_v39 = vld [vmem:[#allocation49_spill] sm:$0xff] }
 0x704   :  { %v4258_v11 = vmax.f32 %v15255_v52, %v4194_v7  ;;  %v15455_v53 = vadd.f32 %v15155_v60, %v4099_v19  ;;  %v15458_v21 = vadd.f32 %v15155_v60, %v4100_v1  ;;  %v4101_v2 = vmul.f32 %v15149_v9, %v21084_v17  ;;  %v21087_v52 = vld [vmem:[#allocation51_spill] sm:$0xff] }
 0x705   :  { %v4102_v50 = vmul.f32 %v15149_v9, %v21085_v41  ;;  %v4104_v7 = vmul.f32 %v15149_v9, %v21087_v52  ;;  %v4259_v49 = vmax.f32 %v15258_v12, %v4195_v51  ;;  %v4197_v20 = vmul.f32 0.1, %v15265_v61 }
 0x706   :  { %10027 = vmatmul.mubr.f32.gmra.mrb[110].mxu0 %v4255_v33  ;;  %v4196_v33 = vmul.f32 0.1, %v15262_v25  ;;  %v4198_v3 = vmul.f32 0.1, %v15268_v45  ;;  %v15473_v31 = vadd.f32 %v15155_v60, %v4101_v2  ;;  %v15486_v12 = vadd.f32 %v15155_v60, %v15176_v32 }
 0x707   :  { %10029 = vmatprep.mubr.f32.mxu0 %v4256_v29  ;;  %v4103_v29 = vmul.f32 %v15149_v9, %v21086_v39  ;;  %v15476_v19 = vadd.f32 %v15155_v60, %v4102_v50  ;;  %v15482_v9 = vadd.f32 %v15155_v60, %v4104_v7  ;;  %v15494_v1 = vadd.f32 %v15155_v60, %v15152_v42 }
 0x708   :  { %v4260_v46 = vmax.f32 %v15262_v25, %v4196_v33  ;;  %v15490_v25 = vadd.f32 %v15155_v60, %v15179_v22  ;;  %v4261_v51 = vmax.f32 %v15265_v61, %v4197_v20  ;;  %v4200_v33 = vmul.f32 0.1, %v15278_v23 }
 0x709   :  { %v15479_v14 = vadd.f32 %v15155_v60, %v4103_v29  ;;  %v4201_v22 = vmul.f32 0.1, %v15295_v6  ;;  %v4202_v2 = vmul.f32 0.1, %v15298_v48  ;;  %v4203_v60 = vmul.f32 0.1, %v15301_v36 }
 0x70a   :  { %10030 = vmatmul.mubr.f32.gmra.mrb[112].mxu0 %v4257_v0  ;;  %v4199_v0 = vmul.f32 0.1, %v15271_v37  ;;  %v4264_v17 = vmax.f32 %v15278_v23, %v4200_v33  ;;  %v4205_v41 = vmul.f32 0.1, %v15309_v18  ;;  %v4206_v50 = vmul.f32 0.1, %v15312_v57 }
 0x70b   :  { %10032 = vmatprep.mubr.f32.mxu0 %v4258_v11  ;;  %v4262_v11 = vmax.f32 %v15268_v45, %v4198_v3  ;;  %v4265_v42 = vmax.f32 %v15295_v6, %v4201_v22  ;;  %v4266_v61 = vmax.f32 %v15298_v48, %v4202_v2  ;;  %v4204_v45 = vmul.f32 0.1, %v15306_v63 }
 0x70c   :  { %v4263_v32 = vmax.f32 %v15271_v37, %v4199_v0  ;;  %v4267_v37 = vmax.f32 %v15301_v36, %v4203_v60  ;;  %v4269_v6 = vmax.f32 %v15309_v18, %v4205_v41  ;;  %v4207_v39 = vmul.f32 0.1, %v15319_v10 }
 0x70d   :  { %v4268_v23 = vmax.f32 %v15306_v63, %v4204_v45  ;;  %v4270_v48 = vmax.f32 %v15312_v57, %v4206_v50  ;;  %v4208_v29 = vmul.f32 0.1, %v15326_v26  ;;  %v4209_v52 = vmul.f32 0.1, %v15343_v24 }
 0x70e   :  { %10033 = vmatmul.mubr.f32.gmra.mrb[114].mxu0 %v4259_v49  ;;  %v4271_v36 = vmax.f32 %v15319_v10, %v4207_v39  ;;  %v4210_v7 = vmul.f32 0.1, %v15346_v30  ;;  %v4211_v49 = vmul.f32 0.1, %v15349_v8  ;;  %v4212_v20 = vmul.f32 0.1, %v15353_v47 }
 0x70f   :  { %10035 = vmatprep.mubr.f32.mxu0 %v4260_v46  ;;  %v4272_v63 = vmax.f32 %v15326_v26, %v4208_v29  ;;  %v4273_v18 = vmax.f32 %v15343_v24, %v4209_v52  ;;  %v4213_v3 = vmul.f32 0.1, %v15356_v15  ;;  %v4214_v46 = vmul.f32 0.1, %v15359_v62 }
 0x710   :  { %v4274_v57 = vmax.f32 %v15346_v30, %v4210_v7  ;;  %v4275_v10 = vmax.f32 %v15349_v8, %v4211_v49  ;;  %v4276_v26 = vmax.f32 %v15353_v47, %v4212_v20  ;;  %v4216_v0 = vmul.f32 0.1, %v15370_v5  ;;  %v5826_v20 = vld [vmem:[%s20418_s4 + $0x18] sm:$0xff] }
 0x711   :  { %v4277_v24 = vmax.f32 %v15356_v15, %v4213_v3  ;;  %v4278_v30 = vmax.f32 %v15359_v62, %v4214_v46  ;;  %v4218_v33 = vmul.f32 0.1, %v15390_v55  ;;  %v4220_v22 = vmul.f32 0.1, %v15398_v27  ;;  %v5827_v3 = vld [vmem:[%s20418_s4 + $0x20] sm:$0xff] }
 0x712   :  { %10036 = vmatmul.mubr.f32.gmra.mrb[116].mxu0 %v4261_v51  ;;  %v4215_v51 = vmul.f32 0.1, %v15363_v16  ;;  %v4280_v47 = vmax.f32 %v15370_v5, %v4216_v0  ;;  %v4222_v2 = vmul.f32 0.1, %v15404_v34  ;;  %v4224_v60 = vmul.f32 0.1, %v15416_v43 }
 0x713   :  { %10038 = vmatprep.mubr.f32.mxu0 %v4262_v11  ;;  %v4217_v11 = vmul.f32 0.1, %v15387_v13  ;;  %v4282_v62 = vmax.f32 %v15390_v55, %v4218_v33  ;;  %v4284_v5 = vmax.f32 %v15398_v27, %v4220_v22  ;;  %v4226_v45 = vmul.f32 0.1, %v15437_v54  ;;  %v5831_v0 = vld [vmem:[%s20418_s4 + $0x40] sm:$0xff]  ;;  %v5834_v33 = vld [vmem:[%s20418_s4 + $0x58] sm:$0xff] }
 0x714   :  { %v4279_v8 = vmax.f32 %v15363_v16, %v4215_v51  ;;  %v4286_v55 = vmax.f32 %v15404_v34, %v4222_v2  ;;  %v4288_v27 = vmax.f32 %v15416_v43, %v4224_v60  ;;  %v4228_v41 = vmul.f32 0.1, %v15444_v4  ;;  %v5830_v51 = vld [vmem:[%s20418_s4 + $0x38] sm:$0xff]  ;;  %v5839_v2 = vld [vmem:[%s20418_s4 + $0x80] sm:$0xff] }
 0x715   :  { %v4281_v15 = vmax.f32 %v15387_v13, %v4217_v11  ;;  %v4290_v34 = vmax.f32 %v15437_v54, %v4226_v45  ;;  %v4230_v50 = vmul.f32 0.1, %v15450_v44  ;;  %v4232_v39 = vmul.f32 0.1, %v15458_v21  ;;  %v5842_v60 = vld [vmem:[%s20418_s4 + $0x98] sm:$0xff] }
 0x716   :  { %10039 = vmatmul.mubr.f32.gmra.mrb[118].mxu0 %v4263_v32  ;;  %v4219_v32 = vmul.f32 0.1, %v15393_v28  ;;  %v4292_v43 = vmax.f32 %v15444_v4, %v4228_v41  ;;  %v4234_v29 = vmul.f32 0.1, %v15476_v19  ;;  %v4236_v52 = vmul.f32 0.1, %v15482_v9 }
 0x717   :  { %10041 = vmatprep.mubr.f32.mxu0 %v4264_v17  ;;  %v4221_v17 = vmul.f32 0.1, %v15401_v56  ;;  %v4294_v54 = vmax.f32 %v15450_v44, %v4230_v50  ;;  %v4296_v4 = vmax.f32 %v15458_v21, %v4232_v39  ;;  %v4238_v7 = vmul.f32 0.1, %v15490_v25 }
 0x718   :  { %v4283_v16 = vmax.f32 %v15393_v28, %v4219_v32  ;;  %v4298_v44 = vmax.f32 %v15476_v19, %v4234_v29  ;;  %v4300_v21 = vmax.f32 %v15482_v9, %v4236_v52  ;;  %v5823_v9 = vld [vmem:[%s20418_s4] sm:$0xff] }
 0x719   :  { %v4285_v13 = vmax.f32 %v15401_v56, %v4221_v17  ;;  %v4302_v19 = vmax.f32 %v15490_v25, %v4238_v7  ;;  %v21088_v25 = vmov 0.0|0.0   ;;  %v5835_v32 = vld [vmem:[%s20418_s4 + $0x60] sm:$0xff]  ;;  %v5838_v17 = vld [vmem:[%s20418_s4 + $0x78] sm:$0xff] }
 0x71a   :  { %10042 = vmatmul.mubr.f32.gmra.mrb[120].mxu0 %v4265_v42  ;;  %v4223_v42 = vmul.f32 0.1, %v15409_v35 }
 0x71b   :  { %10044 = vmatprep.mubr.f32.mxu0 %v4266_v61  ;;  %v4225_v61 = vmul.f32 0.1, %v15434_v58 }
 0x71c   :  { %v4287_v28 = vmax.f32 %v15409_v35, %v4223_v42 }
 0x71d   :  { %v4289_v56 = vmax.f32 %v15434_v58, %v4225_v61 }
 0x71e   :  { %10045 = vmatmul.mubr.f32.gmra.mrb[122].mxu0 %v4267_v37  ;;  %v4227_v37 = vmul.f32 0.1, %v15440_v38 }
 0x71f   :  { %10047 = vmatprep.mubr.f32.mxu0 %v4268_v23  ;;  %v4229_v23 = vmul.f32 0.1, %v15447_v40 }
 0x720   :  { %v4291_v35 = vmax.f32 %v15440_v38, %v4227_v37 }
 0x721   :  { %v4293_v58 = vmax.f32 %v15447_v40, %v4229_v23 }
 0x722   :  { %10048 = vmatmul.mubr.f32.gmra.mrb[124].mxu0 %v4269_v6  ;;  %v4231_v6 = vmul.f32 0.1, %v15455_v53 }
 0x723   :  { %10050 = vmatprep.mubr.f32.mxu0 %v4270_v48  ;;  %v4233_v48 = vmul.f32 0.1, %v15473_v31 }
 0x724   :  { %v4295_v38 = vmax.f32 %v15455_v53, %v4231_v6 }
 0x725   :  { %v4297_v40 = vmax.f32 %v15473_v31, %v4233_v48 }
 0x726   :  { %10051 = vmatmul.mubr.f32.gmra.mrb[126].mxu0 %v4271_v36  ;;  %v4235_v36 = vmul.f32 0.1, %v15479_v14 }
 0x727   :  { %10053 = vmatprep.mubr.f32.mxu0 %v4272_v63  ;;  %v4237_v63 = vmul.f32 0.1, %v15486_v12 }
 0x728   :  { %v4299_v53 = vmax.f32 %v15479_v14, %v4235_v36  ;;  %v15580_v14 = vld [vmem:[#allocation2] sm:$0xff] }
 0x729   :  { %v4301_v31 = vmax.f32 %v15486_v12, %v4237_v63  ;;  %v5824_v12 = vld [vmem:[%s20418_s4 + $0x8] sm:$0xff] }
 0x72a   :  { %10054 = vmatmul.mubr.f32.gmra.mrb[128].mxu0 %v4273_v18  ;;  %v4239_v18 = vmul.f32 0.1, %v15494_v1 }
 0x72b   :  { %10056 = vmatprep.mubr.f32.mxu0 %v4274_v57  ;;  %v10646_v57 = vpack.c.bf16 %v5824_v12, %v5823_v9 }
 0x72c   :  { %v4303_v49 = vmax.f32 %v15494_v1, %v4239_v18  ;;  %v5825_v1 = vld [vmem:[%s20418_s4 + $0x10] sm:$0xff] }
 0x72d   :  { %10647 = vmatpush1.bf16.msra.mxu0 %v10646_v57 }
 0x72e   :  { %10057 = vmatmul.mubr.f32.gmra.mrb[130].mxu0 %v4275_v10  ;;  %10648 = vmatprep.subr.bf16.mxu0 %v21088_v25  ;;  %v10649_v10 = vpack.c.bf16 %v5826_v20, %v5825_v1 }
 0x72f   :  { %10059 = vmatprep.mubr.f32.mxu0 %v4276_v26  ;;  %v5828_v26 = vld [vmem:[%s20418_s4 + $0x28] sm:$0xff] }
 0x730   :  { %v10652_v46 = vpack.c.bf16 %v5828_v26, %v5827_v3 }
 0x731   :  { %10650 = vmatpush1.bf16.msra.mxu0 %v10649_v10 }
 0x732   :  { %10060 = vmatmul.mubr.f32.gmra.mrb[132].mxu0 %v4277_v24  ;;  %10651 = vmatprep.subr.bf16.mxu0 %v21088_v25  ;;  %v5829_v24 = vld [vmem:[%s20418_s4 + $0x30] sm:$0xff] }
 0x733   :  { %10062 = vmatprep.mubr.f32.mxu0 %v4278_v30  ;;  %v10655_v30 = vpack.c.bf16 %v5830_v51, %v5829_v24 }
 0x735   :  { %10653 = vmatpush1.bf16.msra.mxu0 %v10652_v46 }
 0x736   :  { %10063 = vmatmul.mubr.f32.gmra.mrb[134].mxu0 %v4279_v8  ;;  %10654 = vmatprep.subr.bf16.mxu0 %v21088_v25  ;;  %v5832_v8 = vld [vmem:[%s20418_s4 + $0x48] sm:$0xff] }
 0x737   :  { %10065 = vmatprep.mubr.f32.mxu0 %v4280_v47  ;;  %v10658_v11 = vpack.c.bf16 %v5832_v8, %v5831_v0  ;;  %v5833_v47 = vld [vmem:[%s20418_s4 + $0x50] sm:$0xff] }
 0x739   :  { %10656 = vmatpush1.bf16.msra.mxu0 %v10655_v30 }
 0x73a   :  { %10066 = vmatmul.mubr.f32.gmra.mrb[136].mxu0 %v4281_v15  ;;  %10657 = vmatprep.subr.bf16.mxu0 %v21088_v25  ;;  %v10661_v15 = vpack.c.bf16 %v5834_v33, %v5833_v47 }
 0x73b   :  { %10068 = vmatprep.mubr.f32.mxu0 %v4282_v62  ;;  %v5836_v62 = vld [vmem:[%s20418_s4 + $0x68] sm:$0xff] }
 0x73c   :  { %v10664_v22 = vpack.c.bf16 %v5836_v62, %v5835_v32 }
 0x73d   :  { %10659 = vmatpush1.bf16.msra.mxu0 %v10658_v11 }
 0x73e   :  { %10069 = vmatmul.mubr.f32.gmra.mrb[138].mxu0 %v4283_v16  ;;  %10660 = vmatprep.subr.bf16.mxu0 %v21088_v25  ;;  %v5837_v16 = vld [vmem:[%s20418_s4 + $0x70] sm:$0xff] }
 0x73f   :  { %10071 = vmatprep.mubr.f32.mxu0 %v4284_v5  ;;  %v10667_v5 = vpack.c.bf16 %v5838_v17, %v5837_v16 }
 0x741   :  { %10662 = vmatpush1.bf16.msra.mxu0 %v10661_v15 }
 0x742   :  { %10072 = vmatmul.mubr.f32.gmra.mrb[140].mxu0 %v4285_v13  ;;  %10663 = vmatprep.subr.bf16.mxu0 %v21088_v25  ;;  %v5840_v13 = vld [vmem:[%s20418_s4 + $0x88] sm:$0xff] }
 0x743   :  { %10074 = vmatprep.mubr.f32.mxu0 %v4286_v55  ;;  %v10670_v42 = vpack.c.bf16 %v5840_v13, %v5839_v2  ;;  %v5841_v55 = vld [vmem:[%s20418_s4 + $0x90] sm:$0xff] }
 0x745   :  { %10665 = vmatpush1.bf16.msra.mxu0 %v10664_v22 }
 0x746   :  { %10075 = vmatmul.mubr.f32.gmra.mrb[142].mxu0 %v4287_v28  ;;  %10666 = vmatprep.subr.bf16.mxu0 %v21088_v25  ;;  %v10673_v28 = vpack.c.bf16 %v5842_v60, %v5841_v55 }
 0x747   :  { %10077 = vmatprep.mubr.f32.mxu0 %v4288_v27 }
 0x749   :  { %10668 = vmatpush1.bf16.msra.mxu0 %v10667_v5 }
 0x74a   :  { %10078 = vmatmul.mubr.f32.gmra.mrb[144].mxu0 %v4289_v56  ;;  %10669 = vmatprep.subr.bf16.mxu0 %v21088_v25 }
 0x74b   :  { %10080 = vmatprep.mubr.f32.mxu0 %v4290_v34 }
 0x74d   :  { %10671 = vmatpush1.bf16.msra.mxu0 %v10670_v42 }
 0x74e   :  { %10081 = vmatmul.mubr.f32.gmra.mrb[146].mxu0 %v4291_v35  ;;  %10672 = vmatprep.subr.bf16.mxu0 %v21088_v25 }
 0x74f   :  { %10083 = vmatprep.mubr.f32.mxu0 %v4292_v43 }
 0x751   :  { %10674 = vmatpush1.bf16.msra.mxu0 %v10673_v28 }
 0x752   :  { %10084 = vmatmul.mubr.f32.gmra.mrb[148].mxu0 %v4293_v58  ;;  %10675 = vmatprep.subr.bf16.mxu0 %v21088_v25 }
 0x753   :  { %10086 = vmatprep.mubr.f32.mxu0 %v4294_v54 }
 0x756   :  { %10087 = vmatmul.mubr.f32.gmra.mrb[150].mxu0 %v4295_v38 }
 0x757   :  { %10089 = vmatprep.mubr.f32.mxu0 %v4296_v4 }
 0x75a   :  { %10090 = vmatmul.mubr.f32.gmra.mrb[152].mxu0 %v4297_v40 }
 0x75b   :  { %10092 = vmatprep.mubr.f32.mxu0 %v4298_v44 }
 0x75e   :  { %10093 = vmatmul.mubr.f32.gmra.mrb[154].mxu0 %v4299_v53 }
 0x75f   :  { %10095 = vmatprep.mubr.f32.mxu0 %v4300_v21 }
 0x762   :  { %10096 = vmatmul.mubr.f32.gmra.mrb[156].mxu0 %v4301_v31 }
 0x763   :  { %10098 = vmatprep.mubr.f32.mxu0 %v4302_v19 }
 0x766   :  { %10099 = vmatmul.mubr.f32.gmra.mrb[158].mxu0 %v4303_v49 }
 0x767   :  { %6031 = vmatprep.mubr.f32.mxu0 %v15580_v14 }
 0x7bd   :  { %v15652_v61 = vpop.f32.mrb[96].mxu0 }
 0x7be   :  { %v4775_v27 = vmul.f32 %v15652_v61, %v15652_v61  ;;  %v15657_v45 = vpop.f32.mrb[97].mxu0 }
 0x7bf   :  { %v4705_v56 = vadd.f32 %v15652_v61, %v15657_v45  ;;  %v4774_v37 = vmul.f32 %v15657_v45, %v15657_v45 }
 0x7c1   :  { %v4838_v34 = vadd.f32 %v4775_v27, %v4774_v37  ;;  %v15663_v41 = vpop.f32.mrb[98].mxu0 }
 0x7c2   :  { %v15665_v35 = vpop.f32.mrb[99].mxu0  ;;  %v4777_v50 = vmul.f32 %v15663_v41, %v15663_v41 }
 0x7c3   :  { %v4706_v23 = vadd.f32 %v4705_v56, %v15665_v35  ;;  %v4776_v43 = vmul.f32 %v15665_v35, %v15665_v35 }
 0x7c5   :  { %v4707_v58 = vadd.f32 %v15663_v41, %v4706_v23  ;;  %v4839_v6 = vadd.f32 %v4838_v34, %v4776_v43  ;;  %v15673_v54 = vpop.f32.mrb[100].mxu0 }
 0x7c6   :  { %v15675_v39 = vpop.f32.mrb[101].mxu0  ;;  %v4779_v29 = vmul.f32 %v15673_v54, %v15673_v54 }
 0x7c7   :  { %v4840_v38 = vadd.f32 %v4839_v6, %v4777_v50  ;;  %v4708_v48 = vadd.f32 %v4707_v58, %v15675_v39  ;;  %v4778_v4 = vmul.f32 %v15675_v39, %v15675_v39 }
 0x7c9   :  { %v4841_v40 = vadd.f32 %v4840_v38, %v4778_v4  ;;  %v15682_v36 = vpop.f32.mrb[102].mxu0  ;;  %v4709_v44 = vadd.f32 %v15673_v54, %v4708_v48 }
 0x7ca   :  { %v15685_v52 = vpop.f32.mrb[103].mxu0  ;;  %v4781_v7 = vmul.f32 %v15682_v36, %v15682_v36 }
 0x7cb   :  { %v4710_v53 = vadd.f32 %v4709_v44, %v15685_v52  ;;  %v4780_v63 = vmul.f32 %v15685_v52, %v15685_v52  ;;  %v4842_v21 = vadd.f32 %v4841_v40, %v4779_v29 }
 0x7cd   :  { %v4843_v31 = vadd.f32 %v4842_v21, %v4780_v63  ;;  %v15692_v18 = vpop.f32.mrb[104].mxu0  ;;  %v4711_v19 = vadd.f32 %v15682_v36, %v4710_v53 }
 0x7ce   :  { %v15695_v49 = vpop.f32.mrb[105].mxu0  ;;  %v4783_v1 = vmul.f32 %v15692_v18, %v15692_v18 }
 0x7cf   :  { %v4712_v9 = vadd.f32 %v4711_v19, %v15695_v49  ;;  %v4782_v12 = vmul.f32 %v15695_v49, %v15695_v49  ;;  %v4844_v57 = vadd.f32 %v4843_v31, %v4781_v7 }
 0x7d1   :  { %v4845_v20 = vadd.f32 %v4844_v57, %v4782_v12  ;;  %v15702_v10 = vpop.f32.mrb[106].mxu0  ;;  %v4713_v3 = vadd.f32 %v15692_v18, %v4712_v9 }
 0x7d2   :  { %v15705_v26 = vpop.f32.mrb[107].mxu0  ;;  %v4785_v30 = vmul.f32 %v15702_v10, %v15702_v10 }
 0x7d3   :  { %v4714_v46 = vadd.f32 %v4713_v3, %v15705_v26  ;;  %v4784_v24 = vmul.f32 %v15705_v26, %v15705_v26  ;;  %v4846_v51 = vadd.f32 %v4845_v20, %v4783_v1 }
 0x7d5   :  { %v4847_v0 = vadd.f32 %v4846_v51, %v4784_v24  ;;  %v15712_v8 = vpop.f32.mrb[108].mxu0  ;;  %v4715_v11 = vadd.f32 %v15702_v10, %v4714_v46 }
 0x7d6   :  { %v15715_v47 = vpop.f32.mrb[109].mxu0  ;;  %v4787_v62 = vmul.f32 %v15712_v8, %v15712_v8 }
 0x7d7   :  { %v4716_v33 = vadd.f32 %v4715_v11, %v15715_v47  ;;  %v4786_v15 = vmul.f32 %v15715_v47, %v15715_v47  ;;  %v4848_v32 = vadd.f32 %v4847_v0, %v4785_v30 }
 0x7d9   :  { %v4849_v22 = vadd.f32 %v4848_v32, %v4786_v15  ;;  %v15722_v16 = vpop.f32.mrb[110].mxu0  ;;  %v4717_v17 = vadd.f32 %v15712_v8, %v4716_v33 }
 0x7da   :  { %v15725_v5 = vpop.f32.mrb[111].mxu0  ;;  %v4789_v55 = vmul.f32 %v15722_v16, %v15722_v16 }
 0x7db   :  { %v4718_v2 = vadd.f32 %v4717_v17, %v15725_v5  ;;  %v4788_v13 = vmul.f32 %v15725_v5, %v15725_v5  ;;  %v4850_v42 = vadd.f32 %v4849_v22, %v4787_v62 }
 0x7dd   :  { %v4851_v60 = vadd.f32 %v4850_v42, %v4788_v13  ;;  %v15732_v28 = vpop.f32.mrb[112].mxu0  ;;  %v4719_v27 = vadd.f32 %v15722_v16, %v4718_v2 }
 0x7de   :  { %v15735_v56 = vpop.f32.mrb[113].mxu0  ;;  %v4791_v43 = vmul.f32 %v15732_v28, %v15732_v28 }
 0x7df   :  { %v4720_v37 = vadd.f32 %v4719_v27, %v15735_v56  ;;  %v4790_v34 = vmul.f32 %v15735_v56, %v15735_v56  ;;  %v4852_v23 = vadd.f32 %v4851_v60, %v4789_v55 }
 0x7e1   :  { %v4853_v50 = vadd.f32 %v4852_v23, %v4790_v34  ;;  %v15742_v58 = vpop.f32.mrb[114].mxu0  ;;  %v4721_v6 = vadd.f32 %v15732_v28, %v4720_v37 }
 0x7e2   :  { %v15745_v38 = vpop.f32.mrb[115].mxu0  ;;  %v4793_v40 = vmul.f32 %v15742_v58, %v15742_v58 }
 0x7e3   :  { %v4722_v48 = vadd.f32 %v4721_v6, %v15745_v38  ;;  %v4792_v4 = vmul.f32 %v15745_v38, %v15745_v38  ;;  %v4854_v29 = vadd.f32 %v4853_v50, %v4791_v43 }
 0x7e5   :  { %v4855_v44 = vadd.f32 %v4854_v29, %v4792_v4  ;;  %v15752_v53 = vpop.f32.mrb[116].mxu0  ;;  %v4723_v63 = vadd.f32 %v15742_v58, %v4722_v48 }
 0x7e6   :  { %v15755_v21 = vpop.f32.mrb[117].mxu0  ;;  %v4795_v9 = vmul.f32 %v15752_v53, %v15752_v53 }
 0x7e7   :  { %v4724_v7 = vadd.f32 %v4723_v63, %v15755_v21  ;;  %v4794_v31 = vmul.f32 %v15755_v21, %v15755_v21  ;;  %v4856_v19 = vadd.f32 %v4855_v44, %v4793_v40 }
 0x7e9   :  { %v4857_v12 = vadd.f32 %v4856_v19, %v4794_v31  ;;  %v15762_v57 = vpop.f32.mrb[118].mxu0  ;;  %v4725_v1 = vadd.f32 %v15752_v53, %v4724_v7 }
 0x7ea   :  { %v15765_v20 = vpop.f32.mrb[119].mxu0  ;;  %v4797_v51 = vmul.f32 %v15762_v57, %v15762_v57 }
 0x7eb   :  { %v4726_v3 = vadd.f32 %v4725_v1, %v15765_v20  ;;  %v4796_v46 = vmul.f32 %v15765_v20, %v15765_v20  ;;  %v4858_v24 = vadd.f32 %v4857_v12, %v4795_v9 }
 0x7ed   :  { %v4859_v30 = vadd.f32 %v4858_v24, %v4796_v46  ;;  %v15772_v0 = vpop.f32.mrb[120].mxu0  ;;  %v4727_v11 = vadd.f32 %v15762_v57, %v4726_v3 }
 0x7ee   :  { %v15775_v33 = vpop.f32.mrb[121].mxu0  ;;  %v4799_v22 = vmul.f32 %v15772_v0, %v15772_v0 }
 0x7ef   :  { %v4728_v15 = vadd.f32 %v4727_v11, %v15775_v33  ;;  %v4798_v32 = vmul.f32 %v15775_v33, %v15775_v33  ;;  %v4860_v62 = vadd.f32 %v4859_v30, %v4797_v51 }
 0x7f1   :  { %v4861_v17 = vadd.f32 %v4860_v62, %v4798_v32  ;;  %v15782_v2 = vpop.f32.mrb[122].mxu0  ;;  %v4729_v13 = vadd.f32 %v15772_v0, %v4728_v15 }
 0x7f2   :  { %v15785_v42 = vpop.f32.mrb[123].mxu0  ;;  %v4801_v37 = vmul.f32 %v15782_v2, %v15782_v2 }
 0x7f3   :  { %v4730_v55 = vadd.f32 %v4729_v13, %v15785_v42  ;;  %v4800_v60 = vmul.f32 %v15785_v42, %v15785_v42  ;;  %v4862_v27 = vadd.f32 %v4861_v17, %v4799_v22 }
 0x7f5   :  { %v4863_v34 = vadd.f32 %v4862_v27, %v4800_v60  ;;  %v15792_v23 = vpop.f32.mrb[124].mxu0  ;;  %v4731_v43 = vadd.f32 %v15782_v2, %v4730_v55 }
 0x7f6   :  { %v15795_v50 = vpop.f32.mrb[125].mxu0  ;;  %v4803_v29 = vmul.f32 %v15792_v23, %v15792_v23 }
 0x7f7   :  { %v4732_v6 = vadd.f32 %v4731_v43, %v15795_v50  ;;  %v4802_v48 = vmul.f32 %v15795_v50, %v15795_v50  ;;  %v4864_v4 = vadd.f32 %v4863_v34, %v4801_v37 }
 0x7f9   :  { %v4865_v40 = vadd.f32 %v4864_v4, %v4802_v48  ;;  %v15802_v44 = vpop.f32.mrb[126].mxu0  ;;  %v4733_v63 = vadd.f32 %v15792_v23, %v4732_v6 }
 0x7fa   :  { %v15805_v7 = vpop.f32.mrb[127].mxu0  ;;  %v4805_v12 = vmul.f32 %v15802_v44, %v15802_v44 }
 0x7fb   :  { %v4734_v31 = vadd.f32 %v4733_v63, %v15805_v7  ;;  %v4804_v19 = vmul.f32 %v15805_v7, %v15805_v7  ;;  %v4866_v9 = vadd.f32 %v4865_v40, %v4803_v29 }
 0x7fd   :  { %v4867_v1 = vadd.f32 %v4866_v9, %v4804_v19  ;;  %v15812_v3 = vpop.f32.mrb[128].mxu0  ;;  %v4735_v46 = vadd.f32 %v15802_v44, %v4734_v31 }
 0x7fe   :  { %v15815_v24 = vpop.f32.mrb[129].mxu0  ;;  %v4807_v15 = vmul.f32 %v15812_v3, %v15812_v3 }
 0x7ff   :  { %v4736_v51 = vadd.f32 %v4735_v46, %v15815_v24  ;;  %v4806_v30 = vmul.f32 %v15815_v24, %v15815_v24  ;;  %v4868_v11 = vadd.f32 %v4867_v1, %v4805_v12 }
 0x801   :  { %v4869_v32 = vadd.f32 %v4868_v11, %v4806_v30  ;;  %v15822_v62 = vpop.f32.mrb[130].mxu0  ;;  %v4737_v22 = vadd.f32 %v15812_v3, %v4736_v51 }
 0x802   :  { %v15825_v17 = vpop.f32.mrb[131].mxu0  ;;  %v4809_v27 = vmul.f32 %v15822_v62, %v15822_v62 }
 0x803   :  { %v4738_v13 = vadd.f32 %v4737_v22, %v15825_v17  ;;  %v4808_v55 = vmul.f32 %v15825_v17, %v15825_v17  ;;  %v4870_v60 = vadd.f32 %v4869_v32, %v4807_v15 }
 0x805   :  { %v4871_v37 = vadd.f32 %v4870_v60, %v4808_v55  ;;  %v15832_v34 = vpop.f32.mrb[132].mxu0  ;;  %v4739_v43 = vadd.f32 %v15822_v62, %v4738_v13 }
 0x806   :  { %v15835_v6 = vpop.f32.mrb[133].mxu0  ;;  %v4811_v40 = vmul.f32 %v15832_v34, %v15832_v34 }
 0x807   :  { %v4740_v48 = vadd.f32 %v4739_v43, %v15835_v6  ;;  %v4810_v4 = vmul.f32 %v15835_v6, %v15835_v6  ;;  %v4872_v29 = vadd.f32 %v4871_v37, %v4809_v27 }
 0x809   :  { %v4873_v63 = vadd.f32 %v4872_v29, %v4810_v4  ;;  %v15842_v31 = vpop.f32.mrb[134].mxu0  ;;  %v4741_v19 = vadd.f32 %v15832_v34, %v4740_v48 }
 0x80a   :  { %v15845_v9 = vpop.f32.mrb[135].mxu0  ;;  %v4813_v51 = vmul.f32 %v15842_v31, %v15842_v31 }
 0x80b   :  { %v4742_v12 = vadd.f32 %v4741_v19, %v15845_v9  ;;  %v4812_v1 = vmul.f32 %v15845_v9, %v15845_v9  ;;  %v4874_v46 = vadd.f32 %v4873_v63, %v4811_v40 }
 0x80d   :  { %v4875_v30 = vadd.f32 %v4874_v46, %v4812_v1  ;;  %v15852_v11 = vpop.f32.mrb[136].mxu0  ;;  %v4743_v15 = vadd.f32 %v15842_v31, %v4742_v12 }
 0x80e   :  { %21089 = vst [vmem:[#allocation12_spill] sm:$0xff] %v15852_v11  ;;  %v15855_v32 = vpop.f32.mrb[137].mxu0  ;;  %v4815_v60 = vmul.f32 %v15852_v11, %v15852_v11 }
 0x80f   :  { %v4744_v22 = vadd.f32 %v4743_v15, %v15855_v32  ;;  %v4814_v13 = vmul.f32 %v15855_v32, %v15855_v32  ;;  %v4876_v55 = vadd.f32 %v4875_v30, %v4813_v51 }
 0x811   :  { %v4877_v27 = vadd.f32 %v4876_v55, %v4814_v13  ;;  %v15862_v37 = vpop.f32.mrb[138].mxu0  ;;  %v4745_v43 = vadd.f32 %v15852_v11, %v4744_v22 }
 0x812   :  { %21090 = vst [vmem:[#allocation26_spill] sm:$0xff] %v15862_v37  ;;  %v15865_v48 = vpop.f32.mrb[139].mxu0  ;;  %v4817_v63 = vmul.f32 %v15862_v37, %v15862_v37 }
 0x813   :  { %21091 = vst [vmem:[#allocation52_spill] sm:$0xff] %v15865_v48  ;;  %v4746_v4 = vadd.f32 %v4745_v43, %v15865_v48  ;;  %v4816_v29 = vmul.f32 %v15865_v48, %v15865_v48  ;;  %v4878_v40 = vadd.f32 %v4877_v27, %v4815_v60 }
 0x815   :  { %v4879_v19 = vadd.f32 %v4878_v40, %v4816_v29  ;;  %v15872_v12 = vpop.f32.mrb[140].mxu0  ;;  %v4747_v1 = vadd.f32 %v15862_v37, %v4746_v4  ;;  %v5954_v37 = vld [vmem:[%s20418_s4 + $0x418] sm:$0xff] }
 0x816   :  { %21092 = vst [vmem:[#allocation28_spill] sm:$0xff] %v15872_v12  ;;  %v15875_v46 = vpop.f32.mrb[141].mxu0  ;;  %v4819_v22 = vmul.f32 %v15872_v12, %v15872_v12 }
 0x817   :  { %21093 = vst [vmem:[#allocation54_spill] sm:$0xff] %v15875_v46  ;;  %v4748_v51 = vadd.f32 %v4747_v1, %v15875_v46  ;;  %v4818_v30 = vmul.f32 %v15875_v46, %v15875_v46  ;;  %v4880_v15 = vadd.f32 %v4879_v19, %v4817_v63  ;;  %v5953_v46 = vld [vmem:[%s20418_s4 + $0x410] sm:$0xff] }
 0x818   :  { %v10841_v48 = vpack.c.bf16 %v5954_v37, %v5953_v46 }
 0x819   :  { %v4881_v13 = vadd.f32 %v4880_v15, %v4818_v30  ;;  %v15882_v55 = vpop.f32.mrb[142].mxu0  ;;  %v4749_v60 = vadd.f32 %v15872_v12, %v4748_v51  ;;  %v5848_v12 = vld [vmem:[%s20418_s4 + $0xc8] sm:$0xff] }
 0x81a   :  { %21094 = vst [vmem:[#allocation29_spill] sm:$0xff] %v15882_v55  ;;  %v15885_v27 = vpop.f32.mrb[143].mxu0  ;;  %v4821_v40 = vmul.f32 %v15882_v55, %v15882_v55 }
 0x81b   :  { %21095 = vst [vmem:[#allocation55_spill] sm:$0xff] %v15885_v27  ;;  %v4750_v43 = vadd.f32 %v4749_v60, %v15885_v27  ;;  %v4820_v4 = vmul.f32 %v15885_v27, %v15885_v27  ;;  %v4882_v29 = vadd.f32 %v4881_v13, %v4819_v22 }
 0x81d   :  { %v4883_v63 = vadd.f32 %v4882_v29, %v4820_v4  ;;  %v15892_v19 = vpop.f32.mrb[144].mxu0  ;;  %v4751_v1 = vadd.f32 %v15882_v55, %v4750_v43 }
 0x81e   :  { %21096 = vst [vmem:[#allocation56_spill] sm:$0xff] %v15892_v19  ;;  %v15895_v30 = vpop.f32.mrb[145].mxu0  ;;  %v4823_v27 = vmul.f32 %v15892_v19, %v15892_v19 }
 0x81f   :  { %21097 = vst [vmem:[#allocation11_spill] sm:$0xff] %v15895_v30  ;;  %v4752_v51 = vadd.f32 %v4751_v1, %v15895_v30  ;;  %v4822_v15 = vmul.f32 %v15895_v30, %v15895_v30  ;;  %v4884_v60 = vadd.f32 %v4883_v63, %v4821_v40  ;;  %v5843_v40 = vld [vmem:[%s20418_s4 + $0xa0] sm:$0xff]  ;;  %v5844_v63 = vld [vmem:[%s20418_s4 + $0xa8] sm:$0xff] }
 0x820   :  { %v5847_v30 = vld [vmem:[%s20418_s4 + $0xc0] sm:$0xff] }
 0x821   :  { %v4885_v22 = vadd.f32 %v4884_v60, %v4822_v15  ;;  %v15902_v13 = vpop.f32.mrb[146].mxu0  ;;  %v4753_v4 = vadd.f32 %v15892_v19, %v4752_v51  ;;  %v5845_v51 = vld [vmem:[%s20418_s4 + $0xb0] sm:$0xff] }
 0x822   :  { %21098 = vst [vmem:[#allocation31_spill] sm:$0xff] %v15902_v13  ;;  %v15905_v29 = vpop.f32.mrb[147].mxu0  ;;  %v4825_v15 = vmul.f32 %v15902_v13, %v15902_v13 }
 0x823   :  { %21099 = vst [vmem:[#allocation30_spill] sm:$0xff] %v15905_v29  ;;  %v4754_v43 = vadd.f32 %v4753_v4, %v15905_v29  ;;  %v4824_v55 = vmul.f32 %v15905_v29, %v15905_v29  ;;  %v4886_v1 = vadd.f32 %v4885_v22, %v4823_v27  ;;  %v10676_v22 = vpack.c.bf16 %v5844_v63, %v5843_v40  ;;  %v5846_v29 = vld [vmem:[%s20418_s4 + $0xb8] sm:$0xff] }
 0x824   :  { %v10679_v63 = vpack.c.bf16 %v5846_v29, %v5845_v51 }
 0x825   :  { %v4887_v60 = vadd.f32 %v4886_v1, %v4824_v55  ;;  %v15921_v4 = vpop.f32.mrb[148].mxu0  ;;  %v4755_v27 = vadd.f32 %v15902_v13, %v4754_v43  ;;  %v5951_v55 = vld [vmem:[%s20418_s4 + $0x400] sm:$0xff]  ;;  %10677 = vmatpush1.bf16.msra.mxu0 %v10676_v22  ;;  %v5952_v13 = vld [vmem:[%s20418_s4 + $0x408] sm:$0xff] }
 0x826   :  { %21100 = vst [vmem:[#allocation33_spill] sm:$0xff] %v15921_v4  ;;  %v15927_v19 = vpop.f32.mrb[149].mxu0  ;;  %10678 = vmatprep.subr.bf16.mxu0 %v21088_v25  ;;  %v5955_v22 = vld [vmem:[%s20418_s4 + $0x420] sm:$0xff] }
 0x827   :  { %21101 = vst [vmem:[#allocation32_spill] sm:$0xff] %v15927_v19  ;;  %v4756_v43 = vadd.f32 %v4755_v27, %v15927_v19  ;;  %v4826_v1 = vmul.f32 %v15927_v19, %v15927_v19  ;;  %v4888_v40 = vadd.f32 %v4887_v60, %v4825_v15  ;;  %v10837_v27 = vpack.c.bf16 %v5952_v13, %v5951_v55  ;;  %v5956_v19 = vld [vmem:[%s20418_s4 + $0x428] sm:$0xff] }
 0x828   :  { %v4827_v15 = vmul.f32 %v15921_v4, %v15921_v4  ;;  %v10682_v13 = vpack.c.bf16 %v5848_v12, %v5847_v30  ;;  %v10845_v12 = vpack.c.bf16 %v5956_v19, %v5955_v22 }
 0x829   :  { %v4889_v29 = vadd.f32 %v4888_v40, %v4826_v1  ;;  %v15953_v51 = vpop.f32.mrb[150].mxu0  ;;  %v4757_v60 = vadd.f32 %v15921_v4, %v4756_v43  ;;  %10838 = vmatprep.subr.bf16.mxu1 %v10837_v27  ;;  %10680 = vmatpush1.bf16.msra.mxu0 %v10679_v63  ;;  %v5849_v43 = vld [vmem:[%s20418_s4 + $0xd0] sm:$0xff]  ;;  %v5850_v1 = vld [vmem:[%s20418_s4 + $0xd8] sm:$0xff] }
 0x82a   :  { %21102 = vst [vmem:[#allocation13_spill] sm:$0xff] %v15953_v51  ;;  %v15962_v11 = vpop.f32.mrb[151].mxu0  ;;  %10840 = vmatpush3.bf16.msra.mxu1 %v10837_v27  ;;  %10681 = vmatprep.subr.bf16.mxu0 %v21088_v25  ;;  %v4829_v30 = vmul.f32 %v15953_v51, %v15953_v51  ;;  %v5958_v27 = vld [vmem:[%s20418_s4 + $0x438] sm:$0xff] }
 0x82b   :  { %21103 = vst [vmem:[#allocation34_spill] sm:$0xff] %v15962_v11  ;;  %v4758_v37 = vadd.f32 %v4757_v60, %v15962_v11  ;;  %v4828_v46 = vmul.f32 %v15962_v11, %v15962_v11  ;;  %v4890_v55 = vadd.f32 %v4889_v29, %v4827_v15  ;;  %10842 = vmatprep.subr.bf16.mxu1 %v10841_v48  ;;  %v5957_v15 = vld [vmem:[%s20418_s4 + $0x430] sm:$0xff] }
 0x82c   :  { %v10685_v11 = vpack.c.bf16 %v5850_v1, %v5849_v43  ;;  %v10849_v43 = vpack.c.bf16 %v5958_v27, %v5957_v15 }
 0x82d   :  { %v4891_v40 = vadd.f32 %v4890_v55, %v4828_v46  ;;  %v15976_v60 = vpop.f32.mrb[152].mxu0  ;;  %v4759_v63 = vadd.f32 %v15953_v51, %v4758_v37  ;;  %10683 = vmatpush1.bf16.msra.mxu0 %v10682_v13  ;;  %v5851_v37 = vld [vmem:[%s20418_s4 + $0xe0] sm:$0xff]  ;;  %v5852_v55 = vld [vmem:[%s20418_s4 + $0xe8] sm:$0xff] }
 0x82e   :  { %21104 = vst [vmem:[#allocation38_spill] sm:$0xff] %v15976_v60  ;;  %v15985_v29 = vpop.f32.mrb[153].mxu0  ;;  %10844 = vmatpush3.bf16.msra.mxu1 %v10841_v48  ;;  %10684 = vmatprep.subr.bf16.mxu0 %v21088_v25  ;;  %v4831_v1 = vmul.f32 %v15976_v60, %v15976_v60  ;;  %v5959_v13 = vld [vmem:[%s20418_s4 + $0x440] sm:$0xff]  ;;  %v10688_v51 = vpack.c.bf16 %v5852_v55, %v5851_v37 }
 0x82f   :  { %21105 = vst [vmem:[#allocation35_spill] sm:$0xff] %v15985_v29  ;;  %v4760_v19 = vadd.f32 %v4759_v63, %v15985_v29  ;;  %v4830_v22 = vmul.f32 %v15985_v29, %v15985_v29  ;;  %v4892_v46 = vadd.f32 %v4891_v40, %v4829_v30  ;;  %10846 = vmatprep.subr.bf16.mxu1 %v10845_v12  ;;  %v5960_v30 = vld [vmem:[%s20418_s4 + $0x448] sm:$0xff] }
 0x830   :  { %v10853_v37 = vpack.c.bf16 %v5960_v30, %v5959_v13 }
 0x831   :  { %v4893_v63 = vadd.f32 %v4892_v46, %v4830_v22  ;;  %v15999_v29 = vpop.f32.mrb[154].mxu0  ;;  %v4761_v48 = vadd.f32 %v15976_v60, %v4760_v19  ;;  %10686 = vmatpush1.bf16.msra.mxu0 %v10685_v11  ;;  %v5853_v19 = vld [vmem:[%s20418_s4 + $0xf0] sm:$0xff]  ;;  %v5854_v46 = vld [vmem:[%s20418_s4 + $0xf8] sm:$0xff] }
 0x832   :  { %21106 = vst [vmem:[#allocation41_spill] sm:$0xff] %v15999_v29  ;;  %v16008_v40 = vpop.f32.mrb[155].mxu0  ;;  %10848 = vmatpush3.bf16.msra.mxu1 %v10845_v12  ;;  %10687 = vmatprep.subr.bf16.mxu0 %v21088_v25  ;;  %v4833_v55 = vmul.f32 %v15999_v29, %v15999_v29  ;;  %v5961_v12 = vld [vmem:[%s20418_s4 + $0x450] sm:$0xff]  ;;  %v10691_v60 = vpack.c.bf16 %v5854_v46, %v5853_v19 }
 0x833   :  { %21107 = vst [vmem:[#allocation40_spill] sm:$0xff] %v16008_v40  ;;  %v4762_v15 = vadd.f32 %v4761_v48, %v16008_v40  ;;  %v4832_v27 = vmul.f32 %v16008_v40, %v16008_v40  ;;  %v4894_v22 = vadd.f32 %v4893_v63, %v4831_v1  ;;  %10850 = vmatprep.subr.bf16.mxu1 %v10849_v43  ;;  %v5962_v1 = vld [vmem:[%s20418_s4 + $0x458] sm:$0xff] }
 0x834   :  { %v10857_v19 = vpack.c.bf16 %v5962_v1, %v5961_v12 }
 0x835   :  { %v4895_v48 = vadd.f32 %v4894_v22, %v4832_v27  ;;  %v16022_v40 = vpop.f32.mrb[156].mxu0  ;;  %v4763_v11 = vadd.f32 %v15999_v29, %v4762_v15  ;;  %10689 = vmatpush1.bf16.msra.mxu0 %v10688_v51  ;;  %v5855_v15 = vld [vmem:[%s20418_s4 + $0x100] sm:$0xff]  ;;  %v5856_v22 = vld [vmem:[%s20418_s4 + $0x108] sm:$0xff] }
 0x836   :  { %21108 = vst [vmem:[#allocation42_spill] sm:$0xff] %v16022_v40  ;;  %v16031_v63 = vpop.f32.mrb[157].mxu0  ;;  %10852 = vmatpush3.bf16.msra.mxu1 %v10849_v43  ;;  %10690 = vmatprep.subr.bf16.mxu0 %v21088_v25  ;;  %v4835_v46 = vmul.f32 %v16022_v40, %v16022_v40  ;;  %v5963_v43 = vld [vmem:[%s20418_s4 + $0x460] sm:$0xff]  ;;  %v10694_v29 = vpack.c.bf16 %v5856_v22, %v5855_v15  ;;  %v5858_v15 = vld [vmem:[%s20418_s4 + $0x118] sm:$0xff] }
 0x837   :  { %21109 = vst [vmem:[#allocation21_spill] sm:$0xff] %v16031_v63  ;;  %v4764_v13 = vadd.f32 %v4763_v11, %v16031_v63  ;;  %v4834_v30 = vmul.f32 %v16031_v63, %v16031_v63  ;;  %v4896_v27 = vadd.f32 %v4895_v48, %v4833_v55  ;;  %10854 = vmatprep.subr.bf16.mxu1 %v10853_v37  ;;  %v5964_v55 = vld [vmem:[%s20418_s4 + $0x468] sm:$0xff] }
 0x839   :  { %v4897_v11 = vadd.f32 %v4896_v27, %v4834_v30  ;;  %v16045_v63 = vpop.f32.mrb[158].mxu0  ;;  %v4765_v51 = vadd.f32 %v16022_v40, %v4764_v13  ;;  %10692 = vmatpush1.bf16.msra.mxu0 %v10691_v60  ;;  %v5247_v13 = vld [vmem:[#allocation2 + $0x7] sm:$0xff]  ;;  %v10861_v27 = vpack.c.bf16 %v5964_v55, %v5963_v43  ;;  %v5857_v40 = vld [vmem:[%s20418_s4 + $0x110] sm:$0xff] }
 0x83a   :  { %21110 = vst [vmem:[#allocation44_spill] sm:$0xff] %v16045_v63  ;;  %v16054_v48 = vpop.f32.mrb[159].mxu0  ;;  %10856 = vmatpush3.bf16.msra.mxu1 %v10853_v37  ;;  %10693 = vmatprep.subr.bf16.mxu0 %v21088_v25  ;;  %v4837_v22 = vmul.f32 %v16045_v63, %v16045_v63  ;;  %v5965_v37 = vld [vmem:[%s20418_s4 + $0x470] sm:$0xff]  ;;  %v10697_v4 = vpack.c.bf16 %v5858_v15, %v5857_v40  ;;  %v5862_v15 = vld [vmem:[%s20418_s4 + $0x138] sm:$0xff] }
 0x83b   :  { %v4766_v12 = vadd.f32 %v4765_v51, %v16054_v48  ;;  %v4836_v1 = vmul.f32 %v16054_v48, %v16054_v48  ;;  %v4898_v30 = vadd.f32 %v4897_v11, %v4835_v46  ;;  %10858 = vmatprep.subr.bf16.mxu1 %v10857_v19  ;;  %v5966_v11 = vld [vmem:[%s20418_s4 + $0x478] sm:$0xff]  ;;  %v5248_v55 = vld [vmem:[#allocation2 + $0xf] sm:$0xff] }
 0x83c   :  { %6032 = vmatmul.mubr.f32.vlgmr.msra.gmra.mrb[160].mxu0 %v5247_v13 }
 0x83d   :  { %v4767_v46 = vadd.f32 %v16045_v63, %v4766_v12  ;;  %v4899_v60 = vadd.f32 %v4898_v30, %v4836_v1  ;;  %10695 = vmatpush1.bf16.msra.mxu0 %v10694_v29  ;;  %6036 = vmatprep.mubr.f32.mxu0 %v15580_v14  ;;  %v10865_v12 = vpack.c.bf16 %v5966_v11, %v5965_v37  ;;  %v5859_v1 = vld [vmem:[%s20418_s4 + $0x120] sm:$0xff]  ;;  %v5860_v30 = vld [vmem:[%s20418_s4 + $0x128] sm:$0xff]  ;;  %v5861_v14 = vld [vmem:[%s20418_s4 + $0x130] sm:$0xff] }
 0x83e   :  { %10860 = vmatpush3.bf16.msra.mxu1 %v10857_v19  ;;  %10696 = vmatprep.subr.bf16.mxu0 %v21088_v25  ;;  %v10700_v40 = vpack.c.bf16 %v5860_v30, %v5859_v1 }
 0x83f   :  { %v4768_v51 = vrot.slane %v4767_v46, 4  ;;  %v4900_v43 = vadd.f32 %v4899_v60, %v4837_v22  ;;  %10862 = vmatprep.subr.bf16.mxu1 %v10861_v27 }
 0x840   :  { %6037 = vmatmul.mubr.f32.gmra.mrb[162].mxu0 %v5248_v55 }
 0x841   :  { %v4769_v63 = vadd.f32 %v4768_v51, %v4767_v46  ;;  %v4901_v13 = vrot.slane %v4900_v43, 4  ;;  %10698 = vmatpush1.bf16.msra.mxu0 %v10697_v4 }
 0x842   :  { %10864 = vmatpush3.bf16.msra.mxu1 %v10861_v27  ;;  %10699 = vmatprep.subr.bf16.mxu0 %v21088_v25  ;;  %v10703_v27 = vpack.c.bf16 %v5862_v15, %v5861_v14  ;;  %v11704_v14 = vld [vmem:[%s20416_s6] sm:$0xff] }
 0x843   :  { %v4770_v29 = vrot.slane %v4769_v63, 2  ;;  %v4902_v19 = vadd.f32 %v4901_v13, %v4900_v43  ;;  %10866 = vmatprep.subr.bf16.mxu1 %v10865_v12 }
 0x845   :  { %v4771_v22 = vadd.f32 %v4770_v29, %v4769_v63  ;;  %v4903_v46 = vrot.slane %v4902_v19, 2  ;;  %10701 = vmatpush1.bf16.msra.mxu0 %v10700_v40  ;;  %v5863_v63 = vld [vmem:[%s20418_s4 + $0x140] sm:$0xff] }
 0x846   :  { %10868 = vmatpush3.bf16.msra.mxu1 %v10865_v12  ;;  %10702 = vmatprep.subr.bf16.mxu0 %v21088_v25  ;;  %v5864_v12 = vld [vmem:[%s20418_s4 + $0x148] sm:$0xff] }
 0x847   :  { %v4772_v60 = vrot.slane %v4771_v22, 1  ;;  %v4904_v37 = vadd.f32 %v4903_v46, %v4902_v19  ;;  %v10706_v29 = vpack.c.bf16 %v5864_v12, %v5863_v63  ;;  %v4921_v19 = vsub.s32 4, %v21064_v59  ;;  %v21111_v12 = vld [vmem:[#allocation12_spill] sm:$0xff] }
 0x849   :  { %v4773_v4 = vadd.f32 %v4772_v60, %v4771_v22  ;;  %v4905_v11 = vrot.slane %v4904_v37, 1  ;;  %10704 = vmatpush1.bf16.msra.mxu0 %v10703_v27  ;;  %v4989_v60 = vsub.s32 5, %v21064_v59  ;;  %v21129_v59 = vld [vmem:[#allocation13_spill] sm:$0xff] }
 0x84a   :  { %10705 = vmatprep.subr.bf16.mxu0 %v21088_v25 }
 0x84b   :  { %v4906_v51 = vadd.f32 %v4905_v11, %v4904_v37  ;;  %v4907_v43 = vmul.f32 0.001953125, %v4773_v4 }
 0x84d   :  { %v4908_v55 = vmul.f32 0.001953125, %v4906_v51  ;;  %v4909_v1 = vmul.f32 %v4907_v43, %v4907_v43  ;;  %10707 = vmatpush1.bf16.msra.mxu0 %v10706_v29  ;;  %v21112_v29 = vld [vmem:[#allocation52_spill] sm:$0xff] }
 0x84e   :  { %10708 = vmatprep.subr.bf16.mxu0 %v21088_v25  ;;  %v21131_v25 = vld [vmem:[#allocation35_spill] sm:$0xff] }
 0x84f   :  { %v4910_v30 = vsub.f32 %v4908_v55, %v4909_v1 }
 0x851   :  { %v4911_v13 = vadd.f32 1e-05, %v4910_v30 }
 0x853   :  { %11691 = vrsqrt.f32 %v4911_v13 }
 0x85d   :  { %v11692_v40 = vpop.eup %11691 }
 0x85e   :  { %v4913_v15 = vmul.f32 %v11704_v14, %v11692_v40  ;;  %v21114_v40 = vld [vmem:[#allocation54_spill] sm:$0xff] }
 0x860   :  { %v4914_v22 = vmul.f32 %v4913_v15, %v4907_v43  ;;  %v16103_v46 = vrot.slane %v4913_v15, %v4921_v19  ;;  %v21113_v19 = vld [vmem:[#allocation26_spill] sm:$0xff]  ;;  %v21116_v15 = vld [vmem:[#allocation55_spill] sm:$0xff] }
 0x862   :  { %v4916_v37 = vrot.slane %v4914_v22, 7  ;;  %v4985_v27 = vmul.f32 %v16103_v46, %v16054_v48  ;;  %v16110_v4 = vmul.f32 %v16103_v46, %v15657_v45  ;;  %v16114_v11 = vmul.f32 %v15652_v61, %v16103_v46 }
 0x863   :  { %v16118_v51 = vmul.f32 %v16103_v46, %v15665_v35  ;;  %v16122_v43 = vmul.f32 %v15663_v41, %v16103_v46  ;;  %v16126_v55 = vmul.f32 %v16103_v46, %v15675_v39  ;;  %v16130_v45 = vmul.f32 %v15673_v54, %v16103_v46 }
 0x864   :  { %v4918_v48 = vsub.f32 %v11704_v14, %v4916_v37  ;;  %v16134_v61 = vmul.f32 %v16103_v46, %v15685_v52  ;;  %v16138_v35 = vmul.f32 %v15682_v36, %v16103_v46  ;;  %v16142_v41 = vmul.f32 %v16103_v46, %v15695_v49 }
 0x865   :  { %v16146_v39 = vmul.f32 %v15692_v18, %v16103_v46  ;;  %v16150_v54 = vmul.f32 %v16103_v46, %v15705_v26  ;;  %v16154_v52 = vmul.f32 %v15702_v10, %v16103_v46  ;;  %v16158_v36 = vmul.f32 %v16103_v46, %v15715_v47 }
 0x866   :  { %v16160_v1 = vrot.slane %v4918_v48, %v4989_v60  ;;  %v16164_v49 = vmul.f32 %v15712_v8, %v16103_v46  ;;  %v16168_v18 = vmul.f32 %v16103_v46, %v15725_v5  ;;  %v16172_v26 = vmul.f32 %v15722_v16, %v16103_v46  ;;  %v21117_v60 = vld [vmem:[#allocation29_spill] sm:$0xff] }
 0x867   :  { %v16176_v10 = vmul.f32 %v16103_v46, %v15735_v56  ;;  %v16180_v47 = vmul.f32 %v15732_v28, %v16103_v46  ;;  %v16184_v8 = vmul.f32 %v16103_v46, %v15745_v38  ;;  %v16188_v5 = vmul.f32 %v15742_v58, %v16103_v46 }
 0x868   :  { %v5053_v30 = vadd.f32 %v16160_v1, %v4985_v27  ;;  %v16193_v16 = vmul.f32 %v16103_v46, %v15755_v21  ;;  %v16197_v56 = vmul.f32 %v15752_v53, %v16103_v46  ;;  %v16201_v28 = vmul.f32 %v16103_v46, %v15765_v20  ;;  %v21118_v27 = vld [vmem:[#allocation11_spill] sm:$0xff] }
 0x869   :  { %v16205_v38 = vmul.f32 %v15762_v57, %v16103_v46  ;;  %v16209_v58 = vmul.f32 %v16103_v46, %v15775_v33  ;;  %v16213_v21 = vmul.f32 %v15772_v0, %v16103_v46  ;;  %v16217_v53 = vmul.f32 %v16103_v46, %v15785_v42 }
 0x86a   :  { %v5117_v13 = vmul.f32 0.1, %v5053_v30  ;;  %v16221_v20 = vmul.f32 %v15782_v2, %v16103_v46  ;;  %v16225_v57 = vmul.f32 %v16103_v46, %v15795_v50  ;;  %v16229_v33 = vmul.f32 %v15792_v23, %v16103_v46 }
 0x86b   :  { %v16233_v0 = vmul.f32 %v16103_v46, %v15805_v7  ;;  %v16237_v42 = vmul.f32 %v15802_v44, %v16103_v46  ;;  %v16241_v2 = vmul.f32 %v16103_v46, %v15815_v24  ;;  %v16245_v50 = vmul.f32 %v15812_v3, %v16103_v46 }
 0x86c   :  { %v5181_v63 = vmax.f32 %v5053_v30, %v5117_v13  ;;  %v16249_v23 = vmul.f32 %v16103_v46, %v15825_v17  ;;  %v16253_v7 = vmul.f32 %v15822_v62, %v16103_v46  ;;  %v16257_v44 = vmul.f32 %v16103_v46, %v15835_v6  ;;  %v21119_v30 = vld [vmem:[#allocation56_spill] sm:$0xff] }
 0x86d   :  { %v16261_v24 = vmul.f32 %v15832_v34, %v16103_v46  ;;  %v16265_v3 = vmul.f32 %v16103_v46, %v15845_v9  ;;  %v16269_v17 = vmul.f32 %v15842_v31, %v16103_v46  ;;  %v16273_v62 = vmul.f32 %v16103_v46, %v15855_v32  ;;  %v21115_v32 = vld [vmem:[#allocation28_spill] sm:$0xff] }
 0x86e   :  { %v16277_v6 = vmul.f32 %v21111_v12, %v16103_v46  ;;  %v16281_v34 = vmul.f32 %v16103_v46, %v21112_v29  ;;  %v16285_v9 = vmul.f32 %v21113_v19, %v16103_v46  ;;  %v16289_v31 = vmul.f32 %v16103_v46, %v21114_v40  ;;  %5245 = vst [vmem:[#allocation2 + $0x448] sm:$0xff] %v5181_v63  ;;  %v21120_v63 = vld [vmem:[#allocation30_spill] sm:$0xff]  ;;  %v21121_v29 = vld [vmem:[#allocation31_spill] sm:$0xff]  ;;  %v21123_v40 = vld [vmem:[#allocation32_spill] sm:$0xff] }
 0x86f   :  { %v16293_v14 = vmul.f32 %v21115_v32, %v16103_v46  ;;  %v16297_v22 = vmul.f32 %v16103_v46, %v21116_v15  ;;  %v16301_v37 = vmul.f32 %v21117_v60, %v16103_v46  ;;  %v16305_v48 = vmul.f32 %v16103_v46, %v21118_v27  ;;  %v21125_v15 = vld [vmem:[#allocation33_spill] sm:$0xff]  ;;  %v21127_v27 = vld [vmem:[#allocation34_spill] sm:$0xff] }
 0x870   :  { %v16309_v13 = vmul.f32 %v21119_v30, %v16103_v46  ;;  %v16313_v12 = vmul.f32 %v16103_v46, %v21120_v63  ;;  %v16317_v19 = vmul.f32 %v21121_v29, %v16103_v46  ;;  %v16321_v32 = vmul.f32 %v16103_v46, %v21123_v40 }
 0x871   :  { %v16325_v60 = vmul.f32 %v21125_v15, %v16103_v46  ;;  %v16329_v30 = vmul.f32 %v16103_v46, %v21127_v27  ;;  %v16333_v63 = vmul.f32 %v21129_v59, %v16103_v46  ;;  %v16337_v29 = vmul.f32 %v16103_v46, %v21131_v25 }
 0x872   :  { %21122 = vst [vmem:[#allocation43_spill] sm:$0xff] %v16317_v19  ;;  %21124 = vst [vmem:[#allocation46_spill] sm:$0xff] %v16321_v32  ;;  %v21133_v19 = vld [vmem:[#allocation38_spill] sm:$0xff]  ;;  %v21134_v32 = vld [vmem:[#allocation40_spill] sm:$0xff] }
 0x873   :  { %21126 = vst [vmem:[#allocation45_spill] sm:$0xff] %v16325_v60  ;;  %21128 = vst [vmem:[#allocation48_spill] sm:$0xff] %v16329_v30  ;;  %v16341_v40 = vmul.f32 %v21133_v19, %v16103_v46  ;;  %v16345_v15 = vmul.f32 %v16103_v46, %v21134_v32  ;;  %v21135_v60 = vld [vmem:[#allocation41_spill] sm:$0xff]  ;;  %v16365_v32 = vadd.f32 %v16160_v1, %v16110_v4 }
 0x874   :  { %21130 = vst [vmem:[#allocation47_spill] sm:$0xff] %v16333_v63  ;;  %21132 = vst [vmem:[#allocation53_spill] sm:$0xff] %v16337_v29  ;;  %v16349_v27 = vmul.f32 %v21135_v60, %v16103_v46  ;;  %v21136_v30 = vld [vmem:[#allocation21_spill] sm:$0xff]  ;;  %v21137_v63 = vld [vmem:[#allocation42_spill] sm:$0xff]  ;;  %v16369_v60 = vadd.f32 %v16160_v1, %v16114_v11  ;;  %v16385_v4 = vadd.f32 %v16160_v1, %v16130_v45 }
 0x875   :  { %v16353_v59 = vmul.f32 %v16103_v46, %v21136_v30  ;;  %v16357_v25 = vmul.f32 %v21137_v63, %v16103_v46  ;;  %v21138_v29 = vld [vmem:[#allocation44_spill] sm:$0xff]  ;;  %v16373_v30 = vadd.f32 %v16160_v1, %v16118_v51  ;;  %v16377_v63 = vadd.f32 %v16160_v1, %v16122_v43 }
 0x876   :  { %v16361_v19 = vmul.f32 %v21138_v29, %v16103_v46  ;;  %v16381_v46 = vadd.f32 %v16160_v1, %v16126_v55  ;;  %v16389_v11 = vadd.f32 %v16160_v1, %v16134_v61  ;;  %v16393_v51 = vadd.f32 %v16160_v1, %v16138_v35 }
 0x877   :  { %v16397_v43 = vadd.f32 %v16160_v1, %v16142_v41  ;;  %v16401_v55 = vadd.f32 %v16160_v1, %v16146_v39  ;;  %v16405_v45 = vadd.f32 %v16160_v1, %v16150_v54  ;;  %v16409_v61 = vadd.f32 %v16160_v1, %v16154_v52 }
 0x878   :  { %v16413_v35 = vadd.f32 %v16160_v1, %v16158_v36  ;;  %v16417_v41 = vadd.f32 %v16160_v1, %v16164_v49  ;;  %v16421_v39 = vadd.f32 %v16160_v1, %v16168_v18  ;;  %v16425_v54 = vadd.f32 %v16160_v1, %v16172_v26 }
 0x879   :  { %v16429_v52 = vadd.f32 %v16160_v1, %v16176_v10  ;;  %v16433_v36 = vadd.f32 %v16160_v1, %v16180_v47  ;;  %v16437_v49 = vadd.f32 %v16160_v1, %v16184_v8  ;;  %v16441_v18 = vadd.f32 %v16160_v1, %v16188_v5  ;;  %v21157_v29 = vld [vmem:[#allocation43_spill] sm:$0xff] }
 0x87a   :  { %v16445_v26 = vadd.f32 %v16160_v1, %v16193_v16  ;;  %v16449_v10 = vadd.f32 %v16160_v1, %v16197_v56  ;;  %v16453_v47 = vadd.f32 %v16160_v1, %v16201_v28  ;;  %v16457_v8 = vadd.f32 %v16160_v1, %v16205_v38 }
 0x87b   :  { %21139 = vst [vmem:[#allocation50_spill] sm:$0xff] %v16433_v36  ;;  %v16461_v5 = vadd.f32 %v16160_v1, %v16209_v58  ;;  %v16465_v16 = vadd.f32 %v16160_v1, %v16213_v21  ;;  %v16469_v56 = vadd.f32 %v16160_v1, %v16217_v53  ;;  %v16473_v28 = vadd.f32 %v16160_v1, %v16221_v20 }
 0x87c   :  { %21140 = vst [vmem:[#allocation57_spill] sm:$0xff] %v16445_v26  ;;  %21141 = vst [vmem:[#allocation14_spill] sm:$0xff] %v16457_v8  ;;  %v16477_v38 = vadd.f32 %v16160_v1, %v16225_v57  ;;  %v16481_v58 = vadd.f32 %v16160_v1, %v16229_v33  ;;  %v16485_v21 = vadd.f32 %v16160_v1, %v16233_v0 }
 0x87d   :  { %21142 = vst [vmem:[#allocation59_spill] sm:$0xff] %v16469_v56  ;;  %v16489_v53 = vadd.f32 %v16160_v1, %v16237_v42  ;;  %v16493_v20 = vadd.f32 %v16160_v1, %v16241_v2  ;;  %v16497_v57 = vadd.f32 %v16160_v1, %v16245_v50  ;;  %v16501_v33 = vadd.f32 %v16160_v1, %v16249_v23 }
 0x87e   :  { %21143 = vst [vmem:[#allocation58_spill] sm:$0xff] %v16481_v58  ;;  %v16505_v0 = vadd.f32 %v16160_v1, %v16253_v7  ;;  %v16509_v42 = vadd.f32 %v16160_v1, %v16257_v44  ;;  %v16513_v2 = vadd.f32 %v16160_v1, %v16261_v24  ;;  %v16517_v50 = vadd.f32 %v16160_v1, %v16265_v3 }
 0x87f   :  { %21144 = vst [vmem:[#allocation61_spill] sm:$0xff] %v16493_v20  ;;  %v16521_v23 = vadd.f32 %v16160_v1, %v16269_v17  ;;  %v16525_v7 = vadd.f32 %v16160_v1, %v16273_v62  ;;  %v16529_v44 = vadd.f32 %v16160_v1, %v16277_v6  ;;  %v16533_v24 = vadd.f32 %v16160_v1, %v16281_v34 }
 0x880   :  { %21145 = vst [vmem:[#allocation60_spill] sm:$0xff] %v16505_v0  ;;  %21146 = vst [vmem:[#allocation63_spill] sm:$0xff] %v16517_v50  ;;  %v16537_v3 = vadd.f32 %v16160_v1, %v16285_v9  ;;  %v16541_v17 = vadd.f32 %v16160_v1, %v16289_v31  ;;  %v16545_v62 = vadd.f32 %v16160_v1, %v16293_v14 }
 0x881   :  { %21147 = vst [vmem:[#allocation62_spill] sm:$0xff] %v16529_v44  ;;  %21148 = vst [vmem:[#allocation65_spill] sm:$0xff] %v16533_v24  ;;  %v16549_v6 = vadd.f32 %v16160_v1, %v16297_v22  ;;  %v16553_v34 = vadd.f32 %v16160_v1, %v16301_v37  ;;  %v16557_v9 = vadd.f32 %v16160_v1, %v16305_v48 }
 0x882   :  { %21149 = vst [vmem:[#allocation64_spill] sm:$0xff] %v16537_v3  ;;  %21150 = vst [vmem:[#allocation67_spill] sm:$0xff] %v16541_v17  ;;  %v16561_v31 = vadd.f32 %v16160_v1, %v16309_v13  ;;  %v16565_v14 = vadd.f32 %v16160_v1, %v16313_v12  ;;  %v16569_v22 = vadd.f32 %v16160_v1, %v21157_v29 }
 0x883   :  { %21151 = vst [vmem:[#allocation66_spill] sm:$0xff] %v16545_v62  ;;  %21152 = vst [vmem:[#allocation69_spill] sm:$0xff] %v16549_v6  ;;  %v21159_v6 = vld [vmem:[#allocation46_spill] sm:$0xff] }
 0x884   :  { %21153 = vst [vmem:[#allocation68_spill] sm:$0xff] %v16553_v34  ;;  %21154 = vst [vmem:[#allocation71_spill] sm:$0xff] %v16557_v9  ;;  %v16573_v37 = vadd.f32 %v16160_v1, %v21159_v6  ;;  %v21161_v34 = vld [vmem:[#allocation45_spill] sm:$0xff]  ;;  %v21163_v9 = vld [vmem:[#allocation48_spill] sm:$0xff]  ;;  %v16593_v6 = vadd.f32 %v16160_v1, %v16341_v40  ;;  %v16611_v40 = vadd.f32 %v16160_v1, %v16353_v59  ;;  %v5060_v59 = vmul.f32 0.1, %v16385_v4 }
 0x885   :  { %21155 = vst [vmem:[#allocation70_spill] sm:$0xff] %v16561_v31  ;;  %21156 = vst [vmem:[#allocation73_spill] sm:$0xff] %v16565_v14  ;;  %v16577_v48 = vadd.f32 %v16160_v1, %v21161_v34  ;;  %v16581_v13 = vadd.f32 %v16160_v1, %v21163_v9  ;;  %v21165_v31 = vld [vmem:[#allocation47_spill] sm:$0xff]  ;;  %v21167_v14 = vld [vmem:[#allocation53_spill] sm:$0xff] }
 0x886   :  { %21158 = vst [vmem:[#allocation72_spill] sm:$0xff] %v16569_v22  ;;  %21160 = vst [vmem:[#allocation75_spill] sm:$0xff] %v16573_v37  ;;  %v16585_v12 = vadd.f32 %v16160_v1, %v21165_v31  ;;  %v16589_v29 = vadd.f32 %v16160_v1, %v21167_v14  ;;  %v5865_v34 = vld [vmem:[%s20418_s4 + $0x150] sm:$0xff]  ;;  %v5866_v9 = vld [vmem:[%s20418_s4 + $0x158] sm:$0xff]  ;;  %v16603_v31 = vadd.f32 %v16160_v1, %v16345_v15  ;;  %v5056_v15 = vmul.f32 0.1, %v16369_v60 }
 0x887   :  { %21162 = vst [vmem:[#allocation74_spill] sm:$0xff] %v16577_v48  ;;  %21164 = vst [vmem:[#allocation77_spill] sm:$0xff] %v16581_v13  ;;  %v16607_v14 = vadd.f32 %v16160_v1, %v16349_v27  ;;  %v5058_v27 = vmul.f32 0.1, %v16377_v63  ;;  %v5065_v13 = vmul.f32 0.1, %v16405_v45 }
 0x888   :  { %21166 = vst [vmem:[#allocation76_spill] sm:$0xff] %v16585_v12  ;;  %21168 = vst [vmem:[#allocation18_spill] sm:$0xff] %v16589_v29  ;;  %v16619_v29 = vadd.f32 %v16160_v1, %v16361_v19  ;;  %v5055_v12 = vmul.f32 0.1, %v16365_v32  ;;  %v5066_v48 = vmul.f32 0.1, %v16409_v61  ;;  %v16635_v37 = vmax.f32 %v16369_v60, %v5056_v15 }
 0x889   :  { %21169 = vst [vmem:[#allocation22_spill] sm:$0xff] %v16593_v6  ;;  %21170 = vst [vmem:[#allocation10_spill] sm:$0xff] %v16603_v31  ;;  %v16615_v6 = vadd.f32 %v16160_v1, %v16357_v25  ;;  %v5057_v31 = vmul.f32 0.1, %v16373_v30  ;;  %v5061_v25 = vmul.f32 0.1, %v16389_v11  ;;  %v16656_v15 = vmax.f32 %v16377_v63, %v5058_v27 }
 0x88a   :  { %21171 = vst [vmem:[#allocation20_spill] sm:$0xff] %v16607_v14  ;;  %21172 = vst [vmem:[#allocation5_spill] sm:$0xff] %v16611_v40  ;;  %v5059_v14 = vmul.f32 0.1, %v16381_v46  ;;  %v10709_v40 = vpack.c.bf16 %v5866_v9, %v5865_v34  ;;  %v5063_v1 = vmul.f32 0.1, %v16397_v43  ;;  %v5119_v19 = vmax.f32 %v16365_v32, %v5055_v12 }
 0x88b   :  { %21173 = vst [vmem:[#allocation7_spill] sm:$0xff] %v16615_v6  ;;  %21174 = vst [vmem:[#allocation25_spill] sm:$0xff] %v16619_v29  ;;  %v5062_v6 = vmul.f32 0.1, %v16393_v51  ;;  %v5064_v29 = vmul.f32 0.1, %v16401_v55  ;;  %v16643_v62 = vmax.f32 %v16373_v30, %v5057_v31 }
 0x88c   :  { %21175 = vst [vmem:[#allocation27_spill] sm:$0xff] %v16635_v37  ;;  %10710 = vmatpush1.bf16.msra.mxu0 %v10709_v40  ;;  %v5067_v34 = vmul.f32 0.1, %v16413_v35  ;;  %v5068_v9 = vmul.f32 0.1, %v16417_v41  ;;  %5183 = vst [vmem:[#allocation2 + $0x28] sm:$0xff] %v5119_v19  ;;  %6041 = vmatprep.mubr.f32.mxu0 %v5119_v19 }
 0x88d   :  { %v16640_v22 = vmul.f32 0.1, %v16421_v39  ;;  %21176 = vst [vmem:[#allocation37_spill] sm:$0xff] %v16643_v62  ;;  %v21177_v32 = vmov 0.0|0.0   ;;  %v16647_v12 = vmul.f32 0.1, %v16425_v54 }
 0x88e   :  { %10711 = vmatprep.subr.bf16.mxu0 %v21177_v32  ;;  %v16650_v60 = vmul.f32 0.1, %v16429_v52  ;;  %v16653_v40 = vmul.f32 0.1, %v16433_v36  ;;  %21178 = vst [vmem:[#allocation16_spill] sm:$0xff] %v16656_v15  ;;  %5184 = vst [vmem:[#allocation2 + $0x30] sm:$0xff] %v16635_v37  ;;  %v16669_v32 = vmax.f32 %v16381_v46, %v5059_v14  ;;  %v16682_v37 = vmax.f32 %v16385_v4, %v5060_v59 }
 0x88f   :  { %v16660_v30 = vmul.f32 0.1, %v16437_v49  ;;  %v16663_v31 = vmul.f32 0.1, %v16441_v18  ;;  %v16666_v19 = vmul.f32 0.1, %v16445_v26 }
 0x890   :  { %21179 = vst [vmem:[#allocation39_spill] sm:$0xff] %v16669_v32  ;;  %5185 = vst [vmem:[#allocation2 + $0x48] sm:$0xff] %v16643_v62  ;;  %v16673_v36 = vmul.f32 0.1, %v16449_v10  ;;  %v16676_v63 = vmul.f32 0.1, %v16453_v47  ;;  %v16695_v62 = vmax.f32 %v16389_v11, %v5061_v25 }
 0x891   :  { %v16679_v27 = vmul.f32 0.1, %v16457_v8  ;;  %21180 = vst [vmem:[#allocation19_spill] sm:$0xff] %v16682_v37  ;;  %5186 = vst [vmem:[#allocation2 + $0x50] sm:$0xff] %v16656_v15  ;;  %v16686_v26 = vmul.f32 0.1, %v16461_v5  ;;  %v16708_v15 = vmax.f32 %v16393_v51, %v5062_v6 }
 0x892   :  { %v16689_v46 = vmul.f32 0.1, %v16465_v16  ;;  %v16692_v14 = vmul.f32 0.1, %v16469_v56  ;;  %21181 = vst [vmem:[#allocation17_spill] sm:$0xff] %v16695_v62  ;;  %5187 = vst [vmem:[#allocation2 + $0x68] sm:$0xff] %v16669_v32  ;;  %v16721_v32 = vmax.f32 %v16397_v43, %v5063_v1 }
 0x893   :  { %v16699_v8 = vmul.f32 0.1, %v16473_v28  ;;  %v16702_v4 = vmul.f32 0.1, %v16477_v38  ;;  %v16705_v59 = vmul.f32 0.1, %v16481_v58 }
 0x894   :  { %21182 = vst [vmem:[#allocation3_spill] sm:$0xff] %v16708_v15  ;;  %5188 = vst [vmem:[#allocation2 + $0x70] sm:$0xff] %v16682_v37  ;;  %v16712_v56 = vmul.f32 0.1, %v16485_v21  ;;  %v16715_v11 = vmul.f32 0.1, %v16489_v53  ;;  %v16734_v37 = vmax.f32 %v16401_v55, %v5064_v29 }
 0x895   :  { %v16718_v25 = vmul.f32 0.1, %v16493_v20  ;;  %21183 = vst [vmem:[#allocation4_spill] sm:$0xff] %v16721_v32  ;;  %5189 = vst [vmem:[#allocation2 + $0x88] sm:$0xff] %v16695_v62  ;;  %v16725_v58 = vmul.f32 0.1, %v16497_v57  ;;  %v16747_v62 = vmax.f32 %v16405_v45, %v5065_v13 }
 0x896   :  { %v16728_v51 = vmul.f32 0.1, %v16501_v33  ;;  %v16731_v6 = vmul.f32 0.1, %v16505_v0  ;;  %21184 = vst [vmem:[#allocation8_spill] sm:$0xff] %v16734_v37  ;;  %5190 = vst [vmem:[#allocation2 + $0x90] sm:$0xff] %v16708_v15  ;;  %v16760_v15 = vmax.f32 %v16409_v61, %v5066_v48 }
 0x897   :  { %v16738_v20 = vmul.f32 0.1, %v16509_v42  ;;  %v16741_v43 = vmul.f32 0.1, %v16513_v2  ;;  %v16744_v1 = vmul.f32 0.1, %v16517_v50 }
 0x898   :  { %21185 = vst [vmem:[#allocation36_spill] sm:$0xff] %v16747_v62  ;;  %5191 = vst [vmem:[#allocation2 + $0xa8] sm:$0xff] %v16721_v32  ;;  %v16751_v0 = vmul.f32 0.1, %v16521_v23  ;;  %v16754_v55 = vmul.f32 0.1, %v16525_v7  ;;  %v16773_v32 = vmax.f32 %v16413_v35, %v5067_v34 }
 0x899   :  { %v16757_v29 = vmul.f32 0.1, %v16529_v44  ;;  %21187 = vst [vmem:[#allocation15_spill] sm:$0xff] %v16760_v15  ;;  %5192 = vst [vmem:[#allocation2 + $0xb0] sm:$0xff] %v16734_v37  ;;  %v16764_v50 = vmul.f32 0.1, %v16533_v24 }
 0x89a   :  { %v16767_v45 = vmul.f32 0.1, %v16537_v3  ;;  %v16770_v13 = vmul.f32 0.1, %v16541_v17  ;;  %21189 = vst [vmem:[#allocation9_spill] sm:$0xff] %v16773_v32  ;;  %5193 = vst [vmem:[#allocation2 + $0xc8] sm:$0xff] %v16747_v62  ;;  %v16786_v3 = vmax.f32 %v16417_v41, %v5068_v9 }
 0x89b   :  { %21186 = vst [vmem:[#allocation6_spill] sm:$0xff] %v16757_v29  ;;  %v21190_v44 = vld [vmem:[#allocation66_spill] sm:$0xff]  ;;  %v21191_v61 = vld [vmem:[#allocation69_spill] sm:$0xff]  ;;  %v21192_v37 = vld [vmem:[#allocation68_spill] sm:$0xff] }
 0x89c   :  { %21188 = vst [vmem:[#allocation23_spill] sm:$0xff] %v16770_v13  ;;  %v16777_v29 = vmul.f32 0.1, %v21190_v44  ;;  %v16780_v48 = vmul.f32 0.1, %v21191_v61  ;;  %21193 = vst [vmem:[#allocation49_spill] sm:$0xff] %v16786_v3  ;;  %v16800_v61 = vmax.f32 %v16421_v39, %v16640_v22 }
 0x89d   :  { %v16783_v24 = vmul.f32 0.1, %v21192_v37  ;;  %5194 = vst [vmem:[#allocation2 + $0xd0] sm:$0xff] %v16760_v15  ;;  %v21194_v17 = vld [vmem:[#allocation71_spill] sm:$0xff]  ;;  %v21196_v35 = vld [vmem:[#allocation70_spill] sm:$0xff]  ;;  %v21197_v62 = vld [vmem:[#allocation73_spill] sm:$0xff] }
 0x89e   :  { %v16790_v13 = vmul.f32 0.1, %v21194_v17  ;;  %v16793_v34 = vmul.f32 0.1, %v21196_v35  ;;  %v16796_v44 = vmul.f32 0.1, %v21197_v62  ;;  %v16814_v35 = vmax.f32 %v16425_v54, %v16647_v12 }
 0x89f   :  { %21198 = vst [vmem:[#allocation12_spill] sm:$0xff] %v16800_v61  ;;  %5195 = vst [vmem:[#allocation2 + $0xe8] sm:$0xff] %v16773_v32  ;;  %v21199_v37 = vld [vmem:[#allocation72_spill] sm:$0xff]  ;;  %v21201_v9 = vld [vmem:[#allocation75_spill] sm:$0xff] }
 0x8a0   :  { %21195 = vst [vmem:[#allocation51_spill] sm:$0xff] %v16790_v13  ;;  %v16804_v41 = vmul.f32 0.1, %v21199_v37  ;;  %v16807_v15 = vmul.f32 0.1, %v21201_v9  ;;  %v21202_v17 = vld [vmem:[#allocation74_spill] sm:$0xff]  ;;  %v16828_v9 = vmax.f32 %v16429_v52, %v16650_v60 }
 0x8a1   :  { %v16810_v13 = vmul.f32 0.1, %v21202_v17  ;;  %21203 = vst [vmem:[#allocation26_spill] sm:$0xff] %v16814_v35  ;;  %5196 = vst [vmem:[#allocation2 + $0xf0] sm:$0xff] %v16786_v3  ;;  %v21204_v62 = vld [vmem:[#allocation77_spill] sm:$0xff]  ;;  %v21206_v22 = vld [vmem:[#allocation76_spill] sm:$0xff] }
 0x8a2   :  { %21200 = vst [vmem:[#allocation52_spill] sm:$0xff] %v16804_v41  ;;  %v16818_v39 = vmul.f32 0.1, %v21204_v62  ;;  %v16821_v32 = vmul.f32 0.1, %v21206_v22  ;;  %v21208_v37 = vld [vmem:[#allocation18_spill] sm:$0xff] }
 0x8a3   :  { %v16824_v41 = vmul.f32 0.1, %v21208_v37  ;;  %21209 = vst [vmem:[#allocation55_spill] sm:$0xff] %v16828_v9  ;;  %5197 = vst [vmem:[#allocation2 + $0x108] sm:$0xff] %v16800_v61  ;;  %v21210_v17 = vld [vmem:[#allocation22_spill] sm:$0xff]  ;;  %v21213_v62 = vld [vmem:[#allocation20_spill] sm:$0xff] }
 0x8a4   :  { %21205 = vst [vmem:[#allocation54_spill] sm:$0xff] %v16818_v39  ;;  %21207 = vst [vmem:[#allocation28_spill] sm:$0xff] %v16821_v32  ;;  %v16832_v54 = vmul.f32 0.1, %v21210_v17  ;;  %v21212_v12 = vld [vmem:[#allocation10_spill] sm:$0xff]  ;;  %v21215_v37 = vld [vmem:[#allocation5_spill] sm:$0xff] }
 0x8a5   :  { %v16835_v3 = vmul.f32 0.1, %v21212_v12  ;;  %v16838_v39 = vmul.f32 0.1, %v21213_v62  ;;  %v21214_v22 = vld [vmem:[#allocation50_spill] sm:$0xff]  ;;  %5198 = vst [vmem:[#allocation2 + $0x110] sm:$0xff] %v16814_v35  ;;  %v16856_v12 = vmax.f32 %v16437_v49, %v16660_v30 }
 0x8a6   :  { %21211 = vst [vmem:[#allocation29_spill] sm:$0xff] %v16832_v54  ;;  %v16842_v32 = vmax.f32 %v21214_v22, %v16653_v40  ;;  %v16846_v52 = vmul.f32 0.1, %v21215_v37  ;;  %v21216_v60 = vld [vmem:[#allocation7_spill] sm:$0xff]  ;;  %v21217_v17 = vld [vmem:[#allocation25_spill] sm:$0xff]  ;;  %5199 = vst [vmem:[#allocation2 + $0x128] sm:$0xff] %v16828_v9  ;;  %v16861_v40 = vmax.f32 %v16441_v18, %v16663_v31 }
 0x8a7   :  { %v16849_v61 = vmul.f32 0.1, %v21216_v60  ;;  %v16852_v54 = vmul.f32 0.1, %v21217_v17  ;;  %v21218_v22 = vld [vmem:[#allocation57_spill] sm:$0xff]  ;;  %v16869_v60 = vmax.f32 %v16449_v10, %v16673_v36  ;;  %v16873_v17 = vmax.f32 %v16453_v47, %v16676_v63  ;;  %v16876_v30 = vld [vmem:[#allocation2 + $0x27] sm:$0xff] }
 0x8a8   :  { %v16865_v35 = vmax.f32 %v21218_v22, %v16666_v19  ;;  %5200 = vst [vmem:[#allocation2 + $0x130] sm:$0xff] %v16842_v32  ;;  %v5759_v49 = vld [vmem:[#allocation2 + $0x49] sm:$0xff]  ;;  %v5760_v9 = vld [vmem:[#allocation2 + $0x51] sm:$0xff]  ;;  %v16884_v19 = vmax.f32 %v16461_v5, %v16686_v26  ;;  %v16888_v36 = vmax.f32 %v16465_v16, %v16689_v46  ;;  %v21220_v10 = vld [vmem:[#allocation59_spill] sm:$0xff]  ;;  %v16897_v63 = vmax.f32 %v16473_v28, %v16699_v8 }
 0x8a9   :  { %v21219_v18 = vld [vmem:[#allocation14_spill] sm:$0xff]  ;;  %v16892_v47 = vmax.f32 %v21220_v10, %v16692_v14  ;;  %5201 = vst [vmem:[#allocation2 + $0x148] sm:$0xff] %v16856_v12  ;;  %10133 = vmatprep.mubr.f32.mxu1 %v5759_v49  ;;  %v5149_v16 = vmax.f32 %v16485_v21, %v16712_v56  ;;  %5202 = vst [vmem:[#allocation2 + $0x150] sm:$0xff] %v16861_v40  ;;  %6042 = vmatmul.mubr.f32.gmra.mrb[164].mxu0 %v16876_v30  ;;  %v21222_v28 = vld [vmem:[#allocation61_spill] sm:$0xff] }
 0x8aa   :  { %v16880_v31 = vmax.f32 %v21219_v18, %v16679_v27  ;;  %v16901_v27 = vmax.f32 %v16477_v38, %v16702_v4  ;;  %v21221_v26 = vld [vmem:[#allocation58_spill] sm:$0xff]  ;;  %5203 = vst [vmem:[#allocation2 + $0x168] sm:$0xff] %v16865_v35  ;;  %5204 = vst [vmem:[#allocation2 + $0x170] sm:$0xff] %v16869_v60  ;;  %v5150_v8 = vmax.f32 %v16489_v53, %v16715_v11  ;;  %10134 = vmatmul.mubr.f32.vlgmr.msra.gmra.mrb[160].mxu1 %v5760_v9  ;;  %v21223_v53 = vld [vmem:[#allocation60_spill] sm:$0xff] }
 0x8ab   :  { %v16905_v5 = vmax.f32 %v21221_v26, %v16705_v59  ;;  %5205 = vst [vmem:[#allocation2 + $0x188] sm:$0xff] %v16873_v17  ;;  %v16918_v38 = vmax.f32 %v21222_v28, %v16718_v25  ;;  %v16922_v56 = vmax.f32 %v16497_v57, %v16725_v58  ;;  %v16926_v21 = vmax.f32 %v16501_v33, %v16728_v51  ;;  %v21224_v33 = vld [vmem:[#allocation63_spill] sm:$0xff]  ;;  %v16952_v59 = vld [vmem:[#allocation2 + $0x69] sm:$0xff]  ;;  %v21227_v11 = vld [vmem:[#allocation62_spill] sm:$0xff] }
 0x8ac   :  { %5206 = vst [vmem:[#allocation2 + $0x190] sm:$0xff] %v16880_v31  ;;  %5207 = vst [vmem:[#allocation2 + $0x1a8] sm:$0xff] %v16884_v19  ;;  %v16934_v46 = vmax.f32 %v21223_v53, %v16731_v6  ;;  %v16938_v58 = vmax.f32 %v16509_v42, %v16738_v20  ;;  %v16942_v57 = vmax.f32 %v16513_v2, %v16741_v43  ;;  %v21225_v4 = vld [vmem:[#allocation27_spill] sm:$0xff]  ;;  %v21226_v2 = vld [vmem:[#allocation6_spill] sm:$0xff]  ;;  %10136 = vmatprep.mubr.f32.mxu1 %v16952_v59 }
 0x8ad   :  { %5208 = vst [vmem:[#allocation2 + $0x1b0] sm:$0xff] %v16888_v36  ;;  %5209 = vst [vmem:[#allocation2 + $0x1c8] sm:$0xff] %v16892_v47  ;;  %v16946_v14 = vmax.f32 %v21224_v33, %v16744_v1  ;;  %6046 = vmatprep.mubr.f32.mxu0 %v21225_v4  ;;  %v16956_v20 = vmax.f32 %v16521_v23, %v16751_v0  ;;  %v16960_v42 = vmax.f32 %v16525_v7, %v16754_v55  ;;  %v21228_v51 = vld [vmem:[#allocation65_spill] sm:$0xff]  ;;  %v21229_v23 = vld [vmem:[#allocation64_spill] sm:$0xff] }
 0x8ae   :  { %5210 = vst [vmem:[#allocation2 + $0x1d0] sm:$0xff] %v16897_v63  ;;  %5211 = vst [vmem:[#allocation2 + $0x1e8] sm:$0xff] %v16901_v27  ;;  %v16964_v25 = vmax.f32 %v21227_v11, %v21226_v2  ;;  %v16968_v6 = vmax.f32 %v21228_v51, %v16764_v50  ;;  %v16974_v0 = vld [vmem:[#allocation2 + $0x2f] sm:$0xff]  ;;  %v16978_v7 = vmax.f32 %v21229_v23, %v16767_v45  ;;  %v21230_v43 = vld [vmem:[#allocation23_spill] sm:$0xff] }
 0x8af   :  { %5212 = vst [vmem:[#allocation2 + $0x1f0] sm:$0xff] %v16905_v5  ;;  %5213 = vst [vmem:[#allocation2 + $0x208] sm:$0xff] %v5149_v16  ;;  %v21231_v1 = vld [vmem:[#allocation67_spill] sm:$0xff]  ;;  %v21232_v50 = vld [vmem:[#allocation66_spill] sm:$0xff]  ;;  %6047 = vmatmul.mubr.f32.gmra.mrb[166].mxu0 %v16974_v0 }
 0x8b0   :  { %5214 = vst [vmem:[#allocation2 + $0x210] sm:$0xff] %v5150_v8  ;;  %5215 = vst [vmem:[#allocation2 + $0x268] sm:$0xff] %v16918_v38  ;;  %v16982_v55 = vmax.f32 %v21231_v1, %v21230_v43  ;;  %v16986_v9 = vmax.f32 %v21232_v50, %v16777_v29  ;;  %v21233_v22 = vld [vmem:[#allocation69_spill] sm:$0xff]  ;;  %v21234_v18 = vld [vmem:[#allocation68_spill] sm:$0xff] }
 0x8b1   :  { %5216 = vst [vmem:[#allocation2 + $0x270] sm:$0xff] %v16922_v56  ;;  %5217 = vst [vmem:[#allocation2 + $0x288] sm:$0xff] %v16926_v21  ;;  %v16990_v49 = vmax.f32 %v21233_v22, %v16780_v48  ;;  %v16997_v45 = vld [vmem:[#allocation2 + $0x71] sm:$0xff]  ;;  %v17001_v29 = vmax.f32 %v21234_v18, %v16783_v24  ;;  %v21235_v10 = vld [vmem:[#allocation51_spill] sm:$0xff] }
 0x8b2   :  { %5218 = vst [vmem:[#allocation2 + $0x290] sm:$0xff] %v16934_v46  ;;  %5219 = vst [vmem:[#allocation2 + $0x2a8] sm:$0xff] %v16938_v58  ;;  %v21236_v26 = vld [vmem:[#allocation71_spill] sm:$0xff]  ;;  %v21237_v16 = vld [vmem:[#allocation70_spill] sm:$0xff]  ;;  %10137 = vmatmul.mubr.f32.gmra.mrb[162].mxu1 %v16997_v45 }
 0x8b3   :  { %5220 = vst [vmem:[#allocation2 + $0x2b0] sm:$0xff] %v16942_v57  ;;  %5221 = vst [vmem:[#allocation2 + $0x2c8] sm:$0xff] %v16946_v14  ;;  %v17005_v48 = vmax.f32 %v21236_v26, %v21235_v10  ;;  %v17009_v8 = vmax.f32 %v21237_v16, %v16793_v34  ;;  %v21238_v28 = vld [vmem:[#allocation73_spill] sm:$0xff]  ;;  %v21239_v24 = vld [vmem:[#allocation52_spill] sm:$0xff] }
 0x8b4   :  { %v17013_v53 = vmax.f32 %v21238_v28, %v16796_v44  ;;  %5222 = vst [vmem:[#allocation2 + $0x2d0] sm:$0xff] %v16956_v20  ;;  %5223 = vst [vmem:[#allocation2 + $0x2e8] sm:$0xff] %v16960_v42  ;;  %v21240_v33 = vld [vmem:[#allocation72_spill] sm:$0xff]  ;;  %v21241_v34 = vld [vmem:[#allocation75_spill] sm:$0xff] }
 0x8b5   :  { %5224 = vst [vmem:[#allocation2 + $0x2f0] sm:$0xff] %v16964_v25  ;;  %5225 = vst [vmem:[#allocation2 + $0x308] sm:$0xff] %v16968_v6  ;;  %v17022_v4 = vmax.f32 %v21240_v33, %v21239_v24  ;;  %v17026_v2 = vmax.f32 %v21241_v34, %v16807_v15  ;;  %v21242_v44 = vld [vmem:[#allocation74_spill] sm:$0xff]  ;;  %v21244_v23 = vld [vmem:[#allocation77_spill] sm:$0xff] }
 0x8b6   :  { %v17030_v11 = vmax.f32 %v21242_v44, %v16810_v13  ;;  %v21243_v51 = vld [vmem:[#allocation54_spill] sm:$0xff]  ;;  %5226 = vst [vmem:[#allocation2 + $0x310] sm:$0xff] %v16978_v7  ;;  %5227 = vst [vmem:[#allocation2 + $0x328] sm:$0xff] %v16982_v55  ;;  %v21245_v1 = vld [vmem:[#allocation37_spill] sm:$0xff] }
 0x8b7   :  { %v17034_v43 = vmax.f32 %v21244_v23, %v21243_v51  ;;  %5228 = vst [vmem:[#allocation2 + $0x330] sm:$0xff] %v16986_v9  ;;  %5229 = vst [vmem:[#allocation2 + $0x348] sm:$0xff] %v16990_v49  ;;  %6051 = vmatprep.mubr.f32.mxu0 %v21245_v1  ;;  %v17041_v15 = vld [vmem:[#allocation2 + $0x89] sm:$0xff]  ;;  %v5867_v13 = vld [vmem:[%s20418_s4 + $0x160] sm:$0xff]  ;;  %v5179_v23 = vmax.f32 %v21215_v37, %v16846_v52 }
 0x8b8   :  { %v5868_v50 = vld [vmem:[%s20418_s4 + $0x168] sm:$0xff]  ;;  %v21248_v26 = vld [vmem:[#allocation18_spill] sm:$0xff]  ;;  %v21249_v28 = vld [vmem:[#allocation29_spill] sm:$0xff]  ;;  %5230 = vst [vmem:[#allocation2 + $0x350] sm:$0xff] %v17001_v29  ;;  %10139 = vmatprep.mubr.f32.mxu1 %v17041_v15 }
 0x8b9   :  { %v21246_v22 = vld [vmem:[#allocation28_spill] sm:$0xff]  ;;  %v5175_v16 = vmax.f32 %v21248_v26, %v16824_v41  ;;  %v21250_v24 = vld [vmem:[#allocation22_spill] sm:$0xff]  ;;  %5231 = vst [vmem:[#allocation2 + $0x368] sm:$0xff] %v17005_v48  ;;  %5232 = vst [vmem:[#allocation2 + $0x370] sm:$0xff] %v17009_v8  ;;  %v5178_v41 = vmax.f32 %v21213_v62, %v16838_v39  ;;  %v10712_v52 = vpack.c.bf16 %v5868_v50, %v5867_v13 }
 0x8ba   :  { %v21247_v18 = vld [vmem:[#allocation76_spill] sm:$0xff]  ;;  %v5176_v33 = vmax.f32 %v21250_v24, %v21249_v28  ;;  %v21251_v34 = vld [vmem:[#allocation10_spill] sm:$0xff]  ;;  %5233 = vst [vmem:[#allocation2 + $0x388] sm:$0xff] %v17013_v53  ;;  %5234 = vst [vmem:[#allocation2 + $0x390] sm:$0xff] %v17022_v4  ;;  %v21256_v24 = vmov 0.0|0.0  }
 0x8bb   :  { %v17051_v10 = vmax.f32 %v21247_v18, %v21246_v22  ;;  %v5177_v44 = vmax.f32 %v21251_v34, %v16835_v3  ;;  %v17064_v51 = vld [vmem:[#allocation2 + $0x47] sm:$0xff]  ;;  %v21253_v22 = vld [vmem:[#allocation25_spill] sm:$0xff]  ;;  %5235 = vst [vmem:[#allocation2 + $0x3a8] sm:$0xff] %v17026_v2  ;;  %5236 = vst [vmem:[#allocation2 + $0x3b0] sm:$0xff] %v17030_v11  ;;  %10713 = vmatpush1.bf16.msra.mxu0 %v10712_v52 }
 0x8bc   :  { %v21252_v3 = vld [vmem:[#allocation7_spill] sm:$0xff]  ;;  %v5182_v18 = vmax.f32 %v21253_v22, %v16852_v54  ;;  %5237 = vst [vmem:[#allocation2 + $0x3c8] sm:$0xff] %v17034_v43  ;;  %6052 = vmatmul.mubr.f32.gmra.mrb[168].mxu0 %v17064_v51  ;;  %v17079_v62 = vld [vmem:[#allocation2 + $0x91] sm:$0xff]  ;;  %5239 = vst [vmem:[#allocation2 + $0x3e8] sm:$0xff] %v5175_v16  ;;  %10714 = vmatprep.subr.bf16.mxu0 %v21256_v24 }
 0x8bd   :  { %v5180_v1 = vmax.f32 %v21252_v3, %v16849_v61  ;;  %v5869_v37 = vld [vmem:[%s20418_s4 + $0x170] sm:$0xff]  ;;  %v5870_v61 = vld [vmem:[%s20418_s4 + $0x178] sm:$0xff]  ;;  %5238 = vst [vmem:[#allocation2 + $0x3d0] sm:$0xff] %v17051_v10  ;;  %5240 = vst [vmem:[#allocation2 + $0x3f0] sm:$0xff] %v5176_v33  ;;  %10140 = vmatmul.mubr.f32.gmra.mrb[164].mxu1 %v17079_v62 }
 0x8be   :  { %5241 = vst [vmem:[#allocation2 + $0x408] sm:$0xff] %v5177_v44  ;;  %v21254_v39 = vld [vmem:[#allocation16_spill] sm:$0xff]  ;;  %5242 = vst [vmem:[#allocation2 + $0x410] sm:$0xff] %v5178_v41  ;;  %v10715_v28 = vpack.c.bf16 %v5870_v61, %v5869_v37  ;;  %v5766_v16 = vld [vmem:[#allocation2 + $0xb1] sm:$0xff] }
 0x8bf   :  { %6056 = vmatprep.mubr.f32.mxu0 %v21254_v39  ;;  %v17090_v54 = vld [vmem:[#allocation2 + $0xa9] sm:$0xff]  ;;  %5243 = vst [vmem:[#allocation2 + $0x428] sm:$0xff] %v5179_v23  ;;  %5244 = vst [vmem:[#allocation2 + $0x430] sm:$0xff] %v5180_v1  ;;  %v21257_v33 = vld [vmem:[#allocation39_spill] sm:$0xff] }
 0x8c0   :  { %21255 = vst [vmem:[#allocation11_spill] sm:$0xff] %v17090_v54  ;;  %5246 = vst [vmem:[#allocation2 + $0x450] sm:$0xff] %v5182_v18  ;;  %10142 = vmatprep.mubr.f32.mxu1 %v17090_v54  ;;  %v17093_v26 = vld [vmem:[#allocation2 + $0x4f] sm:$0xff]  ;;  %v17098_v13 = vld [vmem:[#allocation2 + $0x67] sm:$0xff]  ;;  %10716 = vmatpush1.bf16.msra.mxu0 %v10715_v28 }
 0x8c1   :  { %6057 = vmatmul.mubr.f32.gmra.mrb[170].mxu0 %v17093_v26  ;;  %10143 = vmatmul.mubr.f32.gmra.mrb[166].mxu1 %v5766_v16  ;;  %v5767_v34 = vld [vmem:[#allocation2 + $0xc9] sm:$0xff]  ;;  %v5768_v50 = vld [vmem:[#allocation2 + $0xd1] sm:$0xff]  ;;  %v21258_v44 = vld [vmem:[#allocation19_spill] sm:$0xff] }
 0x8c2   :  { %6061 = vmatprep.mubr.f32.mxu0 %v21257_v33  ;;  %10145 = vmatprep.mubr.f32.mxu1 %v5767_v34  ;;  %v5769_v41 = vld [vmem:[#allocation2 + $0xe9] sm:$0xff]  ;;  %v5770_v3 = vld [vmem:[#allocation2 + $0xf1] sm:$0xff]  ;;  %v21260_v61 = vld [vmem:[#allocation3_spill] sm:$0xff] }
 0x8c3   :  { %10717 = vmatprep.subr.bf16.mxu0 %v21256_v24  ;;  %v17103_v23 = vld [vmem:[#allocation2 + $0x6f] sm:$0xff]  ;;  %v17107_v18 = vld [vmem:[#allocation2 + $0x87] sm:$0xff] }
 0x8c4   :  { %v21259_v1 = vld [vmem:[#allocation17_spill] sm:$0xff]  ;;  %v5871_v16 = vld [vmem:[%s20418_s4 + $0x180] sm:$0xff]  ;;  %v5872_v33 = vld [vmem:[%s20418_s4 + $0x188] sm:$0xff] }
 0x8c5   :  { %6062 = vmatmul.mubr.f32.gmra.mrb[172].mxu0 %v17098_v13  ;;  %10146 = vmatmul.mubr.f32.gmra.mrb[168].mxu1 %v5768_v50  ;;  %v5771_v22 = vld [vmem:[#allocation2 + $0x109] sm:$0xff]  ;;  %v5772_v37 = vld [vmem:[#allocation2 + $0x111] sm:$0xff] }
 0x8c6   :  { %6066 = vmatprep.mubr.f32.mxu0 %v21258_v44  ;;  %10148 = vmatprep.mubr.f32.mxu1 %v5769_v41  ;;  %v5773_v39 = vld [vmem:[#allocation2 + $0x129] sm:$0xff]  ;;  %v5774_v28 = vld [vmem:[#allocation2 + $0x131] sm:$0xff]  ;;  %v10718_v44 = vpack.c.bf16 %v5872_v33, %v5871_v16 }
 0x8c7   :  { %v17111_v52 = vld [vmem:[#allocation2 + $0x8f] sm:$0xff]  ;;  %v17159_v54 = vld [vmem:[#allocation2 + $0xe7] sm:$0xff] }
 0x8c8   :  { %v21261_v34 = vld [vmem:[#allocation4_spill] sm:$0xff]  ;;  %v5873_v41 = vld [vmem:[%s20418_s4 + $0x190] sm:$0xff]  ;;  %10719 = vmatpush1.bf16.msra.mxu0 %v10718_v44  ;;  %21267 = vst [vmem:[#allocation30_spill] sm:$0xff] %v17159_v54 }
 0x8c9   :  { %6067 = vmatmul.mubr.f32.gmra.mrb[174].mxu0 %v17103_v23  ;;  %10149 = vmatmul.mubr.f32.gmra.mrb[170].mxu1 %v5770_v3  ;;  %v5775_v50 = vld [vmem:[#allocation2 + $0x149] sm:$0xff]  ;;  %v5874_v3 = vld [vmem:[%s20418_s4 + $0x198] sm:$0xff] }
 0x8ca   :  { %6071 = vmatprep.mubr.f32.mxu0 %v21259_v1  ;;  %10151 = vmatprep.mubr.f32.mxu1 %v5771_v22  ;;  %v17127_v1 = vld [vmem:[#allocation2 + $0xa7] sm:$0xff]  ;;  %v10721_v22 = vpack.c.bf16 %v5874_v3, %v5873_v41  ;;  %v17138_v33 = vld [vmem:[#allocation2 + $0xaf] sm:$0xff] }
 0x8cb   :  { %10720 = vmatprep.subr.bf16.mxu0 %v21256_v24  ;;  %v5777_v16 = vld [vmem:[#allocation2 + $0x169] sm:$0xff] }
 0x8cc   :  { %10722 = vmatpush1.bf16.msra.mxu0 %v10721_v22  ;;  %v21263_v44 = vld [vmem:[#allocation36_spill] sm:$0xff]  ;;  %v5877_v22 = vld [vmem:[%s20418_s4 + $0x1b0] sm:$0xff] }
 0x8cd   :  { %6072 = vmatmul.mubr.f32.gmra.mrb[176].mxu0 %v17107_v18  ;;  %10152 = vmatmul.mubr.f32.gmra.mrb[172].mxu1 %v5772_v37  ;;  %v5776_v37 = vld [vmem:[#allocation2 + $0x151] sm:$0xff]  ;;  %v5779_v41 = vld [vmem:[#allocation2 + $0x189] sm:$0xff] }
 0x8ce   :  { %6076 = vmatprep.mubr.f32.mxu0 %v21260_v61  ;;  %10154 = vmatprep.mubr.f32.mxu1 %v5773_v39  ;;  %v5875_v61 = vld [vmem:[%s20418_s4 + $0x1a0] sm:$0xff]  ;;  %v5876_v39 = vld [vmem:[%s20418_s4 + $0x1a8] sm:$0xff] }
 0x8cf   :  { %10723 = vmatprep.subr.bf16.mxu0 %v21256_v24  ;;  %v17143_v3 = vld [vmem:[#allocation2 + $0xc7] sm:$0xff] }
 0x8d1   :  { %6077 = vmatmul.mubr.f32.gmra.mrb[178].mxu0 %v17111_v52  ;;  %10155 = vmatmul.mubr.f32.gmra.mrb[174].mxu1 %v5774_v28  ;;  %v21262_v28 = vld [vmem:[#allocation8_spill] sm:$0xff] }
 0x8d2   :  { %6081 = vmatprep.mubr.f32.mxu0 %v21261_v34  ;;  %10157 = vmatprep.mubr.f32.mxu1 %v5775_v50  ;;  %v10724_v34 = vpack.c.bf16 %v5876_v39, %v5875_v61  ;;  %v5778_v50 = vld [vmem:[#allocation2 + $0x171] sm:$0xff]  ;;  %v21264_v39 = vld [vmem:[#allocation15_spill] sm:$0xff] }
 0x8d3   :  { %v5878_v61 = vld [vmem:[%s20418_s4 + $0x1b8] sm:$0xff] }
 0x8d4   :  { %10725 = vmatpush1.bf16.msra.mxu0 %v10724_v34  ;;  %v17154_v34 = vld [vmem:[#allocation2 + $0xcf] sm:$0xff] }
 0x8d5   :  { %6082 = vmatmul.mubr.f32.gmra.mrb[180].mxu0 %v17127_v1  ;;  %10158 = vmatmul.mubr.f32.gmra.mrb[176].mxu1 %v5776_v37  ;;  %v5780_v37 = vld [vmem:[#allocation2 + $0x191] sm:$0xff]  ;;  %21265 = vst [vmem:[#allocation56_spill] sm:$0xff] %v17154_v34 }
 0x8d6   :  { %6086 = vmatprep.mubr.f32.mxu0 %v21262_v28  ;;  %10160 = vmatprep.mubr.f32.mxu1 %v5777_v16  ;;  %v5781_v28 = vld [vmem:[#allocation2 + $0x1a9] sm:$0xff]  ;;  %v10727_v16 = vpack.c.bf16 %v5878_v61, %v5877_v22 }
 0x8d7   :  { %10726 = vmatprep.subr.bf16.mxu0 %v21256_v24  ;;  %v21268_v22 = vld [vmem:[#allocation49_spill] sm:$0xff] }
 0x8d8   :  { %10728 = vmatpush1.bf16.msra.mxu0 %v10727_v16  ;;  %v5785_v61 = vld [vmem:[#allocation2 + $0x1e9] sm:$0xff] }
 0x8d9   :  { %6087 = vmatmul.mubr.f32.gmra.mrb[182].mxu0 %v17138_v33  ;;  %10161 = vmatmul.mubr.f32.gmra.mrb[178].mxu1 %v5778_v50  ;;  %v5782_v50 = vld [vmem:[#allocation2 + $0x1b1] sm:$0xff]  ;;  %v21270_v16 = vld [vmem:[#allocation12_spill] sm:$0xff] }
 0x8da   :  { %6091 = vmatprep.mubr.f32.mxu0 %v21263_v44  ;;  %10163 = vmatprep.mubr.f32.mxu1 %v5779_v41  ;;  %v21266_v44 = vld [vmem:[#allocation9_spill] sm:$0xff] }
 0x8db   :  { %10729 = vmatprep.subr.bf16.mxu0 %v21256_v24  ;;  %v5783_v41 = vld [vmem:[#allocation2 + $0x1c9] sm:$0xff] }
 0x8dd   :  { %6092 = vmatmul.mubr.f32.gmra.mrb[184].mxu0 %v17143_v3  ;;  %10164 = vmatmul.mubr.f32.gmra.mrb[180].mxu1 %v5780_v37  ;;  %v5784_v37 = vld [vmem:[#allocation2 + $0x1d1] sm:$0xff] }
 0x8de   :  { %6096 = vmatprep.mubr.f32.mxu0 %v21264_v39  ;;  %10166 = vmatprep.mubr.f32.mxu1 %v5781_v28  ;;  %v17163_v39 = vld [vmem:[#allocation2 + $0xef] sm:$0xff] }
 0x8df   :  { %21269 = vst [vmem:[#allocation31_spill] sm:$0xff] %v17163_v39  ;;  %v5786_v28 = vld [vmem:[#allocation2 + $0x1f1] sm:$0xff] }
 0x8e1   :  { %6097 = vmatmul.mubr.f32.gmra.mrb[186].mxu0 %v17154_v34  ;;  %10167 = vmatmul.mubr.f32.gmra.mrb[182].mxu1 %v5782_v50  ;;  %v5787_v50 = vld [vmem:[#allocation2 + $0x209] sm:$0xff] }
 0x8e2   :  { %6101 = vmatprep.mubr.f32.mxu0 %v21266_v44  ;;  %10169 = vmatprep.mubr.f32.mxu1 %v5783_v41  ;;  %v17167_v44 = vld [vmem:[#allocation2 + $0x107] sm:$0xff] }
 0x8e3   :  { %21271 = vst [vmem:[#allocation32_spill] sm:$0xff] %v17167_v44  ;;  %v5789_v41 = vld [vmem:[#allocation2 + $0x229] sm:$0xff] }
 0x8e4   :  { %v17182_v34 = vld [vmem:[#allocation2 + $0x127] sm:$0xff] }
 0x8e5   :  { %6102 = vmatmul.mubr.f32.gmra.mrb[188].mxu0 %v17159_v54  ;;  %10170 = vmatmul.mubr.f32.gmra.mrb[184].mxu1 %v5784_v37  ;;  %v5788_v37 = vld [vmem:[#allocation2 + $0x211] sm:$0xff]  ;;  %v5791_v54 = vld [vmem:[#allocation2 + $0x289] sm:$0xff] }
 0x8e6   :  { %6106 = vmatprep.mubr.f32.mxu0 %v21268_v22  ;;  %10172 = vmatprep.mubr.f32.mxu1 %v5785_v61  ;;  %v5879_v22 = vld [vmem:[%s20418_s4 + $0x1c0] sm:$0xff]  ;;  %v5880_v61 = vld [vmem:[%s20418_s4 + $0x1c8] sm:$0xff] }
 0x8e9   :  { %6107 = vmatmul.mubr.f32.gmra.mrb[190].mxu0 %v17163_v39  ;;  %10173 = vmatmul.mubr.f32.gmra.mrb[186].mxu1 %v5786_v28  ;;  %v21272_v28 = vld [vmem:[#allocation26_spill] sm:$0xff]  ;;  %v17177_v39 = vld [vmem:[#allocation2 + $0x10f] sm:$0xff] }
 0x8ea   :  { %6111 = vmatprep.mubr.f32.mxu0 %v21270_v16  ;;  %10175 = vmatprep.mubr.f32.mxu1 %v5787_v50  ;;  %v10730_v16 = vpack.c.bf16 %v5880_v61, %v5879_v22  ;;  %v5790_v50 = vld [vmem:[#allocation2 + $0x231] sm:$0xff] }
 0x8eb   :  { %v17186_v22 = vld [vmem:[#allocation2 + $0x12f] sm:$0xff] }
 0x8ec   :  { %10731 = vmatpush1.bf16.msra.mxu0 %v10730_v16  ;;  %v5794_v61 = vld [vmem:[#allocation2 + $0x2b1] sm:$0xff] }
 0x8ed   :  { %6112 = vmatmul.mubr.f32.gmra.mrb[192].mxu0 %v17167_v44  ;;  %10176 = vmatmul.mubr.f32.gmra.mrb[188].mxu1 %v5788_v37  ;;  %v21273_v44 = vld [vmem:[#allocation55_spill] sm:$0xff]  ;;  %v5792_v37 = vld [vmem:[#allocation2 + $0x291] sm:$0xff] }
 0x8ee   :  { %6116 = vmatprep.mubr.f32.mxu0 %v21272_v28  ;;  %10178 = vmatprep.mubr.f32.mxu1 %v5789_v41  ;;  %v5793_v41 = vld [vmem:[#allocation2 + $0x2a9] sm:$0xff]  ;;  %v5796_v28 = vld [vmem:[#allocation2 + $0x2d1] sm:$0xff] }
 0x8ef   :  { %10732 = vmatprep.subr.bf16.mxu0 %v21256_v24  ;;  %v5882_v16 = vld [vmem:[%s20418_s4 + $0x1d8] sm:$0xff] }
 0x8f1   :  { %6117 = vmatmul.mubr.f32.gmra.mrb[194].mxu0 %v17177_v39  ;;  %10179 = vmatmul.mubr.f32.gmra.mrb[190].mxu1 %v5790_v50  ;;  %v5797_v50 = vld [vmem:[#allocation2 + $0x2e9] sm:$0xff] }
 0x8f2   :  { %6121 = vmatprep.mubr.f32.mxu0 %v21273_v44  ;;  %10181 = vmatprep.mubr.f32.mxu1 %v5791_v54  ;;  %v5795_v44 = vld [vmem:[#allocation2 + $0x2c9] sm:$0xff] }
 0x8f3   :  { %v17190_v54 = vld [vmem:[#allocation2 + $0x147] sm:$0xff] }
 0x8f5   :  { %6122 = vmatmul.mubr.f32.gmra.mrb[196].mxu0 %v17182_v34  ;;  %10182 = vmatmul.mubr.f32.gmra.mrb[192].mxu1 %v5792_v37  ;;  %v17200_v37 = vld [vmem:[#allocation2 + $0x14f] sm:$0xff] }
 0x8f6   :  { %6126 = vmatprep.mubr.f32.mxu0 %v16842_v32  ;;  %10184 = vmatprep.mubr.f32.mxu1 %v5793_v41  ;;  %v5881_v32 = vld [vmem:[%s20418_s4 + $0x1d0] sm:$0xff] }
 0x8f7   :  { %v5798_v41 = vld [vmem:[#allocation2 + $0x2f1] sm:$0xff] }
 0x8f9   :  { %6127 = vmatmul.mubr.f32.gmra.mrb[198].mxu0 %v17186_v22  ;;  %10185 = vmatmul.mubr.f32.gmra.mrb[194].mxu1 %v5794_v61  ;;  %v5799_v61 = vld [vmem:[#allocation2 + $0x309] sm:$0xff] }
 0x8fa   :  { %6131 = vmatprep.mubr.f32.mxu0 %v16856_v12  ;;  %10187 = vmatprep.mubr.f32.mxu1 %v5795_v44  ;;  %v10733_v12 = vpack.c.bf16 %v5882_v16, %v5881_v32  ;;  %v17205_v44 = vld [vmem:[#allocation2 + $0x167] sm:$0xff]  ;;  %v17209_v32 = vld [vmem:[#allocation2 + $0x16f] sm:$0xff] }
 0x8fb   :  { %v5802_v16 = vld [vmem:[#allocation2 + $0x331] sm:$0xff] }
 0x8fc   :  { %10734 = vmatpush1.bf16.msra.mxu0 %v10733_v12  ;;  %v5804_v12 = vld [vmem:[#allocation2 + $0x351] sm:$0xff] }
 0x8fd   :  { %6132 = vmatmul.mubr.f32.gmra.mrb[200].mxu0 %v17190_v54  ;;  %10188 = vmatmul.mubr.f32.gmra.mrb[196].mxu1 %v5796_v28  ;;  %v5801_v28 = vld [vmem:[#allocation2 + $0x329] sm:$0xff] }
 0x8fe   :  { %6136 = vmatprep.mubr.f32.mxu0 %v16861_v40  ;;  %10190 = vmatprep.mubr.f32.mxu1 %v5797_v50  ;;  %v5800_v40 = vld [vmem:[#allocation2 + $0x311] sm:$0xff]  ;;  %v17213_v50 = vld [vmem:[#allocation2 + $0x187] sm:$0xff] }
 0x8ff   :  { %10735 = vmatprep.subr.bf16.mxu0 %v21256_v24 }
 0x901   :  { %6137 = vmatmul.mubr.f32.gmra.mrb[202].mxu0 %v17200_v37  ;;  %10191 = vmatmul.mubr.f32.gmra.mrb[198].mxu1 %v5798_v41  ;;  %v5884_v41 = vld [vmem:[%s20418_s4 + $0x1e8] sm:$0xff] }
 0x902   :  { %6141 = vmatprep.mubr.f32.mxu0 %v16865_v35  ;;  %10193 = vmatprep.mubr.f32.mxu1 %v5799_v61  ;;  %v5803_v35 = vld [vmem:[#allocation2 + $0x349] sm:$0xff] }
 0x903   :  { %v5805_v61 = vld [vmem:[#allocation2 + $0x369] sm:$0xff] }
 0x905   :  { %6142 = vmatmul.mubr.f32.gmra.mrb[204].mxu0 %v17205_v44  ;;  %10194 = vmatmul.mubr.f32.gmra.mrb[200].mxu1 %v5800_v40  ;;  %v17223_v40 = vld [vmem:[#allocation2 + $0x18f] sm:$0xff] }
 0x906   :  { %6146 = vmatprep.mubr.f32.mxu0 %v16869_v60  ;;  %10196 = vmatprep.mubr.f32.mxu1 %v5801_v28  ;;  %v5883_v60 = vld [vmem:[%s20418_s4 + $0x1e0] sm:$0xff]  ;;  %v5806_v28 = vld [vmem:[#allocation2 + $0x371] sm:$0xff] }
 0x909   :  { %6147 = vmatmul.mubr.f32.gmra.mrb[206].mxu0 %v17209_v32  ;;  %10197 = vmatmul.mubr.f32.gmra.mrb[202].mxu1 %v5802_v16  ;;  %v5807_v16 = vld [vmem:[#allocation2 + $0x389] sm:$0xff] }
 0x90a   :  { %6151 = vmatprep.mubr.f32.mxu0 %v16873_v17  ;;  %10199 = vmatprep.mubr.f32.mxu1 %v5803_v35  ;;  %v10736_v17 = vpack.c.bf16 %v5884_v41, %v5883_v60  ;;  %v17228_v35 = vld [vmem:[#allocation2 + $0x1a7] sm:$0xff]  ;;  %v17232_v60 = vld [vmem:[#allocation2 + $0x1af] sm:$0xff] }
 0x90b   :  { %v5810_v41 = vld [vmem:[#allocation2 + $0x3b1] sm:$0xff] }
 0x90c   :  { %10737 = vmatpush1.bf16.msra.mxu0 %v10736_v17  ;;  %v5812_v17 = vld [vmem:[#allocation2 + $0x3d1] sm:$0xff] }
 0x90d   :  { %6152 = vmatmul.mubr.f32.gmra.mrb[208].mxu0 %v17213_v50  ;;  %10200 = vmatmul.mubr.f32.gmra.mrb[204].mxu1 %v5804_v12  ;;  %v5809_v12 = vld [vmem:[#allocation2 + $0x3a9] sm:$0xff] }
 0x90e   :  { %6156 = vmatprep.mubr.f32.mxu0 %v16880_v31  ;;  %10202 = vmatprep.mubr.f32.mxu1 %v5805_v61  ;;  %v5808_v31 = vld [vmem:[#allocation2 + $0x391] sm:$0xff]  ;;  %v17236_v61 = vld [vmem:[#allocation2 + $0x1c7] sm:$0xff] }
 0x90f   :  { %10738 = vmatprep.subr.bf16.mxu0 %v21256_v24 }
 0x911   :  { %6157 = vmatmul.mubr.f32.gmra.mrb[210].mxu0 %v17223_v40  ;;  %10203 = vmatmul.mubr.f32.gmra.mrb[206].mxu1 %v5806_v28  ;;  %v5886_v28 = vld [vmem:[%s20418_s4 + $0x1f8] sm:$0xff] }
 0x912   :  { %6161 = vmatprep.mubr.f32.mxu0 %v16884_v19  ;;  %10205 = vmatprep.mubr.f32.mxu1 %v5807_v16  ;;  %v5811_v19 = vld [vmem:[#allocation2 + $0x3c9] sm:$0xff] }
 0x913   :  { %v5813_v16 = vld [vmem:[#allocation2 + $0x3e9] sm:$0xff] }
 0x915   :  { %6162 = vmatmul.mubr.f32.gmra.mrb[212].mxu0 %v17228_v35  ;;  %10206 = vmatmul.mubr.f32.gmra.mrb[208].mxu1 %v5808_v31  ;;  %v17246_v31 = vld [vmem:[#allocation2 + $0x1cf] sm:$0xff] }
 0x916   :  { %6166 = vmatprep.mubr.f32.mxu0 %v16888_v36  ;;  %10208 = vmatprep.mubr.f32.mxu1 %v5809_v12  ;;  %v5885_v36 = vld [vmem:[%s20418_s4 + $0x1f0] sm:$0xff] }
 0x917   :  { %v5814_v12 = vld [vmem:[#allocation2 + $0x3f1] sm:$0xff] }
 0x919   :  { %6167 = vmatmul.mubr.f32.gmra.mrb[214].mxu0 %v17232_v60  ;;  %10209 = vmatmul.mubr.f32.gmra.mrb[210].mxu1 %v5810_v41  ;;  %v5815_v41 = vld [vmem:[#allocation2 + $0x409] sm:$0xff] }
 0x91a   :  { %6171 = vmatprep.mubr.f32.mxu0 %v16892_v47  ;;  %10211 = vmatprep.mubr.f32.mxu1 %v5811_v19  ;;  %v10739_v47 = vpack.c.bf16 %v5886_v28, %v5885_v36  ;;  %v17251_v19 = vld [vmem:[#allocation2 + $0x1e7] sm:$0xff]  ;;  %v17255_v36 = vld [vmem:[#allocation2 + $0x1ef] sm:$0xff] }
 0x91b   :  { %v5818_v28 = vld [vmem:[#allocation2 + $0x431] sm:$0xff] }
 0x91c   :  { %10740 = vmatpush1.bf16.msra.mxu0 %v10739_v47  ;;  %v5279_v47 = vld [vmem:[#allocation2 + $0x247] sm:$0xff] }
 0x91d   :  { %6172 = vmatmul.mubr.f32.gmra.mrb[216].mxu0 %v17236_v61  ;;  %10212 = vmatmul.mubr.f32.gmra.mrb[212].mxu1 %v5812_v17  ;;  %v5817_v17 = vld [vmem:[#allocation2 + $0x429] sm:$0xff] }
 0x91e   :  { %6176 = vmatprep.mubr.f32.mxu0 %v16897_v63  ;;  %10214 = vmatprep.mubr.f32.mxu1 %v5813_v16  ;;  %v5816_v63 = vld [vmem:[#allocation2 + $0x411] sm:$0xff]  ;;  %v5819_v16 = vld [vmem:[#allocation2 + $0x449] sm:$0xff] }
 0x91f   :  { %10741 = vmatprep.subr.bf16.mxu0 %v21256_v24 }
 0x921   :  { %6177 = vmatmul.mubr.f32.gmra.mrb[218].mxu0 %v17246_v31  ;;  %10215 = vmatmul.mubr.f32.gmra.mrb[214].mxu1 %v5814_v12  ;;  %v5820_v12 = vld [vmem:[#allocation2 + $0x451] sm:$0xff] }
 0x922   :  { %6181 = vmatprep.mubr.f32.mxu0 %v16901_v27  ;;  %10217 = vmatprep.mubr.f32.mxu1 %v5815_v41  ;;  %v11705_v27 = vld [vmem:[#allocation2] sm:$0xff]  ;;  %v5280_v41 = vld [vmem:[#allocation2 + $0x24f] sm:$0xff] }
 0x925   :  { %6182 = vmatmul.mubr.f32.gmra.mrb[220].mxu0 %v17251_v19  ;;  %10218 = vmatmul.mubr.f32.gmra.mrb[216].mxu1 %v5816_v63  ;;  %v17263_v63 = vld [vmem:[#allocation2 + $0x26f] sm:$0xff] }
 0x926   :  { %6186 = vmatprep.mubr.f32.mxu0 %v16905_v5  ;;  %10220 = vmatprep.mubr.f32.mxu1 %v5817_v17  ;;  %v17259_v5 = vld [vmem:[#allocation2 + $0x267] sm:$0xff] }
 0x927   :  { %v17267_v17 = vld [vmem:[#allocation2 + $0x287] sm:$0xff] }
 0x929   :  { %6187 = vmatmul.mubr.f32.gmra.mrb[222].mxu0 %v17255_v36  ;;  %10221 = vmatmul.mubr.f32.gmra.mrb[218].mxu1 %v5818_v28  ;;  %v17271_v28 = vld [vmem:[#allocation2 + $0x28f] sm:$0xff] }
 0x92a   :  { %6191 = vmatprep.mubr.f32.mxu0 %v11705_v27  ;;  %10223 = vmatprep.mubr.f32.mxu1 %v5819_v16 }
 0x92d   :  { %6192 = vmatmul.mubr.f32.gmra.mrb[224].mxu0 %v5279_v47  ;;  %10224 = vmatmul.mubr.f32.gmra.mrb[220].mxu1 %v5820_v12  ;;  %v5369_v12 = vld [vmem:[#allocation2 + $0x3e8] sm:$0xff] }
 0x92e   :  { %6196 = vmatprep.mubr.f32.mxu0 %v11705_v27 }
 0x931   :  { %6197 = vmatmul.mubr.f32.gmra.mrb[226].mxu0 %v5280_v41 }
 0x932   :  { %6201 = vmatprep.mubr.f32.mxu0 %v16918_v38  ;;  %v17275_v38 = vld [vmem:[#allocation2 + $0x2a7] sm:$0xff] }
 0x935   :  { %6202 = vmatmul.mubr.f32.gmra.mrb[228].mxu0 %v17259_v5 }
 0x936   :  { %6206 = vmatprep.mubr.f32.mxu0 %v16922_v56  ;;  %v17279_v56 = vld [vmem:[#allocation2 + $0x2af] sm:$0xff] }
 0x939   :  { %6207 = vmatmul.mubr.f32.gmra.mrb[230].mxu0 %v17263_v63 }
 0x93a   :  { %6211 = vmatprep.mubr.f32.mxu0 %v16926_v21  ;;  %v17283_v21 = vld [vmem:[#allocation2 + $0x2c7] sm:$0xff] }
 0x93d   :  { %6212 = vmatmul.mubr.f32.gmra.mrb[232].mxu0 %v17267_v17 }
 0x93e   :  { %6216 = vmatprep.mubr.f32.mxu0 %v16934_v46  ;;  %v17287_v46 = vld [vmem:[#allocation2 + $0x2cf] sm:$0xff] }
 0x941   :  { %6217 = vmatmul.mubr.f32.gmra.mrb[234].mxu0 %v17271_v28 }
 0x942   :  { %6221 = vmatprep.mubr.f32.mxu0 %v16938_v58  ;;  %v17291_v58 = vld [vmem:[#allocation2 + $0x2e7] sm:$0xff] }
 0x945   :  { %6222 = vmatmul.mubr.f32.gmra.mrb[236].mxu0 %v17275_v38 }
 0x946   :  { %6226 = vmatprep.mubr.f32.mxu0 %v16942_v57  ;;  %v17295_v57 = vld [vmem:[#allocation2 + $0x2ef] sm:$0xff] }
 0x949   :  { %6227 = vmatmul.mubr.f32.gmra.mrb[238].mxu0 %v17279_v56 }
 0x94a   :  { %6231 = vmatprep.mubr.f32.mxu0 %v16946_v14  ;;  %v17299_v14 = vld [vmem:[#allocation2 + $0x307] sm:$0xff] }
 0x94d   :  { %6232 = vmatmul.mubr.f32.gmra.mrb[240].mxu0 %v17283_v21 }
 0x94e   :  { %6236 = vmatprep.mubr.f32.mxu0 %v16956_v20  ;;  %v17303_v20 = vld [vmem:[#allocation2 + $0x30f] sm:$0xff] }
 0x951   :  { %6237 = vmatmul.mubr.f32.gmra.mrb[242].mxu0 %v17287_v46 }
 0x952   :  { %6241 = vmatprep.mubr.f32.mxu0 %v16960_v42  ;;  %v17307_v42 = vld [vmem:[#allocation2 + $0x327] sm:$0xff] }
 0x955   :  { %6242 = vmatmul.mubr.f32.gmra.mrb[244].mxu0 %v17291_v58 }
 0x956   :  { %6246 = vmatprep.mubr.f32.mxu0 %v16964_v25  ;;  %v17311_v25 = vld [vmem:[#allocation2 + $0x32f] sm:$0xff] }
 0x959   :  { %6247 = vmatmul.mubr.f32.gmra.mrb[246].mxu0 %v17295_v57 }
 0x95a   :  { %6251 = vmatprep.mubr.f32.mxu0 %v16968_v6  ;;  %v17315_v6 = vld [vmem:[#allocation2 + $0x347] sm:$0xff] }
 0x95d   :  { %6252 = vmatmul.mubr.f32.gmra.mrb[248].mxu0 %v17299_v14 }
 0x95e   :  { %6256 = vmatprep.mubr.f32.mxu0 %v16978_v7  ;;  %v17319_v7 = vld [vmem:[#allocation2 + $0x34f] sm:$0xff] }
 0x961   :  { %6257 = vmatmul.mubr.f32.gmra.mrb[250].mxu0 %v17303_v20 }
 0x962   :  { %6261 = vmatprep.mubr.f32.mxu0 %v16982_v55  ;;  %v17323_v55 = vld [vmem:[#allocation2 + $0x367] sm:$0xff] }
 0x965   :  { %6262 = vmatmul.mubr.f32.gmra.mrb[252].mxu0 %v17307_v42 }
 0x966   :  { %6266 = vmatprep.mubr.f32.mxu0 %v16986_v9  ;;  %v17327_v9 = vld [vmem:[#allocation2 + $0x36f] sm:$0xff] }
 0x969   :  { %6267 = vmatmul.mubr.f32.gmra.mrb[254].mxu0 %v17311_v25 }
 0x96a   :  { %6271 = vmatprep.mubr.f32.mxu0 %v16990_v49  ;;  %v17331_v49 = vld [vmem:[#allocation2 + $0x387] sm:$0xff] }
 0x96d   :  { %6272 = vmatmul.mubr.f32.gmra.mrb[0].mxu0 %v17315_v6 }
 0x96e   :  { %6276 = vmatprep.mubr.f32.mxu0 %v17001_v29  ;;  %v17335_v29 = vld [vmem:[#allocation2 + $0x38f] sm:$0xff] }
 0x971   :  { %6277 = vmatmul.mubr.f32.gmra.mrb[2].mxu0 %v17319_v7 }
 0x972   :  { %6281 = vmatprep.mubr.f32.mxu0 %v17005_v48  ;;  %v17339_v48 = vld [vmem:[#allocation2 + $0x3a7] sm:$0xff] }
 0x975   :  { %6282 = vmatmul.mubr.f32.gmra.mrb[4].mxu0 %v17323_v55 }
 0x976   :  { %6286 = vmatprep.mubr.f32.mxu0 %v17009_v8  ;;  %v17343_v8 = vld [vmem:[#allocation2 + $0x3af] sm:$0xff] }
 0x979   :  { %6287 = vmatmul.mubr.f32.gmra.mrb[6].mxu0 %v17327_v9 }
 0x97a   :  { %6291 = vmatprep.mubr.f32.mxu0 %v17013_v53 }
 0x97d   :  { %6292 = vmatmul.mubr.f32.gmra.mrb[8].mxu0 %v17331_v49  ;;  %v17345_v53 = vpop.f32.mrb[160].mxu1 }
 0x97e   :  { %6296 = vmatprep.mubr.f32.mxu0 %v17022_v4  ;;  %21274 = vst [vmem:[#allocation33_spill] sm:$0xff] %v17345_v53  ;;  %v17348_v16 = vpop.f32.mrb[161].mxu1  ;;  %v17351_v4 = vld [vmem:[#allocation2 + $0x3c7] sm:$0xff] }
 0x97f   :  { %21275 = vst [vmem:[#allocation34_spill] sm:$0xff] %v17348_v16 }
 0x981   :  { %6297 = vmatmul.mubr.f32.gmra.mrb[10].mxu0 %v17335_v29 }
 0x982   :  { %6301 = vmatprep.mubr.f32.mxu0 %v17026_v2 }
 0x985   :  { %6302 = vmatmul.mubr.f32.gmra.mrb[12].mxu0 %v17339_v48  ;;  %v17353_v27 = vpop.f32.mrb[162].mxu1 }
 0x986   :  { %6306 = vmatprep.mubr.f32.mxu0 %v17030_v11  ;;  %21276 = vst [vmem:[#allocation13_spill] sm:$0xff] %v17353_v27  ;;  %v17356_v2 = vpop.f32.mrb[163].mxu1  ;;  %v17359_v11 = vld [vmem:[#allocation2 + $0x3cf] sm:$0xff] }
 0x987   :  { %21277 = vst [vmem:[#allocation35_spill] sm:$0xff] %v17356_v2  ;;  %21278 = vst [vmem:[#allocation38_spill] sm:$0xff] %v17359_v11  ;;  %v5370_v27 = vld [vmem:[#allocation2 + $0x3f0] sm:$0xff] }
 0x989   :  { %6307 = vmatmul.mubr.f32.gmra.mrb[14].mxu0 %v17343_v8 }
 0x98a   :  { %6311 = vmatprep.mubr.f32.mxu0 %v17034_v43  ;;  %v17366_v43 = vld [vmem:[#allocation2 + $0x3e7] sm:$0xff] }
 0x98b   :  { %21281 = vst [vmem:[#allocation21_spill] sm:$0xff] %v17366_v43 }
 0x98d   :  { %6312 = vmatmul.mubr.f32.gmra.mrb[16].mxu0 %v17351_v4 }
 0x98e   :  { %6316 = vmatprep.mubr.f32.mxu0 %v17051_v10  ;;  %v17373_v10 = vld [vmem:[#allocation2 + $0x3ef] sm:$0xff] }
 0x98f   :  { %21284 = vst [vmem:[#allocation43_spill] sm:$0xff] %v17373_v10 }
 0x990   :  { %v17361_v47 = vpop.f32.mrb[164].mxu1 }
 0x991   :  { %21279 = vst [vmem:[#allocation40_spill] sm:$0xff] %v17361_v47  ;;  %6317 = vmatmul.mubr.f32.gmra.mrb[18].mxu0 %v17359_v11  ;;  %v17364_v41 = vpop.f32.mrb[165].mxu1  ;;  %v5371_v47 = vld [vmem:[#allocation2 + $0x408] sm:$0xff] }
 0x992   :  { %21280 = vst [vmem:[#allocation41_spill] sm:$0xff] %v17364_v41  ;;  %6321 = vmatprep.mubr.f32.mxu0 %v5369_v12  ;;  %v17380_v12 = vld [vmem:[#allocation2 + $0x407] sm:$0xff] }
 0x993   :  { %21287 = vst [vmem:[#allocation48_spill] sm:$0xff] %v17380_v12 }
 0x994   :  { %v17368_v53 = vpop.f32.mrb[166].mxu1 }
 0x995   :  { %21282 = vst [vmem:[#allocation42_spill] sm:$0xff] %v17368_v53  ;;  %6322 = vmatmul.mubr.f32.gmra.mrb[20].mxu0 %v17366_v43  ;;  %v17371_v2 = vpop.f32.mrb[167].mxu1  ;;  %v5372_v53 = vld [vmem:[#allocation2 + $0x410] sm:$0xff] }
 0x996   :  { %21283 = vst [vmem:[#allocation44_spill] sm:$0xff] %v17371_v2  ;;  %6326 = vmatprep.mubr.f32.mxu0 %v5370_v27  ;;  %v17387_v27 = vld [vmem:[#allocation2 + $0x40f] sm:$0xff] }
 0x997   :  { %21290 = vst [vmem:[#allocation20_spill] sm:$0xff] %v17387_v27 }
 0x998   :  { %v17375_v16 = vpop.f32.mrb[168].mxu1 }
 0x999   :  { %21285 = vst [vmem:[#allocation46_spill] sm:$0xff] %v17375_v16  ;;  %6327 = vmatmul.mubr.f32.gmra.mrb[22].mxu0 %v17373_v10  ;;  %v17378_v11 = vpop.f32.mrb[169].mxu1  ;;  %v5373_v16 = vld [vmem:[#allocation2 + $0x428] sm:$0xff] }
 0x99a   :  { %21286 = vst [vmem:[#allocation45_spill] sm:$0xff] %v17378_v11  ;;  %6331 = vmatprep.mubr.f32.mxu0 %v5371_v47  ;;  %v17394_v47 = vld [vmem:[#allocation2 + $0x427] sm:$0xff] }
 0x99b   :  { %21293 = vst [vmem:[#allocation57_spill] sm:$0xff] %v17394_v47 }
 0x99c   :  { %v17382_v41 = vpop.f32.mrb[170].mxu1 }
 0x99d   :  { %21288 = vst [vmem:[#allocation47_spill] sm:$0xff] %v17382_v41  ;;  %6332 = vmatmul.mubr.f32.gmra.mrb[24].mxu0 %v17380_v12  ;;  %v17385_v43 = vpop.f32.mrb[171].mxu1  ;;  %v5374_v41 = vld [vmem:[#allocation2 + $0x430] sm:$0xff] }
 0x99e   :  { %21289 = vst [vmem:[#allocation53_spill] sm:$0xff] %v17385_v43  ;;  %6336 = vmatprep.mubr.f32.mxu0 %v5372_v53  ;;  %v5887_v53 = vld [vmem:[%s20418_s4 + $0x200] sm:$0xff]  ;;  %v5889_v43 = vld [vmem:[%s20418_s4 + $0x210] sm:$0xff] }
 0x9a0   :  { %v17389_v2 = vpop.f32.mrb[172].mxu1 }
 0x9a1   :  { %21291 = vst [vmem:[#allocation50_spill] sm:$0xff] %v17389_v2  ;;  %6337 = vmatmul.mubr.f32.gmra.mrb[26].mxu0 %v17387_v27  ;;  %v17392_v10 = vpop.f32.mrb[173].mxu1  ;;  %v5888_v2 = vld [vmem:[%s20418_s4 + $0x208] sm:$0xff] }
 0x9a2   :  { %21292 = vst [vmem:[#allocation5_spill] sm:$0xff] %v17392_v10  ;;  %6341 = vmatprep.mubr.f32.mxu0 %v5373_v16  ;;  %v17407_v10 = vld [vmem:[#allocation2 + $0x42f] sm:$0xff] }
 0x9a3   :  { %21296 = vst [vmem:[#allocation58_spill] sm:$0xff] %v17407_v10 }
 0x9a4   :  { %v17396_v11 = vpop.f32.mrb[174].mxu1 }
 0x9a5   :  { %21294 = vst [vmem:[#allocation14_spill] sm:$0xff] %v17396_v11  ;;  %6342 = vmatmul.mubr.f32.gmra.mrb[28].mxu0 %v17394_v47  ;;  %v17399_v12 = vpop.f32.mrb[175].mxu1  ;;  %v5890_v47 = vld [vmem:[%s20418_s4 + $0x218] sm:$0xff] }
 0x9a6   :  { %21295 = vst [vmem:[#allocation59_spill] sm:$0xff] %v17399_v12  ;;  %6346 = vmatprep.mubr.f32.mxu0 %v5374_v41  ;;  %v5375_v12 = vld [vmem:[#allocation2 + $0x9] sm:$0xff]  ;;  %v10742_v41 = vpack.c.bf16 %v5888_v2, %v5887_v53  ;;  %v5891_v2 = vld [vmem:[%s20418_s4 + $0x220] sm:$0xff] }
 0x9a7   :  { %v5892_v53 = vld [vmem:[%s20418_s4 + $0x228] sm:$0xff] }
 0x9a8   :  { %v17409_v16 = vpop.f32.mrb[176].mxu1 }
 0x9a9   :  { %21297 = vst [vmem:[#allocation61_spill] sm:$0xff] %v17409_v16  ;;  %6347 = vmatmul.mubr.f32.gmra.mrb[30].mxu0 %v17407_v10  ;;  %v17412_v11 = vpop.f32.mrb[177].mxu1 }
 0x9aa   :  { %21298 = vst [vmem:[#allocation60_spill] sm:$0xff] %v17412_v11  ;;  %6416 = vmatprep.mubr.f32.mxu0 %v16876_v30  ;;  %v5376_v11 = vld [vmem:[#allocation2 + $0x11] sm:$0xff]  ;;  %v10745_v30 = vpack.c.bf16 %v5890_v47, %v5889_v43 }
 0x9ab   :  { %v5893_v43 = vld [vmem:[%s20418_s4 + $0x230] sm:$0xff]  ;;  %v5894_v47 = vld [vmem:[%s20418_s4 + $0x238] sm:$0xff] }
 0x9ac   :  { %v17421_v27 = vpop.f32.mrb[178].mxu1 }
 0x9ad   :  { %21299 = vst [vmem:[#allocation63_spill] sm:$0xff] %v17421_v27  ;;  %6417 = vmatmul.mubr.f32.vlgmr.msra.gmra.mrb[160].mxu0 %v5375_v12  ;;  %v17423_v16 = vpop.f32.mrb[179].mxu1  ;;  %v5572_v27 = vld [vmem:[#allocation2 + $0x71] sm:$0xff] }
 0x9ae   :  { %10743 = vmatpush1.bf16.msra.mxu0 %v10742_v41  ;;  %21300 = vst [vmem:[#allocation27_spill] sm:$0xff] %v17423_v16  ;;  %6421 = vmatprep.mubr.f32.mxu0 %v16974_v0  ;;  %v10748_v0 = vpack.c.bf16 %v5892_v53, %v5891_v2  ;;  %v17445_v41 = vld [vmem:[#allocation2 + $0x29] sm:$0xff]  ;;  %v17460_v53 = vld [vmem:[#allocation2 + $0x31] sm:$0xff] }
 0x9af   :  { %10744 = vmatprep.subr.bf16.mxu0 %v21256_v24  ;;  %v5896_v2 = vld [vmem:[%s20418_s4 + $0x248] sm:$0xff] }
 0x9b0   :  { %v17433_v10 = vpop.f32.mrb[180].mxu1  ;;  %v5573_v16 = vld [vmem:[#allocation2 + $0x89] sm:$0xff] }
 0x9b1   :  { %21301 = vst [vmem:[#allocation6_spill] sm:$0xff] %v17433_v10  ;;  %6422 = vmatmul.mubr.f32.gmra.mrb[162].mxu0 %v5376_v11  ;;  %v17435_v12 = vpop.f32.mrb[181].mxu1 }
 0x9b2   :  { %21302 = vst [vmem:[#allocation62_spill] sm:$0xff] %v17435_v12  ;;  %6426 = vmatprep.mubr.f32.mxu0 %v17064_v51  ;;  %10746 = vmatpush1.bf16.msra.mxu0 %v10745_v30  ;;  %v10751_v51 = vpack.c.bf16 %v5894_v47, %v5893_v43  ;;  %v5895_v30 = vld [vmem:[%s20418_s4 + $0x240] sm:$0xff]  ;;  %v5898_v43 = vld [vmem:[%s20418_s4 + $0x258] sm:$0xff] }
 0x9b3   :  { %10747 = vmatprep.subr.bf16.mxu0 %v21256_v24 }
 0x9b4   :  { %v17447_v10 = vpop.f32.mrb[182].mxu1 }
 0x9b5   :  { %21303 = vst [vmem:[#allocation65_spill] sm:$0xff] %v17447_v10  ;;  %6427 = vmatmul.mubr.f32.gmra.mrb[164].mxu0 %v17445_v41  ;;  %v17450_v11 = vpop.f32.mrb[183].mxu1 }
 0x9b6   :  { %21304 = vst [vmem:[#allocation64_spill] sm:$0xff] %v17450_v11  ;;  %6431 = vmatprep.mubr.f32.mxu0 %v17093_v26  ;;  %10749 = vmatpush1.bf16.msra.mxu0 %v10748_v0  ;;  %v10754_v26 = vpack.c.bf16 %v5896_v2, %v5895_v30  ;;  %v5897_v0 = vld [vmem:[%s20418_s4 + $0x250] sm:$0xff]  ;;  %v5900_v30 = vld [vmem:[%s20418_s4 + $0x268] sm:$0xff] }
 0x9b7   :  { %10750 = vmatprep.subr.bf16.mxu0 %v21256_v24 }
 0x9b8   :  { %v17462_v10 = vpop.f32.mrb[184].mxu1 }
 0x9b9   :  { %21305 = vst [vmem:[#allocation23_spill] sm:$0xff] %v17462_v10  ;;  %6432 = vmatmul.mubr.f32.gmra.mrb[166].mxu0 %v17460_v53  ;;  %v17465_v11 = vpop.f32.mrb[185].mxu1  ;;  %v11706_v10 = vld [vmem:[#allocation2 + $0x49] sm:$0xff] }
 0x9ba   :  { %21306 = vst [vmem:[#allocation67_spill] sm:$0xff] %v17465_v11  ;;  %6436 = vmatprep.mubr.f32.mxu0 %v17098_v13  ;;  %10752 = vmatpush1.bf16.msra.mxu0 %v10751_v51  ;;  %v10757_v13 = vpack.c.bf16 %v5898_v43, %v5897_v0  ;;  %v5899_v51 = vld [vmem:[%s20418_s4 + $0x260] sm:$0xff]  ;;  %v5902_v0 = vld [vmem:[%s20418_s4 + $0x278] sm:$0xff]  ;;  %v5569_v11 = vld [vmem:[#allocation2 + $0x49] sm:$0xff] }
 0x9bb   :  { %10753 = vmatprep.subr.bf16.mxu0 %v21256_v24 }
 0x9bc   :  { %v17475_v47 = vpop.f32.mrb[186].mxu1 }
 0x9bd   :  { %21307 = vst [vmem:[#allocation66_spill] sm:$0xff] %v17475_v47  ;;  %6437 = vmatmul.mubr.f32.gmra.mrb[168].mxu0 %v11706_v10  ;;  %v17477_v12 = vpop.f32.mrb[187].mxu1  ;;  %v11707_v47 = vld [vmem:[#allocation2 + $0x51] sm:$0xff] }
 0x9be   :  { %21308 = vst [vmem:[#allocation69_spill] sm:$0xff] %v17477_v12  ;;  %6441 = vmatprep.mubr.f32.mxu0 %v17103_v23  ;;  %10755 = vmatpush1.bf16.msra.mxu0 %v10754_v26  ;;  %v10760_v23 = vpack.c.bf16 %v5900_v30, %v5899_v51  ;;  %v5901_v26 = vld [vmem:[%s20418_s4 + $0x270] sm:$0xff]  ;;  %v5904_v51 = vld [vmem:[%s20418_s4 + $0x288] sm:$0xff] }
 0x9bf   :  { %10756 = vmatprep.subr.bf16.mxu0 %v21256_v24 }
 0x9c0   :  { %v17487_v2 = vpop.f32.mrb[188].mxu1 }
 0x9c1   :  { %21309 = vst [vmem:[#allocation68_spill] sm:$0xff] %v17487_v2  ;;  %6442 = vmatmul.mubr.f32.gmra.mrb[170].mxu0 %v11707_v47  ;;  %v17489_v10 = vpop.f32.mrb[189].mxu1  ;;  %v5921_v2 = vld [vmem:[%s20418_s4 + $0x310] sm:$0xff] }
 0x9c2   :  { %21310 = vst [vmem:[#allocation51_spill] sm:$0xff] %v17489_v10  ;;  %6446 = vmatprep.mubr.f32.mxu0 %v17107_v18  ;;  %10758 = vmatpush1.bf16.msra.mxu0 %v10757_v13  ;;  %v10763_v18 = vpack.c.bf16 %v5902_v0, %v5901_v26  ;;  %v5903_v13 = vld [vmem:[%s20418_s4 + $0x280] sm:$0xff]  ;;  %v5906_v26 = vld [vmem:[%s20418_s4 + $0x298] sm:$0xff]  ;;  %v5503_v10 = vld [vmem:[#allocation2 + $0x28] sm:$0xff] }
 0x9c3   :  { %10759 = vmatprep.subr.bf16.mxu0 %v21256_v24 }
 0x9c4   :  { %v17500_v43 = vpop.f32.mrb[190].mxu1 }
 0x9c5   :  { %6447 = vmatmul.mubr.f32.gmra.mrb[172].mxu0 %v16952_v59  ;;  %21311 = vst [vmem:[#allocation71_spill] sm:$0xff] %v17500_v43  ;;  %v17503_v47 = vpop.f32.mrb[191].mxu1  ;;  %v17826_v43 = vld [vmem:[#allocation2 + $0x429] sm:$0xff] }
 0x9c6   :  { %6451 = vmatprep.mubr.f32.mxu0 %v17111_v52  ;;  %21312 = vst [vmem:[#allocation70_spill] sm:$0xff] %v17503_v47  ;;  %10761 = vmatpush1.bf16.msra.mxu0 %v10760_v23  ;;  %v10766_v52 = vpack.c.bf16 %v5904_v51, %v5903_v13  ;;  %v5905_v23 = vld [vmem:[%s20418_s4 + $0x290] sm:$0xff]  ;;  %v5908_v13 = vld [vmem:[%s20418_s4 + $0x2a8] sm:$0xff] }
 0x9c7   :  { %10762 = vmatprep.subr.bf16.mxu0 %v21256_v24  ;;  %v17835_v47 = vld [vmem:[#allocation2 + $0x431] sm:$0xff] }
 0x9c8   :  { %v17512_v30 = vpop.f32.mrb[192].mxu1 }
 0x9c9   :  { %21313 = vst [vmem:[#allocation73_spill] sm:$0xff] %v17512_v30  ;;  %6452 = vmatmul.mubr.f32.gmra.mrb[174].mxu0 %v16997_v45  ;;  %v17515_v59 = vpop.f32.mrb[193].mxu1  ;;  %v17819_v30 = vld [vmem:[#allocation2 + $0x409] sm:$0xff] }
 0x9ca   :  { %21314 = vst [vmem:[#allocation52_spill] sm:$0xff] %v17515_v59  ;;  %6456 = vmatprep.mubr.f32.mxu0 %v17127_v1  ;;  %10764 = vmatpush1.bf16.msra.mxu0 %v10763_v18  ;;  %v10769_v1 = vpack.c.bf16 %v5906_v26, %v5905_v23  ;;  %v5907_v18 = vld [vmem:[%s20418_s4 + $0x2a0] sm:$0xff]  ;;  %v17823_v59 = vld [vmem:[#allocation2 + $0x411] sm:$0xff] }
 0x9cb   :  { %10765 = vmatprep.subr.bf16.mxu0 %v21256_v24  ;;  %v21320_v23 = vld [vmem:[#allocation11_spill] sm:$0xff] }
 0x9cc   :  { %v17525_v0 = vpop.f32.mrb[194].mxu1 }
 0x9cd   :  { %21315 = vst [vmem:[#allocation72_spill] sm:$0xff] %v17525_v0  ;;  %6457 = vmatmul.mubr.f32.gmra.mrb[176].mxu0 %v17041_v15  ;;  %v17528_v45 = vpop.f32.mrb[195].mxu1  ;;  %v21322_v0 = vld [vmem:[#allocation56_spill] sm:$0xff] }
 0x9ce   :  { %21316 = vst [vmem:[#allocation75_spill] sm:$0xff] %v17528_v45  ;;  %6461 = vmatprep.mubr.f32.mxu0 %v17138_v33  ;;  %10767 = vmatpush1.bf16.msra.mxu0 %v10766_v52  ;;  %v10772_v33 = vpack.c.bf16 %v5908_v13, %v5907_v18  ;;  %v17560_v18 = vld [vmem:[#allocation2 + $0xc9] sm:$0xff] }
 0x9cf   :  { %10768 = vmatprep.subr.bf16.mxu0 %v21256_v24 }
 0x9d0   :  { %v17538_v51 = vpop.f32.mrb[196].mxu1 }
 0x9d1   :  { %21317 = vst [vmem:[#allocation74_spill] sm:$0xff] %v17538_v51  ;;  %6462 = vmatmul.mubr.f32.gmra.mrb[178].mxu0 %v17079_v62  ;;  %v17541_v15 = vpop.f32.mrb[197].mxu1  ;;  %v17552_v62 = vld [vmem:[#allocation2 + $0xb1] sm:$0xff] }
 0x9d2   :  { %21318 = vst [vmem:[#allocation54_spill] sm:$0xff] %v17541_v15  ;;  %6466 = vmatprep.mubr.f32.mxu0 %v17143_v3  ;;  %10770 = vmatpush1.bf16.msra.mxu0 %v10769_v1  ;;  %v21325_v1 = vld [vmem:[#allocation30_spill] sm:$0xff]  ;;  %v17583_v15 = vld [vmem:[#allocation2 + $0xe9] sm:$0xff] }
 0x9d3   :  { %10771 = vmatprep.subr.bf16.mxu0 %v21256_v24 }
 0x9d4   :  { %v17545_v52 = vpop.f32.mrb[198].mxu1 }
 0x9d5   :  { %21319 = vst [vmem:[#allocation77_spill] sm:$0xff] %v17545_v52  ;;  %6467 = vmatmul.mubr.f32.gmra.mrb[180].mxu0 %v21320_v23  ;;  %v17548_v26 = vpop.f32.mrb[199].mxu1 }
 0x9d6   :  { %21321 = vst [vmem:[#allocation37_spill] sm:$0xff] %v17548_v26  ;;  %6471 = vmatprep.mubr.f32.mxu0 %v21322_v0  ;;  %10773 = vmatpush1.bf16.msra.mxu0 %v10772_v33  ;;  %v5909_v0 = vld [vmem:[%s20418_s4 + $0x2b0] sm:$0xff]  ;;  %v5910_v33 = vld [vmem:[%s20418_s4 + $0x2b8] sm:$0xff]  ;;  %v21331_v26 = vld [vmem:[#allocation32_spill] sm:$0xff] }
 0x9d7   :  { %10774 = vmatprep.subr.bf16.mxu0 %v21256_v24 }
 0x9d8   :  { %v17554_v51 = vpop.f32.mrb[200].mxu1 }
 0x9d9   :  { %21323 = vst [vmem:[#allocation28_spill] sm:$0xff] %v17554_v51  ;;  %6472 = vmatmul.mubr.f32.gmra.mrb[182].mxu0 %v17552_v62  ;;  %v17557_v3 = vpop.f32.mrb[201].mxu1  ;;  %v21328_v51 = vld [vmem:[#allocation31_spill] sm:$0xff] }
 0x9da   :  { %21324 = vst [vmem:[#allocation76_spill] sm:$0xff] %v17557_v3  ;;  %6476 = vmatprep.mubr.f32.mxu0 %v21325_v1  ;;  %v10775_v3 = vpack.c.bf16 %v5910_v33, %v5909_v0  ;;  %v17574_v1 = vld [vmem:[#allocation2 + $0xd1] sm:$0xff] }
 0x9dc   :  { %v17562_v13 = vpop.f32.mrb[202].mxu1  ;;  %10776 = vmatpush1.bf16.msra.mxu0 %v10775_v3  ;;  %v17591_v3 = vld [vmem:[#allocation2 + $0xf1] sm:$0xff] }
 0x9dd   :  { %21326 = vst [vmem:[#allocation18_spill] sm:$0xff] %v17562_v13  ;;  %6477 = vmatmul.mubr.f32.gmra.mrb[184].mxu0 %v17560_v18  ;;  %v17571_v23 = vpop.f32.mrb[203].mxu1  ;;  %10777 = vmatprep.subr.bf16.mxu0 %v21256_v24 }
 0x9de   :  { %21327 = vst [vmem:[#allocation29_spill] sm:$0xff] %v17571_v23  ;;  %6481 = vmatprep.mubr.f32.mxu0 %v21328_v51 }
 0x9e0   :  { %v17576_v52 = vpop.f32.mrb[204].mxu1 }
 0x9e1   :  { %21329 = vst [vmem:[#allocation22_spill] sm:$0xff] %v17576_v52  ;;  %6482 = vmatmul.mubr.f32.gmra.mrb[186].mxu0 %v17574_v1  ;;  %v17580_v13 = vpop.f32.mrb[205].mxu1 }
 0x9e2   :  { %21330 = vst [vmem:[#allocation10_spill] sm:$0xff] %v17580_v13  ;;  %6486 = vmatprep.mubr.f32.mxu0 %v21331_v26  ;;  %v17599_v26 = vld [vmem:[#allocation2 + $0x109] sm:$0xff] }
 0x9e3   :  { %v17622_v13 = vld [vmem:[#allocation2 + $0x129] sm:$0xff] }
 0x9e4   :  { %v17585_v45 = vpop.f32.mrb[206].mxu1 }
 0x9e5   :  { %21332 = vst [vmem:[#allocation7_spill] sm:$0xff] %v17585_v45  ;;  %6487 = vmatmul.mubr.f32.gmra.mrb[188].mxu0 %v17583_v15  ;;  %v17588_v51 = vpop.f32.mrb[207].mxu1 }
 0x9e6   :  { %21333 = vst [vmem:[#allocation25_spill] sm:$0xff] %v17588_v51  ;;  %6491 = vmatprep.mubr.f32.mxu0 %v17177_v39  ;;  %v5911_v39 = vld [vmem:[%s20418_s4 + $0x2c0] sm:$0xff] }
 0x9e8   :  { %v17593_v0 = vpop.f32.mrb[208].mxu1 }
 0x9e9   :  { %21334 = vst [vmem:[#allocation16_spill] sm:$0xff] %v17593_v0  ;;  %6492 = vmatmul.mubr.f32.gmra.mrb[190].mxu0 %v17591_v3  ;;  %v17596_v33 = vpop.f32.mrb[209].mxu1  ;;  %v5912_v0 = vld [vmem:[%s20418_s4 + $0x2c8] sm:$0xff] }
 0x9ea   :  { %21335 = vst [vmem:[#allocation39_spill] sm:$0xff] %v17596_v33  ;;  %6496 = vmatprep.mubr.f32.mxu0 %v17182_v34  ;;  %v10778_v33 = vpack.c.bf16 %v5912_v0, %v5911_v39  ;;  %v17613_v34 = vld [vmem:[#allocation2 + $0x111] sm:$0xff] }
 0x9eb   :  { %v17630_v0 = vld [vmem:[#allocation2 + $0x131] sm:$0xff] }
 0x9ec   :  { %v17601_v52 = vpop.f32.mrb[210].mxu1  ;;  %10779 = vmatpush1.bf16.msra.mxu0 %v10778_v33 }
 0x9ed   :  { %21336 = vst [vmem:[#allocation19_spill] sm:$0xff] %v17601_v52  ;;  %6497 = vmatmul.mubr.f32.gmra.mrb[192].mxu0 %v17599_v26  ;;  %v17610_v45 = vpop.f32.mrb[211].mxu1  ;;  %10780 = vmatprep.subr.bf16.mxu0 %v21256_v24 }
 0x9ee   :  { %21337 = vst [vmem:[#allocation17_spill] sm:$0xff] %v17610_v45  ;;  %6501 = vmatprep.mubr.f32.mxu0 %v17186_v22  ;;  %v17815_v45 = vld [vmem:[#allocation2 + $0x3f1] sm:$0xff] }
 0x9f0   :  { %v17615_v51 = vpop.f32.mrb[212].mxu1 }
 0x9f1   :  { %21338 = vst [vmem:[#allocation3_spill] sm:$0xff] %v17615_v51  ;;  %6502 = vmatmul.mubr.f32.gmra.mrb[194].mxu0 %v17613_v34  ;;  %v17619_v52 = vpop.f32.mrb[213].mxu1 }
 0x9f2   :  { %21339 = vst [vmem:[#allocation4_spill] sm:$0xff] %v17619_v52  ;;  %6506 = vmatprep.mubr.f32.mxu0 %v17190_v54  ;;  %v17638_v54 = vld [vmem:[#allocation2 + $0x149] sm:$0xff] }
 0x9f3   :  { %v17661_v52 = vld [vmem:[#allocation2 + $0x169] sm:$0xff] }
 0x9f4   :  { %v17624_v23 = vpop.f32.mrb[214].mxu1 }
 0x9f5   :  { %21340 = vst [vmem:[#allocation8_spill] sm:$0xff] %v17624_v23  ;;  %6507 = vmatmul.mubr.f32.gmra.mrb[196].mxu0 %v17622_v13  ;;  %v17627_v22 = vpop.f32.mrb[215].mxu1 }
 0x9f6   :  { %21341 = vst [vmem:[#allocation36_spill] sm:$0xff] %v17627_v22  ;;  %6511 = vmatprep.mubr.f32.mxu0 %v17200_v37  ;;  %v5913_v37 = vld [vmem:[%s20418_s4 + $0x2d0] sm:$0xff] }
 0x9f8   :  { %v17632_v33 = vpop.f32.mrb[216].mxu1 }
 0x9f9   :  { %21342 = vst [vmem:[#allocation15_spill] sm:$0xff] %v17632_v33  ;;  %6512 = vmatmul.mubr.f32.gmra.mrb[198].mxu0 %v17630_v0  ;;  %v17635_v39 = vpop.f32.mrb[217].mxu1  ;;  %v5914_v33 = vld [vmem:[%s20418_s4 + $0x2d8] sm:$0xff] }
 0x9fa   :  { %21343 = vst [vmem:[#allocation9_spill] sm:$0xff] %v17635_v39  ;;  %6516 = vmatprep.mubr.f32.mxu0 %v17205_v44  ;;  %v10781_v39 = vpack.c.bf16 %v5914_v33, %v5913_v37  ;;  %v17652_v44 = vld [vmem:[#allocation2 + $0x151] sm:$0xff]  ;;  %v17669_v33 = vld [vmem:[#allocation2 + $0x189] sm:$0xff] }
 0x9fb   :  { %v17679_v37 = vld [vmem:[#allocation2 + $0x191] sm:$0xff] }
 0x9fc   :  { %v17640_v51 = vpop.f32.mrb[218].mxu1  ;;  %10782 = vmatpush1.bf16.msra.mxu0 %v10781_v39  ;;  %v5916_v39 = vld [vmem:[%s20418_s4 + $0x2e8] sm:$0xff] }
 0x9fd   :  { %21344 = vst [vmem:[#allocation49_spill] sm:$0xff] %v17640_v51  ;;  %6517 = vmatmul.mubr.f32.gmra.mrb[200].mxu0 %v17638_v54  ;;  %v17649_v23 = vpop.f32.mrb[219].mxu1  ;;  %10783 = vmatprep.subr.bf16.mxu0 %v21256_v24 }
 0x9fe   :  { %21345 = vst [vmem:[#allocation12_spill] sm:$0xff] %v17649_v23  ;;  %6521 = vmatprep.mubr.f32.mxu0 %v17209_v32  ;;  %v17665_v32 = vld [vmem:[#allocation2 + $0x171] sm:$0xff] }
 0x9ff   :  { %v17709_v23 = vld [vmem:[#allocation2 + $0x1f1] sm:$0xff] }
 0xa00   :  { %v17654_v22 = vpop.f32.mrb[220].mxu1 }
 0xa01   :  { %21346 = vst [vmem:[#allocation26_spill] sm:$0xff] %v17654_v22  ;;  %6522 = vmatmul.mubr.f32.gmra.mrb[202].mxu0 %v17652_v44  ;;  %v17658_v51 = vpop.f32.mrb[221].mxu1  ;;  %v17688_v22 = vld [vmem:[#allocation2 + $0x1b1] sm:$0xff] }
 0xa02   :  { %21347 = vst [vmem:[#allocation55_spill] sm:$0xff] %v17658_v51  ;;  %6526 = vmatprep.mubr.f32.mxu0 %v17213_v50  ;;  %v5915_v50 = vld [vmem:[%s20418_s4 + $0x2e0] sm:$0xff]  ;;  %v5470_v51 = vld [vmem:[#allocation2 + $0x20f] sm:$0xff] }
 0xa05   :  { %6527 = vmatmul.mubr.f32.gmra.mrb[204].mxu0 %v17661_v52 }
 0xa06   :  { %6531 = vmatprep.mubr.f32.mxu0 %v17223_v40  ;;  %v10784_v40 = vpack.c.bf16 %v5916_v39, %v5915_v50  ;;  %v5918_v50 = vld [vmem:[%s20418_s4 + $0x2f8] sm:$0xff] }
 0xa07   :  { %v17702_v39 = vld [vmem:[#allocation2 + $0x1d1] sm:$0xff] }
 0xa08   :  { %10785 = vmatpush1.bf16.msra.mxu0 %v10784_v40  ;;  %v17706_v40 = vld [vmem:[#allocation2 + $0x1e9] sm:$0xff] }
 0xa09   :  { %6532 = vmatmul.mubr.f32.gmra.mrb[206].mxu0 %v17665_v32  ;;  %10786 = vmatprep.subr.bf16.mxu0 %v21256_v24 }
 0xa0a   :  { %6536 = vmatprep.mubr.f32.mxu0 %v17228_v35  ;;  %v17684_v35 = vld [vmem:[#allocation2 + $0x1a9] sm:$0xff] }
 0xa0d   :  { %6537 = vmatmul.mubr.f32.gmra.mrb[208].mxu0 %v17669_v33 }
 0xa0e   :  { %6541 = vmatprep.mubr.f32.mxu0 %v17232_v60  ;;  %v17692_v60 = vld [vmem:[#allocation2 + $0x1c9] sm:$0xff] }
 0xa11   :  { %6542 = vmatmul.mubr.f32.gmra.mrb[210].mxu0 %v17679_v37 }
 0xa12   :  { %6546 = vmatprep.mubr.f32.mxu0 %v17236_v61  ;;  %v5917_v61 = vld [vmem:[%s20418_s4 + $0x2f0] sm:$0xff] }
 0xa15   :  { %6547 = vmatmul.mubr.f32.gmra.mrb[212].mxu0 %v17684_v35 }
 0xa16   :  { %6551 = vmatprep.mubr.f32.mxu0 %v17246_v31  ;;  %v10787_v31 = vpack.c.bf16 %v5918_v50, %v5917_v61  ;;  %v5408_v61 = vld [vmem:[#allocation2 + $0x251] sm:$0xff]  ;;  %v17715_v50 = vld [vmem:[#allocation2 + $0x269] sm:$0xff] }
 0xa18   :  { %10788 = vmatpush1.bf16.msra.mxu0 %v10787_v31  ;;  %v17799_v31 = vld [vmem:[#allocation2 + $0x3b1] sm:$0xff] }
 0xa19   :  { %6552 = vmatmul.mubr.f32.gmra.mrb[214].mxu0 %v17688_v22  ;;  %10789 = vmatprep.subr.bf16.mxu0 %v21256_v24 }
 0xa1a   :  { %6556 = vmatprep.mubr.f32.mxu0 %v17251_v19  ;;  %v5469_v19 = vld [vmem:[#allocation2 + $0x207] sm:$0xff] }
 0xa1d   :  { %6557 = vmatmul.mubr.f32.gmra.mrb[216].mxu0 %v17692_v60 }
 0xa1e   :  { %6561 = vmatprep.mubr.f32.mxu0 %v17255_v36  ;;  %v5407_v36 = vld [vmem:[#allocation2 + $0x249] sm:$0xff] }
 0xa21   :  { %6562 = vmatmul.mubr.f32.gmra.mrb[218].mxu0 %v17702_v39 }
 0xa22   :  { %6566 = vmatprep.mubr.f32.mxu0 %v5469_v19  ;;  %v17803_v19 = vld [vmem:[#allocation2 + $0x3c9] sm:$0xff] }
 0xa25   :  { %6567 = vmatmul.mubr.f32.gmra.mrb[220].mxu0 %v17706_v40 }
 0xa26   :  { %6571 = vmatprep.mubr.f32.mxu0 %v5470_v51  ;;  %v17719_v51 = vld [vmem:[#allocation2 + $0x271] sm:$0xff] }
 0xa29   :  { %6572 = vmatmul.mubr.f32.gmra.mrb[222].mxu0 %v17709_v23 }
 0xa2a   :  { %6576 = vmatprep.mubr.f32.mxu0 %v17259_v5  ;;  %v17723_v5 = vld [vmem:[#allocation2 + $0x289] sm:$0xff] }
 0xa2d   :  { %6577 = vmatmul.mubr.f32.gmra.mrb[224].mxu0 %v5407_v36  ;;  %v17807_v36 = vld [vmem:[#allocation2 + $0x3d1] sm:$0xff] }
 0xa2e   :  { %6581 = vmatprep.mubr.f32.mxu0 %v17263_v63  ;;  %v17727_v63 = vld [vmem:[#allocation2 + $0x291] sm:$0xff] }
 0xa31   :  { %6582 = vmatmul.mubr.f32.gmra.mrb[226].mxu0 %v5408_v61  ;;  %v17811_v61 = vld [vmem:[#allocation2 + $0x3e9] sm:$0xff] }
 0xa32   :  { %6586 = vmatprep.mubr.f32.mxu0 %v17267_v17  ;;  %v17731_v17 = vld [vmem:[#allocation2 + $0x2a9] sm:$0xff] }
 0xa35   :  { %6587 = vmatmul.mubr.f32.gmra.mrb[228].mxu0 %v17715_v50 }
 0xa36   :  { %6591 = vmatprep.mubr.f32.mxu0 %v17271_v28  ;;  %v17735_v28 = vld [vmem:[#allocation2 + $0x2b1] sm:$0xff] }
 0xa39   :  { %6592 = vmatmul.mubr.f32.gmra.mrb[230].mxu0 %v17719_v51 }
 0xa3a   :  { %6596 = vmatprep.mubr.f32.mxu0 %v17275_v38  ;;  %v17739_v38 = vld [vmem:[#allocation2 + $0x2c9] sm:$0xff] }
 0xa3d   :  { %6597 = vmatmul.mubr.f32.gmra.mrb[232].mxu0 %v17723_v5 }
 0xa3e   :  { %6601 = vmatprep.mubr.f32.mxu0 %v17279_v56  ;;  %v17743_v56 = vld [vmem:[#allocation2 + $0x2d1] sm:$0xff] }
 0xa41   :  { %6602 = vmatmul.mubr.f32.gmra.mrb[234].mxu0 %v17727_v63 }
 0xa42   :  { %6606 = vmatprep.mubr.f32.mxu0 %v17283_v21  ;;  %v17747_v21 = vld [vmem:[#allocation2 + $0x2e9] sm:$0xff] }
 0xa45   :  { %6607 = vmatmul.mubr.f32.gmra.mrb[236].mxu0 %v17731_v17 }
 0xa46   :  { %6611 = vmatprep.mubr.f32.mxu0 %v17287_v46  ;;  %v17751_v46 = vld [vmem:[#allocation2 + $0x2f1] sm:$0xff] }
 0xa49   :  { %6612 = vmatmul.mubr.f32.gmra.mrb[238].mxu0 %v17735_v28 }
 0xa4a   :  { %6616 = vmatprep.mubr.f32.mxu0 %v17291_v58  ;;  %v17755_v58 = vld [vmem:[#allocation2 + $0x309] sm:$0xff] }
 0xa4d   :  { %6617 = vmatmul.mubr.f32.gmra.mrb[240].mxu0 %v17739_v38 }
 0xa4e   :  { %6621 = vmatprep.mubr.f32.mxu0 %v17295_v57  ;;  %v17759_v57 = vld [vmem:[#allocation2 + $0x311] sm:$0xff] }
 0xa51   :  { %6622 = vmatmul.mubr.f32.gmra.mrb[242].mxu0 %v17743_v56 }
 0xa52   :  { %6626 = vmatprep.mubr.f32.mxu0 %v17299_v14  ;;  %v17763_v14 = vld [vmem:[#allocation2 + $0x329] sm:$0xff] }
 0xa55   :  { %6627 = vmatmul.mubr.f32.gmra.mrb[244].mxu0 %v17747_v21 }
 0xa56   :  { %6631 = vmatprep.mubr.f32.mxu0 %v17303_v20  ;;  %v17767_v20 = vld [vmem:[#allocation2 + $0x331] sm:$0xff] }
 0xa59   :  { %6632 = vmatmul.mubr.f32.gmra.mrb[246].mxu0 %v17751_v46 }
 0xa5a   :  { %6636 = vmatprep.mubr.f32.mxu0 %v17307_v42  ;;  %v17771_v42 = vld [vmem:[#allocation2 + $0x349] sm:$0xff] }
 0xa5d   :  { %6637 = vmatmul.mubr.f32.gmra.mrb[248].mxu0 %v17755_v58 }
 0xa5e   :  { %6641 = vmatprep.mubr.f32.mxu0 %v17311_v25  ;;  %v17775_v25 = vld [vmem:[#allocation2 + $0x351] sm:$0xff] }
 0xa61   :  { %6642 = vmatmul.mubr.f32.gmra.mrb[250].mxu0 %v17759_v57 }
 0xa62   :  { %6646 = vmatprep.mubr.f32.mxu0 %v17315_v6  ;;  %v17779_v6 = vld [vmem:[#allocation2 + $0x369] sm:$0xff] }
 0xa65   :  { %6647 = vmatmul.mubr.f32.gmra.mrb[252].mxu0 %v17763_v14 }
 0xa66   :  { %6651 = vmatprep.mubr.f32.mxu0 %v17319_v7  ;;  %v17783_v7 = vld [vmem:[#allocation2 + $0x371] sm:$0xff] }
 0xa69   :  { %6652 = vmatmul.mubr.f32.gmra.mrb[254].mxu0 %v17767_v20 }
 0xa6a   :  { %6656 = vmatprep.mubr.f32.mxu0 %v17323_v55  ;;  %v17787_v55 = vld [vmem:[#allocation2 + $0x389] sm:$0xff] }
 0xa6d   :  { %6657 = vmatmul.mubr.f32.gmra.mrb[0].mxu0 %v17771_v42 }
 0xa6e   :  { %6661 = vmatprep.mubr.f32.mxu0 %v17327_v9  ;;  %v17791_v9 = vld [vmem:[#allocation2 + $0x391] sm:$0xff] }
 0xa71   :  { %6662 = vmatmul.mubr.f32.gmra.mrb[2].mxu0 %v17775_v25 }
 0xa72   :  { %6666 = vmatprep.mubr.f32.mxu0 %v17331_v49  ;;  %v17795_v49 = vld [vmem:[#allocation2 + $0x3a9] sm:$0xff] }
 0xa75   :  { %6667 = vmatmul.mubr.f32.gmra.mrb[4].mxu0 %v17779_v6 }
 0xa76   :  { %6671 = vmatprep.mubr.f32.mxu0 %v17335_v29  ;;  %v21348_v29 = vld [vmem:[#allocation38_spill] sm:$0xff] }
 0xa79   :  { %6672 = vmatmul.mubr.f32.gmra.mrb[6].mxu0 %v17783_v7 }
 0xa7a   :  { %6676 = vmatprep.mubr.f32.mxu0 %v17339_v48  ;;  %v21349_v48 = vld [vmem:[#allocation21_spill] sm:$0xff] }
 0xa7d   :  { %6677 = vmatmul.mubr.f32.gmra.mrb[8].mxu0 %v17787_v55 }
 0xa7e   :  { %6681 = vmatprep.mubr.f32.mxu0 %v17343_v8  ;;  %v21350_v8 = vld [vmem:[#allocation43_spill] sm:$0xff] }
 0xa81   :  { %6682 = vmatmul.mubr.f32.gmra.mrb[10].mxu0 %v17791_v9 }
 0xa82   :  { %6686 = vmatprep.mubr.f32.mxu0 %v17351_v4  ;;  %v21351_v4 = vld [vmem:[#allocation48_spill] sm:$0xff] }
 0xa85   :  { %6687 = vmatmul.mubr.f32.gmra.mrb[12].mxu0 %v17795_v49 }
 0xa86   :  { %6691 = vmatprep.mubr.f32.mxu0 %v21348_v29  ;;  %v21352_v29 = vld [vmem:[#allocation20_spill] sm:$0xff] }
 0xa89   :  { %6692 = vmatmul.mubr.f32.gmra.mrb[14].mxu0 %v17799_v31 }
 0xa8a   :  { %6696 = vmatprep.mubr.f32.mxu0 %v21349_v48  ;;  %v21353_v48 = vld [vmem:[#allocation57_spill] sm:$0xff] }
 0xa8d   :  { %6697 = vmatmul.mubr.f32.gmra.mrb[16].mxu0 %v17803_v19 }
 0xa8e   :  { %6701 = vmatprep.mubr.f32.mxu0 %v21350_v8  ;;  %v21354_v8 = vld [vmem:[#allocation58_spill] sm:$0xff] }
 0xa91   :  { %6702 = vmatmul.mubr.f32.gmra.mrb[18].mxu0 %v17807_v36 }
 0xa92   :  { %6706 = vmatprep.mubr.f32.mxu0 %v21351_v4  ;;  %v5501_v4 = vld [vmem:[#allocation2 + $0x447] sm:$0xff] }
 0xa95   :  { %6707 = vmatmul.mubr.f32.gmra.mrb[20].mxu0 %v17811_v61 }
 0xa96   :  { %6711 = vmatprep.mubr.f32.mxu0 %v21352_v29  ;;  %v5502_v29 = vld [vmem:[#allocation2 + $0x44f] sm:$0xff] }
 0xa99   :  { %6712 = vmatmul.mubr.f32.gmra.mrb[22].mxu0 %v17815_v45 }
 0xa9a   :  { %6716 = vmatprep.mubr.f32.mxu0 %v21353_v48  ;;  %v5919_v48 = vld [vmem:[%s20418_s4 + $0x300] sm:$0xff] }
 0xa9d   :  { %6717 = vmatmul.mubr.f32.gmra.mrb[24].mxu0 %v17819_v30 }
 0xa9e   :  { %6721 = vmatprep.mubr.f32.mxu0 %v21354_v8  ;;  %v5920_v8 = vld [vmem:[%s20418_s4 + $0x308] sm:$0xff] }
 0xaa1   :  { %6722 = vmatmul.mubr.f32.gmra.mrb[26].mxu0 %v17823_v59 }
 0xaa2   :  { %6726 = vmatprep.mubr.f32.mxu0 %v5501_v4  ;;  %v10790_v4 = vpack.c.bf16 %v5920_v8, %v5919_v48  ;;  %v5924_v48 = vld [vmem:[%s20418_s4 + $0x328] sm:$0xff]  ;;  %v5504_v8 = vld [vmem:[#allocation2 + $0x30] sm:$0xff] }
 0xaa5   :  { %6727 = vmatmul.mubr.f32.gmra.mrb[28].mxu0 %v17826_v43 }
 0xaa6   :  { %6731 = vmatprep.mubr.f32.mxu0 %v5502_v29  ;;  %v5922_v29 = vld [vmem:[%s20418_s4 + $0x318] sm:$0xff] }
 0xaa7   :  { %v10793_v12 = vpack.c.bf16 %v5922_v29, %v5921_v2  ;;  %v5926_v2 = vld [vmem:[%s20418_s4 + $0x338] sm:$0xff] }
 0xaa8   :  { %v5570_v29 = vld [vmem:[#allocation2 + $0x51] sm:$0xff] }
 0xaa9   :  { %6732 = vmatmul.mubr.f32.gmra.mrb[30].mxu0 %v17835_v47 }
 0xaaa   :  { %6801 = vmatprep.mubr.f32.mxu0 %v17445_v41  ;;  %v5923_v41 = vld [vmem:[%s20418_s4 + $0x320] sm:$0xff] }
 0xaad   :  { %6802 = vmatmul.mubr.f32.vlgmr.msra.gmra.mrb[160].mxu0 %v5503_v10  ;;  %v10796_v10 = vpack.c.bf16 %v5924_v48, %v5923_v41  ;;  %v5928_v41 = vld [vmem:[%s20418_s4 + $0x348] sm:$0xff]  ;;  %v17870_v48 = vld [vmem:[#allocation2 + $0x50] sm:$0xff] }
 0xaae   :  { %10791 = vmatpush1.bf16.msra.mxu0 %v10790_v4  ;;  %6806 = vmatprep.mubr.f32.mxu0 %v17460_v53  ;;  %v5925_v53 = vld [vmem:[%s20418_s4 + $0x330] sm:$0xff]  ;;  %v17860_v4 = vld [vmem:[#allocation2 + $0x48] sm:$0xff] }
 0xaaf   :  { %10792 = vmatprep.subr.bf16.mxu0 %v21256_v24 }
 0xab1   :  { %6807 = vmatmul.mubr.f32.gmra.mrb[162].mxu0 %v5504_v8  ;;  %v5571_v8 = vld [vmem:[#allocation2 + $0x69] sm:$0xff] }
 0xab2   :  { %6811 = vmatprep.mubr.f32.mxu0 %v5569_v11  ;;  %10794 = vmatpush1.bf16.msra.mxu0 %v10793_v12  ;;  %v10799_v11 = vpack.c.bf16 %v5926_v2, %v5925_v53  ;;  %v5927_v12 = vld [vmem:[%s20418_s4 + $0x340] sm:$0xff]  ;;  %v5930_v53 = vld [vmem:[%s20418_s4 + $0x358] sm:$0xff]  ;;  %v17880_v2 = vld [vmem:[#allocation2 + $0x68] sm:$0xff] }
 0xab3   :  { %10795 = vmatprep.subr.bf16.mxu0 %v21256_v24  ;;  %21355 = vst [vmem:[#allocation11_spill] sm:$0xff] %v17880_v2 }
 0xab5   :  { %6812 = vmatmul.mubr.f32.gmra.mrb[164].mxu0 %v17860_v4 }
 0xab6   :  { %6816 = vmatprep.mubr.f32.mxu0 %v5570_v29  ;;  %10797 = vmatpush1.bf16.msra.mxu0 %v10796_v10  ;;  %v10802_v29 = vpack.c.bf16 %v5928_v41, %v5927_v12  ;;  %v5929_v10 = vld [vmem:[%s20418_s4 + $0x350] sm:$0xff]  ;;  %v5932_v12 = vld [vmem:[%s20418_s4 + $0x368] sm:$0xff] }
 0xab7   :  { %10798 = vmatprep.subr.bf16.mxu0 %v21256_v24  ;;  %v17890_v41 = vld [vmem:[#allocation2 + $0x70] sm:$0xff] }
 0xab8   :  { %21356 = vst [vmem:[#allocation56_spill] sm:$0xff] %v17890_v41 }
 0xab9   :  { %6817 = vmatmul.mubr.f32.gmra.mrb[166].mxu0 %v17870_v48 }
 0xaba   :  { %6821 = vmatprep.mubr.f32.mxu0 %v5571_v8  ;;  %10800 = vmatpush1.bf16.msra.mxu0 %v10799_v11  ;;  %v10805_v8 = vpack.c.bf16 %v5930_v53, %v5929_v10  ;;  %v5931_v11 = vld [vmem:[%s20418_s4 + $0x360] sm:$0xff]  ;;  %v5934_v10 = vld [vmem:[%s20418_s4 + $0x378] sm:$0xff]  ;;  %v17900_v53 = vld [vmem:[#allocation2 + $0x88] sm:$0xff] }
 0xabb   :  { %10801 = vmatprep.subr.bf16.mxu0 %v21256_v24 }
 0xabd   :  { %6822 = vmatmul.mubr.f32.gmra.mrb[168].mxu0 %v17880_v2  ;;  %v5574_v2 = vld [vmem:[#allocation2 + $0x91] sm:$0xff] }
 0xabe   :  { %6826 = vmatprep.mubr.f32.mxu0 %v5572_v27  ;;  %10803 = vmatpush1.bf16.msra.mxu0 %v10802_v29  ;;  %v10808_v27 = vpack.c.bf16 %v5932_v12, %v5931_v11  ;;  %v5933_v29 = vld [vmem:[%s20418_s4 + $0x370] sm:$0xff]  ;;  %v5936_v11 = vld [vmem:[%s20418_s4 + $0x388] sm:$0xff] }
 0xabf   :  { %10804 = vmatprep.subr.bf16.mxu0 %v21256_v24  ;;  %v17910_v12 = vld [vmem:[#allocation2 + $0x90] sm:$0xff] }
 0xac1   :  { %6827 = vmatmul.mubr.f32.gmra.mrb[170].mxu0 %v17890_v41  ;;  %v5575_v41 = vld [vmem:[#allocation2 + $0xa9] sm:$0xff] }
 0xac2   :  { %6831 = vmatprep.mubr.f32.mxu0 %v5573_v16  ;;  %10806 = vmatpush1.bf16.msra.mxu0 %v10805_v8  ;;  %v10811_v16 = vpack.c.bf16 %v5934_v10, %v5933_v29  ;;  %v5935_v8 = vld [vmem:[%s20418_s4 + $0x380] sm:$0xff]  ;;  %v5938_v29 = vld [vmem:[%s20418_s4 + $0x398] sm:$0xff]  ;;  %v17920_v10 = vld [vmem:[#allocation2 + $0xa8] sm:$0xff] }
 0xac3   :  { %10807 = vmatprep.subr.bf16.mxu0 %v21256_v24 }
 0xac5   :  { %6832 = vmatmul.mubr.f32.gmra.mrb[172].mxu0 %v17900_v53 }
 0xac6   :  { %6836 = vmatprep.mubr.f32.mxu0 %v5574_v2  ;;  %10809 = vmatpush1.bf16.msra.mxu0 %v10808_v27  ;;  %v10814_v2 = vpack.c.bf16 %v5936_v11, %v5935_v8  ;;  %v5937_v27 = vld [vmem:[%s20418_s4 + $0x390] sm:$0xff]  ;;  %v5940_v8 = vld [vmem:[%s20418_s4 + $0x3a8] sm:$0xff] }
 0xac7   :  { %10810 = vmatprep.subr.bf16.mxu0 %v21256_v24  ;;  %v17931_v11 = vld [vmem:[#allocation2 + $0xb0] sm:$0xff] }
 0xac9   :  { %6837 = vmatmul.mubr.f32.gmra.mrb[174].mxu0 %v17910_v12 }
 0xaca   :  { %6841 = vmatprep.mubr.f32.mxu0 %v5575_v41  ;;  %10812 = vmatpush1.bf16.msra.mxu0 %v10811_v16  ;;  %v10817_v41 = vpack.c.bf16 %v5938_v29, %v5937_v27  ;;  %v5939_v16 = vld [vmem:[%s20418_s4 + $0x3a0] sm:$0xff]  ;;  %v17941_v27 = vld [vmem:[#allocation2 + $0xd0] sm:$0xff] }
 0xacb   :  { %10813 = vmatprep.subr.bf16.mxu0 %v21256_v24  ;;  %v5941_v29 = vld [vmem:[%s20418_s4 + $0x3b0] sm:$0xff] }
 0xacd   :  { %6842 = vmatmul.mubr.f32.gmra.mrb[176].mxu0 %v17920_v10 }
 0xace   :  { %6846 = vmatprep.mubr.f32.mxu0 %v17552_v62  ;;  %10815 = vmatpush1.bf16.msra.mxu0 %v10814_v2  ;;  %v10820_v62 = vpack.c.bf16 %v5940_v8, %v5939_v16  ;;  %v17936_v2 = vld [vmem:[#allocation2 + $0xc8] sm:$0xff]  ;;  %v17955_v16 = vld [vmem:[#allocation2 + $0xf0] sm:$0xff] }
 0xacf   :  { %10816 = vmatprep.subr.bf16.mxu0 %v21256_v24  ;;  %v17964_v8 = vld [vmem:[#allocation2 + $0x110] sm:$0xff] }
 0xad1   :  { %6847 = vmatmul.mubr.f32.gmra.mrb[178].mxu0 %v17931_v11 }
 0xad2   :  { %6851 = vmatprep.mubr.f32.mxu0 %v17560_v18  ;;  %10818 = vmatpush1.bf16.msra.mxu0 %v10817_v41  ;;  %v17945_v18 = vld [vmem:[#allocation2 + $0xe8] sm:$0xff] }
 0xad3   :  { %10819 = vmatprep.subr.bf16.mxu0 %v21256_v24 }
 0xad5   :  { %6852 = vmatmul.mubr.f32.gmra.mrb[180].mxu0 %v17936_v2 }
 0xad6   :  { %6856 = vmatprep.mubr.f32.mxu0 %v17574_v1  ;;  %10821 = vmatpush1.bf16.msra.mxu0 %v10820_v62  ;;  %v5942_v1 = vld [vmem:[%s20418_s4 + $0x3b8] sm:$0xff]  ;;  %v5944_v62 = vld [vmem:[%s20418_s4 + $0x3c8] sm:$0xff] }
 0xad7   :  { %10822 = vmatprep.subr.bf16.mxu0 %v21256_v24  ;;  %v10823_v41 = vpack.c.bf16 %v5942_v1, %v5941_v29  ;;  %v17978_v29 = vld [vmem:[#allocation2 + $0x130] sm:$0xff] }
 0xad8   :  { %v17987_v1 = vld [vmem:[#allocation2 + $0x150] sm:$0xff] }
 0xad9   :  { %6857 = vmatmul.mubr.f32.gmra.mrb[182].mxu0 %v17941_v27 }
 0xada   :  { %6861 = vmatprep.mubr.f32.mxu0 %v17583_v15  ;;  %10824 = vmatpush1.bf16.msra.mxu0 %v10823_v41  ;;  %v17960_v15 = vld [vmem:[#allocation2 + $0x108] sm:$0xff]  ;;  %v5946_v41 = vld [vmem:[%s20418_s4 + $0x3d8] sm:$0xff] }
 0xadb   :  { %10825 = vmatprep.subr.bf16.mxu0 %v21256_v24 }
 0xadd   :  { %6862 = vmatmul.mubr.f32.gmra.mrb[184].mxu0 %v17945_v18 }
 0xade   :  { %6866 = vmatprep.mubr.f32.mxu0 %v17591_v3  ;;  %v17968_v3 = vld [vmem:[#allocation2 + $0x128] sm:$0xff] }
 0xae1   :  { %6867 = vmatmul.mubr.f32.gmra.mrb[186].mxu0 %v17955_v16 }
 0xae2   :  { %6871 = vmatprep.mubr.f32.mxu0 %v17599_v26  ;;  %v5943_v26 = vld [vmem:[%s20418_s4 + $0x3c0] sm:$0xff] }
 0xae5   :  { %6872 = vmatmul.mubr.f32.gmra.mrb[188].mxu0 %v17960_v15 }
 0xae6   :  { %6876 = vmatprep.mubr.f32.mxu0 %v17613_v34  ;;  %v10826_v34 = vpack.c.bf16 %v5944_v62, %v5943_v26  ;;  %v18001_v26 = vld [vmem:[#allocation2 + $0x170] sm:$0xff] }
 0xae7   :  { %v18010_v62 = vld [vmem:[#allocation2 + $0x190] sm:$0xff] }
 0xae8   :  { %10827 = vmatpush1.bf16.msra.mxu0 %v10826_v34  ;;  %v5948_v34 = vld [vmem:[%s20418_s4 + $0x3e8] sm:$0xff] }
 0xae9   :  { %6877 = vmatmul.mubr.f32.gmra.mrb[190].mxu0 %v17964_v8  ;;  %10828 = vmatprep.subr.bf16.mxu0 %v21256_v24 }
 0xaea   :  { %6881 = vmatprep.mubr.f32.mxu0 %v17622_v13  ;;  %v17983_v13 = vld [vmem:[#allocation2 + $0x148] sm:$0xff] }
 0xaed   :  { %6882 = vmatmul.mubr.f32.gmra.mrb[192].mxu0 %v17968_v3 }
 0xaee   :  { %6886 = vmatprep.mubr.f32.mxu0 %v17630_v0  ;;  %v17991_v0 = vld [vmem:[#allocation2 + $0x168] sm:$0xff] }
 0xaf1   :  { %6887 = vmatmul.mubr.f32.gmra.mrb[194].mxu0 %v17978_v29 }
 0xaf2   :  { %6891 = vmatprep.mubr.f32.mxu0 %v17638_v54  ;;  %v5945_v54 = vld [vmem:[%s20418_s4 + $0x3d0] sm:$0xff] }
 0xaf5   :  { %6892 = vmatmul.mubr.f32.gmra.mrb[196].mxu0 %v17983_v13 }
 0xaf6   :  { %6896 = vmatprep.mubr.f32.mxu0 %v17652_v44  ;;  %v10829_v44 = vpack.c.bf16 %v5946_v41, %v5945_v54  ;;  %v18024_v54 = vld [vmem:[#allocation2 + $0x1b0] sm:$0xff] }
 0xaf7   :  { %v18033_v41 = vld [vmem:[#allocation2 + $0x1d0] sm:$0xff] }
 0xaf8   :  { %10830 = vmatpush1.bf16.msra.mxu0 %v10829_v44  ;;  %v18047_v44 = vld [vmem:[#allocation2 + $0x1f0] sm:$0xff] }
 0xaf9   :  { %6897 = vmatmul.mubr.f32.gmra.mrb[198].mxu0 %v17987_v1  ;;  %10831 = vmatprep.subr.bf16.mxu0 %v21256_v24 }
 0xafa   :  { %6901 = vmatprep.mubr.f32.mxu0 %v17661_v52  ;;  %v18006_v52 = vld [vmem:[#allocation2 + $0x188] sm:$0xff] }
 0xafd   :  { %6902 = vmatmul.mubr.f32.gmra.mrb[200].mxu0 %v17991_v0 }
 0xafe   :  { %6906 = vmatprep.mubr.f32.mxu0 %v17665_v32  ;;  %v18014_v32 = vld [vmem:[#allocation2 + $0x1a8] sm:$0xff] }
 0xb01   :  { %6907 = vmatmul.mubr.f32.gmra.mrb[202].mxu0 %v18001_v26 }
 0xb02   :  { %6911 = vmatprep.mubr.f32.mxu0 %v17669_v33  ;;  %v5947_v33 = vld [vmem:[%s20418_s4 + $0x3e0] sm:$0xff] }
 0xb05   :  { %6912 = vmatmul.mubr.f32.gmra.mrb[204].mxu0 %v18006_v52 }
 0xb06   :  { %6916 = vmatprep.mubr.f32.mxu0 %v17679_v37  ;;  %v10832_v37 = vpack.c.bf16 %v5948_v34, %v5947_v33  ;;  %v18050_v33 = vld [vmem:[#allocation2 + $0x208] sm:$0xff]  ;;  %v5598_v34 = vld [vmem:[#allocation2 + $0x211] sm:$0xff] }
 0xb08   :  { %10833 = vmatpush1.bf16.msra.mxu0 %v10832_v37  ;;  %v18053_v37 = vld [vmem:[#allocation2 + $0x210] sm:$0xff] }
 0xb09   :  { %6917 = vmatmul.mubr.f32.gmra.mrb[206].mxu0 %v18010_v62  ;;  %10834 = vmatprep.subr.bf16.mxu0 %v21256_v24  ;;  %v5949_v24 = vld [vmem:[%s20418_s4 + $0x3f0] sm:$0xff] }
 0xb0a   :  { %6921 = vmatprep.mubr.f32.mxu0 %v17684_v35  ;;  %v18029_v35 = vld [vmem:[#allocation2 + $0x1c8] sm:$0xff] }
 0xb0d   :  { %6922 = vmatmul.mubr.f32.gmra.mrb[208].mxu0 %v18014_v32 }
 0xb0e   :  { %6926 = vmatprep.mubr.f32.mxu0 %v17688_v22  ;;  %v18037_v22 = vld [vmem:[#allocation2 + $0x1e8] sm:$0xff] }
 0xb11   :  { %6927 = vmatmul.mubr.f32.gmra.mrb[210].mxu0 %v18024_v54 }
 0xb12   :  { %6931 = vmatprep.mubr.f32.mxu0 %v17692_v60  ;;  %v5950_v60 = vld [vmem:[%s20418_s4 + $0x3f8] sm:$0xff] }
 0xb15   :  { %6932 = vmatmul.mubr.f32.gmra.mrb[212].mxu0 %v18029_v35 }
 0xb16   :  { %6936 = vmatprep.mubr.f32.mxu0 %v17702_v39  ;;  %v10835_v39 = vpack.c.bf16 %v5950_v60, %v5949_v24  ;;  %v5536_v24 = vld [vmem:[#allocation2 + $0x270] sm:$0xff]  ;;  %v18059_v60 = vld [vmem:[#allocation2 + $0x288] sm:$0xff] }
 0xb18   :  { %10836 = vmatpush1.bf16.msra.mxu0 %v10835_v39  ;;  %v18063_v39 = vld [vmem:[#allocation2 + $0x290] sm:$0xff] }
 0xb19   :  { %6937 = vmatmul.mubr.f32.gmra.mrb[214].mxu0 %v18033_v41 }
 0xb1a   :  { %6941 = vmatprep.mubr.f32.mxu0 %v17706_v40  ;;  %v5597_v40 = vld [vmem:[#allocation2 + $0x209] sm:$0xff] }
 0xb1d   :  { %6942 = vmatmul.mubr.f32.gmra.mrb[216].mxu0 %v18037_v22 }
 0xb1e   :  { %6946 = vmatprep.mubr.f32.mxu0 %v17709_v23  ;;  %v5535_v23 = vld [vmem:[#allocation2 + $0x268] sm:$0xff] }
 0xb21   :  { %6947 = vmatmul.mubr.f32.gmra.mrb[218].mxu0 %v18047_v44 }
 0xb22   :  { %6951 = vmatprep.mubr.f32.mxu0 %v5597_v40  ;;  %v18170_v40 = vld [vmem:[#allocation2 + $0x448] sm:$0xff] }
 0xb23   :  { %21357 = vst [vmem:[#allocation30_spill] sm:$0xff] %v18170_v40 }
 0xb25   :  { %6952 = vmatmul.mubr.f32.gmra.mrb[220].mxu0 %v18050_v33 }
 0xb26   :  { %6956 = vmatprep.mubr.f32.mxu0 %v5598_v34  ;;  %v18173_v34 = vld [vmem:[#allocation2 + $0x450] sm:$0xff] }
 0xb29   :  { %6957 = vmatmul.mubr.f32.gmra.mrb[222].mxu0 %v18053_v37 }
 0xb2a   :  { %6961 = vmatprep.mubr.f32.mxu0 %v17715_v50  ;;  %v18067_v50 = vld [vmem:[#allocation2 + $0x2a8] sm:$0xff] }
 0xb2d   :  { %6962 = vmatmul.mubr.f32.gmra.mrb[224].mxu0 %v5535_v23  ;;  %v21358_v23 = vld [vmem:[#allocation11_spill] sm:$0xff] }
 0xb2e   :  { %6966 = vmatprep.mubr.f32.mxu0 %v17719_v51  ;;  %v18071_v51 = vld [vmem:[#allocation2 + $0x2b0] sm:$0xff] }
 0xb31   :  { %6967 = vmatmul.mubr.f32.gmra.mrb[226].mxu0 %v5536_v24  ;;  %v5633_v24 = vld [vmem:[#allocation2 + $0x67] sm:$0xff] }
 0xb32   :  { %6971 = vmatprep.mubr.f32.mxu0 %v17723_v5  ;;  %v18075_v5 = vld [vmem:[#allocation2 + $0x2c8] sm:$0xff] }
 0xb35   :  { %6972 = vmatmul.mubr.f32.gmra.mrb[228].mxu0 %v18059_v60 }
 0xb36   :  { %6976 = vmatprep.mubr.f32.mxu0 %v17727_v63  ;;  %v18079_v63 = vld [vmem:[#allocation2 + $0x2d0] sm:$0xff] }
 0xb39   :  { %6977 = vmatmul.mubr.f32.gmra.mrb[230].mxu0 %v18063_v39 }
 0xb3a   :  { %6981 = vmatprep.mubr.f32.mxu0 %v17731_v17  ;;  %v18083_v17 = vld [vmem:[#allocation2 + $0x2e8] sm:$0xff] }
 0xb3d   :  { %6982 = vmatmul.mubr.f32.gmra.mrb[232].mxu0 %v18067_v50 }
 0xb3e   :  { %6986 = vmatprep.mubr.f32.mxu0 %v17735_v28  ;;  %v18087_v28 = vld [vmem:[#allocation2 + $0x2f0] sm:$0xff] }
 0xb41   :  { %6987 = vmatmul.mubr.f32.gmra.mrb[234].mxu0 %v18071_v51 }
 0xb42   :  { %6991 = vmatprep.mubr.f32.mxu0 %v17739_v38  ;;  %v18091_v38 = vld [vmem:[#allocation2 + $0x308] sm:$0xff] }
 0xb45   :  { %6992 = vmatmul.mubr.f32.gmra.mrb[236].mxu0 %v18075_v5 }
 0xb46   :  { %6996 = vmatprep.mubr.f32.mxu0 %v17743_v56  ;;  %v18095_v56 = vld [vmem:[#allocation2 + $0x310] sm:$0xff] }
 0xb49   :  { %6997 = vmatmul.mubr.f32.gmra.mrb[238].mxu0 %v18079_v63 }
 0xb4a   :  { %7001 = vmatprep.mubr.f32.mxu0 %v17747_v21  ;;  %v18099_v21 = vld [vmem:[#allocation2 + $0x328] sm:$0xff] }
 0xb4d   :  { %7002 = vmatmul.mubr.f32.gmra.mrb[240].mxu0 %v18083_v17 }
 0xb4e   :  { %7006 = vmatprep.mubr.f32.mxu0 %v17751_v46  ;;  %v18103_v46 = vld [vmem:[#allocation2 + $0x330] sm:$0xff] }
 0xb51   :  { %7007 = vmatmul.mubr.f32.gmra.mrb[242].mxu0 %v18087_v28 }
 0xb52   :  { %7011 = vmatprep.mubr.f32.mxu0 %v17755_v58  ;;  %v18107_v58 = vld [vmem:[#allocation2 + $0x348] sm:$0xff] }
 0xb55   :  { %7012 = vmatmul.mubr.f32.gmra.mrb[244].mxu0 %v18091_v38 }
 0xb56   :  { %7016 = vmatprep.mubr.f32.mxu0 %v17759_v57  ;;  %v18111_v57 = vld [vmem:[#allocation2 + $0x350] sm:$0xff] }
 0xb59   :  { %7017 = vmatmul.mubr.f32.gmra.mrb[246].mxu0 %v18095_v56 }
 0xb5a   :  { %7021 = vmatprep.mubr.f32.mxu0 %v17763_v14  ;;  %v18115_v14 = vld [vmem:[#allocation2 + $0x368] sm:$0xff] }
 0xb5d   :  { %7022 = vmatmul.mubr.f32.gmra.mrb[248].mxu0 %v18099_v21 }
 0xb5e   :  { %7026 = vmatprep.mubr.f32.mxu0 %v17767_v20  ;;  %v18119_v20 = vld [vmem:[#allocation2 + $0x370] sm:$0xff] }
 0xb61   :  { %7027 = vmatmul.mubr.f32.gmra.mrb[250].mxu0 %v18103_v46 }
 0xb62   :  { %7031 = vmatprep.mubr.f32.mxu0 %v17771_v42  ;;  %v18123_v42 = vld [vmem:[#allocation2 + $0x388] sm:$0xff] }
 0xb65   :  { %7032 = vmatmul.mubr.f32.gmra.mrb[252].mxu0 %v18107_v58 }
 0xb66   :  { %7036 = vmatprep.mubr.f32.mxu0 %v17775_v25  ;;  %v18127_v25 = vld [vmem:[#allocation2 + $0x390] sm:$0xff] }
 0xb69   :  { %7037 = vmatmul.mubr.f32.gmra.mrb[254].mxu0 %v18111_v57 }
 0xb6a   :  { %7041 = vmatprep.mubr.f32.mxu0 %v17779_v6  ;;  %v18131_v6 = vld [vmem:[#allocation2 + $0x3a8] sm:$0xff] }
 0xb6d   :  { %7042 = vmatmul.mubr.f32.gmra.mrb[0].mxu0 %v18115_v14 }
 0xb6e   :  { %7046 = vmatprep.mubr.f32.mxu0 %v17783_v7  ;;  %v18135_v7 = vld [vmem:[#allocation2 + $0x3b0] sm:$0xff] }
 0xb71   :  { %7047 = vmatmul.mubr.f32.gmra.mrb[2].mxu0 %v18119_v20 }
 0xb72   :  { %7051 = vmatprep.mubr.f32.mxu0 %v17787_v55  ;;  %v18139_v55 = vld [vmem:[#allocation2 + $0x3c8] sm:$0xff] }
 0xb75   :  { %7052 = vmatmul.mubr.f32.gmra.mrb[4].mxu0 %v18123_v42 }
 0xb76   :  { %7056 = vmatprep.mubr.f32.mxu0 %v17791_v9  ;;  %v18143_v9 = vld [vmem:[#allocation2 + $0x3d0] sm:$0xff] }
 0xb79   :  { %7057 = vmatmul.mubr.f32.gmra.mrb[6].mxu0 %v18127_v25 }
 0xb7a   :  { %7061 = vmatprep.mubr.f32.mxu0 %v17795_v49  ;;  %v18147_v49 = vld [vmem:[#allocation2 + $0x3e8] sm:$0xff] }
 0xb7d   :  { %7062 = vmatmul.mubr.f32.gmra.mrb[8].mxu0 %v18131_v6 }
 0xb7e   :  { %7066 = vmatprep.mubr.f32.mxu0 %v17799_v31  ;;  %v18151_v31 = vld [vmem:[#allocation2 + $0x3f0] sm:$0xff] }
 0xb81   :  { %7067 = vmatmul.mubr.f32.gmra.mrb[10].mxu0 %v18135_v7 }
 0xb82   :  { %7071 = vmatprep.mubr.f32.mxu0 %v17803_v19  ;;  %v18155_v19 = vld [vmem:[#allocation2 + $0x408] sm:$0xff] }
 0xb85   :  { %7072 = vmatmul.mubr.f32.gmra.mrb[12].mxu0 %v18139_v55 }
 0xb86   :  { %7076 = vmatprep.mubr.f32.mxu0 %v17807_v36  ;;  %v18159_v36 = vld [vmem:[#allocation2 + $0x410] sm:$0xff] }
 0xb89   :  { %7077 = vmatmul.mubr.f32.gmra.mrb[14].mxu0 %v18143_v9 }
 0xb8a   :  { %7081 = vmatprep.mubr.f32.mxu0 %v17811_v61  ;;  %v18163_v61 = vld [vmem:[#allocation2 + $0x428] sm:$0xff] }
 0xb8d   :  { %7082 = vmatmul.mubr.f32.gmra.mrb[16].mxu0 %v18147_v49 }
 0xb8e   :  { %7086 = vmatprep.mubr.f32.mxu0 %v17815_v45  ;;  %v18167_v45 = vld [vmem:[#allocation2 + $0x430] sm:$0xff] }
 0xb91   :  { %7087 = vmatmul.mubr.f32.gmra.mrb[18].mxu0 %v18151_v31 }
 0xb92   :  { %7091 = vmatprep.mubr.f32.mxu0 %v17819_v30  ;;  %v5629_v30 = vld [vmem:[#allocation2 + $0x449] sm:$0xff] }
 0xb95   :  { %7092 = vmatmul.mubr.f32.gmra.mrb[20].mxu0 %v18155_v19 }
 0xb96   :  { %7096 = vmatprep.mubr.f32.mxu0 %v17823_v59  ;;  %v5630_v59 = vld [vmem:[#allocation2 + $0x451] sm:$0xff] }
 0xb99   :  { %7097 = vmatmul.mubr.f32.gmra.mrb[22].mxu0 %v18159_v36 }
 0xb9a   :  { %7101 = vmatprep.mubr.f32.mxu0 %v17826_v43  ;;  %v5631_v43 = vld [vmem:[#allocation2 + $0x47] sm:$0xff] }
 0xb9d   :  { %7102 = vmatmul.mubr.f32.gmra.mrb[24].mxu0 %v18163_v61 }
 0xb9e   :  { %7106 = vmatprep.mubr.f32.mxu0 %v17835_v47  ;;  %v5632_v47 = vld [vmem:[#allocation2 + $0x4f] sm:$0xff] }
 0xba1   :  { %7107 = vmatmul.mubr.f32.gmra.mrb[26].mxu0 %v18167_v45 }
 0xba2   :  { %7111 = vmatprep.mubr.f32.mxu0 %v5629_v30  ;;  %v21359_v30 = vld [vmem:[#allocation56_spill] sm:$0xff] }
 0xba5   :  { %7112 = vmatmul.mubr.f32.gmra.mrb[28].mxu0 %v18170_v40  ;;  %v5634_v40 = vld [vmem:[#allocation2 + $0x6f] sm:$0xff] }
 0xba6   :  { %7116 = vmatprep.mubr.f32.mxu0 %v5630_v59  ;;  %v5635_v59 = vld [vmem:[#allocation2 + $0x87] sm:$0xff] }
 0xba9   :  { %7117 = vmatmul.mubr.f32.gmra.mrb[30].mxu0 %v18173_v34 }
 0xbaa   :  { %7186 = vmatprep.mubr.f32.mxu0 %v17860_v4  ;;  %v5636_v4 = vld [vmem:[#allocation2 + $0x8f] sm:$0xff] }
 0xbad   :  { %7187 = vmatmul.mubr.f32.vlgmr.msra.gmra.mrb[160].mxu0 %v5631_v43  ;;  %v5638_v43 = vld [vmem:[#allocation2 + $0xaf] sm:$0xff] }
 0xbae   :  { %7191 = vmatprep.mubr.f32.mxu0 %v17870_v48  ;;  %v5637_v48 = vld [vmem:[#allocation2 + $0xa7] sm:$0xff] }
 0xbb1   :  { %7192 = vmatmul.mubr.f32.gmra.mrb[162].mxu0 %v5632_v47  ;;  %v5639_v47 = vld [vmem:[#allocation2 + $0xc7] sm:$0xff] }
 0xbb2   :  { %7196 = vmatprep.mubr.f32.mxu0 %v21358_v23  ;;  %v5822_v23 = vld [vmem:[#allocation2 + $0x471] sm:$0xff] }
 0xbb5   :  { %7197 = vmatmul.mubr.f32.gmra.mrb[164].mxu0 %v5633_v24  ;;  %v5665_v24 = vld [vmem:[#allocation2 + $0x2a7] sm:$0xff] }
 0xbb6   :  { %7201 = vmatprep.mubr.f32.mxu0 %v21359_v30  ;;  %v5666_v30 = vld [vmem:[#allocation2 + $0x2af] sm:$0xff] }
 0xbb9   :  { %7202 = vmatmul.mubr.f32.gmra.mrb[166].mxu0 %v5634_v40  ;;  %v18206_v40 = vld [vmem:[#allocation2] sm:$0xff] }
 0xbba   :  { %7206 = vmatprep.mubr.f32.mxu0 %v17900_v53  ;;  %v5640_v53 = vld [vmem:[#allocation2 + $0xcf] sm:$0xff] }
 0xbbd   :  { %7207 = vmatmul.mubr.f32.gmra.mrb[168].mxu0 %v5635_v59  ;;  %v5667_v59 = vld [vmem:[#allocation2 + $0x2c7] sm:$0xff] }
 0xbbe   :  { %7211 = vmatprep.mubr.f32.mxu0 %v17910_v12  ;;  %v5641_v12 = vld [vmem:[#allocation2 + $0xe7] sm:$0xff] }
 0xbc1   :  { %7212 = vmatmul.mubr.f32.gmra.mrb[170].mxu0 %v5636_v4  ;;  %v5684_v4 = vld [vmem:[#allocation2 + $0x3cf] sm:$0xff] }
 0xbc2   :  { %7216 = vmatprep.mubr.f32.mxu0 %v17920_v10  ;;  %v5642_v10 = vld [vmem:[#allocation2 + $0xef] sm:$0xff] }
 0xbc5   :  { %7217 = vmatmul.mubr.f32.gmra.mrb[172].mxu0 %v5637_v48  ;;  %v21360_v48 = vld [vmem:[#allocation34_spill] sm:$0xff] }
 0xbc6   :  { %7221 = vmatprep.mubr.f32.mxu0 %v17931_v11  ;;  %v5643_v11 = vld [vmem:[#allocation2 + $0x107] sm:$0xff] }
 0xbc9   :  { %7222 = vmatmul.mubr.f32.gmra.mrb[174].mxu0 %v5638_v43 }
 0xbca   :  { %7226 = vmatprep.mubr.f32.mxu0 %v17936_v2  ;;  %v5644_v2 = vld [vmem:[#allocation2 + $0x10f] sm:$0xff] }
 0xbcd   :  { %7227 = vmatmul.mubr.f32.gmra.mrb[176].mxu0 %v5639_v47  ;;  %v5685_v47 = vld [vmem:[#allocation2 + $0x3e7] sm:$0xff] }
 0xbce   :  { %7231 = vmatprep.mubr.f32.mxu0 %v17941_v27  ;;  %v5645_v27 = vld [vmem:[#allocation2 + $0x127] sm:$0xff] }
 0xbd1   :  { %7232 = vmatmul.mubr.f32.gmra.mrb[178].mxu0 %v5640_v53 }
 0xbd2   :  { %7236 = vmatprep.mubr.f32.mxu0 %v17945_v18  ;;  %v5646_v18 = vld [vmem:[#allocation2 + $0x12f] sm:$0xff] }
 0xbd5   :  { %7237 = vmatmul.mubr.f32.gmra.mrb[180].mxu0 %v5641_v12 }
 0xbd6   :  { %7241 = vmatprep.mubr.f32.mxu0 %v17955_v16  ;;  %v5647_v16 = vld [vmem:[#allocation2 + $0x147] sm:$0xff] }
 0xbd9   :  { %7242 = vmatmul.mubr.f32.gmra.mrb[182].mxu0 %v5642_v10  ;;  %v21362_v10 = vld [vmem:[#allocation35_spill] sm:$0xff] }
 0xbda   :  { %7246 = vmatprep.mubr.f32.mxu0 %v17960_v15  ;;  %v5648_v15 = vld [vmem:[#allocation2 + $0x14f] sm:$0xff] }
 0xbdd   :  { %7247 = vmatmul.mubr.f32.gmra.mrb[184].mxu0 %v5643_v11 }
 0xbde   :  { %7251 = vmatprep.mubr.f32.mxu0 %v17964_v8  ;;  %v5649_v8 = vld [vmem:[#allocation2 + $0x167] sm:$0xff] }
 0xbe1   :  { %7252 = vmatmul.mubr.f32.gmra.mrb[186].mxu0 %v5644_v2 }
 0xbe2   :  { %7256 = vmatprep.mubr.f32.mxu0 %v17968_v3  ;;  %v5650_v3 = vld [vmem:[#allocation2 + $0x16f] sm:$0xff] }
 0xbe5   :  { %7257 = vmatmul.mubr.f32.gmra.mrb[188].mxu0 %v5645_v27 }
 0xbe6   :  { %7261 = vmatprep.mubr.f32.mxu0 %v17978_v29  ;;  %v5651_v29 = vld [vmem:[#allocation2 + $0x187] sm:$0xff] }
 0xbe9   :  { %7262 = vmatmul.mubr.f32.gmra.mrb[190].mxu0 %v5646_v18  ;;  %v21363_v18 = vld [vmem:[#allocation13_spill] sm:$0xff] }
 0xbea   :  { %7266 = vmatprep.mubr.f32.mxu0 %v17983_v13  ;;  %v5652_v13 = vld [vmem:[#allocation2 + $0x18f] sm:$0xff] }
 0xbed   :  { %7267 = vmatmul.mubr.f32.gmra.mrb[192].mxu0 %v5647_v16 }
 0xbee   :  { %7271 = vmatprep.mubr.f32.mxu0 %v17987_v1  ;;  %v5653_v1 = vld [vmem:[#allocation2 + $0x1a7] sm:$0xff] }
 0xbf1   :  { %7272 = vmatmul.mubr.f32.gmra.mrb[194].mxu0 %v5648_v15 }
 0xbf2   :  { %7276 = vmatprep.mubr.f32.mxu0 %v17991_v0  ;;  %v5654_v0 = vld [vmem:[#allocation2 + $0x1af] sm:$0xff] }
 0xbf5   :  { %7277 = vmatmul.mubr.f32.gmra.mrb[196].mxu0 %v5649_v8 }
 0xbf6   :  { %7281 = vmatprep.mubr.f32.mxu0 %v18001_v26  ;;  %v5655_v26 = vld [vmem:[#allocation2 + $0x1c7] sm:$0xff] }
 0xbf9   :  { %7282 = vmatmul.mubr.f32.gmra.mrb[198].mxu0 %v5650_v3  ;;  %v21364_v3 = vld [vmem:[#allocation41_spill] sm:$0xff] }
 0xbfa   :  { %7286 = vmatprep.mubr.f32.mxu0 %v18006_v52  ;;  %v5656_v52 = vld [vmem:[#allocation2 + $0x1cf] sm:$0xff] }
 0xbfd   :  { %7287 = vmatmul.mubr.f32.gmra.mrb[200].mxu0 %v5651_v29 }
 0xbfe   :  { %7291 = vmatprep.mubr.f32.mxu0 %v18010_v62  ;;  %v5657_v62 = vld [vmem:[#allocation2 + $0x1e7] sm:$0xff] }
 0xc01   :  { %7292 = vmatmul.mubr.f32.gmra.mrb[202].mxu0 %v5652_v13 }
 0xc02   :  { %7296 = vmatprep.mubr.f32.mxu0 %v18014_v32  ;;  %v5658_v32 = vld [vmem:[#allocation2 + $0x1ef] sm:$0xff] }
 0xc05   :  { %7297 = vmatmul.mubr.f32.gmra.mrb[204].mxu0 %v5653_v1 }
 0xc06   :  { %7301 = vmatprep.mubr.f32.mxu0 %v18024_v54  ;;  %v5659_v54 = vld [vmem:[#allocation2 + $0x207] sm:$0xff] }
 0xc09   :  { %7302 = vmatmul.mubr.f32.gmra.mrb[206].mxu0 %v5654_v0  ;;  %v21365_v0 = vld [vmem:[#allocation40_spill] sm:$0xff] }
 0xc0a   :  { %7306 = vmatprep.mubr.f32.mxu0 %v18029_v35  ;;  %v5660_v35 = vld [vmem:[#allocation2 + $0x20f] sm:$0xff] }
 0xc0d   :  { %7307 = vmatmul.mubr.f32.gmra.mrb[208].mxu0 %v5655_v26 }
 0xc0e   :  { %7311 = vmatprep.mubr.f32.mxu0 %v18033_v41  ;;  %v5661_v41 = vld [vmem:[#allocation2 + $0x227] sm:$0xff] }
 0xc11   :  { %7312 = vmatmul.mubr.f32.gmra.mrb[210].mxu0 %v5656_v52 }
 0xc12   :  { %7316 = vmatprep.mubr.f32.mxu0 %v18037_v22  ;;  %v5821_v22 = vld [vmem:[#allocation2 + $0x469] sm:$0xff] }
 0xc13   :  { %10226 = vmatprep.mubr.f32.mxu1 %v5821_v22 }
 0xc14   :  { %10227 = vmatmul.mubr.f32.gmra.mrb[222].mxu1 %v5822_v23 }
 0xc15   :  { %7317 = vmatmul.mubr.f32.gmra.mrb[212].mxu0 %v5657_v62 }
 0xc16   :  { %7321 = vmatprep.mubr.f32.mxu0 %v18047_v44  ;;  %v5662_v44 = vld [vmem:[#allocation2 + $0x22f] sm:$0xff] }
 0xc19   :  { %7322 = vmatmul.mubr.f32.gmra.mrb[214].mxu0 %v5658_v32  ;;  %v21366_v32 = vld [vmem:[#allocation44_spill] sm:$0xff] }
 0xc1a   :  { %7326 = vmatprep.mubr.f32.mxu0 %v18050_v33  ;;  %v5663_v33 = vld [vmem:[#allocation2 + $0x287] sm:$0xff] }
 0xc1d   :  { %7327 = vmatmul.mubr.f32.gmra.mrb[216].mxu0 %v5659_v54 }
 0xc1e   :  { %7331 = vmatprep.mubr.f32.mxu0 %v18053_v37  ;;  %v5664_v37 = vld [vmem:[#allocation2 + $0x28f] sm:$0xff] }
 0xc21   :  { %7332 = vmatmul.mubr.f32.gmra.mrb[218].mxu0 %v5660_v35 }
 0xc22   :  { %7336 = vmatprep.mubr.f32.mxu0 %v18206_v40 }
 0xc25   :  { %7337 = vmatmul.mubr.f32.gmra.mrb[220].mxu0 %v5661_v41  ;;  %v21367_v41 = vld [vmem:[#allocation30_spill] sm:$0xff] }
 0xc26   :  { %7341 = vmatprep.mubr.f32.mxu0 %v18206_v40 }
 0xc29   :  { %7342 = vmatmul.mubr.f32.gmra.mrb[222].mxu0 %v5662_v44  ;;  %v21368_v44 = vld [vmem:[#allocation42_spill] sm:$0xff] }
 0xc2a   :  { %7346 = vmatprep.mubr.f32.mxu0 %v18059_v60  ;;  %v5668_v60 = vld [vmem:[#allocation2 + $0x2cf] sm:$0xff] }
 0xc2d   :  { %7347 = vmatmul.mubr.f32.gmra.mrb[224].mxu0 %v5663_v33 }
 0xc2e   :  { %7351 = vmatprep.mubr.f32.mxu0 %v18063_v39  ;;  %v5669_v39 = vld [vmem:[#allocation2 + $0x2e7] sm:$0xff] }
 0xc31   :  { %7352 = vmatmul.mubr.f32.gmra.mrb[226].mxu0 %v5664_v37 }
 0xc32   :  { %7356 = vmatprep.mubr.f32.mxu0 %v18067_v50  ;;  %v5670_v50 = vld [vmem:[#allocation2 + $0x2ef] sm:$0xff] }
 0xc35   :  { %7357 = vmatmul.mubr.f32.gmra.mrb[228].mxu0 %v5665_v24  ;;  %v21369_v24 = vld [vmem:[#allocation45_spill] sm:$0xff] }
 0xc36   :  { %7361 = vmatprep.mubr.f32.mxu0 %v18071_v51  ;;  %v5671_v51 = vld [vmem:[#allocation2 + $0x307] sm:$0xff] }
 0xc39   :  { %7362 = vmatmul.mubr.f32.gmra.mrb[230].mxu0 %v5666_v30 }
 0xc3a   :  { %7366 = vmatprep.mubr.f32.mxu0 %v18075_v5  ;;  %v5672_v5 = vld [vmem:[#allocation2 + $0x30f] sm:$0xff] }
 0xc3d   :  { %7367 = vmatmul.mubr.f32.gmra.mrb[232].mxu0 %v5667_v59 }
 0xc3e   :  { %7371 = vmatprep.mubr.f32.mxu0 %v18079_v63  ;;  %v5673_v63 = vld [vmem:[#allocation2 + $0x327] sm:$0xff] }
 0xc41   :  { %7372 = vmatmul.mubr.f32.gmra.mrb[234].mxu0 %v5668_v60  ;;  %v5693_v60 = vld [vmem:[#allocation2 + $0x467] sm:$0xff] }
 0xc42   :  { %7376 = vmatprep.mubr.f32.mxu0 %v18083_v17  ;;  %v5674_v17 = vld [vmem:[#allocation2 + $0x32f] sm:$0xff] }
 0xc45   :  { %7377 = vmatmul.mubr.f32.gmra.mrb[236].mxu0 %v5669_v39 }
 0xc46   :  { %7381 = vmatprep.mubr.f32.mxu0 %v18087_v28  ;;  %v5675_v28 = vld [vmem:[#allocation2 + $0x347] sm:$0xff] }
 0xc49   :  { %7382 = vmatmul.mubr.f32.gmra.mrb[238].mxu0 %v5670_v50  ;;  %v21370_v50 = vld [vmem:[#allocation46_spill] sm:$0xff] }
 0xc4a   :  { %7386 = vmatprep.mubr.f32.mxu0 %v18091_v38  ;;  %v5676_v38 = vld [vmem:[#allocation2 + $0x34f] sm:$0xff] }
 0xc4d   :  { %7387 = vmatmul.mubr.f32.gmra.mrb[240].mxu0 %v5671_v51 }
 0xc4e   :  { %7391 = vmatprep.mubr.f32.mxu0 %v18095_v56  ;;  %v5677_v56 = vld [vmem:[#allocation2 + $0x367] sm:$0xff] }
 0xc51   :  { %7392 = vmatmul.mubr.f32.gmra.mrb[242].mxu0 %v5672_v5 }
 0xc52   :  { %7396 = vmatprep.mubr.f32.mxu0 %v18099_v21  ;;  %v5678_v21 = vld [vmem:[#allocation2 + $0x36f] sm:$0xff] }
 0xc55   :  { %7397 = vmatmul.mubr.f32.gmra.mrb[244].mxu0 %v5673_v63  ;;  %v5694_v63 = vld [vmem:[#allocation2 + $0x46f] sm:$0xff] }
 0xc56   :  { %7401 = vmatprep.mubr.f32.mxu0 %v18103_v46  ;;  %v5679_v46 = vld [vmem:[#allocation2 + $0x387] sm:$0xff] }
 0xc59   :  { %7402 = vmatmul.mubr.f32.gmra.mrb[246].mxu0 %v5674_v17  ;;  %v21371_v17 = vld [vmem:[#allocation53_spill] sm:$0xff] }
 0xc5a   :  { %7406 = vmatprep.mubr.f32.mxu0 %v18107_v58  ;;  %v5680_v58 = vld [vmem:[#allocation2 + $0x38f] sm:$0xff] }
 0xc5d   :  { %7407 = vmatmul.mubr.f32.gmra.mrb[248].mxu0 %v5675_v28 }
 0xc5e   :  { %7411 = vmatprep.mubr.f32.mxu0 %v18111_v57  ;;  %v5681_v57 = vld [vmem:[#allocation2 + $0x3a7] sm:$0xff] }
 0xc61   :  { %7412 = vmatmul.mubr.f32.gmra.mrb[250].mxu0 %v5676_v38 }
 0xc62   :  { %7416 = vmatprep.mubr.f32.mxu0 %v18115_v14  ;;  %v5682_v14 = vld [vmem:[#allocation2 + $0x3af] sm:$0xff] }
 0xc65   :  { %7417 = vmatmul.mubr.f32.gmra.mrb[252].mxu0 %v5677_v56 }
 0xc66   :  { %7421 = vmatprep.mubr.f32.mxu0 %v18119_v20  ;;  %v5683_v20 = vld [vmem:[#allocation2 + $0x3c7] sm:$0xff] }
 0xc69   :  { %7422 = vmatmul.mubr.f32.gmra.mrb[254].mxu0 %v5678_v21  ;;  %v21372_v21 = vld [vmem:[#allocation47_spill] sm:$0xff] }
 0xc6a   :  { %7426 = vmatprep.mubr.f32.mxu0 %v18123_v42 }
 0xc6d   :  { %7427 = vmatmul.mubr.f32.gmra.mrb[0].mxu0 %v5679_v46 }
 0xc6e   :  { %7431 = vmatprep.mubr.f32.mxu0 %v18127_v25 }
 0xc71   :  { %7432 = vmatmul.mubr.f32.gmra.mrb[2].mxu0 %v5680_v58 }
 0xc72   :  { %7436 = vmatprep.mubr.f32.mxu0 %v18131_v6 }
 0xc75   :  { %7437 = vmatmul.mubr.f32.gmra.mrb[4].mxu0 %v5681_v57 }
 0xc76   :  { %7441 = vmatprep.mubr.f32.mxu0 %v18135_v7  ;;  %v21361_v7 = vld [vmem:[#allocation33_spill] sm:$0xff] }
 0xc79   :  { %7442 = vmatmul.mubr.f32.gmra.mrb[6].mxu0 %v5682_v14  ;;  %v21373_v14 = vld [vmem:[#allocation5_spill] sm:$0xff] }
 0xc7a   :  { %7446 = vmatprep.mubr.f32.mxu0 %v18139_v55 }
 0xc7d   :  { %7447 = vmatmul.mubr.f32.gmra.mrb[8].mxu0 %v5683_v20 }
 0xc7e   :  { %7451 = vmatprep.mubr.f32.mxu0 %v18143_v9  ;;  %v5686_v9 = vld [vmem:[#allocation2 + $0x3ef] sm:$0xff] }
 0xc80   :  { %v7188_v42 = vpop.f32.mrb[160].mxu0 }
 0xc81   :  { %v18233_v25 = vadd.f32 %v21360_v48, %v7188_v42  ;;  %v7190_v43 = vpop.f32.mrb[161].mxu0  ;;  %7452 = vmatmul.mubr.f32.gmra.mrb[10].mxu0 %v5684_v4  ;;  %v21374_v48 = vld [vmem:[#allocation50_spill] sm:$0xff] }
 0xc82   :  { %7456 = vmatprep.mubr.f32.mxu0 %v18147_v49  ;;  %v5687_v49 = vld [vmem:[#allocation2 + $0x407] sm:$0xff] }
 0xc84   :  { %v7193_v6 = vpop.f32.mrb[162].mxu0 }
 0xc85   :  { %v18237_v53 = vadd.f32 %v21361_v7, %v7193_v6  ;;  %v7195_v12 = vpop.f32.mrb[163].mxu0  ;;  %7457 = vmatmul.mubr.f32.gmra.mrb[12].mxu0 %v5685_v47  ;;  %v8370_v6 = vld [vmem:[%s20419_s5] sm:$0xff]  ;;  %v8371_v47 = vld [vmem:[%s20419_s5 + $0x8] sm:$0xff] }
 0xc86   :  { %7461 = vmatprep.mubr.f32.mxu0 %v18151_v31  ;;  %v5688_v31 = vld [vmem:[#allocation2 + $0x40f] sm:$0xff]  ;;  %v10869_v7 = vpack.c.bf16 %v8371_v47, %v8370_v6  ;;  %v21385_v6 = vld [vmem:[#allocation67_spill] sm:$0xff] }
 0xc88   :  { %v7198_v55 = vpop.f32.mrb[164].mxu0  ;;  %10870 = vmatprep.subr.bf16.mxu1 %v10869_v7 }
 0xc89   :  { %v18241_v11 = vadd.f32 %v21362_v10, %v7198_v55  ;;  %v7200_v2 = vpop.f32.mrb[165].mxu0  ;;  %7462 = vmatmul.mubr.f32.gmra.mrb[14].mxu0 %v5686_v9  ;;  %v21375_v55 = vld [vmem:[#allocation59_spill] sm:$0xff]  ;;  %10872 = vmatpush3.bf16.msra.mxu1 %v10869_v7 }
 0xc8a   :  { %7466 = vmatprep.mubr.f32.mxu0 %v18155_v19  ;;  %v5689_v19 = vld [vmem:[#allocation2 + $0x427] sm:$0xff] }
 0xc8c   :  { %v7203_v27 = vpop.f32.mrb[166].mxu0 }
 0xc8d   :  { %v18245_v16 = vadd.f32 %v21363_v18, %v7203_v27  ;;  %v7205_v15 = vpop.f32.mrb[167].mxu0  ;;  %7467 = vmatmul.mubr.f32.gmra.mrb[16].mxu0 %v5687_v49  ;;  %v21376_v27 = vld [vmem:[#allocation14_spill] sm:$0xff] }
 0xc8e   :  { %7471 = vmatprep.mubr.f32.mxu0 %v18159_v36  ;;  %v5690_v36 = vld [vmem:[#allocation2 + $0x42f] sm:$0xff] }
 0xc90   :  { %v7208_v8 = vpop.f32.mrb[168].mxu0 }
 0xc91   :  { %v18249_v29 = vadd.f32 %v21364_v3, %v7208_v8  ;;  %v7210_v13 = vpop.f32.mrb[169].mxu0  ;;  %7472 = vmatmul.mubr.f32.gmra.mrb[18].mxu0 %v5688_v31  ;;  %v21377_v8 = vld [vmem:[#allocation60_spill] sm:$0xff] }
 0xc92   :  { %7476 = vmatprep.mubr.f32.mxu0 %v18163_v61  ;;  %v5691_v61 = vld [vmem:[#allocation2 + $0x447] sm:$0xff] }
 0xc94   :  { %v7213_v1 = vpop.f32.mrb[170].mxu0 }
 0xc95   :  { %v18253_v26 = vadd.f32 %v21365_v0, %v7213_v1  ;;  %v7215_v52 = vpop.f32.mrb[171].mxu0  ;;  %7477 = vmatmul.mubr.f32.gmra.mrb[20].mxu0 %v5689_v19  ;;  %v21378_v1 = vld [vmem:[#allocation61_spill] sm:$0xff] }
 0xc96   :  { %7481 = vmatprep.mubr.f32.mxu0 %v18167_v45  ;;  %v5692_v45 = vld [vmem:[#allocation2 + $0x44f] sm:$0xff] }
 0xc97   :  { %v8372_v52 = vld [vmem:[%s20419_s5 + $0x10] sm:$0xff] }
 0xc98   :  { %v7218_v62 = vpop.f32.mrb[172].mxu0 }
 0xc99   :  { %v18257_v54 = vadd.f32 %v21366_v32, %v7218_v62  ;;  %v7220_v35 = vpop.f32.mrb[173].mxu0  ;;  %7482 = vmatmul.mubr.f32.gmra.mrb[22].mxu0 %v5690_v36  ;;  %v8373_v62 = vld [vmem:[%s20419_s5 + $0x18] sm:$0xff] }
 0xc9a   :  { %7486 = vmatprep.mubr.f32.mxu0 %v21367_v41  ;;  %v10873_v36 = vpack.c.bf16 %v8373_v62, %v8372_v52  ;;  %v21379_v35 = vld [vmem:[#allocation27_spill] sm:$0xff]  ;;  %v21391_v52 = vld [vmem:[#allocation66_spill] sm:$0xff] }
 0xc9c   :  { %v7223_v22 = vpop.f32.mrb[174].mxu0  ;;  %10874 = vmatprep.subr.bf16.mxu1 %v10873_v36 }
 0xc9d   :  { %v18261_v23 = vadd.f32 %v21368_v44, %v7223_v22  ;;  %v7225_v33 = vpop.f32.mrb[175].mxu0  ;;  %7487 = vmatmul.mubr.f32.gmra.mrb[24].mxu0 %v5691_v61  ;;  %10876 = vmatpush3.bf16.msra.mxu1 %v10873_v36  ;;  %v21380_v44 = vld [vmem:[#allocation63_spill] sm:$0xff] }
 0xc9e   :  { %7491 = vmatprep.mubr.f32.mxu0 %v18173_v34 }
 0xca0   :  { %v7228_v37 = vpop.f32.mrb[176].mxu0 }
 0xca1   :  { %v18265_v30 = vadd.f32 %v21369_v24, %v7228_v37  ;;  %v7230_v59 = vpop.f32.mrb[177].mxu0  ;;  %7492 = vmatmul.mubr.f32.gmra.mrb[26].mxu0 %v5692_v45  ;;  %v21381_v24 = vld [vmem:[#allocation62_spill] sm:$0xff] }
 0xca2   :  { %7496 = vmatprep.mubr.f32.mxu0 %v18206_v40 }
 0xca4   :  { %v7233_v39 = vpop.f32.mrb[178].mxu0 }
 0xca5   :  { %v18269_v51 = vadd.f32 %v21370_v50, %v7233_v39  ;;  %v7235_v5 = vpop.f32.mrb[179].mxu0  ;;  %7497 = vmatmul.mubr.f32.gmra.mrb[28].mxu0 %v5693_v60  ;;  %v21382_v50 = vld [vmem:[#allocation6_spill] sm:$0xff] }
 0xca6   :  { %7501 = vmatprep.mubr.f32.mxu0 %v18206_v40 }
 0xca8   :  { %v7238_v34 = vpop.f32.mrb[180].mxu0 }
 0xca9   :  { %v18273_v28 = vadd.f32 %v21371_v17, %v7238_v34  ;;  %v7240_v38 = vpop.f32.mrb[181].mxu0  ;;  %7502 = vmatmul.mubr.f32.gmra.mrb[30].mxu0 %v5694_v63  ;;  %v8374_v34 = vld [vmem:[%s20419_s5 + $0x20] sm:$0xff]  ;;  %v8375_v17 = vld [vmem:[%s20419_s5 + $0x28] sm:$0xff] }
 0xcaa   :  { %v10877_v38 = vpack.c.bf16 %v8375_v17, %v8374_v34  ;;  %v21397_v34 = vld [vmem:[#allocation70_spill] sm:$0xff] }
 0xcac   :  { %v7243_v56 = vpop.f32.mrb[182].mxu0  ;;  %10878 = vmatprep.subr.bf16.mxu1 %v10877_v38 }
 0xcad   :  { %v18276_v46 = vadd.f32 %v21372_v21, %v7243_v56  ;;  %v7245_v58 = vpop.f32.mrb[183].mxu0  ;;  %v21383_v21 = vld [vmem:[#allocation64_spill] sm:$0xff]  ;;  %10880 = vmatpush3.bf16.msra.mxu1 %v10877_v38 }
 0xcb0   :  { %v7248_v57 = vpop.f32.mrb[184].mxu0 }
 0xcb1   :  { %v18279_v20 = vadd.f32 %v21373_v14, %v7248_v57  ;;  %v7250_v42 = vpop.f32.mrb[185].mxu0 }
 0xcb2   :  { %v21384_v42 = vld [vmem:[#allocation65_spill] sm:$0xff] }
 0xcb4   :  { %v7253_v4 = vpop.f32.mrb[186].mxu0 }
 0xcb5   :  { %v18282_v40 = vadd.f32 %v21374_v48, %v7253_v4  ;;  %v7255_v43 = vpop.f32.mrb[187].mxu0 }
 0xcb8   :  { %v7258_v12 = vpop.f32.mrb[188].mxu0 }
 0xcb9   :  { %v18291_v9 = vadd.f32 %v21375_v55, %v7258_v12  ;;  %v7260_v10 = vpop.f32.mrb[189].mxu0  ;;  %v21387_v55 = vld [vmem:[#allocation23_spill] sm:$0xff] }
 0xcbc   :  { %v7263_v2 = vpop.f32.mrb[190].mxu0 }
 0xcbd   :  { %v18294_v49 = vadd.f32 %v21376_v27, %v7263_v2  ;;  %v7265_v18 = vpop.f32.mrb[191].mxu0  ;;  %v8376_v27 = vld [vmem:[%s20419_s5 + $0x30] sm:$0xff] }
 0xcbe   :  { %v8377_v18 = vld [vmem:[%s20419_s5 + $0x38] sm:$0xff] }
 0xcc0   :  { %v7268_v15 = vpop.f32.mrb[192].mxu0 }
 0xcc1   :  { %v18297_v31 = vadd.f32 %v21377_v8, %v7268_v15  ;;  %v7270_v3 = vpop.f32.mrb[193].mxu0  ;;  %v10881_v15 = vpack.c.bf16 %v8377_v18, %v8376_v27 }
 0xcc2   :  { %v21389_v3 = vld [vmem:[#allocation69_spill] sm:$0xff] }
 0xcc3   :  { %10882 = vmatprep.subr.bf16.mxu1 %v10881_v15 }
 0xcc4   :  { %v7273_v13 = vpop.f32.mrb[194].mxu0  ;;  %10884 = vmatpush3.bf16.msra.mxu1 %v10881_v15 }
 0xcc5   :  { %v18300_v19 = vadd.f32 %v21378_v1, %v7273_v13  ;;  %v7275_v0 = vpop.f32.mrb[195].mxu0 }
 0xcc8   :  { %v7278_v32 = vpop.f32.mrb[196].mxu0 }
 0xcc9   :  { %v18309_v41 = vadd.f32 %v21379_v35, %v7278_v32  ;;  %v7280_v22 = vpop.f32.mrb[197].mxu0  ;;  %v21393_v35 = vld [vmem:[#allocation51_spill] sm:$0xff] }
 0xccc   :  { %v7283_v61 = vpop.f32.mrb[198].mxu0 }
 0xccd   :  { %v18312_v33 = vadd.f32 %v21380_v44, %v7283_v61  ;;  %v7285_v37 = vpop.f32.mrb[199].mxu0 }
 0xcce   :  { %v21395_v37 = vld [vmem:[#allocation68_spill] sm:$0xff] }
 0xcd0   :  { %v7288_v45 = vpop.f32.mrb[200].mxu0 }
 0xcd1   :  { %v18315_v59 = vadd.f32 %v21381_v24, %v7288_v45  ;;  %v7290_v60 = vpop.f32.mrb[201].mxu0 }
 0xcd2   :  { %v8378_v60 = vld [vmem:[%s20419_s5 + $0x40] sm:$0xff] }
 0xcd4   :  { %v7293_v39 = vpop.f32.mrb[202].mxu0 }
 0xcd5   :  { %v18318_v5 = vadd.f32 %v21382_v50, %v7293_v39  ;;  %v7295_v63 = vpop.f32.mrb[203].mxu0  ;;  %v8379_v39 = vld [vmem:[%s20419_s5 + $0x48] sm:$0xff] }
 0xcd6   :  { %v10885_v50 = vpack.c.bf16 %v8379_v39, %v8378_v60 }
 0xcd8   :  { %v7298_v56 = vpop.f32.mrb[204].mxu0  ;;  %10886 = vmatprep.subr.bf16.mxu1 %v10885_v50 }
 0xcd9   :  { %v18327_v58 = vadd.f32 %v21383_v21, %v7298_v56  ;;  %v7300_v57 = vpop.f32.mrb[205].mxu0  ;;  %10888 = vmatpush3.bf16.msra.mxu1 %v10885_v50  ;;  %v21399_v21 = vld [vmem:[#allocation71_spill] sm:$0xff] }
 0xcdc   :  { %v7303_v14 = vpop.f32.mrb[206].mxu0 }
 0xcdd   :  { %v18330_v4 = vadd.f32 %v21384_v42, %v7303_v14  ;;  %v7305_v48 = vpop.f32.mrb[207].mxu0 }
 0xce0   :  { %v7308_v43 = vpop.f32.mrb[208].mxu0 }
 0xce1   :  { %v18333_v47 = vadd.f32 %v21385_v6, %v7308_v43  ;;  %v7310_v7 = vpop.f32.mrb[209].mxu0  ;;  %v7962_v43 = vmul.f32 %v18237_v53, %v18237_v53 }
 0xce2   :  { %v7961_v7 = vmul.f32 %v18233_v25, %v18233_v25 }
 0xce3   :  { %21386 = vst [vmem:[#allocation31_spill] sm:$0xff] %v18333_v47 }
 0xce4   :  { %v7313_v12 = vpop.f32.mrb[210].mxu0  ;;  %v8025_v15 = vadd.f32 %v7962_v43, %v7961_v7  ;;  %v7968_v43 = vmul.f32 %v18261_v23, %v18261_v23 }
 0xce5   :  { %v18336_v10 = vadd.f32 %v21387_v55, %v7313_v12  ;;  %v7315_v2 = vpop.f32.mrb[211].mxu0  ;;  %v7892_v12 = vadd.f32 %v18237_v53, %v18233_v25  ;;  %v7963_v55 = vmul.f32 %v18241_v11, %v18241_v11 }
 0xce6   :  { %v21401_v2 = vld [vmem:[#allocation52_spill] sm:$0xff] }
 0xce7   :  { %21388 = vst [vmem:[#allocation32_spill] sm:$0xff] %v18336_v10  ;;  %v18368_v42 = vpop.f32.mrb[222].mxu1 }
 0xce8   :  { %v7318_v8 = vpop.f32.mrb[212].mxu0  ;;  %v18370_v48 = vpop.f32.mrb[223].mxu1 }
 0xce9   :  { %v18345_v13 = vadd.f32 %v21389_v3, %v7318_v8  ;;  %v7320_v1 = vpop.f32.mrb[213].mxu0  ;;  %v7893_v8 = vadd.f32 %v7892_v12, %v18241_v11  ;;  %v7964_v3 = vmul.f32 %v18245_v16, %v18245_v16 }
 0xceb   :  { %21390 = vst [vmem:[#allocation38_spill] sm:$0xff] %v18345_v13 }
 0xcec   :  { %v7323_v0 = vpop.f32.mrb[214].mxu0 }
 0xced   :  { %v18348_v62 = vadd.f32 %v21391_v52, %v7323_v0  ;;  %v7325_v36 = vpop.f32.mrb[215].mxu0  ;;  %v8026_v0 = vadd.f32 %v8025_v15, %v7963_v55  ;;  %v7894_v52 = vadd.f32 %v7893_v8, %v18245_v16  ;;  %v7969_v55 = vmul.f32 %v18265_v30, %v18265_v30 }
 0xcee   :  { %v7965_v36 = vmul.f32 %v18249_v29, %v18249_v29 }
 0xcef   :  { %21392 = vst [vmem:[#allocation21_spill] sm:$0xff] %v18348_v62 }
 0xcf0   :  { %v7328_v32 = vpop.f32.mrb[216].mxu0 }
 0xcf1   :  { %v18351_v22 = vadd.f32 %v21393_v35, %v7328_v32  ;;  %v7330_v61 = vpop.f32.mrb[217].mxu0  ;;  %v21403_v32 = vld [vmem:[#allocation73_spill] sm:$0xff] }
 0xcf3   :  { %21394 = vst [vmem:[#allocation43_spill] sm:$0xff] %v18351_v22 }
 0xcf4   :  { %v7333_v44 = vpop.f32.mrb[218].mxu0 }
 0xcf5   :  { %v18354_v45 = vadd.f32 %v21395_v37, %v7333_v44  ;;  %v7335_v24 = vpop.f32.mrb[219].mxu0  ;;  %v8027_v44 = vadd.f32 %v8026_v0, %v7964_v3  ;;  %v7895_v37 = vadd.f32 %v7894_v52, %v18249_v29 }
 0xcf6   :  { %v7966_v24 = vmul.f32 %v18253_v26, %v18253_v26 }
 0xcf7   :  { %21396 = vst [vmem:[#allocation48_spill] sm:$0xff] %v18354_v45  ;;  %v8028_v39 = vadd.f32 %v8027_v44, %v7965_v36  ;;  %v7896_v50 = vadd.f32 %v7895_v37, %v18253_v26 }
 0xcf8   :  { %v7338_v63 = vpop.f32.mrb[220].mxu0 }
 0xcf9   :  { %v18363_v17 = vadd.f32 %v21397_v34, %v7338_v63  ;;  %v7340_v38 = vpop.f32.mrb[221].mxu0  ;;  %v7967_v63 = vmul.f32 %v18257_v54, %v18257_v54  ;;  %v21404_v34 = vld [vmem:[#allocation75_spill] sm:$0xff] }
 0xcfb   :  { %21398 = vst [vmem:[#allocation20_spill] sm:$0xff] %v18363_v17 }
 0xcfc   :  { %v7343_v56 = vpop.f32.mrb[222].mxu0 }
 0xcfd   :  { %v18366_v57 = vadd.f32 %v21399_v21, %v7343_v56  ;;  %v7345_v14 = vpop.f32.mrb[223].mxu0  ;;  %v8029_v21 = vadd.f32 %v8028_v39, %v7966_v24  ;;  %v7972_v39 = vmul.f32 %v18276_v46, %v18276_v46 }
 0xcfe   :  { %v7897_v14 = vadd.f32 %v7896_v50, %v18257_v54 }
 0xcff   :  { %21400 = vst [vmem:[#allocation57_spill] sm:$0xff] %v18366_v57  ;;  %v8030_v7 = vadd.f32 %v8029_v21, %v7967_v63  ;;  %v21409_v21 = vld [vmem:[#allocation74_spill] sm:$0xff] }
 0xd00   :  { %v7348_v6 = vpop.f32.mrb[224].mxu0  ;;  %v7898_v12 = vadd.f32 %v7897_v14, %v18261_v23 }
 0xd01   :  { %v18381_v27 = vadd.f32 %v21401_v2, %v7348_v6  ;;  %v7350_v18 = vpop.f32.mrb[225].mxu0  ;;  %v21406_v2 = vld [vmem:[#allocation72_spill] sm:$0xff]  ;;  %v8031_v8 = vadd.f32 %v8030_v7, %v7968_v43 }
 0xd02   :  { %v7899_v3 = vadd.f32 %v7898_v12, %v18265_v30  ;;  %v7974_v12 = vmul.f32 %v18282_v40, %v18282_v40 }
 0xd03   :  { %21402 = vst [vmem:[#allocation58_spill] sm:$0xff] %v18381_v27  ;;  %v8032_v52 = vadd.f32 %v8031_v8, %v7969_v55  ;;  %v7975_v8 = vmul.f32 %v18291_v9, %v18291_v9 }
 0xd04   :  { %v7353_v1 = vpop.f32.mrb[226].mxu0  ;;  %v7900_v36 = vadd.f32 %v7899_v3, %v18269_v51  ;;  %v21410_v3 = vld [vmem:[#allocation37_spill] sm:$0xff] }
 0xd05   :  { %v18390_v35 = vadd.f32 %v21403_v32, %v7353_v1  ;;  %v7355_v61 = vpop.f32.mrb[227].mxu0  ;;  %v7970_v1 = vmul.f32 %v18269_v51, %v18269_v51  ;;  %v7971_v32 = vmul.f32 %v18273_v28, %v18273_v28 }
 0xd06   :  { %v21407_v61 = vld [vmem:[#allocation54_spill] sm:$0xff] }
 0xd07   :  { %v8033_v24 = vadd.f32 %v8032_v52, %v7970_v1 }
 0xd08   :  { %v7358_v60 = vpop.f32.mrb[228].mxu0 }
 0xd09   :  { %v18399_v38 = vadd.f32 %v21404_v34, %v7358_v60  ;;  %v7360_v56 = vpop.f32.mrb[229].mxu0  ;;  %v7901_v60 = vadd.f32 %v7900_v36, %v18273_v28  ;;  %v8034_v63 = vadd.f32 %v8033_v24, %v7971_v32  ;;  %v7976_v32 = vmul.f32 %v18294_v49, %v18294_v49 }
 0xd0a   :  { %v7973_v56 = vmul.f32 %v18279_v20, %v18279_v20 }
 0xd0b   :  { %21405 = vst [vmem:[#allocation11_spill] sm:$0xff] %v18399_v38  ;;  %v7902_v34 = vadd.f32 %v7901_v60, %v18276_v46  ;;  %v7977_v60 = vmul.f32 %v18297_v31, %v18297_v31 }
 0xd0c   :  { %v7363_v6 = vpop.f32.mrb[230].mxu0 }
 0xd0d   :  { %v18408_v18 = vadd.f32 %v21406_v2, %v7363_v6  ;;  %v7365_v15 = vpop.f32.mrb[231].mxu0  ;;  %v8035_v6 = vadd.f32 %v8034_v63, %v7972_v39  ;;  %v7903_v7 = vadd.f32 %v7902_v34, %v18279_v20  ;;  %v21412_v39 = vld [vmem:[#allocation77_spill] sm:$0xff] }
 0xd0f   :  { %v8036_v2 = vadd.f32 %v8035_v6, %v7973_v56  ;;  %v7904_v15 = vadd.f32 %v7903_v7, %v18282_v40 }
 0xd10   :  { %v7368_v0 = vpop.f32.mrb[232].mxu0 }
 0xd11   :  { %v18417_v44 = vadd.f32 %v21407_v61, %v7368_v0  ;;  %v7370_v37 = vpop.f32.mrb[233].mxu0  ;;  %v8037_v52 = vadd.f32 %v8036_v2, %v7974_v12  ;;  %v7905_v36 = vadd.f32 %v7904_v15, %v18291_v9  ;;  %v7979_v12 = vmul.f32 %v18309_v41, %v18309_v41 }
 0xd13   :  { %21408 = vst [vmem:[#allocation56_spill] sm:$0xff] %v18417_v44  ;;  %v8038_v37 = vadd.f32 %v8037_v52, %v7975_v8  ;;  %v7906_v24 = vadd.f32 %v7905_v36, %v18294_v49 }
 0xd14   :  { %v7373_v50 = vpop.f32.mrb[234].mxu0 }
 0xd15   :  { %v18426_v14 = vadd.f32 %v21409_v21, %v7373_v50  ;;  %v7375_v43 = vpop.f32.mrb[235].mxu0  ;;  %v8039_v34 = vadd.f32 %v8038_v37, %v7976_v32  ;;  %v7907_v56 = vadd.f32 %v7906_v24, %v18297_v31  ;;  %v7978_v21 = vmul.f32 %v18300_v19, %v18300_v19  ;;  %v21415_v37 = vld [vmem:[#allocation28_spill] sm:$0xff] }
 0xd17   :  { %v8040_v6 = vadd.f32 %v8039_v34, %v7977_v60  ;;  %v7908_v7 = vadd.f32 %v7907_v56, %v18300_v19  ;;  %v7982_v34 = vmul.f32 %v18318_v5, %v18318_v5 }
 0xd18   :  { %v7378_v55 = vpop.f32.mrb[236].mxu0 }
 0xd19   :  { %v18435_v1 = vadd.f32 %v21410_v3, %v7378_v55  ;;  %v7380_v0 = vpop.f32.mrb[237].mxu0  ;;  %v21413_v55 = vld [vmem:[#allocation76_spill] sm:$0xff]  ;;  %v8041_v8 = vadd.f32 %v8040_v6, %v7978_v21  ;;  %v7909_v3 = vadd.f32 %v7908_v7, %v18309_v41  ;;  %v7983_v6 = vmul.f32 %v18327_v58, %v18327_v58  ;;  %v21416_v7 = vld [vmem:[#allocation29_spill] sm:$0xff] }
 0xd1a   :  { %v7980_v0 = vmul.f32 %v18312_v33, %v18312_v33 }
 0xd1b   :  { %21411 = vst [vmem:[#allocation34_spill] sm:$0xff] %v18435_v1  ;;  %v8042_v36 = vadd.f32 %v8041_v8, %v7979_v12  ;;  %v7910_v32 = vadd.f32 %v7909_v3, %v18312_v33  ;;  %v7984_v3 = vmul.f32 %v18330_v4, %v18330_v4 }
 0xd1c   :  { %v7383_v61 = vpop.f32.mrb[238].mxu0 }
 0xd1d   :  { %v18444_v50 = vadd.f32 %v21412_v39, %v7383_v61  ;;  %v7385_v63 = vpop.f32.mrb[239].mxu0  ;;  %v7981_v61 = vmul.f32 %v18315_v59, %v18315_v59  ;;  %v8043_v39 = vadd.f32 %v8042_v36, %v7980_v0 }
 0xd1e   :  { %v7911_v63 = vadd.f32 %v7910_v32, %v18315_v59  ;;  %v7985_v32 = vmul.f32 %v18333_v47, %v18333_v47 }
 0xd1f   :  { %v8044_v21 = vadd.f32 %v8043_v39, %v7981_v61  ;;  %v21418_v61 = vld [vmem:[#allocation18_spill] sm:$0xff] }
 0xd20   :  { %v7388_v43 = vpop.f32.mrb[240].mxu0 }
 0xd21   :  { %v18453_v2 = vadd.f32 %v21413_v55, %v7388_v43  ;;  %v7390_v15 = vpop.f32.mrb[241].mxu0  ;;  %v7912_v43 = vadd.f32 %v7911_v63, %v18318_v5 }
 0xd22   :  { %v8045_v15 = vadd.f32 %v8044_v21, %v7982_v34  ;;  %v7986_v34 = vmul.f32 %v18336_v10, %v18336_v10 }
 0xd23   :  { %21414 = vst [vmem:[#allocation33_spill] sm:$0xff] %v18453_v2  ;;  %v7913_v8 = vadd.f32 %v7912_v43, %v18327_v58 }
 0xd24   :  { %v7393_v52 = vpop.f32.mrb[242].mxu0 }
 0xd25   :  { %v18462_v24 = vadd.f32 %v21415_v37, %v7393_v52  ;;  %v7395_v60 = vpop.f32.mrb[243].mxu0  ;;  %v8046_v52 = vadd.f32 %v8045_v15, %v7983_v6  ;;  %v7914_v36 = vadd.f32 %v7913_v8, %v18330_v4  ;;  %v7987_v6 = vmul.f32 %v18345_v13, %v18345_v13 }
 0xd27   :  { %v8047_v39 = vadd.f32 %v8046_v52, %v7984_v3  ;;  %v7915_v63 = vadd.f32 %v7914_v36, %v18333_v47  ;;  %v7988_v3 = vmul.f32 %v18348_v62, %v18348_v62 }
 0xd28   :  { %v7398_v56 = vpop.f32.mrb[244].mxu0 }
 0xd29   :  { %v18471_v12 = vadd.f32 %v21416_v7, %v7398_v56  ;;  %v7400_v55 = vpop.f32.mrb[245].mxu0  ;;  %v8048_v21 = vadd.f32 %v8047_v39, %v7985_v32  ;;  %v7916_v43 = vadd.f32 %v7915_v63, %v18336_v10  ;;  %v21419_v7 = vld [vmem:[#allocation10_spill] sm:$0xff]  ;;  %v7989_v32 = vmul.f32 %v18351_v22, %v18351_v22 }
 0xd2b   :  { %21417 = vst [vmem:[#allocation35_spill] sm:$0xff] %v18471_v12  ;;  %v8049_v8 = vadd.f32 %v8048_v21, %v7986_v34  ;;  %v7990_v34 = vmul.f32 %v18354_v45, %v18354_v45 }
 0xd2c   :  { %v7403_v0 = vpop.f32.mrb[246].mxu0 }
 0xd2d   :  { %v18480_v37 = vadd.f32 %v21418_v61, %v7403_v0  ;;  %v7405_v60 = vpop.f32.mrb[247].mxu0  ;;  %v7917_v0 = vadd.f32 %v7916_v43, %v18345_v13  ;;  %v8050_v36 = vadd.f32 %v8049_v8, %v7987_v6  ;;  %v7991_v6 = vmul.f32 %v18363_v17, %v18363_v17  ;;  %v21422_v8 = vld [vmem:[#allocation25_spill] sm:$0xff] }
 0xd2e   :  { %v21421_v60 = vld [vmem:[#allocation22_spill] sm:$0xff]  ;;  %v21428_v13 = vld [vmem:[#allocation17_spill] sm:$0xff] }
 0xd2f   :  { %v7918_v61 = vadd.f32 %v7917_v0, %v18348_v62 }
 0xd30   :  { %v7408_v56 = vpop.f32.mrb[248].mxu0 }
 0xd31   :  { %v18489_v55 = vadd.f32 %v21419_v7, %v7408_v56  ;;  %v7410_v15 = vpop.f32.mrb[249].mxu0  ;;  %v8051_v56 = vadd.f32 %v8050_v36, %v7988_v3  ;;  %v7919_v7 = vadd.f32 %v7918_v61, %v18351_v22  ;;  %v7992_v3 = vmul.f32 %v18366_v57, %v18366_v57 }
 0xd33   :  { %21420 = vst [vmem:[#allocation13_spill] sm:$0xff] %v18489_v55  ;;  %v8052_v43 = vadd.f32 %v8051_v56, %v7989_v32  ;;  %v7920_v15 = vadd.f32 %v7919_v7, %v18354_v45  ;;  %v7993_v32 = vmul.f32 %v18381_v27, %v18381_v27  ;;  %v21424_v56 = vld [vmem:[#allocation7_spill] sm:$0xff] }
 0xd34   :  { %v7413_v52 = vpop.f32.mrb[250].mxu0 }
 0xd35   :  { %v18498_v39 = vadd.f32 %v21421_v60, %v7413_v52  ;;  %v7415_v63 = vpop.f32.mrb[251].mxu0  ;;  %v8053_v52 = vadd.f32 %v8052_v43, %v7990_v34  ;;  %v7921_v60 = vadd.f32 %v7920_v15, %v18363_v17  ;;  %v7994_v34 = vmul.f32 %v18390_v35, %v18390_v35 }
 0xd36   :  { %v7998_v17 = vmul.f32 %v18426_v14, %v18426_v14 }
 0xd37   :  { %v8054_v61 = vadd.f32 %v8053_v52, %v7991_v6  ;;  %v7922_v63 = vadd.f32 %v7921_v60, %v18366_v57  ;;  %v7995_v6 = vmul.f32 %v18399_v38, %v18399_v38  ;;  %v21425_v52 = vld [vmem:[#allocation39_spill] sm:$0xff] }
 0xd38   :  { %v7418_v21 = vpop.f32.mrb[252].mxu0 }
 0xd39   :  { %v18507_v0 = vadd.f32 %v21422_v8, %v7418_v21  ;;  %v7420_v62 = vpop.f32.mrb[253].mxu0  ;;  %v8055_v21 = vadd.f32 %v8054_v61, %v7992_v3  ;;  %v8381_v3 = vld [vmem:[%s20419_s5 + $0x58] sm:$0xff] }
 0xd3a   :  { %v7923_v62 = vadd.f32 %v7922_v63, %v18381_v27  ;;  %v8383_v63 = vld [vmem:[%s20419_s5 + $0x68] sm:$0xff] }
 0xd3b   :  { %21423 = vst [vmem:[#allocation41_spill] sm:$0xff] %v18507_v0  ;;  %v8056_v15 = vadd.f32 %v8055_v21, %v7993_v32 }
 0xd3c   :  { %v7423_v36 = vpop.f32.mrb[254].mxu0  ;;  %v7924_v8 = vadd.f32 %v7923_v62, %v18390_v35  ;;  %v8384_v62 = vld [vmem:[%s20419_s5 + $0x70] sm:$0xff] }
 0xd3d   :  { %v18516_v7 = vadd.f32 %v21424_v56, %v7423_v36  ;;  %v7425_v45 = vpop.f32.mrb[255].mxu0  ;;  %v8382_v36 = vld [vmem:[%s20419_s5 + $0x60] sm:$0xff]  ;;  %v8057_v32 = vadd.f32 %v8056_v15, %v7994_v34  ;;  %v7996_v56 = vmul.f32 %v18408_v18, %v18408_v18  ;;  %v7997_v34 = vmul.f32 %v18417_v44, %v18417_v44  ;;  %v21427_v15 = vld [vmem:[#allocation16_spill] sm:$0xff] }
 0xd3e   :  { %v8380_v45 = vld [vmem:[%s20419_s5 + $0x50] sm:$0xff]  ;;  %v10893_v21 = vpack.c.bf16 %v8383_v63, %v8382_v36 }
 0xd3f   :  { %v10889_v61 = vpack.c.bf16 %v8381_v3, %v8380_v45  ;;  %v8058_v45 = vadd.f32 %v8057_v32, %v7995_v6 }
 0xd40   :  { %v7428_v43 = vpop.f32.mrb[0].mxu0 }
 0xd41   :  { %v18525_v60 = vadd.f32 %v21425_v52, %v7428_v43  ;;  %v7430_v57 = vpop.f32.mrb[1].mxu0  ;;  %v8385_v43 = vld [vmem:[%s20419_s5 + $0x78] sm:$0xff]  ;;  %10890 = vmatprep.subr.bf16.mxu1 %v10889_v61 }
 0xd42   :  { %v7925_v57 = vadd.f32 %v7924_v8, %v18399_v38  ;;  %10892 = vmatpush3.bf16.msra.mxu1 %v10889_v61  ;;  %v10897_v63 = vpack.c.bf16 %v8385_v43, %v8384_v62  ;;  %v8059_v38 = vadd.f32 %v8058_v45, %v7996_v56  ;;  %v8000_v62 = vmul.f32 %v18444_v50, %v18444_v50 }
 0xd43   :  { %21426 = vst [vmem:[#allocation40_spill] sm:$0xff] %v18525_v60  ;;  %10894 = vmatprep.subr.bf16.mxu1 %v10893_v21 }
 0xd44   :  { %v7433_v52 = vpop.f32.mrb[2].mxu0  ;;  %v7926_v3 = vadd.f32 %v7925_v57, %v18408_v18  ;;  %v8060_v6 = vadd.f32 %v8059_v38, %v7997_v34  ;;  %v7999_v57 = vmul.f32 %v18435_v1, %v18435_v1 }
 0xd45   :  { %v18552_v8 = vadd.f32 %v21427_v15, %v7433_v52  ;;  %v7435_v36 = vpop.f32.mrb[3].mxu0 }
 0xd46   :  { %v7927_v27 = vadd.f32 %v7926_v3, %v18417_v44  ;;  %10896 = vmatpush3.bf16.msra.mxu1 %v10893_v21  ;;  %v8061_v61 = vadd.f32 %v8060_v6, %v7998_v17  ;;  %v21430_v3 = vld [vmem:[#allocation19_spill] sm:$0xff]  ;;  %v8002_v21 = vmul.f32 %v18462_v24, %v18462_v24 }
 0xd47   :  { %10898 = vmatprep.subr.bf16.mxu1 %v10897_v63 }
 0xd48   :  { %v7438_v22 = vpop.f32.mrb[4].mxu0  ;;  %v7928_v32 = vadd.f32 %v7927_v27, %v18426_v14  ;;  %v8062_v45 = vadd.f32 %v8061_v61, %v7999_v57  ;;  %v8001_v27 = vmul.f32 %v18453_v2, %v18453_v2  ;;  %v8003_v57 = vmul.f32 %v18471_v12, %v18471_v12 }
 0xd49   :  { %v18561_v52 = vadd.f32 %v21428_v13, %v7438_v22  ;;  %v7440_v15 = vpop.f32.mrb[5].mxu0 }
 0xd4a   :  { %v7929_v56 = vadd.f32 %v7928_v32, %v18435_v1  ;;  %10900 = vmatpush3.bf16.msra.mxu1 %v10897_v63  ;;  %v8063_v22 = vadd.f32 %v8062_v45, %v8000_v62  ;;  %v21431_v15 = vld [vmem:[#allocation4_spill] sm:$0xff]  ;;  %v8004_v62 = vmul.f32 %v18480_v37, %v18480_v37 }
 0xd4b   :  { %21429 = vst [vmem:[#allocation44_spill] sm:$0xff] %v18561_v52 }
 0xd4c   :  { %v7443_v43 = vpop.f32.mrb[6].mxu0  ;;  %v7930_v38 = vadd.f32 %v7929_v56, %v18444_v50  ;;  %v8064_v6 = vadd.f32 %v8063_v22, %v8001_v27  ;;  %v8005_v27 = vmul.f32 %v18489_v55, %v18489_v55 }
 0xd4d   :  { %v18570_v34 = vadd.f32 %v21430_v3, %v7443_v43  ;;  %v7445_v13 = vpop.f32.mrb[7].mxu0 }
 0xd4e   :  { %v7931_v17 = vadd.f32 %v7930_v38, %v18453_v2  ;;  %v8065_v43 = vadd.f32 %v8064_v6, %v8002_v21  ;;  %v21433_v13 = vld [vmem:[#allocation3_spill] sm:$0xff]  ;;  %v8006_v21 = vmul.f32 %v18498_v39, %v18498_v39 }
 0xd50   :  { %v7448_v36 = vpop.f32.mrb[8].mxu0  ;;  %v7932_v32 = vadd.f32 %v7931_v17, %v18462_v24  ;;  %v8066_v38 = vadd.f32 %v8065_v43, %v8003_v57  ;;  %v8007_v57 = vmul.f32 %v18507_v0, %v18507_v0  ;;  %v21434_v43 = vld [vmem:[#allocation36_spill] sm:$0xff] }
 0xd51   :  { %v18579_v61 = vadd.f32 %v21431_v15, %v7448_v36  ;;  %v7450_v56 = vpop.f32.mrb[9].mxu0 }
 0xd52   :  { %v7933_v63 = vadd.f32 %v7932_v32, %v18471_v12  ;;  %v8067_v36 = vadd.f32 %v8066_v38, %v8004_v62  ;;  %v8008_v62 = vmul.f32 %v18516_v7, %v18516_v7 }
 0xd53   :  { %21432 = vst [vmem:[#allocation30_spill] sm:$0xff] %v18579_v61 }
 0xd54   :  { %v7453_v45 = vpop.f32.mrb[10].mxu0  ;;  %v7934_v3 = vadd.f32 %v7933_v63, %v18480_v37  ;;  %v8068_v32 = vadd.f32 %v8067_v36, %v8005_v27  ;;  %v8009_v27 = vmul.f32 %v18525_v60, %v18525_v60  ;;  %v21436_v36 = vld [vmem:[#allocation8_spill] sm:$0xff] }
 0xd55   :  { %v18588_v22 = vadd.f32 %v21433_v13, %v7453_v45  ;;  %v7455_v17 = vpop.f32.mrb[11].mxu0 }
 0xd56   :  { %v7935_v15 = vadd.f32 %v7934_v3, %v18489_v55  ;;  %v8069_v45 = vadd.f32 %v8068_v32, %v8006_v21  ;;  %v8010_v21 = vmul.f32 %v18552_v8, %v18552_v8 }
 0xd58   :  { %v7458_v6 = vpop.f32.mrb[12].mxu0  ;;  %v7936_v56 = vadd.f32 %v7935_v15, %v18498_v39  ;;  %v8070_v3 = vadd.f32 %v8069_v45, %v8007_v57  ;;  %v8011_v57 = vmul.f32 %v18561_v52, %v18561_v52  ;;  %v21437_v45 = vld [vmem:[#allocation9_spill] sm:$0xff] }
 0xd59   :  { %v18597_v63 = vadd.f32 %v21434_v43, %v7458_v6  ;;  %v7460_v12 = vpop.f32.mrb[13].mxu0 }
 0xd5a   :  { %v7937_v13 = vadd.f32 %v7936_v56, %v18507_v0  ;;  %v8071_v6 = vadd.f32 %v8070_v3, %v8008_v62  ;;  %v8012_v62 = vmul.f32 %v18570_v34, %v18570_v34 }
 0xd5b   :  { %21435 = vst [vmem:[#allocation42_spill] sm:$0xff] %v18597_v63 }
 0xd5c   :  { %v7463_v38 = vpop.f32.mrb[14].mxu0  ;;  %v7938_v17 = vadd.f32 %v7937_v13, %v18516_v7  ;;  %v8072_v56 = vadd.f32 %v8071_v6, %v8009_v27  ;;  %v8013_v27 = vmul.f32 %v18579_v61, %v18579_v61  ;;  %v21439_v6 = vld [vmem:[#allocation15_spill] sm:$0xff] }
 0xd5d   :  { %v18606_v15 = vadd.f32 %v21436_v36, %v7463_v38  ;;  %v7465_v55 = vpop.f32.mrb[15].mxu0 }
 0xd5e   :  { %v7939_v12 = vadd.f32 %v7938_v17, %v18525_v60  ;;  %v8073_v38 = vadd.f32 %v8072_v56, %v8010_v21  ;;  %v8014_v21 = vmul.f32 %v18588_v22, %v18588_v22 }
 0xd60   :  { %v7468_v32 = vpop.f32.mrb[16].mxu0  ;;  %v7940_v43 = vadd.f32 %v7939_v12, %v18552_v8  ;;  %v8074_v17 = vadd.f32 %v8073_v38, %v8011_v57  ;;  %v8015_v57 = vmul.f32 %v18597_v63, %v18597_v63  ;;  %v21440_v38 = vld [vmem:[#allocation12_spill] sm:$0xff] }
 0xd61   :  { %v18615_v13 = vadd.f32 %v21437_v45, %v7468_v32  ;;  %v7470_v0 = vpop.f32.mrb[17].mxu0 }
 0xd62   :  { %v7941_v55 = vadd.f32 %v7940_v43, %v18561_v52  ;;  %v8075_v32 = vadd.f32 %v8074_v17, %v8012_v62  ;;  %v8016_v62 = vmul.f32 %v18606_v15, %v18606_v15 }
 0xd63   :  { %21438 = vst [vmem:[#allocation45_spill] sm:$0xff] %v18615_v13 }
 0xd64   :  { %v7473_v3 = vpop.f32.mrb[18].mxu0  ;;  %v7942_v36 = vadd.f32 %v7941_v55, %v18570_v34  ;;  %v8076_v43 = vadd.f32 %v8075_v32, %v8013_v27  ;;  %v8017_v27 = vmul.f32 %v18615_v13, %v18615_v13  ;;  %v21442_v32 = vld [vmem:[#allocation49_spill] sm:$0xff] }
 0xd65   :  { %v18624_v12 = vadd.f32 %v21439_v6, %v7473_v3  ;;  %v7475_v60 = vpop.f32.mrb[19].mxu0 }
 0xd66   :  { %v7943_v0 = vadd.f32 %v7942_v36, %v18579_v61  ;;  %v8077_v3 = vadd.f32 %v8076_v43, %v8014_v21 }
 0xd67   :  { %v8018_v21 = vmul.f32 %v18624_v12, %v18624_v12 }
 0xd68   :  { %v7478_v56 = vpop.f32.mrb[20].mxu0  ;;  %v7944_v45 = vadd.f32 %v7943_v0, %v18588_v22  ;;  %v8078_v36 = vadd.f32 %v8077_v3, %v8015_v57  ;;  %v21443_v3 = vld [vmem:[#allocation55_spill] sm:$0xff] }
 0xd69   :  { %v18633_v55 = vadd.f32 %v21440_v38, %v7478_v56  ;;  %v7480_v52 = vpop.f32.mrb[21].mxu0 }
 0xd6a   :  { %v7945_v60 = vadd.f32 %v7944_v45, %v18597_v63  ;;  %v8079_v56 = vadd.f32 %v8078_v36, %v8016_v62 }
 0xd6b   :  { %21441 = vst [vmem:[#allocation46_spill] sm:$0xff] %v18633_v55  ;;  %v8019_v57 = vmul.f32 %v18633_v55, %v18633_v55 }
 0xd6c   :  { %v7483_v17 = vpop.f32.mrb[22].mxu0  ;;  %v7946_v6 = vadd.f32 %v7945_v60, %v18606_v15  ;;  %v8080_v45 = vadd.f32 %v8079_v56, %v8017_v27  ;;  %v21445_v56 = vld [vmem:[#allocation26_spill] sm:$0xff] }
 0xd6d   :  { %v18642_v0 = vadd.f32 %v21442_v32, %v7483_v17  ;;  %v7485_v61 = vpop.f32.mrb[23].mxu0 }
 0xd6e   :  { %v7947_v52 = vadd.f32 %v7946_v6, %v18615_v13  ;;  %v8081_v17 = vadd.f32 %v8080_v45, %v8018_v21 }
 0xd6f   :  { %v8020_v62 = vmul.f32 %v18642_v0, %v18642_v0 }
 0xd70   :  { %v7488_v43 = vpop.f32.mrb[24].mxu0  ;;  %v7948_v38 = vadd.f32 %v7947_v52, %v18624_v12  ;;  %v8082_v6 = vadd.f32 %v8081_v17, %v8019_v57 }
 0xd71   :  { %v18651_v60 = vadd.f32 %v21443_v3, %v7488_v43  ;;  %v7490_v63 = vpop.f32.mrb[25].mxu0 }
 0xd72   :  { %v7949_v61 = vadd.f32 %v7948_v38, %v18633_v55  ;;  %v8083_v43 = vadd.f32 %v8082_v6, %v8020_v62 }
 0xd73   :  { %21444 = vst [vmem:[#allocation53_spill] sm:$0xff] %v18651_v60  ;;  %v8021_v27 = vmul.f32 %v18651_v60, %v18651_v60 }
 0xd74   :  { %v7493_v36 = vpop.f32.mrb[26].mxu0  ;;  %v7950_v32 = vadd.f32 %v7949_v61, %v18642_v0 }
 0xd75   :  { %v18660_v52 = vadd.f32 %v21445_v56, %v7493_v36  ;;  %v7495_v13 = vpop.f32.mrb[27].mxu0  ;;  %v8084_v38 = vadd.f32 %v8083_v43, %v8021_v27 }
 0xd76   :  { %v7951_v63 = vadd.f32 %v7950_v32, %v18651_v60 }
 0xd77   :  { %v8022_v21 = vmul.f32 %v18660_v52, %v18660_v52 }
 0xd78   :  { %v7498_v45 = vpop.f32.mrb[28].mxu0  ;;  %v7952_v3 = vadd.f32 %v7951_v63, %v18660_v52 }
 0xd79   :  { %v7884_v57 = vadd.f32 %v18370_v48, %v7498_v45  ;;  %v7500_v17 = vpop.f32.mrb[29].mxu0  ;;  %v8085_v61 = vadd.f32 %v8084_v38, %v8022_v21 }
 0xd7b   :  { %v7953_v55 = vadd.f32 %v7952_v3, %v7884_v57  ;;  %v8023_v2 = vmul.f32 %v7884_v57, %v7884_v57 }
 0xd7c   :  { %v7503_v1 = vpop.f32.mrb[30].mxu0 }
 0xd7d   :  { %v8086_v36 = vadd.f32 %v8085_v61, %v8023_v2  ;;  %v7889_v13 = vadd.f32 %v18368_v42, %v7503_v1  ;;  %v7505_v62 = vpop.f32.mrb[31].mxu0 }
 0xd7f   :  { %v7954_v6 = vadd.f32 %v7953_v55, %v7889_v13  ;;  %v8024_v32 = vmul.f32 %v7889_v13, %v7889_v13  ;;  %v21446_v55 = vld [vmem:[#allocation24_spill] sm:$0xff] }
 0xd80   :  { %v8108_v62 = vsub.s32 6, %v21446_v55 }
 0xd81   :  { %v7955_v56 = vrot.slane %v7954_v6, 4  ;;  %v8087_v60 = vadd.f32 %v8086_v36, %v8024_v32 }
 0xd83   :  { %v7956_v44 = vadd.f32 %v7955_v56, %v7954_v6  ;;  %v8088_v10 = vrot.slane %v8087_v60, 4  ;;  %v8176_v56 = vsub.s32 7, %v21446_v55 }
 0xd85   :  { %v7957_v27 = vrot.slane %v7956_v44, 2  ;;  %v8089_v43 = vadd.f32 %v8088_v10, %v8087_v60  ;;  %v11709_v10 = vld [vmem:[%s20416_s6] sm:$0xff] }
 0xd87   :  { %v7958_v63 = vadd.f32 %v7957_v27, %v7956_v44  ;;  %v8090_v47 = vrot.slane %v8089_v43, 2 }
 0xd89   :  { %v7959_v48 = vrot.slane %v7958_v63, 1  ;;  %v8091_v45 = vadd.f32 %v8090_v47, %v8089_v43 }
 0xd8b   :  { %v7960_v21 = vadd.f32 %v7959_v48, %v7958_v63  ;;  %v8092_v38 = vrot.slane %v8091_v45, 1 }
 0xd8d   :  { %v8093_v3 = vadd.f32 %v8092_v38, %v8091_v45  ;;  %v8094_v17 = vmul.f32 0.001953125, %v7960_v21 }
 0xd8f   :  { %v8095_v2 = vmul.f32 0.001953125, %v8093_v3  ;;  %v8096_v61 = vmul.f32 %v8094_v17, %v8094_v17 }
 0xd91   :  { %v8097_v42 = vsub.f32 %v8095_v2, %v8096_v61 }
 0xd93   :  { %v8098_v1 = vadd.f32 1e-05, %v8097_v42 }
 0xd95   :  { %11693 = vrsqrt.f32 %v8098_v1 }
 0xd9f   :  { %v11694_v36 = vpop.eup %11693 }
 0xda0   :  { %v8100_v44 = vmul.f32 %v11709_v10, %v11694_v36 }
 0xda2   :  { %v8101_v60 = vmul.f32 %v8100_v44, %v8094_v17  ;;  %v18672_v6 = vrot.slane %v8100_v44, %v8108_v62 }
 0xda4   :  { %v8103_v47 = vrot.slane %v8101_v60, 7  ;;  %v8173_v32 = vmul.f32 %v18672_v6, %v7889_v13  ;;  %v8110_v48 = vmul.f32 %v18672_v6, %v18233_v25  ;;  %v8111_v45 = vmul.f32 %v18672_v6, %v18237_v53 }
 0xda5   :  { %v8143_v21 = vmul.f32 %v18672_v6, %v18390_v35  ;;  %v8145_v13 = vmul.f32 %v18672_v6, %v18408_v18  ;;  %v8147_v38 = vmul.f32 %v18672_v6, %v18426_v14  ;;  %v8149_v3 = vmul.f32 %v18672_v6, %v18444_v50 }
 0xda6   :  { %v8105_v27 = vsub.f32 %v11709_v10, %v8103_v47  ;;  %v8151_v17 = vmul.f32 %v18672_v6, %v18462_v24  ;;  %v8153_v25 = vmul.f32 %v18672_v6, %v18480_v37  ;;  %v8155_v53 = vmul.f32 %v18672_v6, %v18498_v39 }
 0xda7   :  { %v8157_v35 = vmul.f32 %v18672_v6, %v18516_v7  ;;  %v8159_v18 = vmul.f32 %v18672_v6, %v18552_v8  ;;  %v8161_v14 = vmul.f32 %v18672_v6, %v18570_v34  ;;  %v8163_v50 = vmul.f32 %v18672_v6, %v18588_v22 }
 0xda8   :  { %v18676_v43 = vrot.slane %v8105_v27, %v8176_v56  ;;  %v8165_v24 = vmul.f32 %v18672_v6, %v18606_v15  ;;  %v8167_v37 = vmul.f32 %v18672_v6, %v18624_v12  ;;  %v8169_v39 = vmul.f32 %v18672_v6, %v18642_v0 }
 0xda9   :  { %v8171_v7 = vmul.f32 %v18672_v6, %v18660_v52  ;;  %v18716_v8 = vmul.f32 %v18672_v6, %v7884_v57  ;;  %v8112_v56 = vmul.f32 %v18672_v6, %v18241_v11  ;;  %v8113_v27 = vmul.f32 %v18672_v6, %v18245_v16 }
 0xdaa   :  { %v18679_v63 = vadd.f32 %v18676_v43, %v8173_v32  ;;  %v8179_v34 = vadd.f32 %v18676_v43, %v8111_v45  ;;  %v18720_v2 = vadd.f32 %v18676_v43, %v8143_v21  ;;  %v18723_v22 = vadd.f32 %v18676_v43, %v8145_v13 }
 0xdab   :  { %v18726_v15 = vadd.f32 %v18676_v43, %v8147_v38  ;;  %v18729_v12 = vadd.f32 %v18676_v43, %v8149_v3  ;;  %v18732_v0 = vadd.f32 %v18676_v43, %v8151_v17  ;;  %v18735_v52 = vadd.f32 %v18676_v43, %v8153_v25 }
 0xdac   :  { %v18738_v57 = vadd.f32 %v18676_v43, %v8155_v53  ;;  %v18741_v61 = vadd.f32 %v18676_v43, %v8157_v35  ;;  %v18744_v42 = vadd.f32 %v18676_v43, %v8159_v18  ;;  %v18747_v1 = vadd.f32 %v18676_v43, %v8161_v14 }
 0xdad   :  { %v18750_v62 = vadd.f32 %v18676_v43, %v8163_v50  ;;  %v18753_v36 = vadd.f32 %v18676_v43, %v8165_v24  ;;  %v18756_v10 = vadd.f32 %v18676_v43, %v8167_v37  ;;  %v18759_v44 = vadd.f32 %v18676_v43, %v8169_v39 }
 0xdae   :  { %v18762_v60 = vadd.f32 %v18676_v43, %v8171_v7  ;;  %v8178_v47 = vadd.f32 %v18676_v43, %v8110_v48  ;;  %v8243_v32 = vmul.f32 0.1, %v8179_v34  ;;  %v8114_v45 = vmul.f32 %v18672_v6, %v18249_v29 }
 0xdaf   :  { %v8115_v21 = vmul.f32 %v18672_v6, %v18253_v26  ;;  %v8116_v13 = vmul.f32 %v18672_v6, %v18257_v54  ;;  %v8117_v38 = vmul.f32 %v18672_v6, %v18261_v23  ;;  %v8118_v48 = vmul.f32 %v18672_v6, %v18265_v30 }
 0xdb0   :  { %v8119_v11 = vmul.f32 %v18672_v6, %v18269_v51  ;;  %v8120_v16 = vmul.f32 %v18672_v6, %v18273_v28  ;;  %v8307_v3 = vmax.f32 %v8179_v34, %v8243_v32  ;;  %v8242_v29 = vmul.f32 0.1, %v8178_v47 }
 0xdb1   :  { %v8180_v17 = vadd.f32 %v18676_v43, %v8112_v56  ;;  %v8181_v26 = vadd.f32 %v18676_v43, %v8113_v27  ;;  %v8182_v54 = vadd.f32 %v18676_v43, %v8114_v45  ;;  %v8183_v25 = vadd.f32 %v18676_v43, %v8115_v21 }
 0xdb2   :  { %v8306_v23 = vmax.f32 %v8178_v47, %v8242_v29  ;;  %v8184_v53 = vadd.f32 %v18676_v43, %v8116_v13  ;;  %v8185_v30 = vadd.f32 %v18676_v43, %v8117_v38  ;;  %v18790_v51 = vadd.f32 %v18676_v43, %v8118_v48 }
 0xdb3   :  { %v8244_v35 = vmul.f32 0.1, %v8180_v17  ;;  %v8245_v28 = vmul.f32 0.1, %v8181_v26  ;;  %v18793_v18 = vadd.f32 %v18676_v43, %v8119_v11  ;;  %v8121_v14 = vmul.f32 %v18672_v6, %v18276_v46 }
 0xdb4   :  { %10261 = vmatprep.mubr.f32.mxu1 %v8306_v23  ;;  %v8246_v50 = vmul.f32 0.1, %v8182_v54  ;;  %v18798_v24 = vadd.f32 %v18676_v43, %v8120_v16  ;;  %v8122_v37 = vmul.f32 %v18672_v6, %v18279_v20  ;;  %v8123_v39 = vmul.f32 %v18672_v6, %v18282_v40 }
 0xdb5   :  { %v8124_v7 = vmul.f32 %v18672_v6, %v18291_v9  ;;  %10262 = vmatmul.mubr.f32.vlgmr.msra.gmra.mrb[224].mxu1 %v8307_v3  ;;  %v8308_v34 = vmax.f32 %v8180_v17, %v8244_v35  ;;  %v8125_v47 = vmul.f32 %v18672_v6, %v18294_v49  ;;  %v8126_v46 = vmul.f32 %v18672_v6, %v18297_v31  ;;  %v21448_v35 = vld [vmem:[#allocation32_spill] sm:$0xff] }
 0xdb6   :  { %v8127_v32 = vmul.f32 %v18672_v6, %v18300_v19  ;;  %v8247_v56 = vmul.f32 0.1, %v8183_v25  ;;  %v8309_v20 = vmax.f32 %v8181_v26, %v8245_v28  ;;  %v8248_v27 = vmul.f32 0.1, %v8184_v53 }
 0xdb7   :  { %10264 = vmatprep.mubr.f32.mxu1 %v8308_v34  ;;  %v18813_v40 = vadd.f32 %v18676_v43, %v8121_v14  ;;  %v18816_v9 = vadd.f32 %v18676_v43, %v8122_v37  ;;  %v8310_v45 = vmax.f32 %v8182_v54, %v8246_v50  ;;  %v18819_v21 = vadd.f32 %v18676_v43, %v8123_v39  ;;  %v21447_v54 = vld [vmem:[#allocation31_spill] sm:$0xff]  ;;  %v21449_v50 = vld [vmem:[#allocation38_spill] sm:$0xff] }
 0xdb8   :  { %v18822_v49 = vadd.f32 %v18676_v43, %v8124_v7  ;;  %v18825_v31 = vadd.f32 %v18676_v43, %v8125_v47  ;;  %v8128_v19 = vmul.f32 %v18672_v6, %v18309_v41  ;;  %v18830_v13 = vadd.f32 %v18676_v43, %v8126_v46  ;;  %v21450_v47 = vld [vmem:[#allocation21_spill] sm:$0xff] }
 0xdb9   :  { %10265 = vmatmul.mubr.f32.gmra.mrb[226].mxu1 %v8309_v20  ;;  %v8129_v38 = vmul.f32 %v18672_v6, %v18312_v33  ;;  %v8130_v48 = vmul.f32 %v18672_v6, %v18315_v59  ;;  %v18837_v11 = vadd.f32 %v18676_v43, %v8127_v32  ;;  %v8131_v16 = vmul.f32 %v18672_v6, %v18318_v5  ;;  %v21451_v20 = vld [vmem:[#allocation43_spill] sm:$0xff] }
 0xdba   :  { %10267 = vmatprep.mubr.f32.mxu1 %v8310_v45  ;;  %v8311_v3 = vmax.f32 %v8183_v25, %v8247_v56  ;;  %v8249_v29 = vmul.f32 0.1, %v8185_v30  ;;  %v18842_v41 = vadd.f32 %v18676_v43, %v8128_v19  ;;  %v8132_v17 = vmul.f32 %v18672_v6, %v18327_v58  ;;  %v21452_v45 = vld [vmem:[#allocation48_spill] sm:$0xff] }
 0xdbb   :  { %v8133_v33 = vmul.f32 %v18672_v6, %v18330_v4  ;;  %v8312_v26 = vmax.f32 %v8184_v53, %v8248_v27  ;;  %v8250_v59 = vmul.f32 0.1, %v18790_v51  ;;  %v8134_v23 = vmul.f32 %v18672_v6, %v21447_v54 }
 0xdbc   :  { %v8135_v5 = vmul.f32 %v18672_v6, %v21448_v35  ;;  %v18854_v25 = vadd.f32 %v18676_v43, %v8129_v38  ;;  %v18857_v28 = vadd.f32 %v18676_v43, %v8130_v48  ;;  %v8251_v58 = vmul.f32 0.1, %v18793_v18 }
 0xdbd   :  { %10268 = vmatmul.mubr.f32.gmra.mrb[228].mxu1 %v8311_v3  ;;  %v18861_v4 = vadd.f32 %v18676_v43, %v8131_v16  ;;  %v18864_v53 = vadd.f32 %v18676_v43, %v8132_v17  ;;  %v18867_v14 = vadd.f32 %v18676_v43, %v8133_v33  ;;  %v8136_v37 = vmul.f32 %v18672_v6, %v21449_v50  ;;  %v21454_v16 = vld [vmem:[#allocation57_spill] sm:$0xff]  ;;  %v21456_v17 = vld [vmem:[#allocation11_spill] sm:$0xff] }
 0xdbe   :  { %10270 = vmatprep.mubr.f32.mxu1 %v8312_v26  ;;  %v8313_v39 = vmax.f32 %v8185_v30, %v8249_v29  ;;  %v8252_v7 = vmul.f32 0.1, %v18798_v24  ;;  %v18873_v34 = vadd.f32 %v18676_v43, %v8134_v23  ;;  %v8137_v46 = vmul.f32 %v18672_v6, %v21450_v47  ;;  %v21453_v30 = vld [vmem:[#allocation20_spill] sm:$0xff] }
 0xdbf   :  { %v8314_v32 = vmax.f32 %v18790_v51, %v8250_v59  ;;  %v18879_v56 = vadd.f32 %v18676_v43, %v8135_v5  ;;  %v8138_v27 = vmul.f32 %v18672_v6, %v21451_v20  ;;  %v8139_v19 = vmul.f32 %v18672_v6, %v21452_v45  ;;  %v21455_v51 = vld [vmem:[#allocation58_spill] sm:$0xff] }
 0xdc0   :  { %v8140_v38 = vmul.f32 %v18672_v6, %v21453_v30  ;;  %v18888_v48 = vadd.f32 %v18676_v43, %v8136_v37  ;;  %v8141_v3 = vmul.f32 %v18672_v6, %v21454_v16  ;;  %v8142_v29 = vmul.f32 %v18672_v6, %v21455_v51  ;;  %v21461_v16 = vld [vmem:[#allocation13_spill] sm:$0xff] }
 0xdc1   :  { %10271 = vmatmul.mubr.f32.gmra.mrb[230].mxu1 %v8313_v39  ;;  %v8144_v33 = vmul.f32 %v18672_v6, %v21456_v17  ;;  %v8315_v26 = vmax.f32 %v18793_v18, %v8251_v58  ;;  %v8316_v59 = vmax.f32 %v18798_v24, %v8252_v7  ;;  %v8253_v54 = vmul.f32 0.1, %v18813_v40  ;;  %v21457_v24 = vld [vmem:[#allocation56_spill] sm:$0xff]  ;;  %v21458_v7 = vld [vmem:[#allocation34_spill] sm:$0xff]  ;;  %v21462_v51 = vld [vmem:[#allocation41_spill] sm:$0xff] }
 0xdc2   :  { %10273 = vmatprep.mubr.f32.mxu1 %v8314_v32  ;;  %v18900_v23 = vadd.f32 %v18676_v43, %v8137_v46  ;;  %v18903_v35 = vadd.f32 %v18676_v43, %v8138_v27  ;;  %v8254_v5 = vmul.f32 0.1, %v18816_v9  ;;  %v18907_v50 = vadd.f32 %v18676_v43, %v8139_v19  ;;  %v21459_v46 = vld [vmem:[#allocation33_spill] sm:$0xff]  ;;  %v21460_v27 = vld [vmem:[#allocation35_spill] sm:$0xff] }
 0xdc3   :  { %v18910_v37 = vadd.f32 %v18676_v43, %v8140_v38  ;;  %v18913_v18 = vadd.f32 %v18676_v43, %v8141_v3  ;;  %v8146_v58 = vmul.f32 %v18672_v6, %v21457_v24  ;;  %v18918_v39 = vadd.f32 %v18676_v43, %v8142_v29  ;;  %v21464_v24 = vld [vmem:[#allocation44_spill] sm:$0xff] }
 0xdc4   :  { %v8148_v47 = vmul.f32 %v18672_v6, %v21458_v7  ;;  %v8150_v32 = vmul.f32 %v18672_v6, %v21459_v46  ;;  %v18925_v20 = vadd.f32 %v18676_v43, %v8144_v33  ;;  %v8152_v45 = vmul.f32 %v18672_v6, %v21460_v27  ;;  %v21465_v27 = vld [vmem:[#allocation30_spill] sm:$0xff] }
 0xdc5   :  { %10274 = vmatmul.mubr.f32.gmra.mrb[232].mxu1 %v8315_v26  ;;  %v8317_v19 = vmax.f32 %v18813_v40, %v8253_v54  ;;  %v8255_v30 = vmul.f32 0.1, %v18819_v21  ;;  %v18932_v38 = vadd.f32 %v18676_v43, %v8146_v58  ;;  %v8154_v3 = vmul.f32 %v18672_v6, %v21461_v16  ;;  %v21463_v26 = vld [vmem:[#allocation40_spill] sm:$0xff] }
 0xdc6   :  { %10276 = vmatprep.mubr.f32.mxu1 %v8316_v59  ;;  %v8156_v29 = vmul.f32 %v18672_v6, %v21462_v51  ;;  %v8318_v17 = vmax.f32 %v18816_v9, %v8254_v5  ;;  %v8256_v33 = vmul.f32 0.1, %v18822_v49  ;;  %v8158_v59 = vmul.f32 %v18672_v6, %v21463_v26 }
 0xdc7   :  { %v8160_v40 = vmul.f32 %v18672_v6, %v21464_v24  ;;  %v18945_v54 = vadd.f32 %v18676_v43, %v8148_v47  ;;  %v18948_v58 = vadd.f32 %v18676_v43, %v8150_v32  ;;  %v8257_v7 = vmul.f32 0.1, %v18825_v31 }
 0xdc8   :  { %v18952_v9 = vadd.f32 %v18676_v43, %v8152_v45  ;;  %v18955_v5 = vadd.f32 %v18676_v43, %v8154_v3  ;;  %v18958_v46 = vadd.f32 %v18676_v43, %v8156_v29  ;;  %v8319_v47 = vmax.f32 %v18819_v21, %v8255_v30  ;;  %v21466_v3 = vld [vmem:[#allocation42_spill] sm:$0xff]  ;;  %v21467_v29 = vld [vmem:[#allocation45_spill] sm:$0xff] }
 0xdc9   :  { %10277 = vmatmul.mubr.f32.gmra.mrb[234].mxu1 %v8317_v19  ;;  %v8162_v19 = vmul.f32 %v18672_v6, %v21465_v27  ;;  %v8258_v32 = vmul.f32 0.1, %v18830_v13  ;;  %v18965_v16 = vadd.f32 %v18676_v43, %v8158_v59  ;;  %v8320_v51 = vmax.f32 %v18822_v49, %v8256_v33  ;;  %v21468_v21 = vld [vmem:[#allocation46_spill] sm:$0xff]  ;;  %v21469_v59 = vld [vmem:[#allocation53_spill] sm:$0xff] }
 0xdca   :  { %10279 = vmatprep.mubr.f32.mxu1 %v8318_v17  ;;  %v18969_v45 = vadd.f32 %v18676_v43, %v8160_v40  ;;  %v8164_v17 = vmul.f32 %v18672_v6, %v21466_v3  ;;  %v8166_v26 = vmul.f32 %v18672_v6, %v21467_v29  ;;  %v8168_v30 = vmul.f32 %v18672_v6, %v21468_v21 }
 0xdcb   :  { %v18976_v24 = vadd.f32 %v18676_v43, %v8162_v19  ;;  %v8170_v27 = vmul.f32 %v18672_v6, %v21469_v59  ;;  %v8321_v49 = vmax.f32 %v18825_v31, %v8257_v7  ;;  %v8322_v33 = vmax.f32 %v18830_v13, %v8258_v32 }
 0xdcc   :  { %v8259_v40 = vmul.f32 0.1, %v18837_v11  ;;  %v18986_v3 = vadd.f32 %v18676_v43, %v8164_v17  ;;  %v8260_v19 = vmul.f32 0.1, %v18842_v41  ;;  %v18993_v29 = vadd.f32 %v18676_v43, %v8168_v30 }
 0xdcd   :  { %10280 = vmatmul.mubr.f32.gmra.mrb[236].mxu1 %v8319_v47  ;;  %v18989_v47 = vadd.f32 %v18676_v43, %v8166_v26  ;;  %v18996_v6 = vadd.f32 %v18676_v43, %v8170_v27  ;;  %v19000_v31 = vadd.f32 %v18676_v43, %v18716_v8  ;;  %v8261_v7 = vmul.f32 0.1, %v18854_v25 }
 0xdce   :  { %10282 = vmatprep.mubr.f32.mxu1 %v8320_v51  ;;  %v8323_v13 = vmax.f32 %v18837_v11, %v8259_v40  ;;  %v8324_v32 = vmax.f32 %v18842_v41, %v8260_v19  ;;  %v8262_v51 = vmul.f32 0.1, %v18857_v28  ;;  %v8263_v26 = vmul.f32 0.1, %v18861_v4 }
 0xdcf   :  { %v8325_v17 = vmax.f32 %v18854_v25, %v8261_v7  ;;  %v8264_v43 = vmul.f32 0.1, %v18864_v53  ;;  %v8265_v11 = vmul.f32 0.1, %v18867_v14  ;;  %v8266_v30 = vmul.f32 0.1, %v18873_v34 }
 0xdd0   :  { %v8326_v21 = vmax.f32 %v18857_v28, %v8262_v51  ;;  %v8327_v8 = vmax.f32 %v18861_v4, %v8263_v26  ;;  %v8267_v59 = vmul.f32 0.1, %v18879_v56  ;;  %v8268_v27 = vmul.f32 0.1, %v18888_v48 }
 0xdd1   :  { %10283 = vmatmul.mubr.f32.gmra.mrb[238].mxu1 %v8321_v49  ;;  %v8328_v41 = vmax.f32 %v18864_v53, %v8264_v43  ;;  %v8329_v25 = vmax.f32 %v18867_v14, %v8265_v11  ;;  %v8330_v28 = vmax.f32 %v18873_v34, %v8266_v30  ;;  %v8269_v49 = vmul.f32 0.1, %v18900_v23 }
 0xdd2   :  { %10285 = vmatprep.mubr.f32.mxu1 %v8322_v33  ;;  %v8331_v4 = vmax.f32 %v18879_v56, %v8267_v59  ;;  %v8332_v53 = vmax.f32 %v18888_v48, %v8268_v27  ;;  %v8270_v33 = vmul.f32 0.1, %v18903_v35  ;;  %v8271_v40 = vmul.f32 0.1, %v18907_v50 }
 0xdd3   :  { %v8333_v14 = vmax.f32 %v18900_v23, %v8269_v49  ;;  %v8272_v19 = vmul.f32 0.1, %v18910_v37  ;;  %v8274_v7 = vmul.f32 0.1, %v18918_v39  ;;  %v8275_v23 = vmul.f32 0.1, %v18720_v2 }
 0xdd4   :  { %v8334_v34 = vmax.f32 %v18903_v35, %v8270_v33  ;;  %v8335_v56 = vmax.f32 %v18907_v50, %v8271_v40  ;;  %v8276_v51 = vmul.f32 0.1, %v18925_v20  ;;  %v8277_v50 = vmul.f32 0.1, %v18723_v22 }
 0xdd5   :  { %10286 = vmatmul.mubr.f32.gmra.mrb[240].mxu1 %v8323_v13  ;;  %v8273_v13 = vmul.f32 0.1, %v18913_v18  ;;  %v8336_v48 = vmax.f32 %v18910_v37, %v8272_v19  ;;  %v8338_v35 = vmax.f32 %v18918_v39, %v8274_v7  ;;  %v8278_v26 = vmul.f32 0.1, %v18932_v38 }
 0xdd6   :  { %10288 = vmatprep.mubr.f32.mxu1 %v8324_v32  ;;  %v8340_v37 = vmax.f32 %v18925_v20, %v8276_v51  ;;  %v8280_v43 = vmul.f32 0.1, %v18945_v54  ;;  %v8282_v11 = vmul.f32 0.1, %v18948_v58  ;;  %v8284_v30 = vmul.f32 0.1, %v18952_v9 }
 0xdd7   :  { %v8337_v32 = vmax.f32 %v18913_v18, %v8273_v13  ;;  %v8341_v18 = vmax.f32 %v18723_v22, %v8277_v50  ;;  %v8342_v39 = vmax.f32 %v18932_v38, %v8278_v26  ;;  %v8286_v59 = vmul.f32 0.1, %v18955_v5 }
 0xdd8   :  { %v8344_v20 = vmax.f32 %v18945_v54, %v8280_v43  ;;  %v8346_v38 = vmax.f32 %v18948_v58, %v8282_v11  ;;  %v8348_v54 = vmax.f32 %v18952_v9, %v8284_v30  ;;  %v8288_v27 = vmul.f32 0.1, %v18958_v46 }
 0xdd9   :  { %10289 = vmatmul.mubr.f32.gmra.mrb[242].mxu1 %v8325_v17  ;;  %v8339_v17 = vmax.f32 %v18720_v2, %v8275_v23  ;;  %v8350_v58 = vmax.f32 %v18955_v5, %v8286_v59  ;;  %v8290_v49 = vmul.f32 0.1, %v18965_v16  ;;  %v8292_v33 = vmul.f32 0.1, %v18969_v45 }
 0xdda   :  { %10291 = vmatprep.mubr.f32.mxu1 %v8326_v21  ;;  %v8279_v21 = vmul.f32 0.1, %v18726_v15  ;;  %v8352_v9 = vmax.f32 %v18958_v46, %v8288_v27  ;;  %v8294_v40 = vmul.f32 0.1, %v18976_v24  ;;  %v8296_v19 = vmul.f32 0.1, %v18986_v3 }
 0xddb   :  { %v8354_v5 = vmax.f32 %v18965_v16, %v8290_v49  ;;  %v8356_v46 = vmax.f32 %v18969_v45, %v8292_v33  ;;  %v8298_v13 = vmul.f32 0.1, %v18989_v47  ;;  %v8300_v7 = vmul.f32 0.1, %v18993_v29 }
 0xddc   :  { %v8343_v2 = vmax.f32 %v18726_v15, %v8279_v21  ;;  %v8358_v16 = vmax.f32 %v18976_v24, %v8294_v40  ;;  %v8360_v45 = vmax.f32 %v18986_v3, %v8296_v19  ;;  %v8301_v23 = vmul.f32 0.1, %v18759_v44 }
 0xddd   :  { %10292 = vmatmul.mubr.f32.gmra.mrb[244].mxu1 %v8327_v8  ;;  %v8281_v8 = vmul.f32 0.1, %v18729_v12  ;;  %v8362_v24 = vmax.f32 %v18989_v47, %v8298_v13  ;;  %v8364_v3 = vmax.f32 %v18993_v29, %v8300_v7  ;;  %v8304_v51 = vmul.f32 0.1, %v19000_v31 }
 0xdde   :  { %10294 = vmatprep.mubr.f32.mxu1 %v8328_v41  ;;  %v8283_v41 = vmul.f32 0.1, %v18732_v0  ;;  %v8305_v50 = vmul.f32 0.1, %v18679_v63 }
 0xddf   :  { %v8345_v22 = vmax.f32 %v18729_v12, %v8281_v8  ;;  %v8368_v29 = vmax.f32 %v19000_v31, %v8304_v51 }
 0xde0   :  { %v8347_v15 = vmax.f32 %v18732_v0, %v8283_v41 }
 0xde1   :  { %10295 = vmatmul.mubr.f32.gmra.mrb[246].mxu1 %v8329_v25  ;;  %v8285_v25 = vmul.f32 0.1, %v18735_v52 }
 0xde2   :  { %10297 = vmatprep.mubr.f32.mxu1 %v8330_v28  ;;  %v8287_v28 = vmul.f32 0.1, %v18738_v57 }
 0xde3   :  { %v8349_v12 = vmax.f32 %v18735_v52, %v8285_v25 }
 0xde4   :  { %v8351_v0 = vmax.f32 %v18738_v57, %v8287_v28 }
 0xde5   :  { %10298 = vmatmul.mubr.f32.gmra.mrb[248].mxu1 %v8331_v4  ;;  %v8289_v4 = vmul.f32 0.1, %v18741_v61 }
 0xde6   :  { %10300 = vmatprep.mubr.f32.mxu1 %v8332_v53  ;;  %v8291_v53 = vmul.f32 0.1, %v18744_v42 }
 0xde7   :  { %v8353_v52 = vmax.f32 %v18741_v61, %v8289_v4 }
 0xde8   :  { %v8355_v57 = vmax.f32 %v18744_v42, %v8291_v53 }
 0xde9   :  { %10301 = vmatmul.mubr.f32.gmra.mrb[250].mxu1 %v8333_v14  ;;  %v8293_v14 = vmul.f32 0.1, %v18747_v1 }
 0xdea   :  { %10303 = vmatprep.mubr.f32.mxu1 %v8334_v34  ;;  %v8295_v34 = vmul.f32 0.1, %v18750_v62 }
 0xdeb   :  { %v8357_v61 = vmax.f32 %v18747_v1, %v8293_v14 }
 0xdec   :  { %v8359_v42 = vmax.f32 %v18750_v62, %v8295_v34 }
 0xded   :  { %10304 = vmatmul.mubr.f32.gmra.mrb[252].mxu1 %v8335_v56  ;;  %v8297_v56 = vmul.f32 0.1, %v18753_v36 }
 0xdee   :  { %10306 = vmatprep.mubr.f32.mxu1 %v8336_v48  ;;  %v8299_v48 = vmul.f32 0.1, %v18756_v10 }
 0xdef   :  { %v8361_v1 = vmax.f32 %v18753_v36, %v8297_v56  ;;  %v8365_v36 = vmax.f32 %v18759_v44, %v8301_v23 }
 0xdf0   :  { %v8363_v62 = vmax.f32 %v18756_v10, %v8299_v48 }
 0xdf1   :  { %10307 = vmatmul.mubr.f32.gmra.mrb[254].mxu1 %v8337_v32  ;;  %v8302_v32 = vmul.f32 0.1, %v18996_v6 }
 0xdf2   :  { %10309 = vmatprep.mubr.f32.mxu1 %v8338_v35  ;;  %v8303_v35 = vmul.f32 0.1, %v18762_v60 }
 0xdf3   :  { %v8366_v47 = vmax.f32 %v18996_v6, %v8302_v32 }
 0xdf4   :  { %v8367_v10 = vmax.f32 %v18762_v60, %v8303_v35 }
 0xdf5   :  { %10310 = vmatmul.mubr.f32.gmra.mrb[0].mxu1 %v8339_v17  ;;  %v8369_v17 = vmax.f32 %v18679_v63, %v8305_v50 }
 0xdf6   :  { %10312 = vmatprep.mubr.f32.mxu1 %v8340_v37 }
 0xdf9   :  { %10313 = vmatmul.mubr.f32.gmra.mrb[2].mxu1 %v8341_v18 }
 0xdfa   :  { %10315 = vmatprep.mubr.f32.mxu1 %v8342_v39 }
 0xdfd   :  { %10316 = vmatmul.mubr.f32.gmra.mrb[4].mxu1 %v8343_v2 }
 0xdfe   :  { %10318 = vmatprep.mubr.f32.mxu1 %v8344_v20 }
 0xe01   :  { %10319 = vmatmul.mubr.f32.gmra.mrb[6].mxu1 %v8345_v22 }
 0xe02   :  { %10321 = vmatprep.mubr.f32.mxu1 %v8346_v38 }
 0xe05   :  { %10322 = vmatmul.mubr.f32.gmra.mrb[8].mxu1 %v8347_v15 }
 0xe06   :  { %10324 = vmatprep.mubr.f32.mxu1 %v8348_v54 }
 0xe09   :  { %10325 = vmatmul.mubr.f32.gmra.mrb[10].mxu1 %v8349_v12 }
 0xe0a   :  { %10327 = vmatprep.mubr.f32.mxu1 %v8350_v58 }
 0xe0d   :  { %10328 = vmatmul.mubr.f32.gmra.mrb[12].mxu1 %v8351_v0 }
 0xe0e   :  { %10330 = vmatprep.mubr.f32.mxu1 %v8352_v9 }
 0xe11   :  { %10331 = vmatmul.mubr.f32.gmra.mrb[14].mxu1 %v8353_v52 }
 0xe12   :  { %10333 = vmatprep.mubr.f32.mxu1 %v8354_v5 }
 0xe15   :  { %10334 = vmatmul.mubr.f32.gmra.mrb[16].mxu1 %v8355_v57 }
 0xe16   :  { %10336 = vmatprep.mubr.f32.mxu1 %v8356_v46 }
 0xe19   :  { %10337 = vmatmul.mubr.f32.gmra.mrb[18].mxu1 %v8357_v61 }
 0xe1a   :  { %10339 = vmatprep.mubr.f32.mxu1 %v8358_v16 }
 0xe1d   :  { %10340 = vmatmul.mubr.f32.gmra.mrb[20].mxu1 %v8359_v42 }
 0xe1e   :  { %10342 = vmatprep.mubr.f32.mxu1 %v8360_v45 }
 0xe21   :  { %10343 = vmatmul.mubr.f32.gmra.mrb[22].mxu1 %v8361_v1 }
 0xe22   :  { %10345 = vmatprep.mubr.f32.mxu1 %v8362_v24 }
 0xe25   :  { %10346 = vmatmul.mubr.f32.gmra.mrb[24].mxu1 %v8363_v62 }
 0xe26   :  { %10348 = vmatprep.mubr.f32.mxu1 %v8364_v3 }
 0xe29   :  { %10349 = vmatmul.mubr.f32.gmra.mrb[26].mxu1 %v8365_v36 }
 0xe2a   :  { %10351 = vmatprep.mubr.f32.mxu1 %v8366_v47 }
 0xe2d   :  { %10352 = vmatmul.mubr.f32.gmra.mrb[28].mxu1 %v8367_v10 }
 0xe2e   :  { %10354 = vmatprep.mubr.f32.mxu1 %v8368_v29 }
 0xe31   :  { %10355 = vmatmul.mubr.f32.gmra.mrb[30].mxu1 %v8369_v17 }
 0xe88   :  { %v19094_v37 = vpop.f32.mrb[224].mxu1 }
 0xe89   :  { %v8841_v44 = vmul.f32 %v19094_v37, %v19094_v37  ;;  %v19098_v6 = vpop.f32.mrb[225].mxu1 }
 0xe8a   :  { %v8771_v26 = vadd.f32 %v19094_v37, %v19098_v6  ;;  %v8840_v60 = vmul.f32 %v19098_v6, %v19098_v6 }
 0xe8c   :  { %v8904_v21 = vadd.f32 %v8841_v44, %v8840_v60  ;;  %v19104_v31 = vpop.f32.mrb[226].mxu1 }
 0xe8d   :  { %v19106_v18 = vpop.f32.mrb[227].mxu1  ;;  %v8843_v43 = vmul.f32 %v19104_v31, %v19104_v31 }
 0xe8e   :  { %v8772_v63 = vadd.f32 %v8771_v26, %v19106_v18  ;;  %v8842_v39 = vmul.f32 %v19106_v18, %v19106_v18 }
 0xe90   :  { %v8773_v8 = vadd.f32 %v19104_v31, %v8772_v63  ;;  %v8905_v2 = vadd.f32 %v8904_v21, %v8842_v39  ;;  %v19114_v20 = vpop.f32.mrb[228].mxu1 }
 0xe91   :  { %v19116_v11 = vpop.f32.mrb[229].mxu1  ;;  %v8845_v30 = vmul.f32 %v19114_v20, %v19114_v20 }
 0xe92   :  { %v8906_v41 = vadd.f32 %v8905_v2, %v8843_v43  ;;  %v8774_v22 = vadd.f32 %v8773_v8, %v19116_v11  ;;  %v8844_v38 = vmul.f32 %v19116_v11, %v19116_v11 }
 0xe94   :  { %v8907_v25 = vadd.f32 %v8906_v41, %v8844_v38  ;;  %v19123_v15 = vpop.f32.mrb[230].mxu1  ;;  %v8775_v54 = vadd.f32 %v19114_v20, %v8774_v22 }
 0xe95   :  { %v19126_v59 = vpop.f32.mrb[231].mxu1  ;;  %v8847_v27 = vmul.f32 %v19123_v15, %v19123_v15 }
 0xe96   :  { %v8776_v28 = vadd.f32 %v8775_v54, %v19126_v59  ;;  %v8846_v12 = vmul.f32 %v19126_v59, %v19126_v59  ;;  %v8908_v58 = vadd.f32 %v8907_v25, %v8845_v30 }
 0xe98   :  { %v8909_v4 = vadd.f32 %v8908_v58, %v8846_v12  ;;  %v19133_v0 = vpop.f32.mrb[232].mxu1  ;;  %v8777_v9 = vadd.f32 %v19123_v15, %v8776_v28 }
 0xe99   :  { %v19136_v49 = vpop.f32.mrb[233].mxu1  ;;  %v8849_v33 = vmul.f32 %v19133_v0, %v19133_v0 }
 0xe9a   :  { %v8778_v53 = vadd.f32 %v8777_v9, %v19136_v49  ;;  %v8848_v52 = vmul.f32 %v19136_v49, %v19136_v49  ;;  %v8910_v5 = vadd.f32 %v8909_v4, %v8847_v27 }
 0xe9c   :  { %v8911_v14 = vadd.f32 %v8910_v5, %v8848_v52  ;;  %v19143_v57 = vpop.f32.mrb[234].mxu1  ;;  %v8779_v46 = vadd.f32 %v19133_v0, %v8778_v53 }
 0xe9d   :  { %v19146_v40 = vpop.f32.mrb[235].mxu1  ;;  %v8851_v19 = vmul.f32 %v19143_v57, %v19143_v57 }
 0xe9e   :  { %v8780_v34 = vadd.f32 %v8779_v46, %v19146_v40  ;;  %v8850_v61 = vmul.f32 %v19146_v40, %v19146_v40  ;;  %v8912_v16 = vadd.f32 %v8911_v14, %v8849_v33 }
 0xea0   :  { %v8913_v56 = vadd.f32 %v8912_v16, %v8850_v61  ;;  %v19153_v42 = vpop.f32.mrb[236].mxu1  ;;  %v8781_v45 = vadd.f32 %v19143_v57, %v8780_v34 }
 0xea1   :  { %v19156_v13 = vpop.f32.mrb[237].mxu1  ;;  %v8853_v7 = vmul.f32 %v19153_v42, %v19153_v42 }
 0xea2   :  { %v8782_v48 = vadd.f32 %v8781_v45, %v19156_v13  ;;  %v8852_v1 = vmul.f32 %v19156_v13, %v19156_v13  ;;  %v8914_v24 = vadd.f32 %v8913_v56, %v8851_v19 }
 0xea4   :  { %v8915_v23 = vadd.f32 %v8914_v24, %v8852_v1  ;;  %v19163_v62 = vpop.f32.mrb[238].mxu1  ;;  %v8783_v3 = vadd.f32 %v19153_v42, %v8782_v48 }
 0xea5   :  { %v19166_v32 = vpop.f32.mrb[239].mxu1  ;;  %v8855_v51 = vmul.f32 %v19163_v62, %v19163_v62 }
 0xea6   :  { %v8784_v35 = vadd.f32 %v8783_v3, %v19166_v32  ;;  %v8854_v36 = vmul.f32 %v19166_v32, %v19166_v32  ;;  %v8916_v47 = vadd.f32 %v8915_v23, %v8853_v7 }
 0xea8   :  { %v8917_v50 = vadd.f32 %v8916_v47, %v8854_v36  ;;  %v19173_v10 = vpop.f32.mrb[240].mxu1  ;;  %v8785_v29 = vadd.f32 %v19163_v62, %v8784_v35 }
 0xea9   :  { %v19176_v17 = vpop.f32.mrb[241].mxu1  ;;  %v8857_v21 = vmul.f32 %v19173_v10, %v19173_v10 }
 0xeaa   :  { %v8786_v44 = vadd.f32 %v8785_v29, %v19176_v17  ;;  %v8856_v26 = vmul.f32 %v19176_v17, %v19176_v17  ;;  %v8918_v60 = vadd.f32 %v8917_v50, %v8855_v51 }
 0xeac   :  { %v8919_v63 = vadd.f32 %v8918_v60, %v8856_v26  ;;  %v19183_v39 = vpop.f32.mrb[242].mxu1  ;;  %v8787_v43 = vadd.f32 %v19173_v10, %v8786_v44 }
 0xead   :  { %v19186_v8 = vpop.f32.mrb[243].mxu1  ;;  %v8859_v38 = vmul.f32 %v19183_v39, %v19183_v39 }
 0xeae   :  { %v8788_v2 = vadd.f32 %v8787_v43, %v19186_v8  ;;  %v8858_v41 = vmul.f32 %v19186_v8, %v19186_v8  ;;  %v8920_v22 = vadd.f32 %v8919_v63, %v8857_v21 }
 0xeb0   :  { %v8921_v30 = vadd.f32 %v8920_v22, %v8858_v41  ;;  %v19193_v25 = vpop.f32.mrb[244].mxu1  ;;  %v8789_v54 = vadd.f32 %v19183_v39, %v8788_v2 }
 0xeb1   :  { %v19196_v28 = vpop.f32.mrb[245].mxu1  ;;  %v8861_v4 = vmul.f32 %v19193_v25, %v19193_v25 }
 0xeb2   :  { %v8790_v12 = vadd.f32 %v8789_v54, %v19196_v28  ;;  %v8860_v58 = vmul.f32 %v19196_v28, %v19196_v28  ;;  %v8922_v27 = vadd.f32 %v8921_v30, %v8859_v38 }
 0xeb4   :  { %v8923_v9 = vadd.f32 %v8922_v27, %v8860_v58  ;;  %v19203_v53 = vpop.f32.mrb[246].mxu1  ;;  %v8791_v52 = vadd.f32 %v19193_v25, %v8790_v12 }
 0xeb5   :  { %v19206_v5 = vpop.f32.mrb[247].mxu1  ;;  %v8863_v34 = vmul.f32 %v19203_v53, %v19203_v53 }
 0xeb6   :  { %v8792_v33 = vadd.f32 %v8791_v52, %v19206_v5  ;;  %v8862_v14 = vmul.f32 %v19206_v5, %v19206_v5  ;;  %v8924_v46 = vadd.f32 %v8923_v9, %v8861_v4 }
 0xeb8   :  { %v8925_v61 = vadd.f32 %v8924_v46, %v8862_v14  ;;  %v19213_v16 = vpop.f32.mrb[248].mxu1  ;;  %v8793_v19 = vadd.f32 %v19203_v53, %v8792_v33 }
 0xeb9   :  { %v19216_v56 = vpop.f32.mrb[249].mxu1  ;;  %v8865_v24 = vmul.f32 %v19213_v16, %v19213_v16 }
 0xeba   :  { %v8794_v45 = vadd.f32 %v8793_v19, %v19216_v56  ;;  %v8864_v48 = vmul.f32 %v19216_v56, %v19216_v56  ;;  %v8926_v1 = vadd.f32 %v8925_v61, %v8863_v34 }
 0xebc   :  { %v8927_v7 = vadd.f32 %v8926_v1, %v8864_v48  ;;  %v19223_v23 = vpop.f32.mrb[250].mxu1  ;;  %v8795_v3 = vadd.f32 %v19213_v16, %v8794_v45 }
 0xebd   :  { %v19226_v35 = vpop.f32.mrb[251].mxu1  ;;  %v8867_v50 = vmul.f32 %v19223_v23, %v19223_v23 }
 0xebe   :  { %v8796_v36 = vadd.f32 %v8795_v3, %v19226_v35  ;;  %v8866_v47 = vmul.f32 %v19226_v35, %v19226_v35  ;;  %v8928_v51 = vadd.f32 %v8927_v7, %v8865_v24 }
 0xec0   :  { %v8929_v29 = vadd.f32 %v8928_v51, %v8866_v47  ;;  %v19233_v44 = vpop.f32.mrb[252].mxu1  ;;  %v8797_v26 = vadd.f32 %v19223_v23, %v8796_v36 }
 0xec1   :  { %v19236_v60 = vpop.f32.mrb[253].mxu1  ;;  %v8869_v2 = vmul.f32 %v19233_v44, %v19233_v44 }
 0xec2   :  { %v8798_v21 = vadd.f32 %v8797_v26, %v19236_v60  ;;  %v8868_v63 = vmul.f32 %v19236_v60, %v19236_v60  ;;  %v8930_v43 = vadd.f32 %v8929_v29, %v8867_v50 }
 0xec4   :  { %v8931_v41 = vadd.f32 %v8930_v43, %v8868_v63  ;;  %v19243_v22 = vpop.f32.mrb[254].mxu1  ;;  %v8799_v38 = vadd.f32 %v19233_v44, %v8798_v21 }
 0xec5   :  { %v19246_v30 = vpop.f32.mrb[255].mxu1  ;;  %v8871_v27 = vmul.f32 %v19243_v22, %v19243_v22 }
 0xec6   :  { %v8800_v54 = vadd.f32 %v8799_v38, %v19246_v30  ;;  %v8870_v12 = vmul.f32 %v19246_v30, %v19246_v30  ;;  %v8932_v58 = vadd.f32 %v8931_v41, %v8869_v2 }
 0xec8   :  { %v8933_v4 = vadd.f32 %v8932_v58, %v8870_v12  ;;  %v19253_v9 = vpop.f32.mrb[0].mxu1  ;;  %v8801_v52 = vadd.f32 %v19243_v22, %v8800_v54 }
 0xec9   :  { %v19256_v33 = vpop.f32.mrb[1].mxu1  ;;  %v8873_v61 = vmul.f32 %v19253_v9, %v19253_v9 }
 0xeca   :  { %v8802_v14 = vadd.f32 %v8801_v52, %v19256_v33  ;;  %v8872_v46 = vmul.f32 %v19256_v33, %v19256_v33  ;;  %v8934_v34 = vadd.f32 %v8933_v4, %v8871_v27 }
 0xecc   :  { %v8935_v19 = vadd.f32 %v8934_v34, %v8872_v46  ;;  %v19263_v45 = vpop.f32.mrb[2].mxu1  ;;  %v8803_v48 = vadd.f32 %v19253_v9, %v8802_v14 }
 0xecd   :  { %v19266_v1 = vpop.f32.mrb[3].mxu1  ;;  %v8875_v36 = vmul.f32 %v19263_v45, %v19263_v45 }
 0xece   :  { %v8804_v24 = vadd.f32 %v8803_v48, %v19266_v1  ;;  %v8874_v7 = vmul.f32 %v19266_v1, %v19266_v1  ;;  %v8936_v3 = vadd.f32 %v8935_v19, %v8873_v61 }
 0xed0   :  { %v8937_v47 = vadd.f32 %v8936_v3, %v8874_v7  ;;  %v19273_v51 = vpop.f32.mrb[4].mxu1  ;;  %v8805_v50 = vadd.f32 %v19263_v45, %v8804_v24 }
 0xed1   :  { %v19276_v29 = vpop.f32.mrb[5].mxu1  ;;  %v8877_v43 = vmul.f32 %v19273_v51, %v19273_v51 }
 0xed2   :  { %v8806_v26 = vadd.f32 %v8805_v50, %v19276_v29  ;;  %v8876_v21 = vmul.f32 %v19276_v29, %v19276_v29  ;;  %v8938_v63 = vadd.f32 %v8937_v47, %v8875_v36 }
 0xed4   :  { %v8939_v2 = vadd.f32 %v8938_v63, %v8876_v21  ;;  %v19283_v41 = vpop.f32.mrb[6].mxu1  ;;  %v8807_v38 = vadd.f32 %v19273_v51, %v8806_v26 }
 0xed5   :  { %21470 = vst [vmem:[#allocation47_spill] sm:$0xff] %v19283_v41  ;;  %v19286_v54 = vpop.f32.mrb[7].mxu1  ;;  %v8879_v4 = vmul.f32 %v19283_v41, %v19283_v41 }
 0xed6   :  { %21471 = vst [vmem:[#allocation5_spill] sm:$0xff] %v19286_v54  ;;  %v8808_v12 = vadd.f32 %v8807_v38, %v19286_v54  ;;  %v8878_v58 = vmul.f32 %v19286_v54, %v19286_v54  ;;  %v8940_v27 = vadd.f32 %v8939_v2, %v8877_v43 }
 0xed8   :  { %v8941_v52 = vadd.f32 %v8940_v27, %v8878_v58  ;;  %v19293_v14 = vpop.f32.mrb[8].mxu1  ;;  %v8809_v46 = vadd.f32 %v19283_v41, %v8808_v12 }
 0xed9   :  { %21472 = vst [vmem:[#allocation50_spill] sm:$0xff] %v19293_v14  ;;  %v19296_v34 = vpop.f32.mrb[9].mxu1  ;;  %v8881_v24 = vmul.f32 %v19293_v14, %v19293_v14 }
 0xeda   :  { %21473 = vst [vmem:[#allocation59_spill] sm:$0xff] %v19296_v34  ;;  %v8810_v61 = vadd.f32 %v8809_v46, %v19296_v34  ;;  %v8880_v19 = vmul.f32 %v19296_v34, %v19296_v34  ;;  %v8942_v48 = vadd.f32 %v8941_v52, %v8879_v4 }
 0xedc   :  { %v8943_v7 = vadd.f32 %v8942_v48, %v8880_v19  ;;  %v19303_v3 = vpop.f32.mrb[10].mxu1  ;;  %v8811_v36 = vadd.f32 %v19293_v14, %v8810_v61 }
 0xedd   :  { %21474 = vst [vmem:[#allocation14_spill] sm:$0xff] %v19303_v3  ;;  %v19306_v47 = vpop.f32.mrb[11].mxu1  ;;  %v8883_v63 = vmul.f32 %v19303_v3, %v19303_v3 }
 0xede   :  { %21475 = vst [vmem:[#allocation60_spill] sm:$0xff] %v19306_v47  ;;  %v8812_v50 = vadd.f32 %v8811_v36, %v19306_v47  ;;  %v8882_v26 = vmul.f32 %v19306_v47, %v19306_v47  ;;  %v8944_v21 = vadd.f32 %v8943_v7, %v8881_v24 }
 0xee0   :  { %v8945_v43 = vadd.f32 %v8944_v21, %v8882_v26  ;;  %v19313_v2 = vpop.f32.mrb[12].mxu1  ;;  %v8813_v38 = vadd.f32 %v19303_v3, %v8812_v50 }
 0xee1   :  { %21476 = vst [vmem:[#allocation61_spill] sm:$0xff] %v19313_v2  ;;  %v19316_v12 = vpop.f32.mrb[13].mxu1  ;;  %v8885_v52 = vmul.f32 %v19313_v2, %v19313_v2 }
 0xee2   :  { %21477 = vst [vmem:[#allocation27_spill] sm:$0xff] %v19316_v12  ;;  %v8814_v58 = vadd.f32 %v8813_v38, %v19316_v12  ;;  %v8884_v27 = vmul.f32 %v19316_v12, %v19316_v12  ;;  %v8946_v4 = vadd.f32 %v8945_v43, %v8883_v63 }
 0xee4   :  { %v8947_v46 = vadd.f32 %v8946_v4, %v8884_v27  ;;  %v19323_v61 = vpop.f32.mrb[14].mxu1  ;;  %v8815_v19 = vadd.f32 %v19313_v2, %v8814_v58 }
 0xee5   :  { %21478 = vst [vmem:[#allocation63_spill] sm:$0xff] %v19323_v61  ;;  %v19326_v48 = vpop.f32.mrb[15].mxu1  ;;  %v8887_v50 = vmul.f32 %v19323_v61, %v19323_v61 }
 0xee6   :  { %21479 = vst [vmem:[#allocation62_spill] sm:$0xff] %v19326_v48  ;;  %v8816_v24 = vadd.f32 %v8815_v19, %v19326_v48  ;;  %v8886_v7 = vmul.f32 %v19326_v48, %v19326_v48  ;;  %v8948_v36 = vadd.f32 %v8947_v46, %v8885_v52 }
 0xee8   :  { %v8949_v26 = vadd.f32 %v8948_v36, %v8886_v7  ;;  %v19333_v21 = vpop.f32.mrb[16].mxu1  ;;  %v8817_v63 = vadd.f32 %v19323_v61, %v8816_v24 }
 0xee9   :  { %21480 = vst [vmem:[#allocation6_spill] sm:$0xff] %v19333_v21  ;;  %v19336_v43 = vpop.f32.mrb[17].mxu1  ;;  %v8889_v4 = vmul.f32 %v19333_v21, %v19333_v21 }
 0xeea   :  { %21481 = vst [vmem:[#allocation64_spill] sm:$0xff] %v19336_v43  ;;  %v8818_v38 = vadd.f32 %v8817_v63, %v19336_v43  ;;  %v8888_v58 = vmul.f32 %v19336_v43, %v19336_v43  ;;  %v8950_v27 = vadd.f32 %v8949_v26, %v8887_v50 }
 0xeec   :  { %v8951_v52 = vadd.f32 %v8950_v27, %v8888_v58  ;;  %v19343_v46 = vpop.f32.mrb[18].mxu1  ;;  %v8819_v19 = vadd.f32 %v19333_v21, %v8818_v38 }
 0xeed   :  { %21482 = vst [vmem:[#allocation65_spill] sm:$0xff] %v19343_v46  ;;  %v19346_v7 = vpop.f32.mrb[19].mxu1  ;;  %v8891_v43 = vmul.f32 %v19343_v46, %v19343_v46 }
 0xeee   :  { %21483 = vst [vmem:[#allocation67_spill] sm:$0xff] %v19346_v7  ;;  %v8820_v24 = vadd.f32 %v8819_v19, %v19346_v7  ;;  %v8890_v36 = vmul.f32 %v19346_v7, %v19346_v7  ;;  %v8952_v63 = vadd.f32 %v8951_v52, %v8889_v4 }
 0xef0   :  { %v8953_v50 = vadd.f32 %v8952_v63, %v8890_v36  ;;  %v19353_v26 = vpop.f32.mrb[20].mxu1  ;;  %v8821_v58 = vadd.f32 %v19343_v46, %v8820_v24 }
 0xef1   :  { %21484 = vst [vmem:[#allocation23_spill] sm:$0xff] %v19353_v26  ;;  %v19356_v27 = vpop.f32.mrb[21].mxu1  ;;  %v8893_v7 = vmul.f32 %v19353_v26, %v19353_v26 }
 0xef2   :  { %21485 = vst [vmem:[#allocation69_spill] sm:$0xff] %v19356_v27  ;;  %v8822_v38 = vadd.f32 %v8821_v58, %v19356_v27  ;;  %v8892_v21 = vmul.f32 %v19356_v27, %v19356_v27  ;;  %v8954_v19 = vadd.f32 %v8953_v50, %v8891_v43 }
 0xef4   :  { %v8955_v4 = vadd.f32 %v8954_v19, %v8892_v21  ;;  %v19363_v52 = vpop.f32.mrb[22].mxu1  ;;  %v8823_v36 = vadd.f32 %v19353_v26, %v8822_v38 }
 0xef5   :  { %21486 = vst [vmem:[#allocation66_spill] sm:$0xff] %v19363_v52  ;;  %v19366_v63 = vpop.f32.mrb[23].mxu1  ;;  %v8895_v27 = vmul.f32 %v19363_v52, %v19363_v52 }
 0xef6   :  { %21487 = vst [vmem:[#allocation51_spill] sm:$0xff] %v19366_v63  ;;  %v8824_v24 = vadd.f32 %v8823_v36, %v19366_v63  ;;  %v8894_v46 = vmul.f32 %v19366_v63, %v19366_v63  ;;  %v8956_v58 = vadd.f32 %v8955_v4, %v8893_v7 }
 0xef8   :  { %v8957_v43 = vadd.f32 %v8956_v58, %v8894_v46  ;;  %v19373_v50 = vpop.f32.mrb[24].mxu1  ;;  %v8825_v21 = vadd.f32 %v19363_v52, %v8824_v24 }
 0xef9   :  { %21488 = vst [vmem:[#allocation68_spill] sm:$0xff] %v19373_v50  ;;  %v19376_v19 = vpop.f32.mrb[25].mxu1  ;;  %v8897_v63 = vmul.f32 %v19373_v50, %v19373_v50 }
 0xefa   :  { %21489 = vst [vmem:[#allocation70_spill] sm:$0xff] %v19376_v19  ;;  %v8826_v38 = vadd.f32 %v8825_v21, %v19376_v19  ;;  %v8896_v26 = vmul.f32 %v19376_v19, %v19376_v19  ;;  %v8958_v36 = vadd.f32 %v8957_v43, %v8895_v27 }
 0xefc   :  { %v8959_v7 = vadd.f32 %v8958_v36, %v8896_v26  ;;  %v19383_v4 = vpop.f32.mrb[26].mxu1  ;;  %v8827_v46 = vadd.f32 %v19373_v50, %v8826_v38 }
 0xefd   :  { %21490 = vst [vmem:[#allocation71_spill] sm:$0xff] %v19383_v4  ;;  %v19386_v58 = vpop.f32.mrb[27].mxu1  ;;  %v8899_v19 = vmul.f32 %v19383_v4, %v19383_v4 }
 0xefe   :  { %21491 = vst [vmem:[#allocation52_spill] sm:$0xff] %v19386_v58  ;;  %v8828_v24 = vadd.f32 %v8827_v46, %v19386_v58  ;;  %v8898_v52 = vmul.f32 %v19386_v58, %v19386_v58  ;;  %v8960_v21 = vadd.f32 %v8959_v7, %v8897_v63 }
 0xf00   :  { %v8961_v27 = vadd.f32 %v8960_v21, %v8898_v52  ;;  %v19393_v43 = vpop.f32.mrb[28].mxu1  ;;  %v8829_v26 = vadd.f32 %v19383_v4, %v8828_v24 }
 0xf01   :  { %21492 = vst [vmem:[#allocation73_spill] sm:$0xff] %v19393_v43  ;;  %v19396_v36 = vpop.f32.mrb[29].mxu1  ;;  %v8901_v58 = vmul.f32 %v19393_v43, %v19393_v43 }
 0xf02   :  { %21493 = vst [vmem:[#allocation75_spill] sm:$0xff] %v19396_v36  ;;  %v8830_v38 = vadd.f32 %v8829_v26, %v19396_v36  ;;  %v8900_v50 = vmul.f32 %v19396_v36, %v19396_v36  ;;  %v8962_v46 = vadd.f32 %v8961_v27, %v8899_v19 }
 0xf04   :  { %v8963_v63 = vadd.f32 %v8962_v46, %v8900_v50  ;;  %v19403_v7 = vpop.f32.mrb[30].mxu1  ;;  %v8831_v52 = vadd.f32 %v19393_v43, %v8830_v38 }
 0xf05   :  { %v19406_v21 = vpop.f32.mrb[31].mxu1  ;;  %v8903_v36 = vmul.f32 %v19403_v7, %v19403_v7 }
 0xf06   :  { %21494 = vst [vmem:[#allocation72_spill] sm:$0xff] %v19406_v21  ;;  %v8832_v24 = vadd.f32 %v8831_v52, %v19406_v21  ;;  %v8902_v4 = vmul.f32 %v19406_v21, %v19406_v21  ;;  %v8964_v26 = vadd.f32 %v8963_v63, %v8901_v58 }
 0xf08   :  { %v8833_v19 = vadd.f32 %v19403_v7, %v8832_v24  ;;  %v8965_v27 = vadd.f32 %v8964_v26, %v8902_v4  ;;  %v21498_v26 = vld [vmem:[#allocation59_spill] sm:$0xff] }
 0xf0a   :  { %v8834_v61 = vrot.slane %v8833_v19, 4  ;;  %v8966_v50 = vadd.f32 %v8965_v27, %v8903_v36  ;;  %v21500_v27 = vld [vmem:[#allocation60_spill] sm:$0xff] }
 0xf0c   :  { %v8835_v46 = vadd.f32 %v8834_v61, %v8833_v19  ;;  %v8967_v48 = vrot.slane %v8966_v50, 4  ;;  %v27_v61 = vld [vmem:[%s20416_s6 + $0x8] sm:$0x3]  ;;  %v21499_v19 = vld [vmem:[#allocation50_spill] sm:$0xff] }
 0xf0e   :  { %v8836_v2 = vrot.slane %v8835_v46, 2  ;;  %v8968_v38 = vadd.f32 %v8967_v48, %v8966_v50  ;;  %v21501_v50 = vld [vmem:[#allocation14_spill] sm:$0xff] }
 0xf10   :  { %v8837_v43 = vadd.f32 %v8836_v2, %v8835_v46  ;;  %v8969_v12 = vrot.slane %v8968_v38, 2  ;;  %v21495_v2 = vsub.s32 0, %v21446_v55 }
 0xf12   :  { %v8838_v3 = vrot.slane %v8837_v43, 1  ;;  %v8970_v52 = vadd.f32 %v8969_v12, %v8968_v38  ;;  %v21502_v38 = vld [vmem:[#allocation27_spill] sm:$0xff] }
 0xf14   :  { %v8839_v47 = vadd.f32 %v8838_v3, %v8837_v43  ;;  %v8971_v14 = vrot.slane %v8970_v52, 1  ;;  %v21496_v43 = vld [vmem:[#allocation5_spill] sm:$0xff] }
 0xf16   :  { %v8972_v21 = vadd.f32 %v8971_v14, %v8970_v52  ;;  %v8973_v58 = vmul.f32 0.001953125, %v8839_v47 }
 0xf18   :  { %v8974_v63 = vmul.f32 0.001953125, %v8972_v21  ;;  %v8975_v34 = vmul.f32 %v8973_v58, %v8973_v58  ;;  %v21497_v21 = vld [vmem:[#allocation47_spill] sm:$0xff] }
 0xf1a   :  { %v8976_v41 = vsub.f32 %v8974_v63, %v8975_v34 }
 0xf1c   :  { %v8977_v54 = vadd.f32 1e-05, %v8976_v41 }
 0xf1e   :  { %11695 = vrsqrt.f32 %v8977_v54 }
 0xf28   :  { %v11696_v4 = vpop.eup %11695 }
 0xf29   :  { %v8979_v36 = vmul.f32 %v11696_v4, %v27_v61 }
 0xf2b   :  { %v8980_v48 = vmul.f32 %v8979_v36, %v8973_v58  ;;  %v19419_v24 = vrot.slane %v8979_v36, %v21495_v2  ;;  %v21503_v58 = vld [vmem:[#allocation61_spill] sm:$0xff]  ;;  %v21505_v36 = vld [vmem:[#allocation63_spill] sm:$0xff]  ;;  %v21506_v2 = vld [vmem:[#allocation64_spill] sm:$0xff] }
 0xf2d   :  { %v8982_v3 = vrot.slane %v8980_v48, 7  ;;  %v19423_v14 = vmul.f32 %v19419_v24, %v19098_v6  ;;  %v19427_v41 = vmul.f32 %v19094_v37, %v19419_v24  ;;  %v19431_v54 = vmul.f32 %v19419_v24, %v19106_v18 }
 0xf2e   :  { %v19435_v34 = vmul.f32 %v19104_v31, %v19419_v24  ;;  %v19439_v47 = vmul.f32 %v19419_v24, %v19116_v11  ;;  %v19443_v6 = vmul.f32 %v19114_v20, %v19419_v24  ;;  %v19447_v37 = vmul.f32 %v19419_v24, %v19126_v59 }
 0xf2f   :  { %v8984_v12 = vsub.f32 %v27_v61, %v8982_v3  ;;  %v19451_v18 = vmul.f32 %v19123_v15, %v19419_v24  ;;  %v19455_v31 = vmul.f32 %v19419_v24, %v19136_v49  ;;  %v19459_v11 = vmul.f32 %v19133_v0, %v19419_v24  ;;  %v21504_v61 = vld [vmem:[#allocation62_spill] sm:$0xff] }
 0xf30   :  { %v19463_v20 = vmul.f32 %v19419_v24, %v19146_v40  ;;  %v19467_v59 = vmul.f32 %v19143_v57, %v19419_v24  ;;  %v19471_v15 = vmul.f32 %v19419_v24, %v19156_v13  ;;  %v19475_v49 = vmul.f32 %v19153_v42, %v19419_v24 }
 0xf31   :  { %v19479_v0 = vmul.f32 %v19419_v24, %v19166_v32  ;;  %v19483_v40 = vmul.f32 %v19163_v62, %v19419_v24  ;;  %v19487_v57 = vmul.f32 %v19419_v24, %v19176_v17  ;;  %v19491_v13 = vmul.f32 %v19173_v10, %v19419_v24 }
 0xf32   :  { %v19495_v42 = vmul.f32 %v19419_v24, %v19186_v8  ;;  %v19499_v32 = vmul.f32 %v19183_v39, %v19419_v24  ;;  %v19503_v62 = vmul.f32 %v19419_v24, %v19196_v28  ;;  %v19507_v17 = vmul.f32 %v19193_v25, %v19419_v24 }
 0xf33   :  { %v19511_v10 = vmul.f32 %v19419_v24, %v19206_v5  ;;  %v19515_v8 = vmul.f32 %v19203_v53, %v19419_v24  ;;  %v19519_v39 = vmul.f32 %v19419_v24, %v19216_v56  ;;  %v19523_v28 = vmul.f32 %v19213_v16, %v19419_v24 }
 0xf34   :  { %v19527_v25 = vmul.f32 %v19419_v24, %v19226_v35  ;;  %v19531_v5 = vmul.f32 %v19223_v23, %v19419_v24  ;;  %v19535_v53 = vmul.f32 %v19419_v24, %v19236_v60  ;;  %v19539_v56 = vmul.f32 %v19233_v44, %v19419_v24 }
 0xf35   :  { %v19543_v16 = vmul.f32 %v19419_v24, %v19246_v30  ;;  %v19547_v35 = vmul.f32 %v19243_v22, %v19419_v24  ;;  %v19551_v23 = vmul.f32 %v19419_v24, %v19256_v33  ;;  %v19555_v60 = vmul.f32 %v19253_v9, %v19419_v24 }
 0xf36   :  { %v19559_v44 = vmul.f32 %v19419_v24, %v19266_v1  ;;  %v19563_v30 = vmul.f32 %v19263_v45, %v19419_v24  ;;  %v19567_v22 = vmul.f32 %v19419_v24, %v19276_v29  ;;  %v19571_v33 = vmul.f32 %v19273_v51, %v19419_v24 }
 0xf37   :  { %v19575_v9 = vmul.f32 %v19419_v24, %v21496_v43  ;;  %v19579_v1 = vmul.f32 %v21497_v21, %v19419_v24  ;;  %v19583_v45 = vmul.f32 %v19419_v24, %v21498_v26  ;;  %v19587_v29 = vmul.f32 %v21499_v19, %v19419_v24  ;;  %v21507_v43 = vld [vmem:[#allocation6_spill] sm:$0xff]  ;;  %v21509_v26 = vld [vmem:[#allocation67_spill] sm:$0xff] }
 0xf38   :  { %v19591_v51 = vmul.f32 %v19419_v24, %v21500_v27  ;;  %v19595_v46 = vmul.f32 %v21501_v50, %v19419_v24  ;;  %v19599_v52 = vmul.f32 %v19419_v24, %v21502_v38  ;;  %v19603_v63 = vmul.f32 %v21503_v58, %v19419_v24  ;;  %v21511_v27 = vld [vmem:[#allocation65_spill] sm:$0xff] }
 0xf39   :  { %v19607_v4 = vmul.f32 %v19419_v24, %v21504_v61  ;;  %v19611_v48 = vmul.f32 %v21505_v36, %v19419_v24  ;;  %v19615_v3 = vmul.f32 %v19419_v24, %v21506_v2  ;;  %v19619_v21 = vmul.f32 %v21507_v43, %v19419_v24  ;;  %v21513_v38 = vld [vmem:[#allocation69_spill] sm:$0xff]  ;;  %v21515_v61 = vld [vmem:[#allocation23_spill] sm:$0xff] }
 0xf3a   :  { %v19623_v19 = vmul.f32 %v19419_v24, %v21509_v26  ;;  %v19627_v50 = vmul.f32 %v21511_v27, %v19419_v24  ;;  %v19631_v58 = vmul.f32 %v19419_v24, %v21513_v38  ;;  %v19635_v36 = vmul.f32 %v21515_v61, %v19419_v24  ;;  %v21517_v2 = vld [vmem:[#allocation51_spill] sm:$0xff] }
 0xf3b   :  { %21508 = vst [vmem:[#allocation54_spill] sm:$0xff] %v19619_v21  ;;  %v19639_v43 = vmul.f32 %v19419_v24, %v21517_v2  ;;  %v21519_v21 = vld [vmem:[#allocation66_spill] sm:$0xff] }
 0xf3c   :  { %21510 = vst [vmem:[#allocation74_spill] sm:$0xff] %v19623_v19  ;;  %21512 = vst [vmem:[#allocation37_spill] sm:$0xff] %v19627_v50  ;;  %v19643_v26 = vmul.f32 %v21519_v21, %v19419_v24  ;;  %v21521_v19 = vld [vmem:[#allocation70_spill] sm:$0xff]  ;;  %v21523_v50 = vld [vmem:[#allocation68_spill] sm:$0xff] }
 0xf3d   :  { %21514 = vst [vmem:[#allocation77_spill] sm:$0xff] %v19631_v58  ;;  %21516 = vst [vmem:[#allocation76_spill] sm:$0xff] %v19635_v36  ;;  %v19647_v27 = vmul.f32 %v19419_v24, %v21521_v19  ;;  %v19651_v38 = vmul.f32 %v21523_v50, %v19419_v24  ;;  %v21524_v58 = vld [vmem:[#allocation52_spill] sm:$0xff]  ;;  %v21526_v36 = vld [vmem:[#allocation71_spill] sm:$0xff] }
 0xf3e   :  { %21518 = vst [vmem:[#allocation28_spill] sm:$0xff] %v19639_v43  ;;  %21520 = vst [vmem:[#allocation29_spill] sm:$0xff] %v19643_v26  ;;  %v19655_v61 = vmul.f32 %v19419_v24, %v21524_v58  ;;  %v19659_v2 = vmul.f32 %v21526_v36, %v19419_v24  ;;  %v21527_v43 = vld [vmem:[#allocation75_spill] sm:$0xff]  ;;  %v21528_v26 = vld [vmem:[#allocation73_spill] sm:$0xff]  ;;  %v19675_v58 = vmul.f32 %v19403_v7, %v19419_v24 }
 0xf3f   :  { %21522 = vst [vmem:[#allocation18_spill] sm:$0xff] %v19647_v27  ;;  %v19663_v21 = vmul.f32 %v19419_v24, %v21527_v43  ;;  %v19667_v19 = vmul.f32 %v21528_v26, %v19419_v24  ;;  %v21529_v27 = vld [vmem:[#allocation72_spill] sm:$0xff] }
 0xf40   :  { %21525 = vst [vmem:[#allocation10_spill] sm:$0xff] %v19655_v61  ;;  %v19671_v50 = vmul.f32 %v19419_v24, %v21529_v27  ;;  %v21530_v61 = vsub.s32 1, %v21446_v55 }
 0xf42   :  { %v19679_v36 = vrot.slane %v8984_v12, %v21530_v61 }
 0xf43   :  { %v21550_v61 = vld [vmem:[#allocation37_spill] sm:$0xff] }
 0xf44   :  { %v19683_v43 = vadd.f32 %v19679_v36, %v19423_v14  ;;  %v19687_v26 = vadd.f32 %v19679_v36, %v19427_v41  ;;  %v19691_v27 = vadd.f32 %v19679_v36, %v19431_v54  ;;  %v19695_v7 = vadd.f32 %v19679_v36, %v19435_v34 }
 0xf45   :  { %v19699_v55 = vadd.f32 %v19679_v36, %v19439_v47  ;;  %v19703_v24 = vadd.f32 %v19679_v36, %v19443_v6  ;;  %v19707_v14 = vadd.f32 %v19679_v36, %v19447_v37  ;;  %v19711_v41 = vadd.f32 %v19679_v36, %v19451_v18 }
 0xf46   :  { %v19715_v54 = vadd.f32 %v19679_v36, %v19455_v31  ;;  %v19719_v34 = vadd.f32 %v19679_v36, %v19459_v11  ;;  %v19723_v47 = vadd.f32 %v19679_v36, %v19463_v20  ;;  %v19727_v6 = vadd.f32 %v19679_v36, %v19467_v59 }
 0xf47   :  { %v19731_v37 = vadd.f32 %v19679_v36, %v19471_v15  ;;  %v19735_v12 = vadd.f32 %v19679_v36, %v19475_v49  ;;  %v19739_v18 = vadd.f32 %v19679_v36, %v19479_v0  ;;  %v19743_v31 = vadd.f32 %v19679_v36, %v19483_v40 }
 0xf48   :  { %v19747_v11 = vadd.f32 %v19679_v36, %v19487_v57  ;;  %v19751_v20 = vadd.f32 %v19679_v36, %v19491_v13  ;;  %v19755_v59 = vadd.f32 %v19679_v36, %v19495_v42  ;;  %v19759_v15 = vadd.f32 %v19679_v36, %v19499_v32 }
 0xf49   :  { %v19763_v49 = vadd.f32 %v19679_v36, %v19503_v62  ;;  %v19767_v0 = vadd.f32 %v19679_v36, %v19507_v17  ;;  %v19771_v40 = vadd.f32 %v19679_v36, %v19511_v10  ;;  %v19775_v57 = vadd.f32 %v19679_v36, %v19515_v8 }
 0xf4a   :  { %21531 = vst [vmem:[#allocation22_spill] sm:$0xff] %v19747_v11  ;;  %21532 = vst [vmem:[#allocation25_spill] sm:$0xff] %v19759_v15  ;;  %v19779_v13 = vadd.f32 %v19679_v36, %v19519_v39  ;;  %v19783_v42 = vadd.f32 %v19679_v36, %v19523_v28  ;;  %v19787_v32 = vadd.f32 %v19679_v36, %v19527_v25 }
 0xf4b   :  { %21533 = vst [vmem:[#allocation7_spill] sm:$0xff] %v19771_v40  ;;  %v19791_v62 = vadd.f32 %v19679_v36, %v19531_v5  ;;  %v19795_v17 = vadd.f32 %v19679_v36, %v19535_v53  ;;  %v19799_v10 = vadd.f32 %v19679_v36, %v19539_v56  ;;  %v19803_v8 = vadd.f32 %v19679_v36, %v19543_v16 }
 0xf4c   :  { %21534 = vst [vmem:[#allocation39_spill] sm:$0xff] %v19783_v42  ;;  %v19807_v39 = vadd.f32 %v19679_v36, %v19547_v35  ;;  %v19811_v28 = vadd.f32 %v19679_v36, %v19551_v23  ;;  %v19815_v25 = vadd.f32 %v19679_v36, %v19555_v60  ;;  %v19819_v5 = vadd.f32 %v19679_v36, %v19559_v44 }
 0xf4d   :  { %21535 = vst [vmem:[#allocation16_spill] sm:$0xff] %v19795_v17  ;;  %v19823_v53 = vadd.f32 %v19679_v36, %v19563_v30  ;;  %v19827_v56 = vadd.f32 %v19679_v36, %v19567_v22  ;;  %v19831_v16 = vadd.f32 %v19679_v36, %v19571_v33  ;;  %v19835_v35 = vadd.f32 %v19679_v36, %v19575_v9 }
 0xf4e   :  { %21536 = vst [vmem:[#allocation17_spill] sm:$0xff] %v19807_v39  ;;  %21537 = vst [vmem:[#allocation19_spill] sm:$0xff] %v19819_v5  ;;  %v19839_v23 = vadd.f32 %v19679_v36, %v19579_v1  ;;  %v19843_v60 = vadd.f32 %v19679_v36, %v19583_v45  ;;  %v19847_v44 = vadd.f32 %v19679_v36, %v19587_v29 }
 0xf4f   :  { %21538 = vst [vmem:[#allocation4_spill] sm:$0xff] %v19831_v16  ;;  %v19851_v30 = vadd.f32 %v19679_v36, %v19591_v51  ;;  %v19855_v22 = vadd.f32 %v19679_v36, %v19595_v46  ;;  %v19859_v33 = vadd.f32 %v19679_v36, %v19599_v52  ;;  %v19863_v9 = vadd.f32 %v19679_v36, %v19603_v63  ;;  %v21546_v51 = vld [vmem:[#allocation54_spill] sm:$0xff] }
 0xf50   :  { %21539 = vst [vmem:[#allocation3_spill] sm:$0xff] %v19843_v60  ;;  %v19867_v1 = vadd.f32 %v19679_v36, %v19607_v4  ;;  %v19871_v45 = vadd.f32 %v19679_v36, %v19611_v48  ;;  %v19875_v29 = vadd.f32 %v19679_v36, %v19615_v3  ;;  %v19879_v46 = vadd.f32 %v19679_v36, %v21546_v51  ;;  %v21548_v52 = vld [vmem:[#allocation74_spill] sm:$0xff] }
 0xf51   :  { %21540 = vst [vmem:[#allocation36_spill] sm:$0xff] %v19851_v30  ;;  %21541 = vst [vmem:[#allocation8_spill] sm:$0xff] %v19859_v33  ;;  %v19883_v63 = vadd.f32 %v19679_v36, %v21548_v52  ;;  %v19887_v4 = vadd.f32 %v19679_v36, %v21550_v61 }
 0xf52   :  { %21542 = vst [vmem:[#allocation9_spill] sm:$0xff] %v19863_v9  ;;  %21543 = vst [vmem:[#allocation15_spill] sm:$0xff] %v19867_v1  ;;  %v21552_v1 = vld [vmem:[#allocation77_spill] sm:$0xff] }
 0xf53   :  { %21544 = vst [vmem:[#allocation12_spill] sm:$0xff] %v19871_v45  ;;  %21545 = vst [vmem:[#allocation49_spill] sm:$0xff] %v19875_v29  ;;  %v19891_v48 = vadd.f32 %v19679_v36, %v21552_v1  ;;  %v21554_v45 = vld [vmem:[#allocation76_spill] sm:$0xff]  ;;  %v19911_v1 = vadd.f32 %v19679_v36, %v19651_v38  ;;  %v19931_v38 = vadd.f32 %v19679_v36, %v19671_v50  ;;  %v9128_v50 = vmul.f32 0.1, %v19711_v41 }
 0xf54   :  { %21547 = vst [vmem:[#allocation55_spill] sm:$0xff] %v19879_v46  ;;  %21549 = vst [vmem:[#allocation26_spill] sm:$0xff] %v19883_v63  ;;  %v19895_v3 = vadd.f32 %v19679_v36, %v21554_v45  ;;  %v21556_v29 = vld [vmem:[#allocation28_spill] sm:$0xff]  ;;  %v21558_v46 = vld [vmem:[#allocation29_spill] sm:$0xff] }
 0xf55   :  { %21551 = vst [vmem:[#allocation24_spill] sm:$0xff] %v19887_v4  ;;  %21553 = vst [vmem:[#allocation31_spill] sm:$0xff] %v19891_v48  ;;  %v19899_v51 = vadd.f32 %v19679_v36, %v21556_v29  ;;  %v19903_v52 = vadd.f32 %v19679_v36, %v21558_v46  ;;  %v21560_v63 = vld [vmem:[#allocation18_spill] sm:$0xff]  ;;  %v19919_v29 = vadd.f32 %v19679_v36, %v19659_v2  ;;  %v9122_v2 = vmul.f32 0.1, %v19687_v26 }
 0xf56   :  { %21555 = vst [vmem:[#allocation32_spill] sm:$0xff] %v19895_v3  ;;  %v19907_v61 = vadd.f32 %v19679_v36, %v21560_v63  ;;  %21562 = vst [vmem:[#allocation48_spill] sm:$0xff] %v19911_v1  ;;  %v21563_v48 = vld [vmem:[#allocation10_spill] sm:$0xff]  ;;  %v19923_v46 = vadd.f32 %v19679_v36, %v19663_v21  ;;  %v19927_v63 = vadd.f32 %v19679_v36, %v19667_v19  ;;  %v9124_v21 = vmul.f32 0.1, %v19695_v7 }
 0xf57   :  { %21557 = vst [vmem:[#allocation38_spill] sm:$0xff] %v19899_v51  ;;  %21559 = vst [vmem:[#allocation21_spill] sm:$0xff] %v19903_v52  ;;  %v19915_v45 = vadd.f32 %v19679_v36, %v21563_v48  ;;  %v19935_v48 = vadd.f32 %v19679_v36, %v19675_v58  ;;  %v9126_v19 = vmul.f32 0.1, %v19703_v24  ;;  %v9130_v36 = vmul.f32 0.1, %v19719_v34 }
 0xf58   :  { %21561 = vst [vmem:[#allocation43_spill] sm:$0xff] %v19907_v61  ;;  %21565 = vst [vmem:[#allocation57_spill] sm:$0xff] %v19919_v29  ;;  %v9123_v29 = vmul.f32 0.1, %v19691_v27  ;;  %v9132_v1 = vmul.f32 0.1, %v19727_v6  ;;  %v9186_v61 = vmax.f32 %v19687_v26, %v9122_v2  ;;  %v9188_v2 = vmax.f32 %v19695_v7, %v9124_v21 }
 0xf59   :  { %21564 = vst [vmem:[#allocation20_spill] sm:$0xff] %v19915_v45  ;;  %21566 = vst [vmem:[#allocation58_spill] sm:$0xff] %v19923_v46  ;;  %v9121_v45 = vmul.f32 0.1, %v19683_v43  ;;  %v9125_v46 = vmul.f32 0.1, %v19699_v55 }
 0xf5a   :  { %21567 = vst [vmem:[#allocation11_spill] sm:$0xff] %v19927_v63  ;;  %21568 = vst [vmem:[#allocation56_spill] sm:$0xff] %v19931_v38  ;;  %v9127_v63 = vmul.f32 0.1, %v19707_v14  ;;  %v9129_v38 = vmul.f32 0.1, %v19715_v54  ;;  %v9187_v4 = vmax.f32 %v19691_v27, %v9123_v29 }
 0xf5b   :  { %21569 = vst [vmem:[#allocation34_spill] sm:$0xff] %v19935_v48  ;;  %v9185_v58 = vmax.f32 %v19683_v43, %v9121_v45  ;;  %v9131_v48 = vmul.f32 0.1, %v19723_v47  ;;  %v19952_v52 = vmul.f32 0.1, %v19731_v37  ;;  %9250 = vst [vmem:[%s20420_s7 + $0x8] sm:$0xff] %v9186_v61 }
 0xf5c   :  { %v19955_v51 = vmul.f32 0.1, %v19735_v12  ;;  %v19958_v3 = vmul.f32 0.1, %v19739_v18  ;;  %v19965_v43 = vmul.f32 0.1, %v19743_v31 }
 0xf5d   :  { %9249 = vst [vmem:[%s20420_s7] sm:$0xff] %v9185_v58  ;;  %v19968_v26 = vmul.f32 0.1, %v19747_v11  ;;  %v19971_v45 = vmul.f32 0.1, %v19751_v20  ;;  %v19978_v27 = vmul.f32 0.1, %v19755_v59  ;;  %v9189_v11 = vmax.f32 %v19699_v55, %v9125_v46 }
 0xf5e   :  { %v19981_v29 = vmul.f32 0.1, %v19759_v15  ;;  %v19984_v58 = vmul.f32 0.1, %v19763_v49  ;;  %9251 = vst [vmem:[%s20420_s7 + $0x10] sm:$0xff] %v9187_v4  ;;  %v9190_v15 = vmax.f32 %v19703_v24, %v9126_v19  ;;  %9252 = vst [vmem:[%s20420_s7 + $0x18] sm:$0xff] %v9188_v2 }
 0xf5f   :  { %v19991_v7 = vmul.f32 0.1, %v19767_v0  ;;  %v19994_v61 = vmul.f32 0.1, %v19771_v40  ;;  %v19997_v21 = vmul.f32 0.1, %v19775_v57  ;;  %v9191_v40 = vmax.f32 %v19707_v14, %v9127_v63 }
 0xf60   :  { %v20004_v55 = vmul.f32 0.1, %v19779_v13  ;;  %v20007_v4 = vmul.f32 0.1, %v19783_v42  ;;  %v20010_v46 = vmul.f32 0.1, %v19787_v32  ;;  %v9192_v42 = vmax.f32 %v19711_v41, %v9128_v50 }
 0xf61   :  { %9253 = vst [vmem:[%s20420_s7 + $0x20] sm:$0xff] %v9189_v11  ;;  %v20017_v24 = vmul.f32 0.1, %v19791_v62  ;;  %v20020_v19 = vmul.f32 0.1, %v19795_v17  ;;  %9254 = vst [vmem:[%s20420_s7 + $0x28] sm:$0xff] %v9190_v15  ;;  %v9193_v17 = vmax.f32 %v19715_v54, %v9129_v38 }
 0xf62   :  { %v20023_v2 = vmul.f32 0.1, %v19799_v10  ;;  %v20030_v14 = vmul.f32 0.1, %v19803_v8  ;;  %v20033_v11 = vmul.f32 0.1, %v19807_v39  ;;  %v9194_v39 = vmax.f32 %v19719_v34, %v9130_v36 }
 0xf63   :  { %v20036_v63 = vmul.f32 0.1, %v19811_v28  ;;  %9255 = vst [vmem:[%s20420_s7 + $0x30] sm:$0xff] %v9191_v40  ;;  %v20043_v41 = vmul.f32 0.1, %v19815_v25  ;;  %9256 = vst [vmem:[%s20420_s7 + $0x38] sm:$0xff] %v9192_v42 }
 0xf64   :  { %v20046_v15 = vmul.f32 0.1, %v19819_v5  ;;  %v20049_v50 = vmul.f32 0.1, %v19823_v53  ;;  %v20056_v54 = vmul.f32 0.1, %v19827_v56  ;;  %v9195_v5 = vmax.f32 %v19723_v47, %v9131_v48 }
 0xf65   :  { %v20059_v40 = vmul.f32 0.1, %v19831_v16  ;;  %v20062_v38 = vmul.f32 0.1, %v19835_v35  ;;  %9257 = vst [vmem:[%s20420_s7 + $0x40] sm:$0xff] %v9193_v17  ;;  %v9196_v16 = vmax.f32 %v19727_v6, %v9132_v1  ;;  %9258 = vst [vmem:[%s20420_s7 + $0x48] sm:$0xff] %v9194_v39 }
 0xf66   :  { %v20069_v34 = vmul.f32 0.1, %v19839_v23  ;;  %v20072_v42 = vmul.f32 0.1, %v19843_v60  ;;  %v20075_v36 = vmul.f32 0.1, %v19847_v44  ;;  %v9197_v60 = vmax.f32 %v19731_v37, %v19952_v52 }
 0xf67   :  { %v20082_v47 = vmul.f32 0.1, %v19851_v30  ;;  %v20085_v17 = vmul.f32 0.1, %v19855_v22  ;;  %v20088_v48 = vmul.f32 0.1, %v19859_v33  ;;  %v9198_v33 = vmax.f32 %v19735_v12, %v19955_v51 }
 0xf68   :  { %9259 = vst [vmem:[%s20420_s7 + $0x50] sm:$0xff] %v9195_v5  ;;  %v20096_v6 = vmul.f32 0.1, %v19863_v9  ;;  %v21573_v39 = vld [vmem:[#allocation15_spill] sm:$0xff]  ;;  %v21574_v30 = vld [vmem:[#allocation12_spill] sm:$0xff]  ;;  %9260 = vst [vmem:[%s20420_s7 + $0x58] sm:$0xff] %v9196_v16 }
 0xf69   :  { %21570 = vst [vmem:[#allocation33_spill] sm:$0xff] %v20082_v47  ;;  %21571 = vst [vmem:[#allocation35_spill] sm:$0xff] %v20088_v48  ;;  %v20099_v1 = vmul.f32 0.1, %v21573_v39  ;;  %v20102_v47 = vmul.f32 0.1, %v21574_v30  ;;  %v9199_v30 = vmax.f32 %v19739_v18, %v19958_v3 }
 0xf6a   :  { %21572 = vst [vmem:[#allocation13_spill] sm:$0xff] %v20096_v6  ;;  %v21576_v37 = vld [vmem:[#allocation49_spill] sm:$0xff]  ;;  %v21578_v5 = vld [vmem:[#allocation55_spill] sm:$0xff]  ;;  %v21579_v9 = vld [vmem:[#allocation26_spill] sm:$0xff] }
 0xf6b   :  { %21575 = vst [vmem:[#allocation41_spill] sm:$0xff] %v20102_v47  ;;  %v20110_v52 = vmul.f32 0.1, %v21576_v37  ;;  %v20113_v48 = vmul.f32 0.1, %v21578_v5  ;;  %9261 = vst [vmem:[%s20420_s7 + $0x60] sm:$0xff] %v9197_v60 }
 0xf6c   :  { %v20116_v6 = vmul.f32 0.1, %v21579_v9  ;;  %v21581_v12 = vld [vmem:[#allocation24_spill] sm:$0xff]  ;;  %v21583_v16 = vld [vmem:[#allocation31_spill] sm:$0xff]  ;;  %v9200_v9 = vmax.f32 %v19743_v31, %v19965_v43  ;;  %9262 = vst [vmem:[%s20420_s7 + $0x68] sm:$0xff] %v9198_v33  ;;  %v21586_v18 = vld [vmem:[#allocation38_spill] sm:$0xff] }
 0xf6d   :  { %21577 = vst [vmem:[#allocation40_spill] sm:$0xff] %v20110_v52  ;;  %v20124_v51 = vmul.f32 0.1, %v21581_v12  ;;  %v20127_v47 = vmul.f32 0.1, %v21583_v16  ;;  %v21584_v37 = vld [vmem:[#allocation32_spill] sm:$0xff] }
 0xf6e   :  { %21580 = vst [vmem:[#allocation44_spill] sm:$0xff] %v20116_v6  ;;  %v20130_v52 = vmul.f32 0.1, %v21584_v37  ;;  %v20138_v3 = vmul.f32 0.1, %v21586_v18  ;;  %v21588_v60 = vld [vmem:[#allocation21_spill] sm:$0xff] }
 0xf6f   :  { %21582 = vst [vmem:[#allocation30_spill] sm:$0xff] %v20124_v51  ;;  %v20141_v6 = vmul.f32 0.1, %v21588_v60  ;;  %v21589_v12 = vld [vmem:[#allocation43_spill] sm:$0xff]  ;;  %v21591_v16 = vld [vmem:[#allocation22_spill] sm:$0xff]  ;;  %9263 = vst [vmem:[%s20420_s7 + $0x70] sm:$0xff] %v9199_v30 }
 0xf70   :  { %21585 = vst [vmem:[#allocation42_spill] sm:$0xff] %v20130_v52  ;;  %21587 = vst [vmem:[#allocation45_spill] sm:$0xff] %v20138_v3  ;;  %v20144_v51 = vmul.f32 0.1, %v21589_v12  ;;  %v9201_v37 = vmax.f32 %v21591_v16, %v19968_v26  ;;  %v21592_v31 = vld [vmem:[#allocation48_spill] sm:$0xff]  ;;  %v21595_v18 = vld [vmem:[#allocation57_spill] sm:$0xff]  ;;  %v9202_v12 = vmax.f32 %v19751_v20, %v19971_v45 }
 0xf71   :  { %v20152_v43 = vmul.f32 0.1, %v21592_v31  ;;  %v21594_v33 = vld [vmem:[#allocation20_spill] sm:$0xff]  ;;  %v20158_v3 = vmul.f32 0.1, %v21595_v18  ;;  %9264 = vst [vmem:[%s20420_s7 + $0x78] sm:$0xff] %v9200_v9  ;;  %v9203_v18 = vmax.f32 %v19755_v59, %v19978_v27 }
 0xf72   :  { %21590 = vst [vmem:[#allocation46_spill] sm:$0xff] %v20144_v51  ;;  %v20155_v52 = vmul.f32 0.1, %v21594_v33  ;;  %v21596_v26 = vld [vmem:[#allocation58_spill] sm:$0xff]  ;;  %v21597_v30 = vld [vmem:[#allocation11_spill] sm:$0xff]  ;;  %v21598_v31 = vld [vmem:[#allocation56_spill] sm:$0xff] }
 0xf73   :  { %21593 = vst [vmem:[#allocation53_spill] sm:$0xff] %v20152_v43  ;;  %v20166_v16 = vmul.f32 0.1, %v21596_v26  ;;  %v20169_v51 = vmul.f32 0.1, %v21597_v30  ;;  %9265 = vst [vmem:[%s20420_s7 + $0x80] sm:$0xff] %v9201_v37  ;;  %v9205_v30 = vmax.f32 %v19763_v49, %v19984_v58  ;;  %v9208_v37 = vmax.f32 %v19775_v57, %v19997_v21 }
 0xf74   :  { %v20172_v43 = vmul.f32 0.1, %v21598_v31  ;;  %v21599_v20 = vld [vmem:[#allocation34_spill] sm:$0xff]  ;;  %v21600_v9 = vld [vmem:[#allocation25_spill] sm:$0xff]  ;;  %v9206_v31 = vmax.f32 %v19767_v0, %v19991_v7  ;;  %9266 = vst [vmem:[%s20420_s7 + $0x88] sm:$0xff] %v9202_v12  ;;  %v21601_v59 = vld [vmem:[#allocation7_spill] sm:$0xff]  ;;  %v9211_v49 = vmax.f32 %v19787_v32, %v20010_v46  ;;  %v9212_v0 = vmax.f32 %v19791_v62, %v20017_v24 }
 0xf75   :  { %v20180_v45 = vmul.f32 0.1, %v21599_v20  ;;  %v9204_v26 = vmax.f32 %v21600_v9, %v19981_v29  ;;  %v9207_v27 = vmax.f32 %v21601_v59, %v19994_v61  ;;  %v9209_v20 = vmax.f32 %v19779_v13, %v20004_v55  ;;  %v21602_v29 = vld [vmem:[#allocation39_spill] sm:$0xff]  ;;  %9267 = vst [vmem:[%s20420_s7 + $0x90] sm:$0xff] %v9203_v18  ;;  %v21603_v58 = vld [vmem:[#allocation16_spill] sm:$0xff]  ;;  %9269 = vst [vmem:[%s20420_s7 + $0xa0] sm:$0xff] %v9205_v30 }
 0xf76   :  { %v9210_v9 = vmax.f32 %v21602_v29, %v20007_v4  ;;  %v9213_v7 = vmax.f32 %v21603_v58, %v20020_v19  ;;  %v9214_v57 = vmax.f32 %v19799_v10, %v20023_v2  ;;  %9270 = vst [vmem:[%s20420_s7 + $0xa8] sm:$0xff] %v9206_v31  ;;  %v9215_v13 = vmax.f32 %v19803_v8, %v20030_v14  ;;  %v21604_v32 = vld [vmem:[#allocation17_spill] sm:$0xff]  ;;  %v21605_v8 = vld [vmem:[#allocation19_spill] sm:$0xff]  ;;  %v21606_v55 = vld [vmem:[#allocation4_spill] sm:$0xff] }
 0xf77   :  { %9268 = vst [vmem:[%s20420_s7 + $0x98] sm:$0xff] %v9204_v26  ;;  %v9216_v62 = vmax.f32 %v21604_v32, %v20033_v11  ;;  %v9217_v10 = vmax.f32 %v19811_v28, %v20036_v63  ;;  %v9218_v61 = vmax.f32 %v19815_v25, %v20043_v41  ;;  %9271 = vst [vmem:[%s20420_s7 + $0xb0] sm:$0xff] %v9207_v27  ;;  %v21607_v46 = vld [vmem:[#allocation3_spill] sm:$0xff]  ;;  %v21611_v11 = vld [vmem:[#allocation8_spill] sm:$0xff] }
 0xf78   :  { %9272 = vst [vmem:[%s20420_s7 + $0xb8] sm:$0xff] %v9208_v37  ;;  %9273 = vst [vmem:[%s20420_s7 + $0xc0] sm:$0xff] %v9209_v20  ;;  %v9219_v28 = vmax.f32 %v21605_v8, %v20046_v15  ;;  %v9220_v25 = vmax.f32 %v19823_v53, %v20049_v50  ;;  %v9221_v21 = vmax.f32 %v19827_v56, %v20056_v54  ;;  %v21610_v14 = vld [vmem:[#allocation35_spill] sm:$0xff]  ;;  %v21612_v41 = vld [vmem:[#allocation13_spill] sm:$0xff] }
 0xf79   :  { %9274 = vst [vmem:[%s20420_s7 + $0xc8] sm:$0xff] %v9210_v9  ;;  %v9222_v4 = vmax.f32 %v21606_v55, %v20059_v40  ;;  %9275 = vst [vmem:[%s20420_s7 + $0xd0] sm:$0xff] %v9211_v49  ;;  %v9223_v53 = vmax.f32 %v19835_v35, %v20062_v38  ;;  %v9224_v56 = vmax.f32 %v19839_v23, %v20069_v34  ;;  %v21608_v35 = vld [vmem:[#allocation33_spill] sm:$0xff]  ;;  %v21609_v23 = vld [vmem:[#allocation36_spill] sm:$0xff] }
 0xf7a   :  { %9276 = vst [vmem:[%s20420_s7 + $0xd8] sm:$0xff] %v9212_v0  ;;  %9277 = vst [vmem:[%s20420_s7 + $0xe0] sm:$0xff] %v9213_v7  ;;  %v9225_v24 = vmax.f32 %v21607_v46, %v20072_v42  ;;  %v9226_v19 = vmax.f32 %v19847_v44, %v20075_v36  ;;  %v9227_v2 = vmax.f32 %v21609_v23, %v21608_v35  ;;  %v21613_v15 = vld [vmem:[#allocation9_spill] sm:$0xff]  ;;  %v21615_v40 = vld [vmem:[#allocation12_spill] sm:$0xff] }
 0xf7b   :  { %9278 = vst [vmem:[%s20420_s7 + $0xe8] sm:$0xff] %v9214_v57  ;;  %9279 = vst [vmem:[%s20420_s7 + $0xf0] sm:$0xff] %v9215_v13  ;;  %v9228_v44 = vmax.f32 %v19855_v22, %v20085_v17  ;;  %v9229_v63 = vmax.f32 %v21611_v11, %v21610_v14  ;;  %v9230_v50 = vmax.f32 %v21613_v15, %v21612_v41  ;;  %v21614_v54 = vld [vmem:[#allocation41_spill] sm:$0xff]  ;;  %v21616_v34 = vld [vmem:[#allocation40_spill] sm:$0xff] }
 0xf7c   :  { %9280 = vst [vmem:[%s20420_s7 + $0xf8] sm:$0xff] %v9216_v62  ;;  %9281 = vst [vmem:[%s20420_s7 + $0x100] sm:$0xff] %v9217_v10  ;;  %v9231_v22 = vmax.f32 %v21573_v39, %v20099_v1  ;;  %v9232_v38 = vmax.f32 %v21615_v40, %v21614_v54  ;;  %v21617_v42 = vld [vmem:[#allocation49_spill] sm:$0xff]  ;;  %v9234_v17 = vmax.f32 %v21578_v5, %v20113_v48  ;;  %v21618_v39 = vld [vmem:[#allocation44_spill] sm:$0xff] }
 0xf7d   :  { %9282 = vst [vmem:[%s20420_s7 + $0x108] sm:$0xff] %v9218_v61  ;;  %9283 = vst [vmem:[%s20420_s7 + $0x110] sm:$0xff] %v9219_v28  ;;  %v9233_v36 = vmax.f32 %v21617_v42, %v21616_v34  ;;  %v21619_v1 = vld [vmem:[#allocation26_spill] sm:$0xff]  ;;  %v21621_v5 = vld [vmem:[#allocation24_spill] sm:$0xff]  ;;  %v9240_v29 = vmax.f32 %v21588_v60, %v20141_v6  ;;  %v9243_v6 = vmax.f32 %v21594_v33, %v20155_v52 }
 0xf7e   :  { %9284 = vst [vmem:[%s20420_s7 + $0x118] sm:$0xff] %v9220_v25  ;;  %9285 = vst [vmem:[%s20420_s7 + $0x120] sm:$0xff] %v9221_v21  ;;  %v9235_v12 = vmax.f32 %v21619_v1, %v21618_v39  ;;  %v21620_v48 = vld [vmem:[#allocation30_spill] sm:$0xff]  ;;  %v21622_v31 = vld [vmem:[#allocation31_spill] sm:$0xff] }
 0xf7f   :  { %9286 = vst [vmem:[%s20420_s7 + $0x128] sm:$0xff] %v9222_v4  ;;  %9287 = vst [vmem:[%s20420_s7 + $0x130] sm:$0xff] %v9223_v53  ;;  %v9236_v18 = vmax.f32 %v21621_v5, %v21620_v48  ;;  %v9237_v26 = vmax.f32 %v21622_v31, %v20127_v47  ;;  %v21623_v30 = vld [vmem:[#allocation42_spill] sm:$0xff]  ;;  %v21624_v20 = vld [vmem:[#allocation32_spill] sm:$0xff] }
 0xf80   :  { %9288 = vst [vmem:[%s20420_s7 + $0x138] sm:$0xff] %v9224_v56  ;;  %9289 = vst [vmem:[%s20420_s7 + $0x140] sm:$0xff] %v9225_v24  ;;  %v9238_v59 = vmax.f32 %v21624_v20, %v21623_v30  ;;  %v21625_v47 = vld [vmem:[#allocation45_spill] sm:$0xff]  ;;  %v21626_v27 = vld [vmem:[#allocation38_spill] sm:$0xff] }
 0xf81   :  { %9290 = vst [vmem:[%s20420_s7 + $0x148] sm:$0xff] %v9226_v19  ;;  %9291 = vst [vmem:[%s20420_s7 + $0x150] sm:$0xff] %v9227_v2  ;;  %v9239_v37 = vmax.f32 %v21626_v27, %v21625_v47  ;;  %v21627_v9 = vld [vmem:[#allocation46_spill] sm:$0xff]  ;;  %v21628_v49 = vld [vmem:[#allocation43_spill] sm:$0xff] }
 0xf82   :  { %9292 = vst [vmem:[%s20420_s7 + $0x158] sm:$0xff] %v9228_v44  ;;  %9293 = vst [vmem:[%s20420_s7 + $0x160] sm:$0xff] %v9229_v63  ;;  %v9241_v0 = vmax.f32 %v21628_v49, %v21627_v9  ;;  %v21629_v58 = vld [vmem:[#allocation53_spill] sm:$0xff]  ;;  %v21630_v7 = vld [vmem:[#allocation48_spill] sm:$0xff] }
 0xf83   :  { %9294 = vst [vmem:[%s20420_s7 + $0x168] sm:$0xff] %v9230_v50  ;;  %v9242_v57 = vmax.f32 %v21630_v7, %v21629_v58  ;;  %9295 = vst [vmem:[%s20420_s7 + $0x170] sm:$0xff] %v9231_v22  ;;  %v21631_v60 = vld [vmem:[#allocation57_spill] sm:$0xff]  ;;  %v21632_v32 = vld [vmem:[#allocation58_spill] sm:$0xff] }
 0xf84   :  { %9296 = vst [vmem:[%s20420_s7 + $0x178] sm:$0xff] %v9232_v38  ;;  %9297 = vst [vmem:[%s20420_s7 + $0x180] sm:$0xff] %v9233_v36  ;;  %v9244_v13 = vmax.f32 %v21631_v60, %v20158_v3  ;;  %v9245_v62 = vmax.f32 %v21632_v32, %v20166_v16  ;;  %v21633_v10 = vld [vmem:[#allocation11_spill] sm:$0xff]  ;;  %v21634_v52 = vld [vmem:[#allocation56_spill] sm:$0xff] }
 0xf85   :  { %9298 = vst [vmem:[%s20420_s7 + $0x188] sm:$0xff] %v9234_v17  ;;  %v9246_v61 = vmax.f32 %v21633_v10, %v20169_v51  ;;  %9299 = vst [vmem:[%s20420_s7 + $0x190] sm:$0xff] %v9235_v12  ;;  %v9247_v3 = vmax.f32 %v21634_v52, %v20172_v43  ;;  %v21635_v51 = vld [vmem:[#allocation34_spill] sm:$0xff] }
 0xf86   :  { %9300 = vst [vmem:[%s20420_s7 + $0x198] sm:$0xff] %v9236_v18  ;;  %9301 = vst [vmem:[%s20420_s7 + $0x1a0] sm:$0xff] %v9237_v26  ;;  %v9248_v33 = vmax.f32 %v21635_v51, %v20180_v45 }
 0xf87   :  { %9302 = vst [vmem:[%s20420_s7 + $0x1a8] sm:$0xff] %v9238_v59  ;;  %9303 = vst [vmem:[%s20420_s7 + $0x1b0] sm:$0xff] %v9239_v37 }
 0xf88   :  { %9304 = vst [vmem:[%s20420_s7 + $0x1b8] sm:$0xff] %v9240_v29  ;;  %9305 = vst [vmem:[%s20420_s7 + $0x1c0] sm:$0xff] %v9241_v0 }
 0xf89   :  { %9306 = vst [vmem:[%s20420_s7 + $0x1c8] sm:$0xff] %v9242_v57  ;;  %9307 = vst [vmem:[%s20420_s7 + $0x1d0] sm:$0xff] %v9243_v6 }
 0xf8a   :  { %9308 = vst [vmem:[%s20420_s7 + $0x1d8] sm:$0xff] %v9244_v13  ;;  %9309 = vst [vmem:[%s20420_s7 + $0x1e0] sm:$0xff] %v9245_v62 }
 0xf8b   :  { %9310 = vst [vmem:[%s20420_s7 + $0x1e8] sm:$0xff] %v9246_v61  ;;  %9311 = vst [vmem:[%s20420_s7 + $0x1f0] sm:$0xff] %v9247_v3 }
 0xf8c   :  { %9312 = vst [vmem:[%s20420_s7 + $0x1f8] sm:$0xff] %v9248_v33 }

</bundles_post_ra>
